<compile_context>
chip_gen: v5e
topology: v5e:2x2
jax: 0.10.0
libtpu: 0.0.40
codegen_flags: <defaults>
</compile_context>

<pallas_src>
import functools
import math

import jax
import jax.numpy as jnp
from jax.experimental import pallas as pl
from jax.experimental.pallas import tpu as pltpu

# Static VGG feature config: 3 maxpools bring an 8x8 input to 1x1x512,
# matching the classifier's 512 input features.
CFG = [64, "M", 128, "M", 256, "M", 512]

_VMEM_LIMIT = 32 * 1024 * 1024  # fits v5e/v6e (128 MiB) and v7x (64 MiB) easily


def _build_plan(cfg):
    """Static per-conv-layer flag: fuse the following 'M' maxpool into the conv."""
    plan = []
    i = 0
    while i < len(cfg):
        if cfg[i] == "M":
            raise ValueError("'M' without a preceding conv layer is not supported")
        pool = i + 1 < len(cfg) and cfg[i + 1] == "M"
        plan.append(pool)
        i += 2 if pool else 1
    return tuple(plan)


_PLAN = _build_plan(CFG)


# ----------------------------------------------------------------------------
# Fused Conv2d(3x3, pad=1) + bias + ReLU (+ optional MaxPool 2x2 stride 2)
# ----------------------------------------------------------------------------
def _conv3x3_relu_pool_kernel(x_ref, w_ref, b_ref, o_ref, xpad_ref, *, H, W, pool):
    """One whole image per grid step.

    x_ref    : (H, W, Cin)    bf16 input image (batch dim squeezed)
    w_ref    : (9, Cin, Cout) bf16 weights, tap-major (di*3 + dj); resident
    b_ref    : (1, Cout)      f32 bias; resident
    o_ref    : (H, W, Cout) or (H//2, W//2, Cout) bf16 output
    xpad_ref : ((H+3)*(W+2), Cin) bf16 scratch: zero-padded image, flattened
               row-major over the padded (Hp, Wp) grid (+1 spare padded row so
               the junk output columns' tap reads stay in bounds).
    """
    Wp = W + 2
    Cout = o_ref.shape[-1]
    M = H * Wp                          # matmul rows (includes 2 junk cols/row)

    # Build the zero-padded image in VMEM (replaces the per-layer jnp.pad HBM
    # pass).  Re-zero every step: with a "parallel" batch axis each core owns
    # its own scratch, so a program_id(0)==0 guard would be unsafe.
    xpad_ref[...] = jnp.zeros_like(xpad_ref)
    for i in range(H):
        base = (i + 1) * Wp + 1
        xpad_ref[base:base + W, :] = x_ref[i, :, :]

    # 9 unrolled taps, f32 MXU accumulation held in registers (no scratch RMW).
    # Tap (di, dj) for output flat index k = i*Wp + j reads flat k + di*Wp + dj.
    acc = None
    for di in range(3):
        for dj in range(3):
            off = di * Wp + dj
            t = jnp.dot(xpad_ref[off:off + M, :], w_ref[di * 3 + dj],
                        preferred_element_type=jnp.float32)
            acc = t if acc is None else acc + t

    y = jnp.maximum(acc + b_ref[...], 0.0)          # f32 bias + ReLU epilogue

    if pool:                                        # fused 2x2 / stride-2 maxpool
        Ho, Wo = H // 2, W // 2
        for io in range(Ho):
            r0 = y[(2 * io) * Wp:(2 * io) * Wp + W, :]
            r1 = y[(2 * io + 1) * Wp:(2 * io + 1) * Wp + W, :]
            r = jnp.maximum(r0, r1)                 # (W, Cout) row-pair max
            for jo in range(Wo):
                v = jnp.maximum(r[2 * jo:2 * jo + 1, :],
                                r[2 * jo + 1:2 * jo + 2, :])
                o_ref[io, jo:jo + 1, :] = v.astype(o_ref.dtype)
    else:
        for i in range(H):
            o_ref[i, :, :] = y[i * Wp:i * Wp + W, :].astype(o_ref.dtype)


def conv3x3_relu_maxpool(x, w, b, *, pool):
    """x: (N, H, W, Cin) bf16 NHWC; w: (9, Cin, Cout) bf16; b: (1, Cout) f32."""
    N, H, W, Cin = x.shape
    Cout = w.shape[-1]
    if pool:
        assert H % 2 == 0 and W % 2 == 0, "fused maxpool needs even H, W"
        Ho, Wo = H // 2, W // 2
    else:
        Ho, Wo = H, W
    Wp = W + 2
    scratch_rows = (H + 3) * Wp                     # (Hp + 1) * Wp

    kernel = functools.partial(_conv3x3_relu_pool_kernel, H=H, W=W, pool=pool)
    return pl.pallas_call(
        kernel,
        out_shape=jax.ShapeDtypeStruct((N, Ho, Wo, Cout), jnp.bfloat16),
        grid=(N,),
        in_specs=[
            pl.BlockSpec((None, H, W, Cin), lambda n: (n, 0, 0, 0)),
            # constant index -> fetched once, VMEM-resident across the grid
            pl.BlockSpec((9, Cin, Cout), lambda n: (0, 0, 0)),
            pl.BlockSpec((1, Cout), lambda n: (0, 0)),
        ],
        out_specs=pl.BlockSpec((None, Ho, Wo, Cout), lambda n: (n, 0, 0, 0)),
        scratch_shapes=[pltpu.VMEM((scratch_rows, Cin), jnp.bfloat16)],
        compiler_params=pltpu.CompilerParams(
            dimension_semantics=("parallel",),      # batch blocks -> both v7x TCs
            vmem_limit_bytes=_VMEM_LIMIT,
        ),
    )(x, w, b)


# ----------------------------------------------------------------------------
# Fused classifier: Linear-ReLU-(Dropout=id)-Linear-ReLU-(Dropout=id)-Linear
# ----------------------------------------------------------------------------
def _classifier_kernel(x_ref, w1_ref, b1_ref, w2_ref, b2_ref, w3_ref, b3_ref, o_ref):
    h = jnp.dot(x_ref[...], w1_ref[...], preferred_element_type=jnp.float32) + b1_ref[...]
    h = jnp.maximum(h, 0.0).astype(w2_ref.dtype)
    h = jnp.dot(h, w2_ref[...], preferred_element_type=jnp.float32) + b2_ref[...]
    h = jnp.maximum(h, 0.0).astype(w3_ref.dtype)
    o_ref[...] = (jnp.dot(h, w3_ref[...], preferred_element_type=jnp.float32)
                  + b3_ref[...]).astype(o_ref.dtype)


def classifier_fused(x, w1, b1, w2, b2, w3, b3):
    # TODO(synk): for batch >> 128, add an M grid axis with resident weights.
    M = x.shape[0]
    Nout = w3.shape[1]
    args = (x, w1, b1, w2, b2, w3, b3)
    in_specs = [pl.BlockSpec(a.shape, lambda i: (0, 0)) for a in args]  # all 2-D, resident
    return pl.pallas_call(
        _classifier_kernel,
        out_shape=jax.ShapeDtypeStruct((M, Nout), jnp.float32),
        grid=(1,),
        in_specs=in_specs,
        out_specs=pl.BlockSpec((M, Nout), lambda i: (0, 0)),
        compiler_params=pltpu.CompilerParams(
            dimension_semantics=("arbitrary",),
            vmem_limit_bytes=_VMEM_LIMIT,
        ),
    )(*args)


# ----------------------------------------------------------------------------
# Parameters (arrays only -> jit-friendly pytree); mimics the PyTorch init
# ----------------------------------------------------------------------------
def init_params(key, in_ch=3):
    features = []
    c_in = in_ch
    for v in CFG:
        if v == "M":
            continue
        c_out = v
        key, kw = jax.random.split(key)
        std = math.sqrt(2.0 / (3 * 3 * c_out))     # N(0, sqrt(2 / (k*k*Cout)))
        w = jax.random.normal(kw, (3, 3, c_in, c_out), jnp.float32) * std
        features.append({
            "w": w.reshape(9, c_in, c_out).astype(jnp.bfloat16),   # tap-major (di*3+dj)
            "b": jnp.zeros((1, c_out), jnp.float32),
        })
        c_in = c_out

    classifier = []
    for fi, fo in [(512, 512), (512, 512), (512, 10)]:
        key, kw, kb = jax.random.split(key, 3)
        bound = 1.0 / math.sqrt(fi)                # PyTorch default Linear init
        w = jax.random.uniform(kw, (fi, fo), jnp.float32, -bound, bound)
        b = jax.random.uniform(kb, (fo,), jnp.float32, -bound, bound)
        classifier.append({"w": w.astype(jnp.bfloat16), "b": b.reshape(1, fo)})
    return {"features": features, "classifier": classifier}


# ----------------------------------------------------------------------------
# Forward pass (== VGG.forward, eval mode)
# ----------------------------------------------------------------------------
def vgg_forward(params, x_nchw):
    # NCHW (PyTorch) -> NHWC (channels on the 128-lane axis), bf16 activations.
    x = jnp.transpose(x_nchw, (0, 2, 3, 1)).astype(jnp.bfloat16)

    for li, pool in enumerate(_PLAN):              # static layer plan (not traced)
        p = params["features"][li]
        x = conv3x3_relu_maxpool(x, p["w"], p["b"], pool=pool)

    # x.view(x.size(0), -1) in PyTorch NCHW flatten order
    n = x.shape[0]
    x = jnp.transpose(x, (0, 3, 1, 2)).reshape(n, -1)

    # TODO(synk): Dropout(p=0.5) is identity in eval mode (no RNG mask applied).
    c1, c2, c3 = params["classifier"]
    return classifier_fused(x, c1["w"], c1["b"], c2["w"], c2["b"], c3["w"], c3["b"])


if __name__ == "__main__":
    key = jax.random.PRNGKey(0)
    key, kx = jax.random.split(key)
    params = init_params(key, in_ch=3)

    # 3-channel 8x8 input: 3 maxpools -> 1x1x512 -> flatten 512 -> classifier.
    x = jax.random.normal(kx, (2, 3, 8, 8), jnp.float32)

    out = jax.jit(vgg_forward)(params, x)
    out = jax.block_until_ready(out)
    assert out.shape == (2, 10), out.shape
    print("KERNEL_OK")
</pallas_src>

<mosaic_0001>
module attributes {stable_mosaic.version = 11 : i64} {
  func.func @_conv3x3_relu_pool_kernel(%arg0: i32, %arg1: memref<1x4x4x64xbf16, #tpu.memory_space<vmem>>, %arg2: memref<9x64x128xbf16, #tpu.memory_space<vmem>>, %arg3: memref<1x128xf32, #tpu.memory_space<vmem>>, %arg4: memref<1x2x2x128xbf16, #tpu.memory_space<vmem>>, %arg5: memref<42x64xbf16, #tpu.memory_space<vmem>>) attributes {dimension_semantics = [#tpu.dimension_semantics<parallel>], iteration_bounds = array<i64: 2>, scalar_prefetch = 0 : i64, scratch_operands = 1 : i64, tpu.core_type = #tpu.core_type<tc>, window_params = [{transform_indices = @transform_0, window_bounds = array<i64: 1, 4, 4, 64>}, {pipeline_mode = #tpu.pipeline_mode<synchronous>, transform_indices = @transform_1, window_bounds = array<i64: 9, 64, 128>}, {pipeline_mode = #tpu.pipeline_mode<synchronous>, transform_indices = @transform_2, window_bounds = array<i64: 1, 128>}, {transform_indices = @transform_3, window_bounds = array<i64: 1, 2, 2, 128>}]} {
    %cst = arith.constant 0.000000e+00 : bf16
    %0 = vector.broadcast %cst : bf16 to vector<42x64xbf16>
    %c0 = arith.constant 0 : index
    %c0_0 = arith.constant 0 : index
    %1 = vector.load %arg5[%c0, %c0_0] : memref<42x64xbf16, #tpu.memory_space<vmem>>, vector<42x64xbf16>
    tpu.vector_store %arg5[%c0, %c0_0], %0 {strides = array<i32>} : memref<42x64xbf16, #tpu.memory_space<vmem>>, vector<42x64xbf16>,
    %c0_1 = arith.constant 0 : index
    %c0_2 = arith.constant 0 : index
    %c0_3 = arith.constant 0 : index
    %c0_4 = arith.constant 0 : index
    %2 = vector.load %arg1[%c0_1, %c0_2, %c0_3, %c0_4] : memref<1x4x4x64xbf16, #tpu.memory_space<vmem>>, vector<1x1x4x64xbf16>
    %3 = vector.shape_cast %2 : vector<1x1x4x64xbf16> to vector<4x64xbf16>
    %c7 = arith.constant 7 : index
    %c0_5 = arith.constant 0 : index
    %4 = vector.load %arg5[%c7, %c0_5] : memref<42x64xbf16, #tpu.memory_space<vmem>>, vector<4x64xbf16>
    tpu.vector_store %arg5[%c7, %c0_5], %3 {strides = array<i32>} : memref<42x64xbf16, #tpu.memory_space<vmem>>, vector<4x64xbf16>,
    %c0_6 = arith.constant 0 : index
    %c1 = arith.constant 1 : index
    %c0_7 = arith.constant 0 : index
    %c0_8 = arith.constant 0 : index
    %5 = vector.load %arg1[%c0_6, %c1, %c0_7, %c0_8] : memref<1x4x4x64xbf16, #tpu.memory_space<vmem>>, vector<1x1x4x64xbf16>
    %6 = vector.shape_cast %5 : vector<1x1x4x64xbf16> to vector<4x64xbf16>
    %c13 = arith.constant 13 : index
    %c0_9 = arith.constant 0 : index
    %7 = vector.load %arg5[%c13, %c0_9] : memref<42x64xbf16, #tpu.memory_space<vmem>>, vector<4x64xbf16>
    tpu.vector_store %arg5[%c13, %c0_9], %6 {strides = array<i32>} : memref<42x64xbf16, #tpu.memory_space<vmem>>, vector<4x64xbf16>,
    %c0_10 = arith.constant 0 : index
    %c2 = arith.constant 2 : index
    %c0_11 = arith.constant 0 : index
    %c0_12 = arith.constant 0 : index
    %8 = vector.load %arg1[%c0_10, %c2, %c0_11, %c0_12] : memref<1x4x4x64xbf16, #tpu.memory_space<vmem>>, vector<1x1x4x64xbf16>
    %9 = vector.shape_cast %8 : vector<1x1x4x64xbf16> to vector<4x64xbf16>
    %c19 = arith.constant 19 : index
    %c0_13 = arith.constant 0 : index
    %10 = vector.load %arg5[%c19, %c0_13] : memref<42x64xbf16, #tpu.memory_space<vmem>>, vector<4x64xbf16>
    tpu.vector_store %arg5[%c19, %c0_13], %9 {strides = array<i32>} : memref<42x64xbf16, #tpu.memory_space<vmem>>, vector<4x64xbf16>,
    %c0_14 = arith.constant 0 : index
    %c3 = arith.constant 3 : index
    %c0_15 = arith.constant 0 : index
    %c0_16 = arith.constant 0 : index
    %11 = vector.load %arg1[%c0_14, %c3, %c0_15, %c0_16] : memref<1x4x4x64xbf16, #tpu.memory_space<vmem>>, vector<1x1x4x64xbf16>
    %12 = vector.shape_cast %11 : vector<1x1x4x64xbf16> to vector<4x64xbf16>
    %c25 = arith.constant 25 : index
    %c0_17 = arith.constant 0 : index
    %13 = vector.load %arg5[%c25, %c0_17] : memref<42x64xbf16, #tpu.memory_space<vmem>>, vector<4x64xbf16>
    tpu.vector_store %arg5[%c25, %c0_17], %12 {strides = array<i32>} : memref<42x64xbf16, #tpu.memory_space<vmem>>, vector<4x64xbf16>,
    %c0_18 = arith.constant 0 : index
    %c0_19 = arith.constant 0 : index
    %14 = vector.load %arg5[%c0_18, %c0_19] : memref<42x64xbf16, #tpu.memory_space<vmem>>, vector<24x64xbf16>
    %c0_20 = arith.constant 0 : index
    %c0_21 = arith.constant 0 : index
    %c0_22 = arith.constant 0 : index
    %15 = vector.load %arg2[%c0_20, %c0_21, %c0_22] : memref<9x64x128xbf16, #tpu.memory_space<vmem>>, vector<1x64x128xbf16>
    %16 = vector.shape_cast %15 : vector<1x64x128xbf16> to vector<64x128xbf16>
    %cst_23 = arith.constant dense<0.000000e+00> : vector<24x128xf32>
    %17 = tpu.matmul %14, %16, %cst_23 {dimension_numbers = #tpu.dot_dimension_numbers<[1], [0], [0], [1], [0, 0, 1, 1], [], []>} : vector<24x64xbf16>, vector<64x128xbf16>, vector<24x128xf32> -> vector<24x128xf32>
    %c1_24 = arith.constant 1 : index
    %c0_25 = arith.constant 0 : index
    %18 = vector.load %arg5[%c1_24, %c0_25] : memref<42x64xbf16, #tpu.memory_space<vmem>>, vector<24x64xbf16>
    %c1_26 = arith.constant 1 : index
    %c0_27 = arith.constant 0 : index
    %c0_28 = arith.constant 0 : index
    %19 = vector.load %arg2[%c1_26, %c0_27, %c0_28] : memref<9x64x128xbf16, #tpu.memory_space<vmem>>, vector<1x64x128xbf16>
    %20 = vector.shape_cast %19 : vector<1x64x128xbf16> to vector<64x128xbf16>
    %cst_29 = arith.constant dense<0.000000e+00> : vector<24x128xf32>
    %21 = tpu.matmul %18, %20, %cst_29 {dimension_numbers = #tpu.dot_dimension_numbers<[1], [0], [0], [1], [0, 0, 1, 1], [], []>} : vector<24x64xbf16>, vector<64x128xbf16>, vector<24x128xf32> -> vector<24x128xf32>
    %22 = arith.addf %17, %21 : vector<24x128xf32>
    %c2_30 = arith.constant 2 : index
    %c0_31 = arith.constant 0 : index
    %23 = vector.load %arg5[%c2_30, %c0_31] : memref<42x64xbf16, #tpu.memory_space<vmem>>, vector<24x64xbf16>
    %c2_32 = arith.constant 2 : index
    %c0_33 = arith.constant 0 : index
    %c0_34 = arith.constant 0 : index
    %24 = vector.load %arg2[%c2_32, %c0_33, %c0_34] : memref<9x64x128xbf16, #tpu.memory_space<vmem>>, vector<1x64x128xbf16>
    %25 = vector.shape_cast %24 : vector<1x64x128xbf16> to vector<64x128xbf16>
    %cst_35 = arith.constant dense<0.000000e+00> : vector<24x128xf32>
    %26 = tpu.matmul %23, %25, %cst_35 {dimension_numbers = #tpu.dot_dimension_numbers<[1], [0], [0], [1], [0, 0, 1, 1], [], []>} : vector<24x64xbf16>, vector<64x128xbf16>, vector<24x128xf32> -> vector<24x128xf32>
    %27 = arith.addf %22, %26 : vector<24x128xf32>
    %c6 = arith.constant 6 : index
    %c0_36 = arith.constant 0 : index
    %28 = vector.load %arg5[%c6, %c0_36] : memref<42x64xbf16, #tpu.memory_space<vmem>>, vector<24x64xbf16>
    %c3_37 = arith.constant 3 : index
    %c0_38 = arith.constant 0 : index
    %c0_39 = arith.constant 0 : index
    %29 = vector.load %arg2[%c3_37, %c0_38, %c0_39] : memref<9x64x128xbf16, #tpu.memory_space<vmem>>, vector<1x64x128xbf16>
    %30 = vector.shape_cast %29 : vector<1x64x128xbf16> to vector<64x128xbf16>
    %cst_40 = arith.constant dense<0.000000e+00> : vector<24x128xf32>
    %31 = tpu.matmul %28, %30, %cst_40 {dimension_numbers = #tpu.dot_dimension_numbers<[1], [0], [0], [1], [0, 0, 1, 1], [], []>} : vector<24x64xbf16>, vector<64x128xbf16>, vector<24x128xf32> -> vector<24x128xf32>
    %32 = arith.addf %27, %31 : vector<24x128xf32>
    %c7_41 = arith.constant 7 : index
    %c0_42 = arith.constant 0 : index
    %33 = vector.load %arg5[%c7_41, %c0_42] : memref<42x64xbf16, #tpu.memory_space<vmem>>, vector<24x64xbf16>
    %c4 = arith.constant 4 : index
    %c0_43 = arith.constant 0 : index
    %c0_44 = arith.constant 0 : index
    %34 = vector.load %arg2[%c4, %c0_43, %c0_44] : memref<9x64x128xbf16, #tpu.memory_space<vmem>>, vector<1x64x128xbf16>
    %35 = vector.shape_cast %34 : vector<1x64x128xbf16> to vector<64x128xbf16>
    %cst_45 = arith.constant dense<0.000000e+00> : vector<24x128xf32>
    %36 = tpu.matmul %33, %35, %cst_45 {dimension_numbers = #tpu.dot_dimension_numbers<[1], [0], [0], [1], [0, 0, 1, 1], [], []>} : vector<24x64xbf16>, vector<64x128xbf16>, vector<24x128xf32> -> vector<24x128xf32>
    %37 = arith.addf %32, %36 : vector<24x128xf32>
    %c8 = arith.constant 8 : index
    %c0_46 = arith.constant 0 : index
    %38 = vector.load %arg5[%c8, %c0_46] : memref<42x64xbf16, #tpu.memory_space<vmem>>, vector<24x64xbf16>
    %c5 = arith.constant 5 : index
    %c0_47 = arith.constant 0 : index
    %c0_48 = arith.constant 0 : index
    %39 = vector.load %arg2[%c5, %c0_47, %c0_48] : memref<9x64x128xbf16, #tpu.memory_space<vmem>>, vector<1x64x128xbf16>
    %40 = vector.shape_cast %39 : vector<1x64x128xbf16> to vector<64x128xbf16>
    %cst_49 = arith.constant dense<0.000000e+00> : vector<24x128xf32>
    %41 = tpu.matmul %38, %40, %cst_49 {dimension_numbers = #tpu.dot_dimension_numbers<[1], [0], [0], [1], [0, 0, 1, 1], [], []>} : vector<24x64xbf16>, vector<64x128xbf16>, vector<24x128xf32> -> vector<24x128xf32>
    %42 = arith.addf %37, %41 : vector<24x128xf32>
    %c12 = arith.constant 12 : index
    %c0_50 = arith.constant 0 : index
    %43 = vector.load %arg5[%c12, %c0_50] : memref<42x64xbf16, #tpu.memory_space<vmem>>, vector<24x64xbf16>
    %c6_51 = arith.constant 6 : index
    %c0_52 = arith.constant 0 : index
    %c0_53 = arith.constant 0 : index
    %44 = vector.load %arg2[%c6_51, %c0_52, %c0_53] : memref<9x64x128xbf16, #tpu.memory_space<vmem>>, vector<1x64x128xbf16>
    %45 = vector.shape_cast %44 : vector<1x64x128xbf16> to vector<64x128xbf16>
    %cst_54 = arith.constant dense<0.000000e+00> : vector<24x128xf32>
    %46 = tpu.matmul %43, %45, %cst_54 {dimension_numbers = #tpu.dot_dimension_numbers<[1], [0], [0], [1], [0, 0, 1, 1], [], []>} : vector<24x64xbf16>, vector<64x128xbf16>, vector<24x128xf32> -> vector<24x128xf32>
    %47 = arith.addf %42, %46 : vector<24x128xf32>
    %c13_55 = arith.constant 13 : index
    %c0_56 = arith.constant 0 : index
    %48 = vector.load %arg5[%c13_55, %c0_56] : memref<42x64xbf16, #tpu.memory_space<vmem>>, vector<24x64xbf16>
    %c7_57 = arith.constant 7 : index
    %c0_58 = arith.constant 0 : index
    %c0_59 = arith.constant 0 : index
    %49 = vector.load %arg2[%c7_57, %c0_58, %c0_59] : memref<9x64x128xbf16, #tpu.memory_space<vmem>>, vector<1x64x128xbf16>
    %50 = vector.shape_cast %49 : vector<1x64x128xbf16> to vector<64x128xbf16>
    %cst_60 = arith.constant dense<0.000000e+00> : vector<24x128xf32>
    %51 = tpu.matmul %48, %50, %cst_60 {dimension_numbers = #tpu.dot_dimension_numbers<[1], [0], [0], [1], [0, 0, 1, 1], [], []>} : vector<24x64xbf16>, vector<64x128xbf16>, vector<24x128xf32> -> vector<24x128xf32>
    %52 = arith.addf %47, %51 : vector<24x128xf32>
    %c14 = arith.constant 14 : index
    %c0_61 = arith.constant 0 : index
    %53 = vector.load %arg5[%c14, %c0_61] : memref<42x64xbf16, #tpu.memory_space<vmem>>, vector<24x64xbf16>
    %c8_62 = arith.constant 8 : index
    %c0_63 = arith.constant 0 : index
    %c0_64 = arith.constant 0 : index
    %54 = vector.load %arg2[%c8_62, %c0_63, %c0_64] : memref<9x64x128xbf16, #tpu.memory_space<vmem>>, vector<1x64x128xbf16>
    %55 = vector.shape_cast %54 : vector<1x64x128xbf16> to vector<64x128xbf16>
    %cst_65 = arith.constant dense<0.000000e+00> : vector<24x128xf32>
    %56 = tpu.matmul %53, %55, %cst_65 {dimension_numbers = #tpu.dot_dimension_numbers<[1], [0], [0], [1], [0, 0, 1, 1], [], []>} : vector<24x64xbf16>, vector<64x128xbf16>, vector<24x128xf32> -> vector<24x128xf32>
    %57 = arith.addf %52, %56 : vector<24x128xf32>
    %c0_66 = arith.constant 0 : index
    %c0_67 = arith.constant 0 : index
    %58 = vector.load %arg3[%c0_66, %c0_67] : memref<1x128xf32, #tpu.memory_space<vmem>>, vector<1x128xf32>
    %59 = vector.broadcast %58 : vector<1x128xf32> to vector<24x128xf32>
    %60 = arith.addf %57, %59 : vector<24x128xf32>
    %cst_68 = arith.constant 0.000000e+00 : f32
    %61 = vector.broadcast %cst_68 : f32 to vector<24x128xf32>
    %62 = arith.maximumf %60, %61 : vector<24x128xf32>
    %63 = vector.extract_strided_slice %62 {offsets = [0, 0], sizes = [4, 128], strides = [1, 1]} : vector<24x128xf32> to vector<4x128xf32>
    %64 = vector.extract_strided_slice %62 {offsets = [6, 0], sizes = [4, 128], strides = [1, 1]} : vector<24x128xf32> to vector<4x128xf32>
    %65 = arith.maximumf %63, %64 : vector<4x128xf32>
    %66 = vector.extract_strided_slice %65 {offsets = [0, 0], sizes = [1, 128], strides = [1, 1]} : vector<4x128xf32> to vector<1x128xf32>
    %67 = vector.extract_strided_slice %65 {offsets = [1, 0], sizes = [1, 128], strides = [1, 1]} : vector<4x128xf32> to vector<1x128xf32>
    %68 = arith.maximumf %66, %67 : vector<1x128xf32>
    %69 = arith.truncf %68 : vector<1x128xf32> to vector<1x128xbf16>
    %c0_69 = arith.constant 0 : index
    %c0_70 = arith.constant 0 : index
    %c0_71 = arith.constant 0 : index
    %c0_72 = arith.constant 0 : index
    %70 = vector.load %arg4[%c0_69, %c0_70, %c0_71, %c0_72] : memref<1x2x2x128xbf16, #tpu.memory_space<vmem>>, vector<1x1x1x128xbf16>
    %71 = vector.shape_cast %70 : vector<1x1x1x128xbf16> to vector<1x128xbf16>
    %72 = vector.shape_cast %69 : vector<1x128xbf16> to vector<1x1x1x128xbf16>
    tpu.vector_store %arg4[%c0_69, %c0_70, %c0_71, %c0_72], %72 {strides = array<i32>} : memref<1x2x2x128xbf16, #tpu.memory_space<vmem>>, vector<1x1x1x128xbf16>,
    %73 = vector.extract_strided_slice %65 {offsets = [2, 0], sizes = [1, 128], strides = [1, 1]} : vector<4x128xf32> to vector<1x128xf32>
    %74 = vector.extract_strided_slice %65 {offsets = [3, 0], sizes = [1, 128], strides = [1, 1]} : vector<4x128xf32> to vector<1x128xf32>
    %75 = arith.maximumf %73, %74 : vector<1x128xf32>
    %76 = arith.truncf %75 : vector<1x128xf32> to vector<1x128xbf16>
    %c0_73 = arith.constant 0 : index
    %c0_74 = arith.constant 0 : index
    %c1_75 = arith.constant 1 : index
    %c0_76 = arith.constant 0 : index
    %77 = vector.load %arg4[%c0_73, %c0_74, %c1_75, %c0_76] : memref<1x2x2x128xbf16, #tpu.memory_space<vmem>>, vector<1x1x1x128xbf16>
    %78 = vector.shape_cast %77 : vector<1x1x1x128xbf16> to vector<1x128xbf16>
    %79 = vector.shape_cast %76 : vector<1x128xbf16> to vector<1x1x1x128xbf16>
    tpu.vector_store %arg4[%c0_73, %c0_74, %c1_75, %c0_76], %79 {strides = array<i32>} : memref<1x2x2x128xbf16, #tpu.memory_space<vmem>>, vector<1x1x1x128xbf16>,
    %80 = vector.extract_strided_slice %62 {offsets = [12, 0], sizes = [4, 128], strides = [1, 1]} : vector<24x128xf32> to vector<4x128xf32>
    %81 = vector.extract_strided_slice %62 {offsets = [18, 0], sizes = [4, 128], strides = [1, 1]} : vector<24x128xf32> to vector<4x128xf32>
    %82 = arith.maximumf %80, %81 : vector<4x128xf32>
    %83 = vector.extract_strided_slice %82 {offsets = [0, 0], sizes = [1, 128], strides = [1, 1]} : vector<4x128xf32> to vector<1x128xf32>
    %84 = vector.extract_strided_slice %82 {offsets = [1, 0], sizes = [1, 128], strides = [1, 1]} : vector<4x128xf32> to vector<1x128xf32>
    %85 = arith.maximumf %83, %84 : vector<1x128xf32>
    %86 = arith.truncf %85 : vector<1x128xf32> to vector<1x128xbf16>
    %c0_77 = arith.constant 0 : index
    %c1_78 = arith.constant 1 : index
    %c0_79 = arith.constant 0 : index
    %c0_80 = arith.constant 0 : index
    %87 = vector.load %arg4[%c0_77, %c1_78, %c0_79, %c0_80] : memref<1x2x2x128xbf16, #tpu.memory_space<vmem>>, vector<1x1x1x128xbf16>
    %88 = vector.shape_cast %87 : vector<1x1x1x128xbf16> to vector<1x128xbf16>
    %89 = vector.shape_cast %86 : vector<1x128xbf16> to vector<1x1x1x128xbf16>
    tpu.vector_store %arg4[%c0_77, %c1_78, %c0_79, %c0_80], %89 {strides = array<i32>} : memref<1x2x2x128xbf16, #tpu.memory_space<vmem>>, vector<1x1x1x128xbf16>,
    %90 = vector.extract_strided_slice %82 {offsets = [2, 0], sizes = [1, 128], strides = [1, 1]} : vector<4x128xf32> to vector<1x128xf32>
    %91 = vector.extract_strided_slice %82 {offsets = [3, 0], sizes = [1, 128], strides = [1, 1]} : vector<4x128xf32> to vector<1x128xf32>
    %92 = arith.maximumf %90, %91 : vector<1x128xf32>
    %93 = arith.truncf %92 : vector<1x128xf32> to vector<1x128xbf16>
    %c0_81 = arith.constant 0 : index
    %c1_82 = arith.constant 1 : index
    %c1_83 = arith.constant 1 : index
    %c0_84 = arith.constant 0 : index
    %94 = vector.load %arg4[%c0_81, %c1_82, %c1_83, %c0_84] : memref<1x2x2x128xbf16, #tpu.memory_space<vmem>>, vector<1x1x1x128xbf16>
    %95 = vector.shape_cast %94 : vector<1x1x1x128xbf16> to vector<1x128xbf16>
    %96 = vector.shape_cast %93 : vector<1x128xbf16> to vector<1x1x1x128xbf16>
    tpu.vector_store %arg4[%c0_81, %c1_82, %c1_83, %c0_84], %96 {strides = array<i32>} : memref<1x2x2x128xbf16, #tpu.memory_space<vmem>>, vector<1x1x1x128xbf16>,
    return
  }
  func.func @transform_0(%arg0: i32) -> (i32, i32, i32, i32) {
    %c0_i32 = arith.constant 0 : i32
    %c0_i32_0 = arith.constant 0 : i32
    %c0_i32_1 = arith.constant 0 : i32
    %c0_i32_2 = arith.constant 0 : i32
    return %arg0, %c0_i32, %c0_i32_0, %c0_i32_1 : i32, i32, i32, i32
  }
  func.func @transform_1(%arg0: i32) -> (i32, i32, i32) {
    %c0_i32 = arith.constant 0 : i32
    %c0_i32_0 = arith.constant 0 : i32
    %c0_i32_1 = arith.constant 0 : i32
    %c0_i32_2 = arith.constant 0 : i32
    return %c0_i32, %c0_i32_0, %c0_i32_1 : i32, i32, i32
  }
  func.func @transform_2(%arg0: i32) -> (i32, i32) {
    %c0_i32 = arith.constant 0 : i32
    %c0_i32_0 = arith.constant 0 : i32
    %c0_i32_1 = arith.constant 0 : i32
    return %c0_i32, %c0_i32_0 : i32, i32
  }
  func.func @transform_3(%arg0: i32) -> (i32, i32, i32, i32) {
    %c0_i32 = arith.constant 0 : i32
    %c0_i32_0 = arith.constant 0 : i32
    %c0_i32_1 = arith.constant 0 : i32
    %c0_i32_2 = arith.constant 0 : i32
    return %arg0, %c0_i32, %c0_i32_0, %c0_i32_1 : i32, i32, i32, i32
  }
}

module attributes {stable_mosaic.version = 11 : i64} {
  func.func @_conv3x3_relu_pool_kernel(%arg0: i32, %arg1: memref<1x1x1x256xbf16, #tpu.memory_space<vmem>>, %arg2: memref<9x256x512xbf16, #tpu.memory_space<vmem>>, %arg3: memref<1x512xf32, #tpu.memory_space<vmem>>, %arg4: memref<1x1x1x512xbf16, #tpu.memory_space<vmem>>, %arg5: memref<12x256xbf16, #tpu.memory_space<vmem>>) attributes {dimension_semantics = [#tpu.dimension_semantics<parallel>], iteration_bounds = array<i64: 2>, scalar_prefetch = 0 : i64, scratch_operands = 1 : i64, tpu.core_type = #tpu.core_type<tc>, window_params = [{transform_indices = @transform_0, window_bounds = array<i64: 1, 1, 1, 256>}, {pipeline_mode = #tpu.pipeline_mode<synchronous>, transform_indices = @transform_1, window_bounds = array<i64: 9, 256, 512>}, {pipeline_mode = #tpu.pipeline_mode<synchronous>, transform_indices = @transform_2, window_bounds = array<i64: 1, 512>}, {transform_indices = @transform_3, window_bounds = array<i64: 1, 1, 1, 512>}]} {
    %cst = arith.constant 0.000000e+00 : bf16
    %0 = vector.broadcast %cst : bf16 to vector<12x256xbf16>
    %c0 = arith.constant 0 : index
    %c0_0 = arith.constant 0 : index
    %1 = vector.load %arg5[%c0, %c0_0] : memref<12x256xbf16, #tpu.memory_space<vmem>>, vector<12x256xbf16>
    tpu.vector_store %arg5[%c0, %c0_0], %0 {strides = array<i32>} : memref<12x256xbf16, #tpu.memory_space<vmem>>, vector<12x256xbf16>,
    %c0_1 = arith.constant 0 : index
    %c0_2 = arith.constant 0 : index
    %c0_3 = arith.constant 0 : index
    %c0_4 = arith.constant 0 : index
    %2 = vector.load %arg1[%c0_1, %c0_2, %c0_3, %c0_4] : memref<1x1x1x256xbf16, #tpu.memory_space<vmem>>, vector<1x1x1x256xbf16>
    %3 = vector.shape_cast %2 : vector<1x1x1x256xbf16> to vector<1x256xbf16>
    %c4 = arith.constant 4 : index
    %c0_5 = arith.constant 0 : index
    %4 = vector.load %arg5[%c4, %c0_5] : memref<12x256xbf16, #tpu.memory_space<vmem>>, vector<1x256xbf16>
    tpu.vector_store %arg5[%c4, %c0_5], %3 {strides = array<i32>} : memref<12x256xbf16, #tpu.memory_space<vmem>>, vector<1x256xbf16>,
    %c0_6 = arith.constant 0 : index
    %c0_7 = arith.constant 0 : index
    %5 = vector.load %arg5[%c0_6, %c0_7] : memref<12x256xbf16, #tpu.memory_space<vmem>>, vector<3x256xbf16>
    %c0_8 = arith.constant 0 : index
    %c0_9 = arith.constant 0 : index
    %c0_10 = arith.constant 0 : index
    %6 = vector.load %arg2[%c0_8, %c0_9, %c0_10] : memref<9x256x512xbf16, #tpu.memory_space<vmem>>, vector<1x256x512xbf16>
    %7 = vector.shape_cast %6 : vector<1x256x512xbf16> to vector<256x512xbf16>
    %cst_11 = arith.constant dense<0.000000e+00> : vector<3x512xf32>
    %8 = tpu.matmul %5, %7, %cst_11 {dimension_numbers = #tpu.dot_dimension_numbers<[1], [0], [0], [1], [0, 0, 1, 1], [], []>} : vector<3x256xbf16>, vector<256x512xbf16>, vector<3x512xf32> -> vector<3x512xf32>
    %c1 = arith.constant 1 : index
    %c0_12 = arith.constant 0 : index
    %9 = vector.load %arg5[%c1, %c0_12] : memref<12x256xbf16, #tpu.memory_space<vmem>>, vector<3x256xbf16>
    %c1_13 = arith.constant 1 : index
    %c0_14 = arith.constant 0 : index
    %c0_15 = arith.constant 0 : index
    %10 = vector.load %arg2[%c1_13, %c0_14, %c0_15] : memref<9x256x512xbf16, #tpu.memory_space<vmem>>, vector<1x256x512xbf16>
    %11 = vector.shape_cast %10 : vector<1x256x512xbf16> to vector<256x512xbf16>
    %cst_16 = arith.constant dense<0.000000e+00> : vector<3x512xf32>
    %12 = tpu.matmul %9, %11, %cst_16 {dimension_numbers = #tpu.dot_dimension_numbers<[1], [0], [0], [1], [0, 0, 1, 1], [], []>} : vector<3x256xbf16>, vector<256x512xbf16>, vector<3x512xf32> -> vector<3x512xf32>
    %13 = arith.addf %8, %12 : vector<3x512xf32>
    %c2 = arith.constant 2 : index
    %c0_17 = arith.constant 0 : index
    %14 = vector.load %arg5[%c2, %c0_17] : memref<12x256xbf16, #tpu.memory_space<vmem>>, vector<3x256xbf16>
    %c2_18 = arith.constant 2 : index
    %c0_19 = arith.constant 0 : index
    %c0_20 = arith.constant 0 : index
    %15 = vector.load %arg2[%c2_18, %c0_19, %c0_20] : memref<9x256x512xbf16, #tpu.memory_space<vmem>>, vector<1x256x512xbf16>
    %16 = vector.shape_cast %15 : vector<1x256x512xbf16> to vector<256x512xbf16>
    %cst_21 = arith.constant dense<0.000000e+00> : vector<3x512xf32>
    %17 = tpu.matmul %14, %16, %cst_21 {dimension_numbers = #tpu.dot_dimension_numbers<[1], [0], [0], [1], [0, 0, 1, 1], [], []>} : vector<3x256xbf16>, vector<256x512xbf16>, vector<3x512xf32> -> vector<3x512xf32>
    %18 = arith.addf %13, %17 : vector<3x512xf32>
    %c3 = arith.constant 3 : index
    %c0_22 = arith.constant 0 : index
    %19 = vector.load %arg5[%c3, %c0_22] : memref<12x256xbf16, #tpu.memory_space<vmem>>, vector<3x256xbf16>
    %c3_23 = arith.constant 3 : index
    %c0_24 = arith.constant 0 : index
    %c0_25 = arith.constant 0 : index
    %20 = vector.load %arg2[%c3_23, %c0_24, %c0_25] : memref<9x256x512xbf16, #tpu.memory_space<vmem>>, vector<1x256x512xbf16>
    %21 = vector.shape_cast %20 : vector<1x256x512xbf16> to vector<256x512xbf16>
    %cst_26 = arith.constant dense<0.000000e+00> : vector<3x512xf32>
    %22 = tpu.matmul %19, %21, %cst_26 {dimension_numbers = #tpu.dot_dimension_numbers<[1], [0], [0], [1], [0, 0, 1, 1], [], []>} : vector<3x256xbf16>, vector<256x512xbf16>, vector<3x512xf32> -> vector<3x512xf32>
    %23 = arith.addf %18, %22 : vector<3x512xf32>
    %c4_27 = arith.constant 4 : index
    %c0_28 = arith.constant 0 : index
    %24 = vector.load %arg5[%c4_27, %c0_28] : memref<12x256xbf16, #tpu.memory_space<vmem>>, vector<3x256xbf16>
    %c4_29 = arith.constant 4 : index
    %c0_30 = arith.constant 0 : index
    %c0_31 = arith.constant 0 : index
    %25 = vector.load %arg2[%c4_29, %c0_30, %c0_31] : memref<9x256x512xbf16, #tpu.memory_space<vmem>>, vector<1x256x512xbf16>
    %26 = vector.shape_cast %25 : vector<1x256x512xbf16> to vector<256x512xbf16>
    %cst_32 = arith.constant dense<0.000000e+00> : vector<3x512xf32>
    %27 = tpu.matmul %24, %26, %cst_32 {dimension_numbers = #tpu.dot_dimension_numbers<[1], [0], [0], [1], [0, 0, 1, 1], [], []>} : vector<3x256xbf16>, vector<256x512xbf16>, vector<3x512xf32> -> vector<3x512xf32>
    %28 = arith.addf %23, %27 : vector<3x512xf32>
    %c5 = arith.constant 5 : index
    %c0_33 = arith.constant 0 : index
    %29 = vector.load %arg5[%c5, %c0_33] : memref<12x256xbf16, #tpu.memory_space<vmem>>, vector<3x256xbf16>
    %c5_34 = arith.constant 5 : index
    %c0_35 = arith.constant 0 : index
    %c0_36 = arith.constant 0 : index
    %30 = vector.load %arg2[%c5_34, %c0_35, %c0_36] : memref<9x256x512xbf16, #tpu.memory_space<vmem>>, vector<1x256x512xbf16>
    %31 = vector.shape_cast %30 : vector<1x256x512xbf16> to vector<256x512xbf16>
    %cst_37 = arith.constant dense<0.000000e+00> : vector<3x512xf32>
    %32 = tpu.matmul %29, %31, %cst_37 {dimension_numbers = #tpu.dot_dimension_numbers<[1], [0], [0], [1], [0, 0, 1, 1], [], []>} : vector<3x256xbf16>, vector<256x512xbf16>, vector<3x512xf32> -> vector<3x512xf32>
    %33 = arith.addf %28, %32 : vector<3x512xf32>
    %c6 = arith.constant 6 : index
    %c0_38 = arith.constant 0 : index
    %34 = vector.load %arg5[%c6, %c0_38] : memref<12x256xbf16, #tpu.memory_space<vmem>>, vector<3x256xbf16>
    %c6_39 = arith.constant 6 : index
    %c0_40 = arith.constant 0 : index
    %c0_41 = arith.constant 0 : index
    %35 = vector.load %arg2[%c6_39, %c0_40, %c0_41] : memref<9x256x512xbf16, #tpu.memory_space<vmem>>, vector<1x256x512xbf16>
    %36 = vector.shape_cast %35 : vector<1x256x512xbf16> to vector<256x512xbf16>
    %cst_42 = arith.constant dense<0.000000e+00> : vector<3x512xf32>
    %37 = tpu.matmul %34, %36, %cst_42 {dimension_numbers = #tpu.dot_dimension_numbers<[1], [0], [0], [1], [0, 0, 1, 1], [], []>} : vector<3x256xbf16>, vector<256x512xbf16>, vector<3x512xf32> -> vector<3x512xf32>
    %38 = arith.addf %33, %37 : vector<3x512xf32>
    %c7 = arith.constant 7 : index
    %c0_43 = arith.constant 0 : index
    %39 = vector.load %arg5[%c7, %c0_43] : memref<12x256xbf16, #tpu.memory_space<vmem>>, vector<3x256xbf16>
    %c7_44 = arith.constant 7 : index
    %c0_45 = arith.constant 0 : index
    %c0_46 = arith.constant 0 : index
    %40 = vector.load %arg2[%c7_44, %c0_45, %c0_46] : memref<9x256x512xbf16, #tpu.memory_space<vmem>>, vector<1x256x512xbf16>
    %41 = vector.shape_cast %40 : vector<1x256x512xbf16> to vector<256x512xbf16>
    %cst_47 = arith.constant dense<0.000000e+00> : vector<3x512xf32>
    %42 = tpu.matmul %39, %41, %cst_47 {dimension_numbers = #tpu.dot_dimension_numbers<[1], [0], [0], [1], [0, 0, 1, 1], [], []>} : vector<3x256xbf16>, vector<256x512xbf16>, vector<3x512xf32> -> vector<3x512xf32>
    %43 = arith.addf %38, %42 : vector<3x512xf32>
    %c8 = arith.constant 8 : index
    %c0_48 = arith.constant 0 : index
    %44 = vector.load %arg5[%c8, %c0_48] : memref<12x256xbf16, #tpu.memory_space<vmem>>, vector<3x256xbf16>
    %c8_49 = arith.constant 8 : index
    %c0_50 = arith.constant 0 : index
    %c0_51 = arith.constant 0 : index
    %45 = vector.load %arg2[%c8_49, %c0_50, %c0_51] : memref<9x256x512xbf16, #tpu.memory_space<vmem>>, vector<1x256x512xbf16>
    %46 = vector.shape_cast %45 : vector<1x256x512xbf16> to vector<256x512xbf16>
    %cst_52 = arith.constant dense<0.000000e+00> : vector<3x512xf32>
    %47 = tpu.matmul %44, %46, %cst_52 {dimension_numbers = #tpu.dot_dimension_numbers<[1], [0], [0], [1], [0, 0, 1, 1], [], []>} : vector<3x256xbf16>, vector<256x512xbf16>, vector<3x512xf32> -> vector<3x512xf32>
    %48 = arith.addf %43, %47 : vector<3x512xf32>
    %c0_53 = arith.constant 0 : index
    %c0_54 = arith.constant 0 : index
    %49 = vector.load %arg3[%c0_53, %c0_54] : memref<1x512xf32, #tpu.memory_space<vmem>>, vector<1x512xf32>
    %50 = vector.broadcast %49 : vector<1x512xf32> to vector<3x512xf32>
    %51 = arith.addf %48, %50 : vector<3x512xf32>
    %cst_55 = arith.constant 0.000000e+00 : f32
    %52 = vector.broadcast %cst_55 : f32 to vector<3x512xf32>
    %53 = arith.maximumf %51, %52 : vector<3x512xf32>
    %54 = vector.extract_strided_slice %53 {offsets = [0, 0], sizes = [1, 512], strides = [1, 1]} : vector<3x512xf32> to vector<1x512xf32>
    %55 = arith.truncf %54 : vector<1x512xf32> to vector<1x512xbf16>
    %c0_56 = arith.constant 0 : index
    %c0_57 = arith.constant 0 : index
    %c0_58 = arith.constant 0 : index
    %c0_59 = arith.constant 0 : index
    %56 = vector.load %arg4[%c0_56, %c0_57, %c0_58, %c0_59] : memref<1x1x1x512xbf16, #tpu.memory_space<vmem>>, vector<1x1x1x512xbf16>
    %57 = vector.shape_cast %56 : vector<1x1x1x512xbf16> to vector<1x512xbf16>
    %58 = vector.shape_cast %55 : vector<1x512xbf16> to vector<1x1x1x512xbf16>
    tpu.vector_store %arg4[%c0_56, %c0_57, %c0_58, %c0_59], %58 {strides = array<i32>} : memref<1x1x1x512xbf16, #tpu.memory_space<vmem>>, vector<1x1x1x512xbf16>,
    return
  }
  func.func @transform_0(%arg0: i32) -> (i32, i32, i32, i32) {
    %c0_i32 = arith.constant 0 : i32
    %c0_i32_0 = arith.constant 0 : i32
    %c0_i32_1 = arith.constant 0 : i32
    %c0_i32_2 = arith.constant 0 : i32
    return %arg0, %c0_i32, %c0_i32_0, %c0_i32_1 : i32, i32, i32, i32
  }
  func.func @transform_1(%arg0: i32) -> (i32, i32, i32) {
    %c0_i32 = arith.constant 0 : i32
    %c0_i32_0 = arith.constant 0 : i32
    %c0_i32_1 = arith.constant 0 : i32
    %c0_i32_2 = arith.constant 0 : i32
    return %c0_i32, %c0_i32_0, %c0_i32_1 : i32, i32, i32
  }
  func.func @transform_2(%arg0: i32) -> (i32, i32) {
    %c0_i32 = arith.constant 0 : i32
    %c0_i32_0 = arith.constant 0 : i32
    %c0_i32_1 = arith.constant 0 : i32
    return %c0_i32, %c0_i32_0 : i32, i32
  }
  func.func @transform_3(%arg0: i32) -> (i32, i32, i32, i32) {
    %c0_i32 = arith.constant 0 : i32
    %c0_i32_0 = arith.constant 0 : i32
    %c0_i32_1 = arith.constant 0 : i32
    %c0_i32_2 = arith.constant 0 : i32
    return %arg0, %c0_i32, %c0_i32_0, %c0_i32_1 : i32, i32, i32, i32
  }
}

module attributes {stable_mosaic.version = 11 : i64} {
  func.func @_conv3x3_relu_pool_kernel(%arg0: i32, %arg1: memref<1x8x8x3xbf16, #tpu.memory_space<vmem>>, %arg2: memref<9x3x64xbf16, #tpu.memory_space<vmem>>, %arg3: memref<1x64xf32, #tpu.memory_space<vmem>>, %arg4: memref<1x4x4x64xbf16, #tpu.memory_space<vmem>>, %arg5: memref<110x3xbf16, #tpu.memory_space<vmem>>) attributes {dimension_semantics = [#tpu.dimension_semantics<parallel>], iteration_bounds = array<i64: 2>, scalar_prefetch = 0 : i64, scratch_operands = 1 : i64, tpu.core_type = #tpu.core_type<tc>, window_params = [{transform_indices = @transform_0, window_bounds = array<i64: 1, 8, 8, 3>}, {pipeline_mode = #tpu.pipeline_mode<synchronous>, transform_indices = @transform_1, window_bounds = array<i64: 9, 3, 64>}, {pipeline_mode = #tpu.pipeline_mode<synchronous>, transform_indices = @transform_2, window_bounds = array<i64: 1, 64>}, {transform_indices = @transform_3, window_bounds = array<i64: 1, 4, 4, 64>}]} {
    %cst = arith.constant 0.000000e+00 : bf16
    %0 = vector.broadcast %cst : bf16 to vector<110x3xbf16>
    %c0 = arith.constant 0 : index
    %c0_0 = arith.constant 0 : index
    %1 = vector.load %arg5[%c0, %c0_0] : memref<110x3xbf16, #tpu.memory_space<vmem>>, vector<110x3xbf16>
    tpu.vector_store %arg5[%c0, %c0_0], %0 {strides = array<i32>} : memref<110x3xbf16, #tpu.memory_space<vmem>>, vector<110x3xbf16>,
    %c0_1 = arith.constant 0 : index
    %c0_2 = arith.constant 0 : index
    %c0_3 = arith.constant 0 : index
    %c0_4 = arith.constant 0 : index
    %2 = vector.load %arg1[%c0_1, %c0_2, %c0_3, %c0_4] : memref<1x8x8x3xbf16, #tpu.memory_space<vmem>>, vector<1x1x8x3xbf16>
    %3 = vector.shape_cast %2 : vector<1x1x8x3xbf16> to vector<8x3xbf16>
    %c11 = arith.constant 11 : index
    %c0_5 = arith.constant 0 : index
    %4 = vector.load %arg5[%c11, %c0_5] : memref<110x3xbf16, #tpu.memory_space<vmem>>, vector<8x3xbf16>
    tpu.vector_store %arg5[%c11, %c0_5], %3 {strides = array<i32>} : memref<110x3xbf16, #tpu.memory_space<vmem>>, vector<8x3xbf16>,
    %c0_6 = arith.constant 0 : index
    %c1 = arith.constant 1 : index
    %c0_7 = arith.constant 0 : index
    %c0_8 = arith.constant 0 : index
    %5 = vector.load %arg1[%c0_6, %c1, %c0_7, %c0_8] : memref<1x8x8x3xbf16, #tpu.memory_space<vmem>>, vector<1x1x8x3xbf16>
    %6 = vector.shape_cast %5 : vector<1x1x8x3xbf16> to vector<8x3xbf16>
    %c21 = arith.constant 21 : index
    %c0_9 = arith.constant 0 : index
    %7 = vector.load %arg5[%c21, %c0_9] : memref<110x3xbf16, #tpu.memory_space<vmem>>, vector<8x3xbf16>
    tpu.vector_store %arg5[%c21, %c0_9], %6 {strides = array<i32>} : memref<110x3xbf16, #tpu.memory_space<vmem>>, vector<8x3xbf16>,
    %c0_10 = arith.constant 0 : index
    %c2 = arith.constant 2 : index
    %c0_11 = arith.constant 0 : index
    %c0_12 = arith.constant 0 : index
    %8 = vector.load %arg1[%c0_10, %c2, %c0_11, %c0_12] : memref<1x8x8x3xbf16, #tpu.memory_space<vmem>>, vector<1x1x8x3xbf16>
    %9 = vector.shape_cast %8 : vector<1x1x8x3xbf16> to vector<8x3xbf16>
    %c31 = arith.constant 31 : index
    %c0_13 = arith.constant 0 : index
    %10 = vector.load %arg5[%c31, %c0_13] : memref<110x3xbf16, #tpu.memory_space<vmem>>, vector<8x3xbf16>
    tpu.vector_store %arg5[%c31, %c0_13], %9 {strides = array<i32>} : memref<110x3xbf16, #tpu.memory_space<vmem>>, vector<8x3xbf16>,
    %c0_14 = arith.constant 0 : index
    %c3 = arith.constant 3 : index
    %c0_15 = arith.constant 0 : index
    %c0_16 = arith.constant 0 : index
    %11 = vector.load %arg1[%c0_14, %c3, %c0_15, %c0_16] : memref<1x8x8x3xbf16, #tpu.memory_space<vmem>>, vector<1x1x8x3xbf16>
    %12 = vector.shape_cast %11 : vector<1x1x8x3xbf16> to vector<8x3xbf16>
    %c41 = arith.constant 41 : index
    %c0_17 = arith.constant 0 : index
    %13 = vector.load %arg5[%c41, %c0_17] : memref<110x3xbf16, #tpu.memory_space<vmem>>, vector<8x3xbf16>
    tpu.vector_store %arg5[%c41, %c0_17], %12 {strides = array<i32>} : memref<110x3xbf16, #tpu.memory_space<vmem>>, vector<8x3xbf16>,
    %c0_18 = arith.constant 0 : index
    %c4 = arith.constant 4 : index
    %c0_19 = arith.constant 0 : index
    %c0_20 = arith.constant 0 : index
    %14 = vector.load %arg1[%c0_18, %c4, %c0_19, %c0_20] : memref<1x8x8x3xbf16, #tpu.memory_space<vmem>>, vector<1x1x8x3xbf16>
    %15 = vector.shape_cast %14 : vector<1x1x8x3xbf16> to vector<8x3xbf16>
    %c51 = arith.constant 51 : index
    %c0_21 = arith.constant 0 : index
    %16 = vector.load %arg5[%c51, %c0_21] : memref<110x3xbf16, #tpu.memory_space<vmem>>, vector<8x3xbf16>
    tpu.vector_store %arg5[%c51, %c0_21], %15 {strides = array<i32>} : memref<110x3xbf16, #tpu.memory_space<vmem>>, vector<8x3xbf16>,
    %c0_22 = arith.constant 0 : index
    %c5 = arith.constant 5 : index
    %c0_23 = arith.constant 0 : index
    %c0_24 = arith.constant 0 : index
    %17 = vector.load %arg1[%c0_22, %c5, %c0_23, %c0_24] : memref<1x8x8x3xbf16, #tpu.memory_space<vmem>>, vector<1x1x8x3xbf16>
    %18 = vector.shape_cast %17 : vector<1x1x8x3xbf16> to vector<8x3xbf16>
    %c61 = arith.constant 61 : index
    %c0_25 = arith.constant 0 : index
    %19 = vector.load %arg5[%c61, %c0_25] : memref<110x3xbf16, #tpu.memory_space<vmem>>, vector<8x3xbf16>
    tpu.vector_store %arg5[%c61, %c0_25], %18 {strides = array<i32>} : memref<110x3xbf16, #tpu.memory_space<vmem>>, vector<8x3xbf16>,
    %c0_26 = arith.constant 0 : index
    %c6 = arith.constant 6 : index
    %c0_27 = arith.constant 0 : index
    %c0_28 = arith.constant 0 : index
    %20 = vector.load %arg1[%c0_26, %c6, %c0_27, %c0_28] : memref<1x8x8x3xbf16, #tpu.memory_space<vmem>>, vector<1x1x8x3xbf16>
    %21 = vector.shape_cast %20 : vector<1x1x8x3xbf16> to vector<8x3xbf16>
    %c71 = arith.constant 71 : index
    %c0_29 = arith.constant 0 : index
    %22 = vector.load %arg5[%c71, %c0_29] : memref<110x3xbf16, #tpu.memory_space<vmem>>, vector<8x3xbf16>
    tpu.vector_store %arg5[%c71, %c0_29], %21 {strides = array<i32>} : memref<110x3xbf16, #tpu.memory_space<vmem>>, vector<8x3xbf16>,
    %c0_30 = arith.constant 0 : index
    %c7 = arith.constant 7 : index
    %c0_31 = arith.constant 0 : index
    %c0_32 = arith.constant 0 : index
    %23 = vector.load %arg1[%c0_30, %c7, %c0_31, %c0_32] : memref<1x8x8x3xbf16, #tpu.memory_space<vmem>>, vector<1x1x8x3xbf16>
    %24 = vector.shape_cast %23 : vector<1x1x8x3xbf16> to vector<8x3xbf16>
    %c81 = arith.constant 81 : index
    %c0_33 = arith.constant 0 : index
    %25 = vector.load %arg5[%c81, %c0_33] : memref<110x3xbf16, #tpu.memory_space<vmem>>, vector<8x3xbf16>
    tpu.vector_store %arg5[%c81, %c0_33], %24 {strides = array<i32>} : memref<110x3xbf16, #tpu.memory_space<vmem>>, vector<8x3xbf16>,
    %c0_34 = arith.constant 0 : index
    %c0_35 = arith.constant 0 : index
    %26 = vector.load %arg5[%c0_34, %c0_35] : memref<110x3xbf16, #tpu.memory_space<vmem>>, vector<80x3xbf16>
    %c0_36 = arith.constant 0 : index
    %c0_37 = arith.constant 0 : index
    %c0_38 = arith.constant 0 : index
    %27 = vector.load %arg2[%c0_36, %c0_37, %c0_38] : memref<9x3x64xbf16, #tpu.memory_space<vmem>>, vector<1x3x64xbf16>
    %28 = vector.shape_cast %27 : vector<1x3x64xbf16> to vector<3x64xbf16>
    %cst_39 = arith.constant dense<0.000000e+00> : vector<80x64xf32>
    %29 = tpu.matmul %26, %28, %cst_39 {dimension_numbers = #tpu.dot_dimension_numbers<[1], [0], [0], [1], [0, 0, 1, 1], [], []>} : vector<80x3xbf16>, vector<3x64xbf16>, vector<80x64xf32> -> vector<80x64xf32>
    %c1_40 = arith.constant 1 : index
    %c0_41 = arith.constant 0 : index
    %30 = vector.load %arg5[%c1_40, %c0_41] : memref<110x3xbf16, #tpu.memory_space<vmem>>, vector<80x3xbf16>
    %c1_42 = arith.constant 1 : index
    %c0_43 = arith.constant 0 : index
    %c0_44 = arith.constant 0 : index
    %31 = vector.load %arg2[%c1_42, %c0_43, %c0_44] : memref<9x3x64xbf16, #tpu.memory_space<vmem>>, vector<1x3x64xbf16>
    %32 = vector.shape_cast %31 : vector<1x3x64xbf16> to vector<3x64xbf16>
    %cst_45 = arith.constant dense<0.000000e+00> : vector<80x64xf32>
    %33 = tpu.matmul %30, %32, %cst_45 {dimension_numbers = #tpu.dot_dimension_numbers<[1], [0], [0], [1], [0, 0, 1, 1], [], []>} : vector<80x3xbf16>, vector<3x64xbf16>, vector<80x64xf32> -> vector<80x64xf32>
    %34 = arith.addf %29, %33 : vector<80x64xf32>
    %c2_46 = arith.constant 2 : index
    %c0_47 = arith.constant 0 : index
    %35 = vector.load %arg5[%c2_46, %c0_47] : memref<110x3xbf16, #tpu.memory_space<vmem>>, vector<80x3xbf16>
    %c2_48 = arith.constant 2 : index
    %c0_49 = arith.constant 0 : index
    %c0_50 = arith.constant 0 : index
    %36 = vector.load %arg2[%c2_48, %c0_49, %c0_50] : memref<9x3x64xbf16, #tpu.memory_space<vmem>>, vector<1x3x64xbf16>
    %37 = vector.shape_cast %36 : vector<1x3x64xbf16> to vector<3x64xbf16>
    %cst_51 = arith.constant dense<0.000000e+00> : vector<80x64xf32>
    %38 = tpu.matmul %35, %37, %cst_51 {dimension_numbers = #tpu.dot_dimension_numbers<[1], [0], [0], [1], [0, 0, 1, 1], [], []>} : vector<80x3xbf16>, vector<3x64xbf16>, vector<80x64xf32> -> vector<80x64xf32>
    %39 = arith.addf %34, %38 : vector<80x64xf32>
    %c10 = arith.constant 10 : index
    %c0_52 = arith.constant 0 : index
    %40 = vector.load %arg5[%c10, %c0_52] : memref<110x3xbf16, #tpu.memory_space<vmem>>, vector<80x3xbf16>
    %c3_53 = arith.constant 3 : index
    %c0_54 = arith.constant 0 : index
    %c0_55 = arith.constant 0 : index
    %41 = vector.load %arg2[%c3_53, %c0_54, %c0_55] : memref<9x3x64xbf16, #tpu.memory_space<vmem>>, vector<1x3x64xbf16>
    %42 = vector.shape_cast %41 : vector<1x3x64xbf16> to vector<3x64xbf16>
    %cst_56 = arith.constant dense<0.000000e+00> : vector<80x64xf32>
    %43 = tpu.matmul %40, %42, %cst_56 {dimension_numbers = #tpu.dot_dimension_numbers<[1], [0], [0], [1], [0, 0, 1, 1], [], []>} : vector<80x3xbf16>, vector<3x64xbf16>, vector<80x64xf32> -> vector<80x64xf32>
    %44 = arith.addf %39, %43 : vector<80x64xf32>
    %c11_57 = arith.constant 11 : index
    %c0_58 = arith.constant 0 : index
    %45 = vector.load %arg5[%c11_57, %c0_58] : memref<110x3xbf16, #tpu.memory_space<vmem>>, vector<80x3xbf16>
    %c4_59 = arith.constant 4 : index
    %c0_60 = arith.constant 0 : index
    %c0_61 = arith.constant 0 : index
    %46 = vector.load %arg2[%c4_59, %c0_60, %c0_61] : memref<9x3x64xbf16, #tpu.memory_space<vmem>>, vector<1x3x64xbf16>
    %47 = vector.shape_cast %46 : vector<1x3x64xbf16> to vector<3x64xbf16>
    %cst_62 = arith.constant dense<0.000000e+00> : vector<80x64xf32>
    %48 = tpu.matmul %45, %47, %cst_62 {dimension_numbers = #tpu.dot_dimension_numbers<[1], [0], [0], [1], [0, 0, 1, 1], [], []>} : vector<80x3xbf16>, vector<3x64xbf16>, vector<80x64xf32> -> vector<80x64xf32>
    %49 = arith.addf %44, %48 : vector<80x64xf32>
    %c12 = arith.constant 12 : index
    %c0_63 = arith.constant 0 : index
    %50 = vector.load %arg5[%c12, %c0_63] : memref<110x3xbf16, #tpu.memory_space<vmem>>, vector<80x3xbf16>
    %c5_64 = arith.constant 5 : index
    %c0_65 = arith.constant 0 : index
    %c0_66 = arith.constant 0 : index
    %51 = vector.load %arg2[%c5_64, %c0_65, %c0_66] : memref<9x3x64xbf16, #tpu.memory_space<vmem>>, vector<1x3x64xbf16>
    %52 = vector.shape_cast %51 : vector<1x3x64xbf16> to vector<3x64xbf16>
    %cst_67 = arith.constant dense<0.000000e+00> : vector<80x64xf32>
    %53 = tpu.matmul %50, %52, %cst_67 {dimension_numbers = #tpu.dot_dimension_numbers<[1], [0], [0], [1], [0, 0, 1, 1], [], []>} : vector<80x3xbf16>, vector<3x64xbf16>, vector<80x64xf32> -> vector<80x64xf32>
    %54 = arith.addf %49, %53 : vector<80x64xf32>
    %c20 = arith.constant 20 : index
    %c0_68 = arith.constant 0 : index
    %55 = vector.load %arg5[%c20, %c0_68] : memref<110x3xbf16, #tpu.memory_space<vmem>>, vector<80x3xbf16>
    %c6_69 = arith.constant 6 : index
    %c0_70 = arith.constant 0 : index
    %c0_71 = arith.constant 0 : index
    %56 = vector.load %arg2[%c6_69, %c0_70, %c0_71] : memref<9x3x64xbf16, #tpu.memory_space<vmem>>, vector<1x3x64xbf16>
    %57 = vector.shape_cast %56 : vector<1x3x64xbf16> to vector<3x64xbf16>
    %cst_72 = arith.constant dense<0.000000e+00> : vector<80x64xf32>
    %58 = tpu.matmul %55, %57, %cst_72 {dimension_numbers = #tpu.dot_dimension_numbers<[1], [0], [0], [1], [0, 0, 1, 1], [], []>} : vector<80x3xbf16>, vector<3x64xbf16>, vector<80x64xf32> -> vector<80x64xf32>
    %59 = arith.addf %54, %58 : vector<80x64xf32>
    %c21_73 = arith.constant 21 : index
    %c0_74 = arith.constant 0 : index
    %60 = vector.load %arg5[%c21_73, %c0_74] : memref<110x3xbf16, #tpu.memory_space<vmem>>, vector<80x3xbf16>
    %c7_75 = arith.constant 7 : index
    %c0_76 = arith.constant 0 : index
    %c0_77 = arith.constant 0 : index
    %61 = vector.load %arg2[%c7_75, %c0_76, %c0_77] : memref<9x3x64xbf16, #tpu.memory_space<vmem>>, vector<1x3x64xbf16>
    %62 = vector.shape_cast %61 : vector<1x3x64xbf16> to vector<3x64xbf16>
    %cst_78 = arith.constant dense<0.000000e+00> : vector<80x64xf32>
    %63 = tpu.matmul %60, %62, %cst_78 {dimension_numbers = #tpu.dot_dimension_numbers<[1], [0], [0], [1], [0, 0, 1, 1], [], []>} : vector<80x3xbf16>, vector<3x64xbf16>, vector<80x64xf32> -> vector<80x64xf32>
    %64 = arith.addf %59, %63 : vector<80x64xf32>
    %c22 = arith.constant 22 : index
    %c0_79 = arith.constant 0 : index
    %65 = vector.load %arg5[%c22, %c0_79] : memref<110x3xbf16, #tpu.memory_space<vmem>>, vector<80x3xbf16>
    %c8 = arith.constant 8 : index
    %c0_80 = arith.constant 0 : index
    %c0_81 = arith.constant 0 : index
    %66 = vector.load %arg2[%c8, %c0_80, %c0_81] : memref<9x3x64xbf16, #tpu.memory_space<vmem>>, vector<1x3x64xbf16>
    %67 = vector.shape_cast %66 : vector<1x3x64xbf16> to vector<3x64xbf16>
    %cst_82 = arith.constant dense<0.000000e+00> : vector<80x64xf32>
    %68 = tpu.matmul %65, %67, %cst_82 {dimension_numbers = #tpu.dot_dimension_numbers<[1], [0], [0], [1], [0, 0, 1, 1], [], []>} : vector<80x3xbf16>, vector<3x64xbf16>, vector<80x64xf32> -> vector<80x64xf32>
    %69 = arith.addf %64, %68 : vector<80x64xf32>
    %c0_83 = arith.constant 0 : index
    %c0_84 = arith.constant 0 : index
    %70 = vector.load %arg3[%c0_83, %c0_84] : memref<1x64xf32, #tpu.memory_space<vmem>>, vector<1x64xf32>
    %71 = vector.broadcast %70 : vector<1x64xf32> to vector<80x64xf32>
    %72 = arith.addf %69, %71 : vector<80x64xf32>
    %cst_85 = arith.constant 0.000000e+00 : f32
    %73 = vector.broadcast %cst_85 : f32 to vector<80x64xf32>
    %74 = arith.maximumf %72, %73 : vector<80x64xf32>
    %75 = vector.extract_strided_slice %74 {offsets = [0, 0], sizes = [8, 64], strides = [1, 1]} : vector<80x64xf32> to vector<8x64xf32>
    %76 = vector.extract_strided_slice %74 {offsets = [10, 0], sizes = [8, 64], strides = [1, 1]} : vector<80x64xf32> to vector<8x64xf32>
    %77 = arith.maximumf %75, %76 : vector<8x64xf32>
    %78 = vector.extract_strided_slice %77 {offsets = [0, 0], sizes = [1, 64], strides = [1, 1]} : vector<8x64xf32> to vector<1x64xf32>
    %79 = vector.extract_strided_slice %77 {offsets = [1, 0], sizes = [1, 64], strides = [1, 1]} : vector<8x64xf32> to vector<1x64xf32>
    %80 = arith.maximumf %78, %79 : vector<1x64xf32>
    %81 = arith.truncf %80 : vector<1x64xf32> to vector<1x64xbf16>
    %c0_86 = arith.constant 0 : index
    %c0_87 = arith.constant 0 : index
    %c0_88 = arith.constant 0 : index
    %c0_89 = arith.constant 0 : index
    %82 = vector.load %arg4[%c0_86, %c0_87, %c0_88, %c0_89] : memref<1x4x4x64xbf16, #tpu.memory_space<vmem>>, vector<1x1x1x64xbf16>
    %83 = vector.shape_cast %82 : vector<1x1x1x64xbf16> to vector<1x64xbf16>
    %84 = vector.shape_cast %81 : vector<1x64xbf16> to vector<1x1x1x64xbf16>
    tpu.vector_store %arg4[%c0_86, %c0_87, %c0_88, %c0_89], %84 {strides = array<i32>} : memref<1x4x4x64xbf16, #tpu.memory_space<vmem>>, vector<1x1x1x64xbf16>,
    %85 = vector.extract_strided_slice %77 {offsets = [2, 0], sizes = [1, 64], strides = [1, 1]} : vector<8x64xf32> to vector<1x64xf32>
    %86 = vector.extract_strided_slice %77 {offsets = [3, 0], sizes = [1, 64], strides = [1, 1]} : vector<8x64xf32> to vector<1x64xf32>
    %87 = arith.maximumf %85, %86 : vector<1x64xf32>
    %88 = arith.truncf %87 : vector<1x64xf32> to vector<1x64xbf16>
    %c0_90 = arith.constant 0 : index
    %c0_91 = arith.constant 0 : index
    %c1_92 = arith.constant 1 : index
    %c0_93 = arith.constant 0 : index
    %89 = vector.load %arg4[%c0_90, %c0_91, %c1_92, %c0_93] : memref<1x4x4x64xbf16, #tpu.memory_space<vmem>>, vector<1x1x1x64xbf16>
    %90 = vector.shape_cast %89 : vector<1x1x1x64xbf16> to vector<1x64xbf16>
    %91 = vector.shape_cast %88 : vector<1x64xbf16> to vector<1x1x1x64xbf16>
    tpu.vector_store %arg4[%c0_90, %c0_91, %c1_92, %c0_93], %91 {strides = array<i32>} : memref<1x4x4x64xbf16, #tpu.memory_space<vmem>>, vector<1x1x1x64xbf16>,
    %92 = vector.extract_strided_slice %77 {offsets = [4, 0], sizes = [1, 64], strides = [1, 1]} : vector<8x64xf32> to vector<1x64xf32>
    %93 = vector.extract_strided_slice %77 {offsets = [5, 0], sizes = [1, 64], strides = [1, 1]} : vector<8x64xf32> to vector<1x64xf32>
    %94 = arith.maximumf %92, %93 : vector<1x64xf32>
    %95 = arith.truncf %94 : vector<1x64xf32> to vector<1x64xbf16>
    %c0_94 = arith.constant 0 : index
    %c0_95 = arith.constant 0 : index
    %c2_96 = arith.constant 2 : index
    %c0_97 = arith.constant 0 : index
    %96 = vector.load %arg4[%c0_94, %c0_95, %c2_96, %c0_97] : memref<1x4x4x64xbf16, #tpu.memory_space<vmem>>, vector<1x1x1x64xbf16>
    %97 = vector.shape_cast %96 : vector<1x1x1x64xbf16> to vector<1x64xbf16>
    %98 = vector.shape_cast %95 : vector<1x64xbf16> to vector<1x1x1x64xbf16>
    tpu.vector_store %arg4[%c0_94, %c0_95, %c2_96, %c0_97], %98 {strides = array<i32>} : memref<1x4x4x64xbf16, #tpu.memory_space<vmem>>, vector<1x1x1x64xbf16>,
    %99 = vector.extract_strided_slice %77 {offsets = [6, 0], sizes = [1, 64], strides = [1, 1]} : vector<8x64xf32> to vector<1x64xf32>
    %100 = vector.extract_strided_slice %77 {offsets = [7, 0], sizes = [1, 64], strides = [1, 1]} : vector<8x64xf32> to vector<1x64xf32>
    %101 = arith.maximumf %99, %100 : vector<1x64xf32>
    %102 = arith.truncf %101 : vector<1x64xf32> to vector<1x64xbf16>
    %c0_98 = arith.constant 0 : index
    %c0_99 = arith.constant 0 : index
    %c3_100 = arith.constant 3 : index
    %c0_101 = arith.constant 0 : index
    %103 = vector.load %arg4[%c0_98, %c0_99, %c3_100, %c0_101] : memref<1x4x4x64xbf16, #tpu.memory_space<vmem>>, vector<1x1x1x64xbf16>
    %104 = vector.shape_cast %103 : vector<1x1x1x64xbf16> to vector<1x64xbf16>
    %105 = vector.shape_cast %102 : vector<1x64xbf16> to vector<1x1x1x64xbf16>
    tpu.vector_store %arg4[%c0_98, %c0_99, %c3_100, %c0_101], %105 {strides = array<i32>} : memref<1x4x4x64xbf16, #tpu.memory_space<vmem>>, vector<1x1x1x64xbf16>,
    %106 = vector.extract_strided_slice %74 {offsets = [20, 0], sizes = [8, 64], strides = [1, 1]} : vector<80x64xf32> to vector<8x64xf32>
    %107 = vector.extract_strided_slice %74 {offsets = [30, 0], sizes = [8, 64], strides = [1, 1]} : vector<80x64xf32> to vector<8x64xf32>
    %108 = arith.maximumf %106, %107 : vector<8x64xf32>
    %109 = vector.extract_strided_slice %108 {offsets = [0, 0], sizes = [1, 64], strides = [1, 1]} : vector<8x64xf32> to vector<1x64xf32>
    %110 = vector.extract_strided_slice %108 {offsets = [1, 0], sizes = [1, 64], strides = [1, 1]} : vector<8x64xf32> to vector<1x64xf32>
    %111 = arith.maximumf %109, %110 : vector<1x64xf32>
    %112 = arith.truncf %111 : vector<1x64xf32> to vector<1x64xbf16>
    %c0_102 = arith.constant 0 : index
    %c1_103 = arith.constant 1 : index
    %c0_104 = arith.constant 0 : index
    %c0_105 = arith.constant 0 : index
    %113 = vector.load %arg4[%c0_102, %c1_103, %c0_104, %c0_105] : memref<1x4x4x64xbf16, #tpu.memory_space<vmem>>, vector<1x1x1x64xbf16>
    %114 = vector.shape_cast %113 : vector<1x1x1x64xbf16> to vector<1x64xbf16>
    %115 = vector.shape_cast %112 : vector<1x64xbf16> to vector<1x1x1x64xbf16>
    tpu.vector_store %arg4[%c0_102, %c1_103, %c0_104, %c0_105], %115 {strides = array<i32>} : memref<1x4x4x64xbf16, #tpu.memory_space<vmem>>, vector<1x1x1x64xbf16>,
    %116 = vector.extract_strided_slice %108 {offsets = [2, 0], sizes = [1, 64], strides = [1, 1]} : vector<8x64xf32> to vector<1x64xf32>
    %117 = vector.extract_strided_slice %108 {offsets = [3, 0], sizes = [1, 64], strides = [1, 1]} : vector<8x64xf32> to vector<1x64xf32>
    %118 = arith.maximumf %116, %117 : vector<1x64xf32>
    %119 = arith.truncf %118 : vector<1x64xf32> to vector<1x64xbf16>
    %c0_106 = arith.constant 0 : index
    %c1_107 = arith.constant 1 : index
    %c1_108 = arith.constant 1 : index
    %c0_109 = arith.constant 0 : index
    %120 = vector.load %arg4[%c0_106, %c1_107, %c1_108, %c0_109] : memref<1x4x4x64xbf16, #tpu.memory_space<vmem>>, vector<1x1x1x64xbf16>
    %121 = vector.shape_cast %120 : vector<1x1x1x64xbf16> to vector<1x64xbf16>
    %122 = vector.shape_cast %119 : vector<1x64xbf16> to vector<1x1x1x64xbf16>
    tpu.vector_store %arg4[%c0_106, %c1_107, %c1_108, %c0_109], %122 {strides = array<i32>} : memref<1x4x4x64xbf16, #tpu.memory_space<vmem>>, vector<1x1x1x64xbf16>,
    %123 = vector.extract_strided_slice %108 {offsets = [4, 0], sizes = [1, 64], strides = [1, 1]} : vector<8x64xf32> to vector<1x64xf32>
    %124 = vector.extract_strided_slice %108 {offsets = [5, 0], sizes = [1, 64], strides = [1, 1]} : vector<8x64xf32> to vector<1x64xf32>
    %125 = arith.maximumf %123, %124 : vector<1x64xf32>
    %126 = arith.truncf %125 : vector<1x64xf32> to vector<1x64xbf16>
    %c0_110 = arith.constant 0 : index
    %c1_111 = arith.constant 1 : index
    %c2_112 = arith.constant 2 : index
    %c0_113 = arith.constant 0 : index
    %127 = vector.load %arg4[%c0_110, %c1_111, %c2_112, %c0_113] : memref<1x4x4x64xbf16, #tpu.memory_space<vmem>>, vector<1x1x1x64xbf16>
    %128 = vector.shape_cast %127 : vector<1x1x1x64xbf16> to vector<1x64xbf16>
    %129 = vector.shape_cast %126 : vector<1x64xbf16> to vector<1x1x1x64xbf16>
    tpu.vector_store %arg4[%c0_110, %c1_111, %c2_112, %c0_113], %129 {strides = array<i32>} : memref<1x4x4x64xbf16, #tpu.memory_space<vmem>>, vector<1x1x1x64xbf16>,
    %130 = vector.extract_strided_slice %108 {offsets = [6, 0], sizes = [1, 64], strides = [1, 1]} : vector<8x64xf32> to vector<1x64xf32>
    %131 = vector.extract_strided_slice %108 {offsets = [7, 0], sizes = [1, 64], strides = [1, 1]} : vector<8x64xf32> to vector<1x64xf32>
    %132 = arith.maximumf %130, %131 : vector<1x64xf32>
    %133 = arith.truncf %132 : vector<1x64xf32> to vector<1x64xbf16>
    %c0_114 = arith.constant 0 : index
    %c1_115 = arith.constant 1 : index
    %c3_116 = arith.constant 3 : index
    %c0_117 = arith.constant 0 : index
    %134 = vector.load %arg4[%c0_114, %c1_115, %c3_116, %c0_117] : memref<1x4x4x64xbf16, #tpu.memory_space<vmem>>, vector<1x1x1x64xbf16>
    %135 = vector.shape_cast %134 : vector<1x1x1x64xbf16> to vector<1x64xbf16>
    %136 = vector.shape_cast %133 : vector<1x64xbf16> to vector<1x1x1x64xbf16>
    tpu.vector_store %arg4[%c0_114, %c1_115, %c3_116, %c0_117], %136 {strides = array<i32>} : memref<1x4x4x64xbf16, #tpu.memory_space<vmem>>, vector<1x1x1x64xbf16>,
    %137 = vector.extract_strided_slice %74 {offsets = [40, 0], sizes = [8, 64], strides = [1, 1]} : vector<80x64xf32> to vector<8x64xf32>
    %138 = vector.extract_strided_slice %74 {offsets = [50, 0], sizes = [8, 64], strides = [1, 1]} : vector<80x64xf32> to vector<8x64xf32>
    %139 = arith.maximumf %137, %138 : vector<8x64xf32>
    %140 = vector.extract_strided_slice %139 {offsets = [0, 0], sizes = [1, 64], strides = [1, 1]} : vector<8x64xf32> to vector<1x64xf32>
    %141 = vector.extract_strided_slice %139 {offsets = [1, 0], sizes = [1, 64], strides = [1, 1]} : vector<8x64xf32> to vector<1x64xf32>
    %142 = arith.maximumf %140, %141 : vector<1x64xf32>
    %143 = arith.truncf %142 : vector<1x64xf32> to vector<1x64xbf16>
    %c0_118 = arith.constant 0 : index
    %c2_119 = arith.constant 2 : index
    %c0_120 = arith.constant 0 : index
    %c0_121 = arith.constant 0 : index
    %144 = vector.load %arg4[%c0_118, %c2_119, %c0_120, %c0_121] : memref<1x4x4x64xbf16, #tpu.memory_space<vmem>>, vector<1x1x1x64xbf16>
    %145 = vector.shape_cast %144 : vector<1x1x1x64xbf16> to vector<1x64xbf16>
    %146 = vector.shape_cast %143 : vector<1x64xbf16> to vector<1x1x1x64xbf16>
    tpu.vector_store %arg4[%c0_118, %c2_119, %c0_120, %c0_121], %146 {strides = array<i32>} : memref<1x4x4x64xbf16, #tpu.memory_space<vmem>>, vector<1x1x1x64xbf16>,
    %147 = vector.extract_strided_slice %139 {offsets = [2, 0], sizes = [1, 64], strides = [1, 1]} : vector<8x64xf32> to vector<1x64xf32>
    %148 = vector.extract_strided_slice %139 {offsets = [3, 0], sizes = [1, 64], strides = [1, 1]} : vector<8x64xf32> to vector<1x64xf32>
    %149 = arith.maximumf %147, %148 : vector<1x64xf32>
    %150 = arith.truncf %149 : vector<1x64xf32> to vector<1x64xbf16>
    %c0_122 = arith.constant 0 : index
    %c2_123 = arith.constant 2 : index
    %c1_124 = arith.constant 1 : index
    %c0_125 = arith.constant 0 : index
    %151 = vector.load %arg4[%c0_122, %c2_123, %c1_124, %c0_125] : memref<1x4x4x64xbf16, #tpu.memory_space<vmem>>, vector<1x1x1x64xbf16>
    %152 = vector.shape_cast %151 : vector<1x1x1x64xbf16> to vector<1x64xbf16>
    %153 = vector.shape_cast %150 : vector<1x64xbf16> to vector<1x1x1x64xbf16>
    tpu.vector_store %arg4[%c0_122, %c2_123, %c1_124, %c0_125], %153 {strides = array<i32>} : memref<1x4x4x64xbf16, #tpu.memory_space<vmem>>, vector<1x1x1x64xbf16>,
    %154 = vector.extract_strided_slice %139 {offsets = [4, 0], sizes = [1, 64], strides = [1, 1]} : vector<8x64xf32> to vector<1x64xf32>
    %155 = vector.extract_strided_slice %139 {offsets = [5, 0], sizes = [1, 64], strides = [1, 1]} : vector<8x64xf32> to vector<1x64xf32>
    %156 = arith.maximumf %154, %155 : vector<1x64xf32>
    %157 = arith.truncf %156 : vector<1x64xf32> to vector<1x64xbf16>
    %c0_126 = arith.constant 0 : index
    %c2_127 = arith.constant 2 : index
    %c2_128 = arith.constant 2 : index
    %c0_129 = arith.constant 0 : index
    %158 = vector.load %arg4[%c0_126, %c2_127, %c2_128, %c0_129] : memref<1x4x4x64xbf16, #tpu.memory_space<vmem>>, vector<1x1x1x64xbf16>
    %159 = vector.shape_cast %158 : vector<1x1x1x64xbf16> to vector<1x64xbf16>
    %160 = vector.shape_cast %157 : vector<1x64xbf16> to vector<1x1x1x64xbf16>
    tpu.vector_store %arg4[%c0_126, %c2_127, %c2_128, %c0_129], %160 {strides = array<i32>} : memref<1x4x4x64xbf16, #tpu.memory_space<vmem>>, vector<1x1x1x64xbf16>,
    %161 = vector.extract_strided_slice %139 {offsets = [6, 0], sizes = [1, 64], strides = [1, 1]} : vector<8x64xf32> to vector<1x64xf32>
    %162 = vector.extract_strided_slice %139 {offsets = [7, 0], sizes = [1, 64], strides = [1, 1]} : vector<8x64xf32> to vector<1x64xf32>
    %163 = arith.maximumf %161, %162 : vector<1x64xf32>
    %164 = arith.truncf %163 : vector<1x64xf32> to vector<1x64xbf16>
    %c0_130 = arith.constant 0 : index
    %c2_131 = arith.constant 2 : index
    %c3_132 = arith.constant 3 : index
    %c0_133 = arith.constant 0 : index
    %165 = vector.load %arg4[%c0_130, %c2_131, %c3_132, %c0_133] : memref<1x4x4x64xbf16, #tpu.memory_space<vmem>>, vector<1x1x1x64xbf16>
    %166 = vector.shape_cast %165 : vector<1x1x1x64xbf16> to vector<1x64xbf16>
    %167 = vector.shape_cast %164 : vector<1x64xbf16> to vector<1x1x1x64xbf16>
    tpu.vector_store %arg4[%c0_130, %c2_131, %c3_132, %c0_133], %167 {strides = array<i32>} : memref<1x4x4x64xbf16, #tpu.memory_space<vmem>>, vector<1x1x1x64xbf16>,
    %168 = vector.extract_strided_slice %74 {offsets = [60, 0], sizes = [8, 64], strides = [1, 1]} : vector<80x64xf32> to vector<8x64xf32>
    %169 = vector.extract_strided_slice %74 {offsets = [70, 0], sizes = [8, 64], strides = [1, 1]} : vector<80x64xf32> to vector<8x64xf32>
    %170 = arith.maximumf %168, %169 : vector<8x64xf32>
    %171 = vector.extract_strided_slice %170 {offsets = [0, 0], sizes = [1, 64], strides = [1, 1]} : vector<8x64xf32> to vector<1x64xf32>
    %172 = vector.extract_strided_slice %170 {offsets = [1, 0], sizes = [1, 64], strides = [1, 1]} : vector<8x64xf32> to vector<1x64xf32>
    %173 = arith.maximumf %171, %172 : vector<1x64xf32>
    %174 = arith.truncf %173 : vector<1x64xf32> to vector<1x64xbf16>
    %c0_134 = arith.constant 0 : index
    %c3_135 = arith.constant 3 : index
    %c0_136 = arith.constant 0 : index
    %c0_137 = arith.constant 0 : index
    %175 = vector.load %arg4[%c0_134, %c3_135, %c0_136, %c0_137] : memref<1x4x4x64xbf16, #tpu.memory_space<vmem>>, vector<1x1x1x64xbf16>
    %176 = vector.shape_cast %175 : vector<1x1x1x64xbf16> to vector<1x64xbf16>
    %177 = vector.shape_cast %174 : vector<1x64xbf16> to vector<1x1x1x64xbf16>
    tpu.vector_store %arg4[%c0_134, %c3_135, %c0_136, %c0_137], %177 {strides = array<i32>} : memref<1x4x4x64xbf16, #tpu.memory_space<vmem>>, vector<1x1x1x64xbf16>,
    %178 = vector.extract_strided_slice %170 {offsets = [2, 0], sizes = [1, 64], strides = [1, 1]} : vector<8x64xf32> to vector<1x64xf32>
    %179 = vector.extract_strided_slice %170 {offsets = [3, 0], sizes = [1, 64], strides = [1, 1]} : vector<8x64xf32> to vector<1x64xf32>
    %180 = arith.maximumf %178, %179 : vector<1x64xf32>
    %181 = arith.truncf %180 : vector<1x64xf32> to vector<1x64xbf16>
    %c0_138 = arith.constant 0 : index
    %c3_139 = arith.constant 3 : index
    %c1_140 = arith.constant 1 : index
    %c0_141 = arith.constant 0 : index
    %182 = vector.load %arg4[%c0_138, %c3_139, %c1_140, %c0_141] : memref<1x4x4x64xbf16, #tpu.memory_space<vmem>>, vector<1x1x1x64xbf16>
    %183 = vector.shape_cast %182 : vector<1x1x1x64xbf16> to vector<1x64xbf16>
    %184 = vector.shape_cast %181 : vector<1x64xbf16> to vector<1x1x1x64xbf16>
    tpu.vector_store %arg4[%c0_138, %c3_139, %c1_140, %c0_141], %184 {strides = array<i32>} : memref<1x4x4x64xbf16, #tpu.memory_space<vmem>>, vector<1x1x1x64xbf16>,
    %185 = vector.extract_strided_slice %170 {offsets = [4, 0], sizes = [1, 64], strides = [1, 1]} : vector<8x64xf32> to vector<1x64xf32>
    %186 = vector.extract_strided_slice %170 {offsets = [5, 0], sizes = [1, 64], strides = [1, 1]} : vector<8x64xf32> to vector<1x64xf32>
    %187 = arith.maximumf %185, %186 : vector<1x64xf32>
    %188 = arith.truncf %187 : vector<1x64xf32> to vector<1x64xbf16>
    %c0_142 = arith.constant 0 : index
    %c3_143 = arith.constant 3 : index
    %c2_144 = arith.constant 2 : index
    %c0_145 = arith.constant 0 : index
    %189 = vector.load %arg4[%c0_142, %c3_143, %c2_144, %c0_145] : memref<1x4x4x64xbf16, #tpu.memory_space<vmem>>, vector<1x1x1x64xbf16>
    %190 = vector.shape_cast %189 : vector<1x1x1x64xbf16> to vector<1x64xbf16>
    %191 = vector.shape_cast %188 : vector<1x64xbf16> to vector<1x1x1x64xbf16>
    tpu.vector_store %arg4[%c0_142, %c3_143, %c2_144, %c0_145], %191 {strides = array<i32>} : memref<1x4x4x64xbf16, #tpu.memory_space<vmem>>, vector<1x1x1x64xbf16>,
    %192 = vector.extract_strided_slice %170 {offsets = [6, 0], sizes = [1, 64], strides = [1, 1]} : vector<8x64xf32> to vector<1x64xf32>
    %193 = vector.extract_strided_slice %170 {offsets = [7, 0], sizes = [1, 64], strides = [1, 1]} : vector<8x64xf32> to vector<1x64xf32>
    %194 = arith.maximumf %192, %193 : vector<1x64xf32>
    %195 = arith.truncf %194 : vector<1x64xf32> to vector<1x64xbf16>
    %c0_146 = arith.constant 0 : index
    %c3_147 = arith.constant 3 : index
    %c3_148 = arith.constant 3 : index
    %c0_149 = arith.constant 0 : index
    %196 = vector.load %arg4[%c0_146, %c3_147, %c3_148, %c0_149] : memref<1x4x4x64xbf16, #tpu.memory_space<vmem>>, vector<1x1x1x64xbf16>
    %197 = vector.shape_cast %196 : vector<1x1x1x64xbf16> to vector<1x64xbf16>
    %198 = vector.shape_cast %195 : vector<1x64xbf16> to vector<1x1x1x64xbf16>
    tpu.vector_store %arg4[%c0_146, %c3_147, %c3_148, %c0_149], %198 {strides = array<i32>} : memref<1x4x4x64xbf16, #tpu.memory_space<vmem>>, vector<1x1x1x64xbf16>,
    return
  }
  func.func @transform_0(%arg0: i32) -> (i32, i32, i32, i32) {
    %c0_i32 = arith.constant 0 : i32
    %c0_i32_0 = arith.constant 0 : i32
    %c0_i32_1 = arith.constant 0 : i32
    %c0_i32_2 = arith.constant 0 : i32
    return %arg0, %c0_i32, %c0_i32_0, %c0_i32_1 : i32, i32, i32, i32
  }
  func.func @transform_1(%arg0: i32) -> (i32, i32, i32) {
    %c0_i32 = arith.constant 0 : i32
    %c0_i32_0 = arith.constant 0 : i32
    %c0_i32_1 = arith.constant 0 : i32
    %c0_i32_2 = arith.constant 0 : i32
    return %c0_i32, %c0_i32_0, %c0_i32_1 : i32, i32, i32
  }
  func.func @transform_2(%arg0: i32) -> (i32, i32) {
    %c0_i32 = arith.constant 0 : i32
    %c0_i32_0 = arith.constant 0 : i32
    %c0_i32_1 = arith.constant 0 : i32
    return %c0_i32, %c0_i32_0 : i32, i32
  }
  func.func @transform_3(%arg0: i32) -> (i32, i32, i32, i32) {
    %c0_i32 = arith.constant 0 : i32
    %c0_i32_0 = arith.constant 0 : i32
    %c0_i32_1 = arith.constant 0 : i32
    %c0_i32_2 = arith.constant 0 : i32
    return %arg0, %c0_i32, %c0_i32_0, %c0_i32_1 : i32, i32, i32, i32
  }
}

module attributes {stable_mosaic.version = 11 : i64} {
  func.func @_conv3x3_relu_pool_kernel(%arg0: i32, %arg1: memref<1x2x2x128xbf16, #tpu.memory_space<vmem>>, %arg2: memref<9x128x256xbf16, #tpu.memory_space<vmem>>, %arg3: memref<1x256xf32, #tpu.memory_space<vmem>>, %arg4: memref<1x1x1x256xbf16, #tpu.memory_space<vmem>>, %arg5: memref<20x128xbf16, #tpu.memory_space<vmem>>) attributes {dimension_semantics = [#tpu.dimension_semantics<parallel>], iteration_bounds = array<i64: 2>, scalar_prefetch = 0 : i64, scratch_operands = 1 : i64, tpu.core_type = #tpu.core_type<tc>, window_params = [{transform_indices = @transform_0, window_bounds = array<i64: 1, 2, 2, 128>}, {pipeline_mode = #tpu.pipeline_mode<synchronous>, transform_indices = @transform_1, window_bounds = array<i64: 9, 128, 256>}, {pipeline_mode = #tpu.pipeline_mode<synchronous>, transform_indices = @transform_2, window_bounds = array<i64: 1, 256>}, {transform_indices = @transform_3, window_bounds = array<i64: 1, 1, 1, 256>}]} {
    %cst = arith.constant 0.000000e+00 : bf16
    %0 = vector.broadcast %cst : bf16 to vector<20x128xbf16>
    %c0 = arith.constant 0 : index
    %c0_0 = arith.constant 0 : index
    %1 = vector.load %arg5[%c0, %c0_0] : memref<20x128xbf16, #tpu.memory_space<vmem>>, vector<20x128xbf16>
    tpu.vector_store %arg5[%c0, %c0_0], %0 {strides = array<i32>} : memref<20x128xbf16, #tpu.memory_space<vmem>>, vector<20x128xbf16>,
    %c0_1 = arith.constant 0 : index
    %c0_2 = arith.constant 0 : index
    %c0_3 = arith.constant 0 : index
    %c0_4 = arith.constant 0 : index
    %2 = vector.load %arg1[%c0_1, %c0_2, %c0_3, %c0_4] : memref<1x2x2x128xbf16, #tpu.memory_space<vmem>>, vector<1x1x2x128xbf16>
    %3 = vector.shape_cast %2 : vector<1x1x2x128xbf16> to vector<2x128xbf16>
    %c5 = arith.constant 5 : index
    %c0_5 = arith.constant 0 : index
    %4 = vector.load %arg5[%c5, %c0_5] : memref<20x128xbf16, #tpu.memory_space<vmem>>, vector<2x128xbf16>
    tpu.vector_store %arg5[%c5, %c0_5], %3 {strides = array<i32>} : memref<20x128xbf16, #tpu.memory_space<vmem>>, vector<2x128xbf16>,
    %c0_6 = arith.constant 0 : index
    %c1 = arith.constant 1 : index
    %c0_7 = arith.constant 0 : index
    %c0_8 = arith.constant 0 : index
    %5 = vector.load %arg1[%c0_6, %c1, %c0_7, %c0_8] : memref<1x2x2x128xbf16, #tpu.memory_space<vmem>>, vector<1x1x2x128xbf16>
    %6 = vector.shape_cast %5 : vector<1x1x2x128xbf16> to vector<2x128xbf16>
    %c9 = arith.constant 9 : index
    %c0_9 = arith.constant 0 : index
    %7 = vector.load %arg5[%c9, %c0_9] : memref<20x128xbf16, #tpu.memory_space<vmem>>, vector<2x128xbf16>
    tpu.vector_store %arg5[%c9, %c0_9], %6 {strides = array<i32>} : memref<20x128xbf16, #tpu.memory_space<vmem>>, vector<2x128xbf16>,
    %c0_10 = arith.constant 0 : index
    %c0_11 = arith.constant 0 : index
    %8 = vector.load %arg5[%c0_10, %c0_11] : memref<20x128xbf16, #tpu.memory_space<vmem>>, vector<8x128xbf16>
    %c0_12 = arith.constant 0 : index
    %c0_13 = arith.constant 0 : index
    %c0_14 = arith.constant 0 : index
    %9 = vector.load %arg2[%c0_12, %c0_13, %c0_14] : memref<9x128x256xbf16, #tpu.memory_space<vmem>>, vector<1x128x256xbf16>
    %10 = vector.shape_cast %9 : vector<1x128x256xbf16> to vector<128x256xbf16>
    %cst_15 = arith.constant dense<0.000000e+00> : vector<8x256xf32>
    %11 = tpu.matmul %8, %10, %cst_15 {dimension_numbers = #tpu.dot_dimension_numbers<[1], [0], [0], [1], [0, 0, 1, 1], [], []>} : vector<8x128xbf16>, vector<128x256xbf16>, vector<8x256xf32> -> vector<8x256xf32>
    %c1_16 = arith.constant 1 : index
    %c0_17 = arith.constant 0 : index
    %12 = vector.load %arg5[%c1_16, %c0_17] : memref<20x128xbf16, #tpu.memory_space<vmem>>, vector<8x128xbf16>
    %c1_18 = arith.constant 1 : index
    %c0_19 = arith.constant 0 : index
    %c0_20 = arith.constant 0 : index
    %13 = vector.load %arg2[%c1_18, %c0_19, %c0_20] : memref<9x128x256xbf16, #tpu.memory_space<vmem>>, vector<1x128x256xbf16>
    %14 = vector.shape_cast %13 : vector<1x128x256xbf16> to vector<128x256xbf16>
    %cst_21 = arith.constant dense<0.000000e+00> : vector<8x256xf32>
    %15 = tpu.matmul %12, %14, %cst_21 {dimension_numbers = #tpu.dot_dimension_numbers<[1], [0], [0], [1], [0, 0, 1, 1], [], []>} : vector<8x128xbf16>, vector<128x256xbf16>, vector<8x256xf32> -> vector<8x256xf32>
    %16 = arith.addf %11, %15 : vector<8x256xf32>
    %c2 = arith.constant 2 : index
    %c0_22 = arith.constant 0 : index
    %17 = vector.load %arg5[%c2, %c0_22] : memref<20x128xbf16, #tpu.memory_space<vmem>>, vector<8x128xbf16>
    %c2_23 = arith.constant 2 : index
    %c0_24 = arith.constant 0 : index
    %c0_25 = arith.constant 0 : index
    %18 = vector.load %arg2[%c2_23, %c0_24, %c0_25] : memref<9x128x256xbf16, #tpu.memory_space<vmem>>, vector<1x128x256xbf16>
    %19 = vector.shape_cast %18 : vector<1x128x256xbf16> to vector<128x256xbf16>
    %cst_26 = arith.constant dense<0.000000e+00> : vector<8x256xf32>
    %20 = tpu.matmul %17, %19, %cst_26 {dimension_numbers = #tpu.dot_dimension_numbers<[1], [0], [0], [1], [0, 0, 1, 1], [], []>} : vector<8x128xbf16>, vector<128x256xbf16>, vector<8x256xf32> -> vector<8x256xf32>
    %21 = arith.addf %16, %20 : vector<8x256xf32>
    %c4 = arith.constant 4 : index
    %c0_27 = arith.constant 0 : index
    %22 = vector.load %arg5[%c4, %c0_27] : memref<20x128xbf16, #tpu.memory_space<vmem>>, vector<8x128xbf16>
    %c3 = arith.constant 3 : index
    %c0_28 = arith.constant 0 : index
    %c0_29 = arith.constant 0 : index
    %23 = vector.load %arg2[%c3, %c0_28, %c0_29] : memref<9x128x256xbf16, #tpu.memory_space<vmem>>, vector<1x128x256xbf16>
    %24 = vector.shape_cast %23 : vector<1x128x256xbf16> to vector<128x256xbf16>
    %cst_30 = arith.constant dense<0.000000e+00> : vector<8x256xf32>
    %25 = tpu.matmul %22, %24, %cst_30 {dimension_numbers = #tpu.dot_dimension_numbers<[1], [0], [0], [1], [0, 0, 1, 1], [], []>} : vector<8x128xbf16>, vector<128x256xbf16>, vector<8x256xf32> -> vector<8x256xf32>
    %26 = arith.addf %21, %25 : vector<8x256xf32>
    %c5_31 = arith.constant 5 : index
    %c0_32 = arith.constant 0 : index
    %27 = vector.load %arg5[%c5_31, %c0_32] : memref<20x128xbf16, #tpu.memory_space<vmem>>, vector<8x128xbf16>
    %c4_33 = arith.constant 4 : index
    %c0_34 = arith.constant 0 : index
    %c0_35 = arith.constant 0 : index
    %28 = vector.load %arg2[%c4_33, %c0_34, %c0_35] : memref<9x128x256xbf16, #tpu.memory_space<vmem>>, vector<1x128x256xbf16>
    %29 = vector.shape_cast %28 : vector<1x128x256xbf16> to vector<128x256xbf16>
    %cst_36 = arith.constant dense<0.000000e+00> : vector<8x256xf32>
    %30 = tpu.matmul %27, %29, %cst_36 {dimension_numbers = #tpu.dot_dimension_numbers<[1], [0], [0], [1], [0, 0, 1, 1], [], []>} : vector<8x128xbf16>, vector<128x256xbf16>, vector<8x256xf32> -> vector<8x256xf32>
    %31 = arith.addf %26, %30 : vector<8x256xf32>
    %c6 = arith.constant 6 : index
    %c0_37 = arith.constant 0 : index
    %32 = vector.load %arg5[%c6, %c0_37] : memref<20x128xbf16, #tpu.memory_space<vmem>>, vector<8x128xbf16>
    %c5_38 = arith.constant 5 : index
    %c0_39 = arith.constant 0 : index
    %c0_40 = arith.constant 0 : index
    %33 = vector.load %arg2[%c5_38, %c0_39, %c0_40] : memref<9x128x256xbf16, #tpu.memory_space<vmem>>, vector<1x128x256xbf16>
    %34 = vector.shape_cast %33 : vector<1x128x256xbf16> to vector<128x256xbf16>
    %cst_41 = arith.constant dense<0.000000e+00> : vector<8x256xf32>
    %35 = tpu.matmul %32, %34, %cst_41 {dimension_numbers = #tpu.dot_dimension_numbers<[1], [0], [0], [1], [0, 0, 1, 1], [], []>} : vector<8x128xbf16>, vector<128x256xbf16>, vector<8x256xf32> -> vector<8x256xf32>
    %36 = arith.addf %31, %35 : vector<8x256xf32>
    %c8 = arith.constant 8 : index
    %c0_42 = arith.constant 0 : index
    %37 = vector.load %arg5[%c8, %c0_42] : memref<20x128xbf16, #tpu.memory_space<vmem>>, vector<8x128xbf16>
    %c6_43 = arith.constant 6 : index
    %c0_44 = arith.constant 0 : index
    %c0_45 = arith.constant 0 : index
    %38 = vector.load %arg2[%c6_43, %c0_44, %c0_45] : memref<9x128x256xbf16, #tpu.memory_space<vmem>>, vector<1x128x256xbf16>
    %39 = vector.shape_cast %38 : vector<1x128x256xbf16> to vector<128x256xbf16>
    %cst_46 = arith.constant dense<0.000000e+00> : vector<8x256xf32>
    %40 = tpu.matmul %37, %39, %cst_46 {dimension_numbers = #tpu.dot_dimension_numbers<[1], [0], [0], [1], [0, 0, 1, 1], [], []>} : vector<8x128xbf16>, vector<128x256xbf16>, vector<8x256xf32> -> vector<8x256xf32>
    %41 = arith.addf %36, %40 : vector<8x256xf32>
    %c9_47 = arith.constant 9 : index
    %c0_48 = arith.constant 0 : index
    %42 = vector.load %arg5[%c9_47, %c0_48] : memref<20x128xbf16, #tpu.memory_space<vmem>>, vector<8x128xbf16>
    %c7 = arith.constant 7 : index
    %c0_49 = arith.constant 0 : index
    %c0_50 = arith.constant 0 : index
    %43 = vector.load %arg2[%c7, %c0_49, %c0_50] : memref<9x128x256xbf16, #tpu.memory_space<vmem>>, vector<1x128x256xbf16>
    %44 = vector.shape_cast %43 : vector<1x128x256xbf16> to vector<128x256xbf16>
    %cst_51 = arith.constant dense<0.000000e+00> : vector<8x256xf32>
    %45 = tpu.matmul %42, %44, %cst_51 {dimension_numbers = #tpu.dot_dimension_numbers<[1], [0], [0], [1], [0, 0, 1, 1], [], []>} : vector<8x128xbf16>, vector<128x256xbf16>, vector<8x256xf32> -> vector<8x256xf32>
    %46 = arith.addf %41, %45 : vector<8x256xf32>
    %c10 = arith.constant 10 : index
    %c0_52 = arith.constant 0 : index
    %47 = vector.load %arg5[%c10, %c0_52] : memref<20x128xbf16, #tpu.memory_space<vmem>>, vector<8x128xbf16>
    %c8_53 = arith.constant 8 : index
    %c0_54 = arith.constant 0 : index
    %c0_55 = arith.constant 0 : index
    %48 = vector.load %arg2[%c8_53, %c0_54, %c0_55] : memref<9x128x256xbf16, #tpu.memory_space<vmem>>, vector<1x128x256xbf16>
    %49 = vector.shape_cast %48 : vector<1x128x256xbf16> to vector<128x256xbf16>
    %cst_56 = arith.constant dense<0.000000e+00> : vector<8x256xf32>
    %50 = tpu.matmul %47, %49, %cst_56 {dimension_numbers = #tpu.dot_dimension_numbers<[1], [0], [0], [1], [0, 0, 1, 1], [], []>} : vector<8x128xbf16>, vector<128x256xbf16>, vector<8x256xf32> -> vector<8x256xf32>
    %51 = arith.addf %46, %50 : vector<8x256xf32>
    %c0_57 = arith.constant 0 : index
    %c0_58 = arith.constant 0 : index
    %52 = vector.load %arg3[%c0_57, %c0_58] : memref<1x256xf32, #tpu.memory_space<vmem>>, vector<1x256xf32>
    %53 = vector.broadcast %52 : vector<1x256xf32> to vector<8x256xf32>
    %54 = arith.addf %51, %53 : vector<8x256xf32>
    %cst_59 = arith.constant 0.000000e+00 : f32
    %55 = vector.broadcast %cst_59 : f32 to vector<8x256xf32>
    %56 = arith.maximumf %54, %55 : vector<8x256xf32>
    %57 = vector.extract_strided_slice %56 {offsets = [0, 0], sizes = [2, 256], strides = [1, 1]} : vector<8x256xf32> to vector<2x256xf32>
    %58 = vector.extract_strided_slice %56 {offsets = [4, 0], sizes = [2, 256], strides = [1, 1]} : vector<8x256xf32> to vector<2x256xf32>
    %59 = arith.maximumf %57, %58 : vector<2x256xf32>
    %60 = vector.extract_strided_slice %59 {offsets = [0, 0], sizes = [1, 256], strides = [1, 1]} : vector<2x256xf32> to vector<1x256xf32>
    %61 = vector.extract_strided_slice %59 {offsets = [1, 0], sizes = [1, 256], strides = [1, 1]} : vector<2x256xf32> to vector<1x256xf32>
    %62 = arith.maximumf %60, %61 : vector<1x256xf32>
    %63 = arith.truncf %62 : vector<1x256xf32> to vector<1x256xbf16>
    %c0_60 = arith.constant 0 : index
    %c0_61 = arith.constant 0 : index
    %c0_62 = arith.constant 0 : index
    %c0_63 = arith.constant 0 : index
    %64 = vector.load %arg4[%c0_60, %c0_61, %c0_62, %c0_63] : memref<1x1x1x256xbf16, #tpu.memory_space<vmem>>, vector<1x1x1x256xbf16>
    %65 = vector.shape_cast %64 : vector<1x1x1x256xbf16> to vector<1x256xbf16>
    %66 = vector.shape_cast %63 : vector<1x256xbf16> to vector<1x1x1x256xbf16>
    tpu.vector_store %arg4[%c0_60, %c0_61, %c0_62, %c0_63], %66 {strides = array<i32>} : memref<1x1x1x256xbf16, #tpu.memory_space<vmem>>, vector<1x1x1x256xbf16>,
    return
  }
  func.func @transform_0(%arg0: i32) -> (i32, i32, i32, i32) {
    %c0_i32 = arith.constant 0 : i32
    %c0_i32_0 = arith.constant 0 : i32
    %c0_i32_1 = arith.constant 0 : i32
    %c0_i32_2 = arith.constant 0 : i32
    return %arg0, %c0_i32, %c0_i32_0, %c0_i32_1 : i32, i32, i32, i32
  }
  func.func @transform_1(%arg0: i32) -> (i32, i32, i32) {
    %c0_i32 = arith.constant 0 : i32
    %c0_i32_0 = arith.constant 0 : i32
    %c0_i32_1 = arith.constant 0 : i32
    %c0_i32_2 = arith.constant 0 : i32
    return %c0_i32, %c0_i32_0, %c0_i32_1 : i32, i32, i32
  }
  func.func @transform_2(%arg0: i32) -> (i32, i32) {
    %c0_i32 = arith.constant 0 : i32
    %c0_i32_0 = arith.constant 0 : i32
    %c0_i32_1 = arith.constant 0 : i32
    return %c0_i32, %c0_i32_0 : i32, i32
  }
  func.func @transform_3(%arg0: i32) -> (i32, i32, i32, i32) {
    %c0_i32 = arith.constant 0 : i32
    %c0_i32_0 = arith.constant 0 : i32
    %c0_i32_1 = arith.constant 0 : i32
    %c0_i32_2 = arith.constant 0 : i32
    return %arg0, %c0_i32, %c0_i32_0, %c0_i32_1 : i32, i32, i32, i32
  }
}

module attributes {stable_mosaic.version = 11 : i64} {
  func.func @_classifier_kernel(%arg0: i32, %arg1: memref<2x512xbf16, #tpu.memory_space<vmem>>, %arg2: memref<512x512xbf16, #tpu.memory_space<vmem>>, %arg3: memref<1x512xf32, #tpu.memory_space<vmem>>, %arg4: memref<512x512xbf16, #tpu.memory_space<vmem>>, %arg5: memref<1x512xf32, #tpu.memory_space<vmem>>, %arg6: memref<512x10xbf16, #tpu.memory_space<vmem>>, %arg7: memref<1x10xf32, #tpu.memory_space<vmem>>, %arg8: memref<2x10xf32, #tpu.memory_space<vmem>>) attributes {dimension_semantics = [#tpu.dimension_semantics<arbitrary>], iteration_bounds = array<i64: 1>, scalar_prefetch = 0 : i64, scratch_operands = 0 : i64, tpu.core_type = #tpu.core_type<tc>, window_params = [{pipeline_mode = #tpu.pipeline_mode<synchronous>, transform_indices = @transform_0, window_bounds = array<i64: 2, 512>}, {pipeline_mode = #tpu.pipeline_mode<synchronous>, transform_indices = @transform_1, window_bounds = array<i64: 512, 512>}, {pipeline_mode = #tpu.pipeline_mode<synchronous>, transform_indices = @transform_2, window_bounds = array<i64: 1, 512>}, {pipeline_mode = #tpu.pipeline_mode<synchronous>, transform_indices = @transform_3, window_bounds = array<i64: 512, 512>}, {pipeline_mode = #tpu.pipeline_mode<synchronous>, transform_indices = @transform_4, window_bounds = array<i64: 1, 512>}, {pipeline_mode = #tpu.pipeline_mode<synchronous>, transform_indices = @transform_5, window_bounds = array<i64: 512, 10>}, {pipeline_mode = #tpu.pipeline_mode<synchronous>, transform_indices = @transform_6, window_bounds = array<i64: 1, 10>}, {pipeline_mode = #tpu.pipeline_mode<synchronous>, transform_indices = @transform_7, window_bounds = array<i64: 2, 10>}]} {
    %c0 = arith.constant 0 : index
    %c0_0 = arith.constant 0 : index
    %0 = vector.load %arg1[%c0, %c0_0] : memref<2x512xbf16, #tpu.memory_space<vmem>>, vector<2x512xbf16>
    %c0_1 = arith.constant 0 : index
    %c0_2 = arith.constant 0 : index
    %1 = vector.load %arg2[%c0_1, %c0_2] : memref<512x512xbf16, #tpu.memory_space<vmem>>, vector<512x512xbf16>
    %cst = arith.constant dense<0.000000e+00> : vector<2x512xf32>
    %2 = tpu.matmul %0, %1, %cst {dimension_numbers = #tpu.dot_dimension_numbers<[1], [0], [0], [1], [0, 0, 1, 1], [], []>} : vector<2x512xbf16>, vector<512x512xbf16>, vector<2x512xf32> -> vector<2x512xf32>
    %c0_3 = arith.constant 0 : index
    %c0_4 = arith.constant 0 : index
    %3 = vector.load %arg3[%c0_3, %c0_4] : memref<1x512xf32, #tpu.memory_space<vmem>>, vector<1x512xf32>
    %4 = vector.broadcast %3 : vector<1x512xf32> to vector<2x512xf32>
    %5 = arith.addf %2, %4 : vector<2x512xf32>
    %cst_5 = arith.constant 0.000000e+00 : f32
    %6 = vector.broadcast %cst_5 : f32 to vector<2x512xf32>
    %7 = arith.maximumf %5, %6 : vector<2x512xf32>
    %8 = arith.truncf %7 : vector<2x512xf32> to vector<2x512xbf16>
    %c0_6 = arith.constant 0 : index
    %c0_7 = arith.constant 0 : index
    %9 = vector.load %arg4[%c0_6, %c0_7] : memref<512x512xbf16, #tpu.memory_space<vmem>>, vector<512x512xbf16>
    %cst_8 = arith.constant dense<0.000000e+00> : vector<2x512xf32>
    %10 = tpu.matmul %8, %9, %cst_8 {dimension_numbers = #tpu.dot_dimension_numbers<[1], [0], [0], [1], [0, 0, 1, 1], [], []>} : vector<2x512xbf16>, vector<512x512xbf16>, vector<2x512xf32> -> vector<2x512xf32>
    %c0_9 = arith.constant 0 : index
    %c0_10 = arith.constant 0 : index
    %11 = vector.load %arg5[%c0_9, %c0_10] : memref<1x512xf32, #tpu.memory_space<vmem>>, vector<1x512xf32>
    %12 = vector.broadcast %11 : vector<1x512xf32> to vector<2x512xf32>
    %13 = arith.addf %10, %12 : vector<2x512xf32>
    %cst_11 = arith.constant 0.000000e+00 : f32
    %14 = vector.broadcast %cst_11 : f32 to vector<2x512xf32>
    %15 = arith.maximumf %13, %14 : vector<2x512xf32>
    %16 = arith.truncf %15 : vector<2x512xf32> to vector<2x512xbf16>
    %c0_12 = arith.constant 0 : index
    %c0_13 = arith.constant 0 : index
    %17 = vector.load %arg6[%c0_12, %c0_13] : memref<512x10xbf16, #tpu.memory_space<vmem>>, vector<512x10xbf16>
    %cst_14 = arith.constant dense<0.000000e+00> : vector<2x10xf32>
    %18 = tpu.matmul %16, %17, %cst_14 {dimension_numbers = #tpu.dot_dimension_numbers<[1], [0], [0], [1], [0, 0, 1, 1], [], []>} : vector<2x512xbf16>, vector<512x10xbf16>, vector<2x10xf32> -> vector<2x10xf32>
    %c0_15 = arith.constant 0 : index
    %c0_16 = arith.constant 0 : index
    %19 = vector.load %arg7[%c0_15, %c0_16] : memref<1x10xf32, #tpu.memory_space<vmem>>, vector<1x10xf32>
    %20 = vector.broadcast %19 : vector<1x10xf32> to vector<2x10xf32>
    %21 = arith.addf %18, %20 : vector<2x10xf32>
    %c0_17 = arith.constant 0 : index
    %c0_18 = arith.constant 0 : index
    %22 = vector.load %arg8[%c0_17, %c0_18] : memref<2x10xf32, #tpu.memory_space<vmem>>, vector<2x10xf32>
    tpu.vector_store %arg8[%c0_17, %c0_18], %21 {strides = array<i32>} : memref<2x10xf32, #tpu.memory_space<vmem>>, vector<2x10xf32>,
    return
  }
  func.func @transform_0(%arg0: i32) -> (i32, i32) {
    %c0_i32 = arith.constant 0 : i32
    %c0_i32_0 = arith.constant 0 : i32
    %c0_i32_1 = arith.constant 0 : i32
    return %c0_i32, %c0_i32_0 : i32, i32
  }
  func.func @transform_1(%arg0: i32) -> (i32, i32) {
    %c0_i32 = arith.constant 0 : i32
    %c0_i32_0 = arith.constant 0 : i32
    %c0_i32_1 = arith.constant 0 : i32
    return %c0_i32, %c0_i32_0 : i32, i32
  }
  func.func @transform_2(%arg0: i32) -> (i32, i32) {
    %c0_i32 = arith.constant 0 : i32
    %c0_i32_0 = arith.constant 0 : i32
    %c0_i32_1 = arith.constant 0 : i32
    return %c0_i32, %c0_i32_0 : i32, i32
  }
  func.func @transform_3(%arg0: i32) -> (i32, i32) {
    %c0_i32 = arith.constant 0 : i32
    %c0_i32_0 = arith.constant 0 : i32
    %c0_i32_1 = arith.constant 0 : i32
    return %c0_i32, %c0_i32_0 : i32, i32
  }
  func.func @transform_4(%arg0: i32) -> (i32, i32) {
    %c0_i32 = arith.constant 0 : i32
    %c0_i32_0 = arith.constant 0 : i32
    %c0_i32_1 = arith.constant 0 : i32
    return %c0_i32, %c0_i32_0 : i32, i32
  }
  func.func @transform_5(%arg0: i32) -> (i32, i32) {
    %c0_i32 = arith.constant 0 : i32
    %c0_i32_0 = arith.constant 0 : i32
    %c0_i32_1 = arith.constant 0 : i32
    return %c0_i32, %c0_i32_0 : i32, i32
  }
  func.func @transform_6(%arg0: i32) -> (i32, i32) {
    %c0_i32 = arith.constant 0 : i32
    %c0_i32_0 = arith.constant 0 : i32
    %c0_i32_1 = arith.constant 0 : i32
    return %c0_i32, %c0_i32_0 : i32, i32
  }
  func.func @transform_7(%arg0: i32) -> (i32, i32) {
    %c0_i32 = arith.constant 0 : i32
    %c0_i32_0 = arith.constant 0 : i32
    %c0_i32_1 = arith.constant 0 : i32
    return %c0_i32, %c0_i32_0 : i32, i32
  }
}

</mosaic_0001>

<bundles_post_ra>
// kernel: vgg_forward.6
= control target key start
LH: loop header
LB: loop body
LE: loop exit
PB: predicated region body
PF: predicated region fallthrough
CT: control target
= control target key end

     0   :  { %8 = vsyncpa [#allocation4], 0  ;;  %s1589_s0 = inlined_call_operand.vmem [shape: bf16[2,4,4,64], index: 0, kind: input, shape index: {}]   ;;  %s1590_s1 = inlined_call_operand.hbm [shape: bf16[9,64,128], index: 1, kind: input, shape index: {}]   ;;  %s1591_s2 = inlined_call_operand.hbm [shape: f32[1,128], index: 2, kind: input, shape index: {}]   ;;  %s1592_s3 = inlined_call_operand.vmem [shape: bf16[2,2,2,128], index: 3, kind: output, shape index: {}]  }
   0x1   :  { %9 = vsyncpa [#allocation6], 0  ;;  %s1464_s12 = smov 0  }
   0x2 LB: > { %s125_s15 = sshll.u32 %s1590_s1, 4  ;;  %s1097_s16 = sadd.s32 4294967295, %s1437_s12   ;;  %s1437_s12 = sphi %s1464_s12, %s15_s12   ;;  %s126_s15 = int_to_ptr.hbm [resolvable:$true] %s125_s15 }
   0x3   : > { %p1099_p0 = scmp.ge.s32.totalorder %s1437_s12, 1  ;;  %p114_p1 = scmp.lt.s32.totalorder %s1437_s12, 3 }
   0x4   : > { %p1345_p2 = scmp.eq.s32.totalorder %s1097_s16, 0  ;;  %s1439_s18 = smov [#allocation3]  }
   0x5   : > { %p1475_p3 = pnand %p1099_p0, %p114_p1  ;;  %s127_s19 = sshll.u32 %s1439_s18, 4  ;;  %s128_s19 = int_to_ptr.vmem [resolvable:$true] %s127_s19 }
   0x6   : > { %s140_s22 = sshll.u32 %s1591_s2, 4  ;;  %s1440_s23 = smov [#allocation5]   ;;  %s141_s22 = int_to_ptr.hbm [resolvable:$true] %s140_s22 }
   0x7   : > { %p1338_p4 = pneg %p1475_p3  ;;  %s142_s24 = sshll.u32 %s1440_s23, 4  ;;  %s143_s24 = int_to_ptr.vmem [resolvable:$true] %s142_s24 }
   0x8   : > { %s1441_s25 = smov 64   ;;  %s1442_s26 = smov 4  }
   0x9   : > { %p1339_p5 = pnand %p1345_p2, %p1338_p4  ;;  %163 = sbr.rel (%p1475_p3) target bundleno = 315 (0x13b), region = 32 }
   0xb   : > { %1341 = dma.hbm_to_vmem [thread:$0]  (!%p1339_p5), %s126_s15, 4608, %s128_s19, [#allocation4], %s1441_s25, %s1441_s25, %s1442_s26  }
   0xc   : > { %1344 = dma.hbm_to_vmem [thread:$0]  (!%p1339_p5), %s141_s22, 16, %s143_s24, [#allocation6]  }
   0xe   : > { %1428 = dma.done.wait (%p1345_p2), [#allocation4], 4608  }
   0xf   : > { %1430 = vsyncadd (%p1345_p2), [#allocation4], 4294962688 }
  0x10   : > { %1432 = dma.done.wait (%p1345_p2), [#allocation6], 16  }
  0x11   : > { %1434 = vsyncadd (%p1345_p2), [#allocation6], 4294967280  ;;  %p192_p6 = scmp.lt.s32.totalorder %s1097_s16, 1  ;;  %vm202_vm0 = vcmask 519168   ;;  %v1443_v0 = vmov 0   ;;  %vm208_vm1 = vcmask 516096  }
  0x12   : > { %203 = vst.msk [vmem:[#allocation2] sm:$0xf] %vm202_vm0, %v1443_v0  ;;  %v1288_v1 = vld [vmem:[#allocation3 + $0x38] sm:$0xff]  ;;  %v1287_v4 = vld [vmem:[#allocation3 + $0x30] sm:$0xff]  ;;  %v1286_v8 = vld [vmem:[#allocation3 + $0x28] sm:$0xff]  ;;  %vm224_vm2 = vcmask 519171  }
  0x13   : > { %s1597_s16 = smov (!%p192_p6, %s1097_s16), 1  ;;  %204 = vst.msk [vmem:[#allocation2 + $0x4] sm:$0xf] %vm202_vm0, %v1443_v0  ;;  %v1292_v2 = vld [vmem:[#allocation3 + $0x58] sm:$0xff]  ;;  %382 = vmatpush.bf16.msra.mxu0 %v1288_v1  ;;  %1326 = vmatpush.bf16.msra.mxu1 %v1288_v1  ;;  %v1291_v5 = vld [vmem:[#allocation3 + $0x50] sm:$0xff]  ;;  %v1290_v9 = vld [vmem:[#allocation3 + $0x48] sm:$0xff] }
  0x14   : > { %205 = vst.msk [vmem:[#allocation2 + $0x8] sm:$0xf] %vm202_vm0, %v1443_v0  ;;  %s1280_s27 = sshll.u32 %s1597_s16, 3  ;;  %v1296_v3 = vld [vmem:[#allocation3 + $0x78] sm:$0xff]  ;;  %495 = vmatpush.bf16.msra.mxu2 %v1292_v2  ;;  %v1295_v6 = vld [vmem:[#allocation3 + $0x70] sm:$0xff]  ;;  %v1285_v11 = vld [vmem:[#allocation3 + $0x20] sm:$0xff] }
  0x15   : > { %206 = vst.msk [vmem:[#allocation2 + $0xc] sm:$0xf] %vm202_vm0, %v1443_v0  ;;  %s1497_s30 = scalar_lea.vmem %s1589_s0, %s1280_s27  ;;  %567 = vmatpush.bf16.msra.mxu3 %v1296_v3  ;;  %vm225_vm3 = vsmask.f32 7950  ;;  %vm230_vm5 = vcmask 517120   ;;  %vm251_vm8 = vcmask 519170  }
  0x16   : > { %207 = vst.msk [vmem:[#allocation2 + $0x10] sm:$0xf] %vm202_vm0, %v1443_v0  ;;  %v210_v7 = vld [vmem:[%s1497_s30] sm:$0x3]  ;;  %v1109_v10 = vld [vmem:[%s1497_s30 + $0x2] sm:$0x3]  ;;  %vm226_vm4 = vmand %vm224_vm2, %vm225_vm3 }
  0x17   : > { %212 = vst [vmem:[#allocation1] ss:$2 sm:$0xff] %v210_v7  ;;  %383 = vmatpush.bf16.msra.mxu0 %v1287_v4  ;;  %1327 = vmatpush.bf16.msra.mxu1 %v1287_v4  ;;  %vm231_vm6 = vsmask.f32 1280  ;;  %v1110_v21 = vld [vmem:[%s1497_s30 + $0x4] sm:$0x3] }
  0x18   : > { %496 = vmatpush.bf16.msra.mxu2 %v1291_v5  ;;  %vm232_vm7 = vmand %vm230_vm5, %vm231_vm6  ;;  %vm252_vm9 = vsmask.f32 7946  ;;  %vm258_vm10 = vsmask.f32 256  ;;  %vm277_vm13 = vsmask.f32 3334 }
  0x19   : > { %568 = vmatpush.bf16.msra.mxu3 %v1295_v6  ;;  %v227_v15 = vld [vmem:[#allocation2] sm:$0x8]  ;;  %vm253_vm11 = vmand %vm251_vm8, %vm252_vm9  ;;  %v1111_v35 = vld [vmem:[%s1497_s30 + $0x6] sm:$0x3]  ;;  %vm276_vm14 = vcmask 519169   ;;  %vm294_vm0 = vcmask 518144  }
  0x1a   : > { %v233_v20 = vld [vmem:[#allocation2 + $0x4] sm:$0x3]  ;;  %v254_v29 = vld [vmem:[#allocation2 + $0x4] sm:$0xc]  ;;  %vm259_vm12 = vmand %vm208_vm1, %vm258_vm10  ;;  %vm295_vm1 = vsmask.f32 2306 }
  0x1b   : > { %384 = vmatpush.bf16.msra.mxu0 %v1286_v8  ;;  %1328 = vmatpush.bf16.msra.mxu1 %v1286_v8  ;;  %v260_v30 = vld [vmem:[#allocation2 + $0x8] sm:$0x1]  ;;  %v1294_v37 = vld [vmem:[#allocation3 + $0x68] sm:$0xff]  ;;  %v1300_v40 = vld [vmem:[#allocation3 + $0x98] sm:$0xff]  ;;  %vm457_vm3 = vcmask 1046528   ;;  %vm371_vm6 = vcmask 523264  }
  0x1c   : > { %497 = vmatpush.bf16.msra.mxu2 %v1290_v9  ;;  %v1284_v41 = vld [vmem:[#allocation3 + $0x18] sm:$0xff]  ;;  %v1289_v42 = vld [vmem:[#allocation3 + $0x40] sm:$0xff]  ;;  %v1299_v46 = vld [vmem:[#allocation3 + $0x90] sm:$0xff]  ;;  %vm331_vm5 = vsmask.f32 7424  ;;  %vm751_vm8 = vcmask 1045504  }
  0x1d   : > { %569 = vmatpush.bf16.msra.mxu3 %v1294_v37  ;;  %v1293_v45 = vld [vmem:[#allocation3 + $0x60] sm:$0xff]  ;;  %vm278_vm15 = vmand %vm276_vm14, %vm277_vm13  ;;  %v279_v47 = vld [vmem:[#allocation2 + $0x8] sm:$0xe]  ;;  %vm819_vm9 = vsmask.f32 5376  ;;  %s1108_s4 = sshll.u32 %s1597_s16, 1 }
  0x1e   : > { %v213_v12 = vld.sshfl [vmem:[#allocation1] sm:$0xff pattern:$0x75643120]  ;;  %v1283_v48 = vld [vmem:[#allocation3 + $0x10] sm:$0xff]  ;;  %v1308_v50 = vld [vmem:[#allocation3 + $0xd8] sm:$0xff]  ;;  %s1565_s7 = scalar_lea.vmem %s1592_s3, %s1108_s4 }
  0x1f   : > { %v214_v13 = vshll.u32 %v213_v12, 16  ;;  %v217_v14 = vshrl.u32 %v213_v12, 16  ;;  %239 = vst [vmem:[#allocation1] ss:$2 sm:$0xff] %v1109_v10  ;;  %385 = vmatpush.bf16.msra.mxu0 %v1285_v11  ;;  %1329 = vmatpush.bf16.msra.mxu1 %v1285_v11  ;;  %v1312_v51 = vld [vmem:[#allocation3 + $0xf8] sm:$0xff]  ;;  %v1298_v53 = vld [vmem:[#allocation3 + $0x88] sm:$0xff]  ;;  %vm296_vm2 = vmand %vm294_vm0, %vm295_vm1 }
  0x20   : > { %498 = vmatpush.bf16.msra.mxu2 %v1289_v42  ;;  %v1282_v54 = vld [vmem:[#allocation3 + $0x8] sm:$0xff]  ;;  %v1297_v58 = vld [vmem:[#allocation3 + $0x80] sm:$0xff]  ;;  %v297_v61 = vld [vmem:[#allocation2 + $0xc] sm:$0x7]  ;;  %vm990_vm14 = vsmask.f32 7938 }
  0x21   : > { %v216_v16 = vrot.slane %v214_v13, 5  ;;  %v219_v17 = vrot.slane %v217_v14, 4  ;;  %570 = vmatpush.bf16.msra.mxu3 %v1293_v45  ;;  %v1281_v60 = vld [vmem:[#allocation3] sm:$0xff]  ;;  %v1307_v6 = vld [vmem:[#allocation3 + $0xd0] sm:$0xff]  ;;  %v1306_v9 = vld [vmem:[#allocation3 + $0xc8] sm:$0xff] }
  0x22   : > { %v1311_v7 = vld [vmem:[#allocation3 + $0xf0] sm:$0xff]  ;;  %v1310_v10 = vld [vmem:[#allocation3 + $0xe8] sm:$0xff] }
  0x23   : > { %v220_v18 = vor.u32 %v219_v17, %v216_v16  ;;  %v228_v19 = vsel %vm226_vm4, %v216_v16, %v227_v15  ;;  %649 = vmatpush.bf16.msrb.mxu0 %v1300_v40  ;;  %430 = vmatpush.bf16.msrb.mxu1 %v1284_v41  ;;  %vm529_vm4 = vcmask 1044480   ;;  %v1303_v45 = vld [vmem:[#allocation3 + $0xb0] sm:$0xff] }
  0x24   : > { %229 = vst [vmem:[#allocation2] sm:$0x8] %v228_v19  ;;  %789 = vmatpush.bf16.msrb.mxu2 %v1308_v50 }
  0x25   : > { %v221_v22 = vrot.slane %v220_v18, 4  ;;  %871 = vmatpush.bf16.msrb.mxu3 %v1312_v51 }
  0x26   : > { %v240_v23 = vld.sshfl [vmem:[#allocation1] sm:$0xff pattern:$0x75643120] }
  0x27   : > { %v234_v24 = vsel %vm232_vm7, %v221_v22, %v233_v20  ;;  %v241_v25 = vshrl.u32 %v240_v23, 16  ;;  %v244_v26 = vshll.u32 %v240_v23, 16  ;;  %266 = vst [vmem:[#allocation1] ss:$2 sm:$0xff] %v1110_v21  ;;  %650 = vmatpush.bf16.msrb.mxu0 %v1299_v46  ;;  %431 = vmatpush.bf16.msrb.mxu1 %v1283_v48  ;;  %v806_v48 = vld [vmem:[#allocation2 + $0x10] sm:$0x7] }
  0x28   : > { %235 = vst [vmem:[#allocation2 + $0x4] sm:$0x3] %v234_v24  ;;  %790 = vmatpush.bf16.msrb.mxu2 %v1307_v6  ;;  %vm597_vm7 = vsmask.f32 4352 }
  0x29   : > { %v243_v27 = vrot.slane %v241_v25, 5  ;;  %v246_v28 = vrot.slane %v244_v26, 6  ;;  %872 = vmatpush.bf16.msrb.mxu3 %v1311_v7 }
  0x2b   : > { %v247_v31 = vor.u32 %v246_v28, %v243_v27  ;;  %v248_v32 = vrot.slane %v243_v27, 4  ;;  %651 = vmatpush.bf16.msrb.mxu0 %v1298_v53  ;;  %432 = vmatpush.bf16.msrb.mxu1 %v1282_v54  ;;  %v444_v63 = vld [vmem:[#allocation2] sm:$0xe] }
  0x2c   : > { %v512_v1 = vld [vmem:[#allocation2] sm:$0x8]  ;;  %v455_v4 = vunpack.c.l.b16 %v444_v63  ;;  %791 = vmatpush.bf16.msrb.mxu2 %v1306_v9 }
  0x2d   : > { %v255_v33 = vsel %vm253_vm11, %v247_v31, %v254_v29  ;;  %v261_v34 = vsel %vm259_vm12, %v248_v32, %v260_v30  ;;  %v525_v5 = vunpack.c.l.b16 %v512_v1  ;;  %873 = vmatpush.bf16.msrb.mxu3 %v1310_v10  ;;  %v1314_v53 = vld [vmem:[#allocation3 + $0x108] sm:$0xff]  ;;  %v1301_v1 = vld [vmem:[#allocation3 + $0xa0] sm:$0xff]  ;;  %vm967_vm11 = vcmask 1041408  }
  0x2e   : > { %256 = vst [vmem:[#allocation2 + $0x4] sm:$0xc] %v255_v33  ;;  %v267_v36 = vld.sshfl [vmem:[#allocation1] sm:$0xff pattern:$0x75643120]  ;;  %v1302_v54 = vld [vmem:[#allocation3 + $0xa8] sm:$0xff] }
  0x2f   : > { %262 = vst [vmem:[#allocation2 + $0x8] sm:$0x1] %v261_v34  ;;  %v268_v38 = vshrl.u32 %v267_v36, 16  ;;  %v271_v39 = vshll.u32 %v267_v36, 16  ;;  %652 = vmatpush.bf16.msrb.mxu0 %v1297_v58  ;;  %433 = vmatpush.bf16.msrb.mxu1 %v1281_v60  ;;  %v1316_v34 = vld [vmem:[#allocation3 + $0x118] sm:$0xff]  ;;  %v817_v58 = vunpack.c.l.b16 %v806_v48  ;;  %vm978_vm12 = vcmask 1040384  }
  0x30   : > { %285 = vst [vmem:[#allocation1] ss:$2 sm:$0xff] %v1111_v35  ;;  %v1304_v35 = vld [vmem:[#allocation3 + $0xb8] sm:$0xff]  ;;  %vm1569_vm13 = vmand %vm978_vm12, %vm258_vm10 }
  0x31   : > { %v270_v43 = vrot.slane %v268_v38, 6  ;;  %v273_v44 = vrot.slane %v271_v39, 7  ;;  %v1305_v38 = vld [vmem:[#allocation3 + $0xc0] sm:$0xff]  ;;  %vm991_vm10 = vmand %vm978_vm12, %vm990_vm14 }
  0x32   : > { %792 = vmatpush.bf16.msrb.mxu2 %v1305_v38 }
  0x33   : > { %v274_v49 = vor.u32 %v273_v44, %v270_v43  ;;  %v1315_v43 = vld [vmem:[#allocation3 + $0x110] sm:$0xff]  ;;  %v1309_v44 = vld [vmem:[#allocation3 + $0xe0] sm:$0xff] }
  0x34   : > { %874 = vmatpush.bf16.msrb.mxu3 %v1309_v44 }
  0x35   : > { %v280_v52 = vsel %vm278_vm15, %v274_v49, %v279_v47  ;;  %v1506_v2 = vld [vmem:[#allocation2] sm:$0xff]  }
  0x36   : > { %281 = vst [vmem:[#allocation2 + $0x8] sm:$0xe] %v280_v52  ;;  %v1509_v3 = vunpack.c.h.b16 %v1506_v2  ;;  %v335_v8 = vshll.u32 %v1506_v2, 16  ;;  %v333_v12 = vshrl.u32 %v1506_v2, 16  ;;  %v728_v46 = vld [vmem:[#allocation2 + $0x4] sm:$0xc] }
  0x37   : > { %v286_v55 = vld.sshfl [vmem:[#allocation1] sm:$0xff pattern:$0x75643120] }
  0x38   : > { %v287_v56 = vshrl.u32 %v286_v55, 16  ;;  %v290_v57 = vshll.u32 %v286_v55, 16  ;;  %v456_v11 = vpack.c.b16 %v1509_v3, %v455_v4  ;;  %v527_v13 = vpack.c.b16 %v1509_v3, %v525_v5 }
  0x39   : > { %v337_v16 = vrot.slane %v335_v8, 1 }
  0x3a   : > { %v289_v59 = vrot.slane %v287_v56, 7  ;;  %v458_v21 = vrot.slane %v456_v11, 1  ;;  %v530_v24 = vrot.slane %v527_v13, 3  ;;  %v599_v39 = vshrl.u32 %v527_v13, 16 }
  0x3b   : > { %v338_v26 = vor.u32 %v337_v16, %v333_v12  ;;  %v602_v40 = vshll.u32 %v527_v13, 16 }
  0x3c   : > { %v292_v62 = vor.u32 %v290_v57, %v289_v59  ;;  %v601_v49 = vrot.slane %v599_v39, 3  ;;  %v745_v57 = vunpack.c.l.b16 %v728_v46 }
  0x3d   : > { %v604_v50 = vrot.slane %v602_v40, 4 }
  0x3e   : > { %v298_v0 = vsel %vm296_vm2, %v292_v62, %v297_v61  ;;  %v1313_v61 = vld [vmem:[#allocation3 + $0x100] sm:$0xff]  ;;  %v731_v62 = vld [vmem:[#allocation2 + $0x10] sm:$0x3] }
  0x3f   : > { %299 = vst [vmem:[#allocation2 + $0xc] sm:$0x7] %v298_v0  ;;  %v605_v59 = vor.u32 %v604_v50, %v601_v49  ;;  %v748_v5 = vunpack.c.l.b16 %v731_v62 }
  0x46   : > { %v1515_v14 = vld [vmem:[#allocation2 + $0x8] sm:$0xff]  }
  0x47   : > { %v311_v15 = vld [vmem:[#allocation2 + $0xc] sm:$0x1]  ;;  %v1518_v18 = vunpack.c.l.b16 %v1515_v14  ;;  %v595_v25 = vunpack.c.h.b16 %v1515_v14  ;;  %v607_v41 = vshrl.u32 %v1515_v14, 16  ;;  %v610_v42 = vshll.u32 %v1515_v14, 16 }
  0x48   : > { %v513_v17 = vld [vmem:[#allocation2 + $0xc] sm:$0x7]  ;;  %v328_v19 = vunpack.c.l.b16 %v311_v15 }
  0x49   : > { %v526_v20 = vunpack.c.l.b16 %v513_v17  ;;  %v1325_v47 = vld [vmem:[#allocation2 + $0x8] sm:$0xff]   ;;  %v609_v51 = vrot.slane %v607_v41, 3  ;;  %v612_v52 = vrot.slane %v610_v42, 4 }
  0x4a   : > { %v1521_v22 = vpack.c.b16 %v328_v19, %v1518_v18  ;;  %v1323_v55 = vunpack.c.l.b16 %v1325_v47  ;;  %v1324_v56 = vunpack.c.h.b16 %v1325_v47 }
  0x4b   : > { %v1524_v23 = vpack.c.b16 %v526_v20, %v1518_v18  ;;  %v613_v60 = vor.u32 %v612_v52, %v609_v51 }
  0x4c   : > { %v340_v27 = vshll.u32 %v1521_v22, 16  ;;  %v344_v28 = vshrl.u32 %v1521_v22, 16  ;;  %v459_v29 = vrot.slane %v1521_v22, 1  ;;  %v749_v63 = vpack.c.b16 %v1323_v55, %v745_v57 }
  0x4d   : > { %v531_v30 = vrot.slane %v1524_v23, 3  ;;  %v818_v0 = vpack.c.b16 %v817_v58, %v1324_v56  ;;  %v614_v4 = vsel %vm597_vm7, %v605_v59, %v613_v60  ;;  %v750_v10 = vpack.c.b16 %v748_v5, %v1324_v56 }
  0x4e   : > { %v342_v31 = vrot.slane %v340_v27, 1  ;;  %v460_v32 = vsel %vm457_vm3, %v458_v21, %v459_v29  ;;  %v821_v6 = vshrl.u32 %v749_v63, 16  ;;  %v824_v7 = vshll.u32 %v749_v63, 16 }
  0x4f   : > { %v532_v33 = vsel %vm529_vm4, %v530_v24, %v531_v30  ;;  %1164 = vmatmul.msk.bf16.vlgmr.msra.gmra.mxu2 %vm371_vm6, %v460_v32  ;;  %v829_v8 = vshrl.u32 %v818_v0, 16  ;;  %v832_v9 = vshll.u32 %v818_v0, 16  ;;  %v752_v16 = vrot.slane %v749_v63, 2 }
  0x50   : > { %1182 = vmatmul.msk.bf16.vlgmr.msra.gmra.mxu3 %vm371_vm6, %v532_v33  ;;  %v343_v36 = vsel %vm331_vm5, %v338_v26, %v342_v31  ;;  %v346_v37 = vor.u32 %v344_v28, %v342_v31  ;;  %v823_v11 = vrot.slane %v821_v6, 2  ;;  %v826_v12 = vrot.slane %v824_v7, 3 }
  0x51   : > { %1128 = vmatmul.msk.bf16.vlgmr.msra.gmra.mxu0 %vm371_vm6, %v343_v36  ;;  %v831_v13 = vrot.slane %v829_v8, 2  ;;  %v834_v15 = vrot.slane %v832_v9, 3  ;;  %v753_v17 = vrot.slane %v750_v10, 2  ;;  %v396_v23 = vpack.c.b16 %v1518_v18, %v1518_v18  ;;  %v1362_v10 = vld [vmem:[#allocation5] ss:$0 sm:$0xff] }
  0x52   : > { %1129 = vmatmul.msk.bf16.vlgmr.msra.gmra.mxu1 %vm371_vm6, %v346_v37  ;;  %938 = vmatpush.bf16.msra.mxu0 %v1316_v34  ;;  %v827_v19 = vor.u32 %v826_v12, %v823_v11  ;;  %v902_v28 = vrot.slane %v818_v0, 3  ;;  %v676_v31 = vpack.c.b16 %v595_v25, %v595_v25 }
  0x53   : > { %711 = vmatpush.bf16.msra.mxu1 %v1304_v35  ;;  %v835_v20 = vor.u32 %v834_v15, %v831_v13  ;;  %v754_v21 = vsel %vm751_vm8, %v752_v16, %v753_v17 }
  0x55   : > { %v836_v22 = vsel %vm819_vm9, %v827_v19, %v835_v20 }
  0x56   : > { %939 = vmatpush.bf16.msra.mxu0 %v1315_v43 }
  0x57   : > { %712 = vmatpush.bf16.msra.mxu1 %v1303_v45 }
  0x5a   : > { %940 = vmatpush.bf16.msra.mxu0 %v1314_v53 }
  0x5b   : > { %713 = vmatpush.bf16.msra.mxu1 %v1302_v54 }
  0x5e   : > { %941 = vmatpush.bf16.msra.mxu0 %v1313_v61 }
  0x5f   : > { %1165 = vmatmul.msk.bf16.gmra.mxu2 %vm371_vm6, %v459_v29  ;;  %714 = vmatpush.bf16.msra.mxu1 %v1301_v1 }
  0x60   : > { %1183 = vmatmul.msk.bf16.gmra.mxu3 %vm371_vm6, %v531_v30  ;;  %v675_v30 = vpack.c.b16 %v1518_v18, %v1509_v3 }
  0x61   : > { %1200 = vmatmul.msk.bf16.vlgmr.msrb.gmra.mxu0 %vm371_vm6, %v614_v4 }
  0x62   : > { %1146 = vmatmul.msk.bf16.vlgmr.msrb.gmra.mxu1 %vm371_vm6, %v1506_v2  ;;  %v888_v2 = vld [vmem:[#allocation2 + $0x4] sm:$0x8] }
  0x63   : > { %v899_v24 = vunpack.c.l.b16 %v888_v2 }
  0x65   : > { %v900_v26 = vpack.c.b16 %v1323_v55, %v899_v24 }
  0x67   : > { %v901_v27 = vrot.slane %v900_v26, 3 }
  0x69   : > { %v903_v29 = vsel %vm529_vm4, %v901_v27, %v902_v28 }
  0x6f   : > { %1236 = vmatmul.msk.bf16.vlgmr.msrb.gmra.mxu2 %vm371_vm6, %v754_v21 }
  0x70   : > { %1254 = vmatmul.msk.bf16.vlgmr.msrb.gmra.mxu3 %vm371_vm6, %v836_v22 }
  0x71   : > { %1201 = vmatmul.msk.bf16.gmra.mxu0 %vm371_vm6, %v613_v60 }
  0x72   : > { %1147 = vmatmul.msk.bf16.gmra.mxu1 %vm371_vm6, %v396_v23 }
  0x7f   : > { %1237 = vmatmul.msk.bf16.gmra.mxu2 %vm371_vm6, %v753_v17 }
  0x80   : > { %1255 = vmatmul.msk.bf16.gmra.mxu3 %vm371_vm6, %v835_v20 }
  0x81   : > { %1272 = vmatmul.msk.bf16.vlgmr.msra.gmra.mxu0 %vm371_vm6, %v903_v29 }
  0x82   : > { %1218 = vmatmul.msk.bf16.vlgmr.msra.gmra.mxu1 %vm371_vm6, %v675_v30 }
  0x91   : > { %1273 = vmatmul.msk.bf16.gmra.mxu0 %vm371_vm6, %v902_v28 }
  0x92   : > { %1219 = vmatmul.msk.bf16.gmra.mxu1 %vm371_vm6, %v676_v31 }
  0xce   : > { %v387_v32 = vpop.f32.mrf.mxu0 }
  0xcf   : > { %v392_v33 = vpop.f32.mrf.mxu1 }
  0xd2   : > { %v500_v34 = vpop.f32.mrf.mxu2 }
  0xd3   : > { %v572_v3 = vpop.f32.mrf.mxu3 }
  0xd6   : > { %v389_v18 = vpop.f32.mrf.mxu0 }
  0xd7   : > { %v394_v35 = vpop.f32.mrf.mxu1 }
  0xda   : > { %v502_v36 = vpop.f32.mrf.mxu2 }
  0xdb   : > { %v574_v37 = vpop.f32.mrf.mxu3 }
  0xde   : > { %v654_v38 = vpop.f32.mrf.mxu0 }
  0xdf   : > { %v435_v39 = vpop.f32.mrf.mxu1 }
  0xe0   : > { %v436_v46 = vadd.f32 %v435_v39, %v387_v32 }
  0xe2   : > { %v505_v40 = vpop.f32.mrf.mxu2  ;;  %v509_v49 = vadd.f32 %v500_v34, %v436_v46 }
  0xe3   : > { %v577_v41 = vpop.f32.mrf.mxu3 }
  0xe4   : > { %v581_v53 = vadd.f32 %v572_v3, %v509_v49 }
  0xe6   : > { %v656_v42 = vpop.f32.mrf.mxu0  ;;  %v663_v58 = vadd.f32 %v654_v38, %v581_v53 }
  0xe7   : > { %v437_v14 = vpop.f32.mrf.mxu1 }
  0xe8   : > { %v438_v52 = vadd.f32 %v437_v14, %v389_v18 }
  0xea   : > { %v507_v43 = vpop.f32.mrf.mxu2  ;;  %v510_v56 = vadd.f32 %v502_v36, %v438_v52 }
  0xeb   : > { %v579_v25 = vpop.f32.mrf.mxu3 }
  0xec   : > { %v582_v63 = vadd.f32 %v574_v37, %v510_v56 }
  0xee   : > { %v659_v44 = vpop.f32.mrf.mxu0  ;;  %v664_v7 = vadd.f32 %v656_v42, %v582_v63 }
  0xef   : > { %v440_v45 = vpop.f32.mrf.mxu1 }
  0xf0   : > { %v441_v61 = vadd.f32 %v440_v45, %v392_v33 }
  0xf2   : > { %v794_v47 = vpop.f32.mrf.mxu2  ;;  %v511_v5 = vadd.f32 %v505_v40, %v441_v61  ;;  %v980_v40 = vld [vmem:[%s1565_s7] sm:$0x1] }
  0xf3   : > { %v876_v48 = vpop.f32.mrf.mxu3 }
  0xf4   : > { %v583_v13 = vadd.f32 %v577_v41, %v511_v5 }
  0xf6   : > { %v661_v50 = vpop.f32.mrf.mxu0  ;;  %v665_v22 = vadd.f32 %v659_v44, %v583_v13 }
  0xf7   : > { %v442_v51 = vpop.f32.mrf.mxu1  ;;  %v1274_v50 = vld [vmem:[%s1565_s7 + $0x1] sm:$0x1] }
  0xfa   : > { %v796_v54 = vpop.f32.mrf.mxu2 }
  0xfb   : > { %v878_v55 = vpop.f32.mrf.mxu3 }
  0xfe   : > { %v943_v57 = vpop.f32.mrf.mxu0 }
  0xff   : > { %v716_v59 = vpop.f32.mrf.mxu1 }
 0x100   : > { %v725_v60 = vadd.f32 %v716_v59, %v663_v58 }
 0x102   : > { %v803_v62 = vadd.f32 %v794_v47, %v725_v60  ;;  %v799_v0 = vpop.f32.mrf.mxu2 }
 0x103   : > { %v881_v1 = vpop.f32.mrf.mxu3 }
 0x104   : > { %v885_v4 = vadd.f32 %v876_v48, %v803_v62 }
 0x106   : > { %v945_v6 = vpop.f32.mrf.mxu0  ;;  %v952_v9 = vadd.f32 %v943_v57, %v885_v4 }
 0x107   : > { %v718_v8 = vpop.f32.mrf.mxu1 }
 0x108   : > { %v726_v11 = vadd.f32 %v718_v8, %v664_v7  ;;  %v959_v17 = vadd.f32 %v1362_v10, %v952_v9 }
 0x10a   : > { %v804_v12 = vadd.f32 %v796_v54, %v726_v11  ;;  %v801_v15 = vpop.f32.mrf.mxu2  ;;  %v962_v2 = vmax.f32 %v959_v17, 0.0 }
 0x10b   : > { %v883_v16 = vpop.f32.mrf.mxu3 }
 0x10c   : > { %v886_v19 = vadd.f32 %v878_v55, %v804_v12  ;;  %v968_v29 = vrot.slane %v962_v2, 6 }
 0x10e   : > { %v953_v20 = vadd.f32 %v945_v6, %v886_v19  ;;  %v948_v21 = vpop.f32.mrf.mxu0 }
 0x10f   : > { %v721_v23 = vpop.f32.mrf.mxu1 }
 0x110   : > { %v960_v24 = vadd.f32 %v1362_v10, %v953_v20  ;;  %v727_v26 = vadd.f32 %v721_v23, %v665_v22 }
 0x112   : > { %v963_v27 = vmax.f32 %v960_v24, 0.0  ;;  %v805_v28 = vadd.f32 %v799_v0, %v727_v26 }
 0x114   : > { %v969_v30 = vrot.slane %v963_v27, 6  ;;  %v887_v31 = vadd.f32 %v881_v1, %v805_v28 }
 0x116   : > { %v970_v32 = vsel %vm967_vm11, %v968_v29, %v969_v30  ;;  %v954_v33 = vadd.f32 %v948_v21, %v887_v31  ;;  %v950_v34 = vpop.f32.mrf.mxu0 }
 0x117   : > { %v972_v3 = vmax.f32 %v962_v2, %v970_v32  ;;  %v723_v18 = vpop.f32.mrf.mxu1 }
 0x118   : > { %v961_v35 = vadd.f32 %v1362_v10, %v954_v33 }
 0x119   : > { %v974_v36 = vrot.slane %v972_v3, 1 }
 0x11a   : > { %v964_v37 = vmax.f32 %v961_v35, 0.0 }
 0x11b   : > { %v976_v38 = vmax.f32 %v972_v3, %v974_v36 }
 0x11c   : > { %v996_v41 = vrot.slane %v964_v37, 6 }
 0x11d   : > { %v977_v42 = vpack.c.bf16 %v976_v38, %v976_v38 }
 0x11e   : > { %v998_v14 = vmax.f32 %v963_v27, %v996_v41 }
 0x11f   : > { %v981_v43 = vsel %vm1569_vm13, %v977_v42, %v980_v40  ;;  %984 = vst [vmem:[#allocation1] sm:$0xff] %v977_v42 }
 0x120   : > { %982 = vst [vmem:[%s1565_s7] sm:$0x1] %v981_v43  ;;  %v1000_v25 = vrot.slane %v998_v14, 1 }
 0x122   : > { %v1002_v44 = vmax.f32 %v998_v14, %v1000_v25 }
 0x124   : > { %v1003_v45 = vpack.c.bf16 %v1002_v44, %v1002_v44 }
 0x126   : > { %v986_v46 = vld [vmem:[#allocation1 + $0x1] ss:$4 sm:$0xff] }
 0x127   : > { %v987_v47 = vshll.u32 %v986_v46, 16  ;;  %v992_v48 = vld [vmem:[%s1565_s7] sm:$0x1]  ;;  %1005 = vst [vmem:[#allocation1] sm:$0xff] %v1003_v45 }
 0x129   : > { %v993_v49 = vsel %vm991_vm10, %v987_v47, %v992_v48 }
 0x12a   : > { %994 = vst [vmem:[%s1565_s7] sm:$0x1] %v993_v49 }
 0x12e   : > { %v1007_v51 = vld [vmem:[#allocation1 + $0x2] ss:$4 sm:$0xff] }
 0x12f   : > { %v1011_v52 = vsel %vm1569_vm13, %v1007_v51, %v1274_v50  ;;  %1013 = vst [vmem:[#allocation1] sm:$0xff] %v1003_v45 }
 0x130   : > { %1275 = vst [vmem:[%s1565_s7 + $0x1] sm:$0x1] %v1011_v52 }
 0x136   : > { %v1015_v53 = vld [vmem:[#allocation1 + $0x3] ss:$4 sm:$0xff] }
 0x137   : > { %v1016_v54 = vshll.u32 %v1015_v53, 16  ;;  %v1276_v55 = vld [vmem:[%s1565_s7 + $0x1] sm:$0x1] }
 0x139   : > { %v1020_v56 = vsel %vm991_vm10, %v1016_v54, %v1276_v55 }
 0x13a   : > { %1277 = vst [vmem:[%s1565_s7 + $0x1] sm:$0x1] %v1020_v56 }
 0x13b PF: > { %s15_s12 = sadd.s32 1, %s1437_s12  }
 0x13c   : > { %p12_p7 = scmp.ge.s32.totalorder %s15_s12, 4  }
 0x13e   :  { %14 = sbr.rel (!%p12_p7) target bundleno = 2 (0x2), region = 86 }
 0x143   :  { %1041 = vsyncpa [#allocation4], 1 }
 0x144   :  { %1043 = vsyncpa [#allocation4 + $0x1], 1 }
 0x145   :  { %1044 = vsyncpa [#allocation6], 1 }

// kernel: vgg_forward.7
= control target key start
LH: loop header
LB: loop body
LE: loop exit
PB: predicated region body
PF: predicated region fallthrough
CT: control target
= control target key end

     0   :  { %8 = vsyncpa [#allocation4], 0  ;;  %s2511_s0 = inlined_call_operand.vmem [shape: bf16[2,2,2,128], index: 0, kind: input, shape index: {}]   ;;  %s2512_s1 = inlined_call_operand.hbm [shape: bf16[9,128,256], index: 1, kind: input, shape index: {}]   ;;  %s2513_s2 = inlined_call_operand.hbm [shape: f32[1,256], index: 2, kind: input, shape index: {}]   ;;  %s2514_s3 = inlined_call_operand.vmem [shape: bf16[2,1,1,256], index: 3, kind: output, shape index: {}]  }
   0x1   :  { %9 = vsyncpa [#allocation6], 0  ;;  %s2415_s12 = smov 0  }
   0x2 LB: > { %s125_s15 = sshll.u32 %s2512_s1, 4  ;;  %s2424_s16 = sadd.s32 4294967295, %s2388_s12   ;;  %s2388_s12 = sphi %s2415_s12, %s15_s12   ;;  %s126_s15 = int_to_ptr.hbm [resolvable:$true] %s125_s15 }
   0x3   : > { %p1550_p0 = scmp.ge.s32.totalorder %s2388_s12, 1  ;;  %p114_p1 = scmp.lt.s32.totalorder %s2388_s12, 3 }
   0x4   : > { %p2297_p2 = scmp.eq.s32.totalorder %s2424_s16, 0  ;;  %s2390_s18 = smov [#allocation3]  }
   0x5   : > { %p2429_p3 = pnand %p1550_p0, %p114_p1  ;;  %s127_s19 = sshll.u32 %s2390_s18, 4  ;;  %s128_s19 = int_to_ptr.vmem [resolvable:$true] %s127_s19 }
   0x6   : > { %s140_s22 = sshll.u32 %s2513_s2, 4  ;;  %s2391_s23 = smov [#allocation5]   ;;  %s141_s22 = int_to_ptr.hbm [resolvable:$true] %s140_s22 }
   0x7   : > { %p2290_p4 = pneg %p2429_p3  ;;  %s142_s24 = sshll.u32 %s2391_s23, 4  ;;  %s143_s24 = int_to_ptr.vmem [resolvable:$true] %s142_s24 }
   0x8   : > { %s2392_s25 = smov 128   ;;  %s2393_s26 = smov 8  }
   0x9   : > { %p2291_p5 = pnand %p2297_p2, %p2290_p4  ;;  %162 = sbr.rel (%p2429_p3) target bundleno = 332 (0x14c), region = 32 }
   0xb   : > { %2293 = dma.hbm_to_vmem [thread:$0]  (!%p2291_p5), %s126_s15, 18432, %s128_s19, [#allocation4], %s2392_s25, %s2392_s25, %s2393_s26  }
   0xc   : > { %2296 = dma.hbm_to_vmem [thread:$0]  (!%p2291_p5), %s141_s22, 32, %s143_s24, [#allocation6]  }
   0xe   : > { %2379 = dma.done.wait (%p2297_p2), [#allocation4], 18432  }
   0xf   : > { %2381 = vsyncadd (%p2297_p2), [#allocation4], 4294948864 }
  0x10   : > { %2383 = dma.done.wait (%p2297_p2), [#allocation6], 32  }
  0x11   : > { %2385 = vsyncadd (%p2297_p2), [#allocation6], 4294967264  ;;  %v2394_v0 = vmov 0   ;;  %v1618_v1 = vld [vmem:[#allocation3 + $0xf0] sm:$0xf]  ;;  %p190_p6 = scmp.lt.s32.totalorder %s2424_s16, 1 }
  0x12   : > { %199 = vst [vmem:[#allocation2] sm:$0xf] %v2394_v0  ;;  %v2169_v2 = vld [vmem:[#allocation3 + $0xf4] sm:$0xf0]  ;;  %v2168_v3 = vld [vmem:[#allocation3 + $0xf4] sm:$0xf] }
  0x13   : > { %200 = vst [vmem:[#allocation2 + $0x4] sm:$0xf] %v2394_v0  ;;  %v1619_v4 = vor.u32 %v2169_v2, %v1618_v1  ;;  %v1620_v5 = vld [vmem:[#allocation3 + $0xf8] sm:$0xf0]  ;;  %v1682_v6 = vld [vmem:[#allocation3 + $0x70] sm:$0xf] }
  0x14   : > { %201 = vst [vmem:[#allocation2 + $0x8] sm:$0x3] %v2394_v0  ;;  %v2153_v7 = vld [vmem:[#allocation3 + $0x74] sm:$0xf0]  ;;  %v1623_v8 = vor.u32 %v2168_v3, %v1620_v5  ;;  %v2152_v10 = vld [vmem:[#allocation3 + $0x74] sm:$0xf] }
  0x15   : > { %v1683_v9 = vor.u32 %v2153_v7, %v1682_v6  ;;  %v1684_v11 = vld [vmem:[#allocation3 + $0x78] sm:$0xf0]  ;;  %v1610_v12 = vld [vmem:[#allocation3 + $0xe0] sm:$0xf]  ;;  %366 = vmatpush.bf16.msra.mxu0 %v1619_v4  ;;  %v2167_v14 = vld [vmem:[#allocation3 + $0xe4] sm:$0xf0] }
  0x16   : > { %v1687_v13 = vor.u32 %v2152_v10, %v1684_v11  ;;  %v2166_v15 = vld [vmem:[#allocation3 + $0xe4] sm:$0xf]  ;;  %v1612_v16 = vld [vmem:[#allocation3 + $0xe8] sm:$0xf0]  ;;  %379 = vmatpush.bf16.msra.mxu1 %v1623_v8  ;;  %v1611_v17 = vor.u32 %v2167_v14, %v1610_v12  ;;  %v1674_v19 = vld [vmem:[#allocation3 + $0x60] sm:$0xf] }
  0x17   : > { %472 = vmatpush.bf16.msra.mxu2 %v1683_v9  ;;  %v1615_v18 = vor.u32 %v2166_v15, %v1612_v16  ;;  %v2151_v20 = vld [vmem:[#allocation3 + $0x64] sm:$0xf0]  ;;  %v2150_v21 = vld [vmem:[#allocation3 + $0x64] sm:$0xf]  ;;  %v1676_v23 = vld [vmem:[#allocation3 + $0x68] sm:$0xf0] }
  0x18   : > { %485 = vmatpush.bf16.msra.mxu3 %v1687_v13  ;;  %v1675_v22 = vor.u32 %v2151_v20, %v1674_v19  ;;  %v1602_v24 = vld [vmem:[#allocation3 + $0xd0] sm:$0xf]  ;;  %v2165_v25 = vld [vmem:[#allocation3 + $0xd4] sm:$0xf0]  ;;  %v1679_v26 = vor.u32 %v2150_v21, %v1676_v23  ;;  %v2164_v27 = vld [vmem:[#allocation3 + $0xd4] sm:$0xf] }
  0x19   : > { %v1604_v28 = vld [vmem:[#allocation3 + $0xd8] sm:$0xf0]  ;;  %v1666_v29 = vld [vmem:[#allocation3 + $0x50] sm:$0xf]  ;;  %367 = vmatpush.bf16.msra.mxu0 %v1611_v17  ;;  %v1603_v30 = vor.u32 %v2165_v25, %v1602_v24  ;;  %v2149_v31 = vld [vmem:[#allocation3 + $0x54] sm:$0xf0] }
  0x1a   : > { %v2148_v32 = vld [vmem:[#allocation3 + $0x54] sm:$0xf]  ;;  %v1668_v33 = vld [vmem:[#allocation3 + $0x58] sm:$0xf0]  ;;  %380 = vmatpush.bf16.msra.mxu1 %v1615_v18  ;;  %v1607_v34 = vor.u32 %v2164_v27, %v1604_v28  ;;  %v1667_v35 = vor.u32 %v2149_v31, %v1666_v29  ;;  %v1594_v36 = vld [vmem:[#allocation3 + $0xc0] sm:$0xf] }
  0x1b   : > { %473 = vmatpush.bf16.msra.mxu2 %v1675_v22  ;;  %v2163_v37 = vld [vmem:[#allocation3 + $0xc4] sm:$0xf0]  ;;  %v2162_v38 = vld [vmem:[#allocation3 + $0xc4] sm:$0xf]  ;;  %v1671_v39 = vor.u32 %v2148_v32, %v1668_v33  ;;  %v1596_v40 = vld [vmem:[#allocation3 + $0xc8] sm:$0xf0] }
  0x1c   : > { %486 = vmatpush.bf16.msra.mxu3 %v1679_v26  ;;  %v1658_v41 = vld [vmem:[#allocation3 + $0x40] sm:$0xf]  ;;  %v2147_v42 = vld [vmem:[#allocation3 + $0x44] sm:$0xf0]  ;;  %v2146_v43 = vld [vmem:[#allocation3 + $0x44] sm:$0xf]  ;;  %v1595_v45 = vor.u32 %v2163_v37, %v1594_v36  ;;  %v1599_v46 = vor.u32 %v2162_v38, %v1596_v40 }
  0x1d   : > { %v1660_v44 = vld [vmem:[#allocation3 + $0x48] sm:$0xf0]  ;;  %368 = vmatpush.bf16.msra.mxu0 %v1603_v30  ;;  %v1659_v47 = vor.u32 %v2147_v42, %v1658_v41  ;;  %v1586_v48 = vld [vmem:[#allocation3 + $0xb0] sm:$0xf]  ;;  %v2161_v49 = vld [vmem:[#allocation3 + $0xb4] sm:$0xf0] }
  0x1e   : > { %381 = vmatpush.bf16.msra.mxu1 %v1607_v34  ;;  %v2160_v50 = vld [vmem:[#allocation3 + $0xb4] sm:$0xf]  ;;  %v1663_v51 = vor.u32 %v2146_v43, %v1660_v44  ;;  %v1588_v52 = vld [vmem:[#allocation3 + $0xb8] sm:$0xf0]  ;;  %v1650_v53 = vld [vmem:[#allocation3 + $0x30] sm:$0xf]  ;;  %v1587_v57 = vor.u32 %v2161_v49, %v1586_v48 }
  0x1f   : > { %474 = vmatpush.bf16.msra.mxu2 %v1667_v35  ;;  %v2145_v54 = vld [vmem:[#allocation3 + $0x34] sm:$0xf0]  ;;  %v2144_v55 = vld [vmem:[#allocation3 + $0x34] sm:$0xf]  ;;  %v1652_v56 = vld [vmem:[#allocation3 + $0x38] sm:$0xf0]  ;;  %v1591_v58 = vor.u32 %v2160_v50, %v1588_v52 }
  0x20   : > { %487 = vmatpush.bf16.msra.mxu3 %v1671_v39  ;;  %v1651_v59 = vor.u32 %v2145_v54, %v1650_v53  ;;  %v1578_v60 = vld [vmem:[#allocation3 + $0xa0] sm:$0xf]  ;;  %v2159_v61 = vld [vmem:[#allocation3 + $0xa4] sm:$0xf0]  ;;  %v2158_v62 = vld [vmem:[#allocation3 + $0xa4] sm:$0xf]  ;;  %v1655_v63 = vor.u32 %v2144_v55, %v1652_v56 }
  0x21   : > { %369 = vmatpush.bf16.msra.mxu0 %v1595_v45  ;;  %v1580_v0 = vld [vmem:[#allocation3 + $0xa8] sm:$0xf0]  ;;  %v1642_v1 = vld [vmem:[#allocation3 + $0x20] sm:$0xf]  ;;  %v2143_v2 = vld [vmem:[#allocation3 + $0x24] sm:$0xf0]  ;;  %v1579_v5 = vor.u32 %v2159_v61, %v1578_v60 }
  0x22   : > { %382 = vmatpush.bf16.msra.mxu1 %v1599_v46  ;;  %v2142_v3 = vld [vmem:[#allocation3 + $0x24] sm:$0xf]  ;;  %v1644_v4 = vld [vmem:[#allocation3 + $0x28] sm:$0xf0]  ;;  %s2521_s16 = smov (!%p190_p6, %s2424_s16), 1  ;;  %v1583_v6 = vor.u32 %v2158_v62, %v1580_v0  ;;  %v1643_v7 = vor.u32 %v2143_v2, %v1642_v1  ;;  %vm214_vm0 = vcmask 1043458  }
  0x23   : > { %475 = vmatpush.bf16.msra.mxu2 %v1659_v47  ;;  %v1570_v8 = vld [vmem:[#allocation3 + $0x90] sm:$0xf]  ;;  %v2157_v9 = vld [vmem:[#allocation3 + $0x94] sm:$0xf0]  ;;  %v2156_v10 = vld [vmem:[#allocation3 + $0x94] sm:$0xf]  ;;  %v1647_v11 = vor.u32 %v2142_v3, %v1644_v4 }
  0x24   : > { %488 = vmatpush.bf16.msra.mxu3 %v1663_v51  ;;  %v1572_v12 = vld [vmem:[#allocation3 + $0x98] sm:$0xf0]  ;;  %v1634_v13 = vld [vmem:[#allocation3 + $0x10] sm:$0xf]  ;;  %v2141_v14 = vld [vmem:[#allocation3 + $0x14] sm:$0xf0]  ;;  %v1571_v17 = vor.u32 %v2157_v9, %v1570_v8 }
  0x25   : > { %370 = vmatpush.bf16.msra.mxu0 %v1587_v57  ;;  %v2140_v15 = vld [vmem:[#allocation3 + $0x14] sm:$0xf]  ;;  %v1636_v16 = vld [vmem:[#allocation3 + $0x18] sm:$0xf0]  ;;  %v1562_v18 = vld [vmem:[#allocation3 + $0x80] sm:$0xf]  ;;  %v1575_v20 = vor.u32 %v2156_v10, %v1572_v12  ;;  %v1635_v21 = vor.u32 %v2141_v14, %v1634_v13 }
  0x26   : > { %383 = vmatpush.bf16.msra.mxu1 %v1591_v58  ;;  %v2155_v19 = vld [vmem:[#allocation3 + $0x84] sm:$0xf0]  ;;  %s1557_s27 = sshll.u32 %s2521_s16, 1  ;;  %v2154_v22 = vld [vmem:[#allocation3 + $0x84] sm:$0xf]  ;;  %v1639_v25 = vor.u32 %v2140_v15, %v1636_v16  ;;  %vm232_vm3 = vcmask 1041408  }
  0x27   : > { %476 = vmatpush.bf16.msra.mxu2 %v1651_v59  ;;  %v1564_v23 = vld [vmem:[#allocation3 + $0x88] sm:$0xf0]  ;;  %v1626_v24 = vld [vmem:[#allocation3] sm:$0xf]  ;;  %v2139_v26 = vld [vmem:[#allocation3 + $0x4] sm:$0xf0]  ;;  %v1563_v32 = vor.u32 %v2155_v19, %v1562_v18  ;;  %s2462_s30 = scalar_lea.vmem %s2511_s0, %s1557_s27  ;;  %s197_s6 = scalar_lea.vmem %s2514_s3, %s1557_s27 }
  0x28   : > { %489 = vmatpush.bf16.msra.mxu3 %v1655_v63  ;;  %v2138_v27 = vld [vmem:[#allocation3 + $0x4] sm:$0xf]  ;;  %v1628_v28 = vld [vmem:[#allocation3 + $0x8] sm:$0xf0]  ;;  %v1746_v29 = vld [vmem:[#allocation3 + $0x170] sm:$0xf]  ;;  %v1567_v36 = vor.u32 %v2154_v22, %v1564_v23  ;;  %v1627_v37 = vor.u32 %v2139_v26, %v1626_v24 }
  0x29   : > { %371 = vmatpush.bf16.msra.mxu0 %v1579_v5  ;;  %v2185_v30 = vld [vmem:[#allocation3 + $0x174] sm:$0xf0]  ;;  %v2184_v31 = vld [vmem:[#allocation3 + $0x174] sm:$0xf]  ;;  %v1748_v33 = vld [vmem:[#allocation3 + $0x178] sm:$0xf0]  ;;  %v1631_v40 = vor.u32 %v2138_v27, %v1628_v28 }
  0x2a   : > { %384 = vmatpush.bf16.msra.mxu1 %v1583_v6  ;;  %v1810_v34 = vld [vmem:[#allocation3 + $0x1f0] sm:$0xf]  ;;  %v2201_v35 = vld [vmem:[#allocation3 + $0x1f4] sm:$0xf0]  ;;  %v2200_v38 = vld [vmem:[#allocation3 + $0x1f4] sm:$0xf]  ;;  %v1747_v41 = vor.u32 %v2185_v30, %v1746_v29  ;;  %v1751_v42 = vor.u32 %v2184_v31, %v1748_v33 }
  0x2b   : > { %477 = vmatpush.bf16.msra.mxu2 %v1643_v7  ;;  %v1812_v39 = vld [vmem:[#allocation3 + $0x1f8] sm:$0xf0]  ;;  %v1811_v43 = vor.u32 %v2201_v35, %v1810_v34  ;;  %v1738_v44 = vld [vmem:[#allocation3 + $0x160] sm:$0xf]  ;;  %v2183_v45 = vld [vmem:[#allocation3 + $0x164] sm:$0xf0] }
  0x2c   : > { %490 = vmatpush.bf16.msra.mxu3 %v1647_v11  ;;  %v2182_v46 = vld [vmem:[#allocation3 + $0x164] sm:$0xf]  ;;  %v1815_v47 = vor.u32 %v2200_v38, %v1812_v39  ;;  %v1740_v48 = vld [vmem:[#allocation3 + $0x168] sm:$0xf0]  ;;  %v1802_v49 = vld [vmem:[#allocation3 + $0x1e0] sm:$0xf]  ;;  %v1739_v54 = vor.u32 %v2183_v45, %v1738_v44 }
  0x2d   : > { %372 = vmatpush.bf16.msra.mxu0 %v1571_v17  ;;  %v2199_v50 = vld [vmem:[#allocation3 + $0x1e4] sm:$0xf0]  ;;  %v2198_v51 = vld [vmem:[#allocation3 + $0x1e4] sm:$0xf]  ;;  %v1804_v52 = vld [vmem:[#allocation3 + $0x1e8] sm:$0xf0]  ;;  %v1743_v55 = vor.u32 %v2182_v46, %v1740_v48 }
  0x2e   : > { %385 = vmatpush.bf16.msra.mxu1 %v1575_v20  ;;  %v202_v53 = vld [vmem:[%s2462_s30] sm:$0x1]  ;;  %v1803_v56 = vor.u32 %v2199_v50, %v1802_v49  ;;  %v1730_v57 = vld [vmem:[#allocation3 + $0x150] sm:$0xf]  ;;  %v2181_v58 = vld [vmem:[#allocation3 + $0x154] sm:$0xf0]  ;;  %v1807_v60 = vor.u32 %v2198_v51, %v1804_v52 }
  0x2f   : > { %478 = vmatpush.bf16.msra.mxu2 %v1635_v21  ;;  %204 = vst [vmem:[#allocation1] ss:$4 sm:$0xff] %v202_v53  ;;  %v2180_v59 = vld [vmem:[#allocation3 + $0x154] sm:$0xf]  ;;  %v1732_v61 = vld [vmem:[#allocation3 + $0x158] sm:$0xf0]  ;;  %v1731_v2 = vor.u32 %v2181_v58, %v1730_v57 }
  0x30   : > { %491 = vmatpush.bf16.msra.mxu3 %v1639_v25  ;;  %v1794_v62 = vld [vmem:[#allocation3 + $0x1d0] sm:$0xf]  ;;  %v2197_v63 = vld [vmem:[#allocation3 + $0x1d4] sm:$0xf0]  ;;  %v2196_v0 = vld [vmem:[#allocation3 + $0x1d4] sm:$0xf]  ;;  %v1735_v5 = vor.u32 %v2180_v59, %v1732_v61 }
  0x31   : > { %373 = vmatpush.bf16.msra.mxu0 %v1563_v32  ;;  %v1796_v1 = vld [vmem:[#allocation3 + $0x1d8] sm:$0xf0]  ;;  %v1722_v3 = vld [vmem:[#allocation3 + $0x140] sm:$0xf]  ;;  %v2179_v4 = vld [vmem:[#allocation3 + $0x144] sm:$0xf0]  ;;  %v1795_v6 = vor.u32 %v2197_v63, %v1794_v62 }
  0x32   : > { %386 = vmatpush.bf16.msra.mxu1 %v1567_v36  ;;  %v2178_v7 = vld [vmem:[#allocation3 + $0x144] sm:$0xf]  ;;  %v1724_v8 = vld [vmem:[#allocation3 + $0x148] sm:$0xf0]  ;;  %v1799_v10 = vor.u32 %v2196_v0, %v1796_v1  ;;  %v1786_v11 = vld [vmem:[#allocation3 + $0x1c0] sm:$0xf]  ;;  %v1723_v16 = vor.u32 %v2179_v4, %v1722_v3 }
  0x33   : > { %479 = vmatpush.bf16.msra.mxu2 %v1627_v37  ;;  %v1559_v9 = vld [vmem:[%s2462_s30 + $0x1] sm:$0x1]  ;;  %v2195_v12 = vld [vmem:[#allocation3 + $0x1c4] sm:$0xf0]  ;;  %v2194_v13 = vld [vmem:[#allocation3 + $0x1c4] sm:$0xf]  ;;  %v1727_v20 = vor.u32 %v2178_v7, %v1724_v8 }
  0x34   : > { %492 = vmatpush.bf16.msra.mxu3 %v1631_v40  ;;  %v1788_v14 = vld [vmem:[#allocation3 + $0x1c8] sm:$0xf0]  ;;  %vm215_vm1 = vsmask.f32 3338  ;;  %v1714_v19 = vld [vmem:[#allocation3 + $0x130] sm:$0xf]  ;;  %v1787_v21 = vor.u32 %v2195_v12, %v1786_v11 }
  0x35   : > { %601 = vmatpush.bf16.msrb.mxu0 %v1747_v41  ;;  %v2177_v22 = vld [vmem:[#allocation3 + $0x134] sm:$0xf0]  ;;  %v2176_v23 = vld [vmem:[#allocation3 + $0x134] sm:$0xf]  ;;  %v1716_v24 = vld [vmem:[#allocation3 + $0x138] sm:$0xf0]  ;;  %v1791_v25 = vor.u32 %v2194_v13, %v1788_v14 }
  0x36   : > { %614 = vmatpush.bf16.msrb.mxu1 %v1751_v42  ;;  %v205_v15 = vld [vmem:[#allocation1] sm:$0xff]  ;;  %vm2468_vm2 = vmand %vm214_vm0, %vm215_vm1  ;;  %v2193_v30 = vld [vmem:[#allocation3 + $0x1b4] sm:$0xf0]  ;;  %v1715_v35 = vor.u32 %v2177_v22, %v1714_v19  ;;  %v1719_v37 = vor.u32 %v2176_v23, %v1716_v24  ;;  %vm233_vm4 = vsmask.f32 1282  ;;  %vm1458_vm6 = vcmask 1040384  }
  0x37   : > { %735 = vmatpush.bf16.msrb.mxu2 %v1811_v43  ;;  %v206_v17 = vshrl.u32 %v205_v15, 16  ;;  %v209_v18 = vshll.u32 %v205_v15, 16  ;;  %223 = vst [vmem:[#allocation1] ss:$4 sm:$0xff] %v1559_v9  ;;  %v1778_v29 = vld [vmem:[#allocation3 + $0x1b0] sm:$0xf]  ;;  %vm2476_vm5 = vmand %vm232_vm3, %vm233_vm4 }
  0x38   : > { %748 = vmatpush.bf16.msrb.mxu3 %v1815_v47  ;;  %v217_v31 = vld [vmem:[#allocation2] sm:$0xc]  ;;  %v1780_v33 = vld [vmem:[#allocation3 + $0x1b8] sm:$0xf0]  ;;  %v1706_v36 = vld [vmem:[#allocation3 + $0x120] sm:$0xf]  ;;  %v1779_v38 = vor.u32 %v2193_v30, %v1778_v29 }
  0x39   : > { %602 = vmatpush.bf16.msrb.mxu0 %v1739_v54  ;;  %v208_v26 = vrot.slane %v206_v17, 5  ;;  %v211_v27 = vrot.slane %v209_v18, 6  ;;  %v2192_v32 = vld [vmem:[#allocation3 + $0x1b4] sm:$0xf]  ;;  %v2175_v39 = vld [vmem:[#allocation3 + $0x124] sm:$0xf0] }
  0x3a   : > { %615 = vmatpush.bf16.msrb.mxu1 %v1743_v55  ;;  %v2174_v40 = vld [vmem:[#allocation3 + $0x124] sm:$0xf]  ;;  %v1708_v41 = vld [vmem:[#allocation3 + $0x128] sm:$0xf0]  ;;  %v1783_v43 = vor.u32 %v2192_v32, %v1780_v33  ;;  %v1770_v44 = vld [vmem:[#allocation3 + $0x1a0] sm:$0xf]  ;;  %v1707_v51 = vor.u32 %v2175_v39, %v1706_v36 }
  0x3b   : > { %736 = vmatpush.bf16.msrb.mxu2 %v1803_v56  ;;  %v212_v34 = vor.u32 %v211_v27, %v208_v26  ;;  %v2191_v45 = vld [vmem:[#allocation3 + $0x1a4] sm:$0xf0]  ;;  %v2190_v46 = vld [vmem:[#allocation3 + $0x1a4] sm:$0xf]  ;;  %v1772_v48 = vld [vmem:[#allocation3 + $0x1a8] sm:$0xf0]  ;;  %v1711_v54 = vor.u32 %v2174_v40, %v1708_v41 }
  0x3c   : > { %749 = vmatpush.bf16.msrb.mxu3 %v1807_v60  ;;  %v1698_v52 = vld [vmem:[#allocation3 + $0x110] sm:$0xf]  ;;  %v235_v53 = vld [vmem:[#allocation2 + $0x4] sm:$0x3]  ;;  %v1771_v55 = vor.u32 %v2191_v45, %v1770_v44  ;;  %v2172_v57 = vld [vmem:[#allocation3 + $0x114] sm:$0xf]  ;;  %v1775_v60 = vor.u32 %v2190_v46, %v1772_v48 }
  0x3d   : > { %603 = vmatpush.bf16.msrb.mxu0 %v1731_v2  ;;  %v218_v42 = vsel %vm2468_vm2, %v212_v34, %v217_v31  ;;  %v2173_v56 = vld [vmem:[#allocation3 + $0x114] sm:$0xf0]  ;;  %v1700_v58 = vld [vmem:[#allocation3 + $0x118] sm:$0xf0]  ;;  %v1762_v61 = vld [vmem:[#allocation3 + $0x190] sm:$0xf] }
  0x3e   : > { %616 = vmatpush.bf16.msrb.mxu1 %v1735_v5  ;;  %219 = vst [vmem:[#allocation2] sm:$0xc] %v218_v42  ;;  %v224_v47 = vld [vmem:[#allocation1] sm:$0xff]  ;;  %v2189_v62 = vld [vmem:[#allocation3 + $0x194] sm:$0xf0]  ;;  %v1699_v3 = vor.u32 %v2173_v56, %v1698_v52  ;;  %v1703_v7 = vor.u32 %v2172_v57, %v1700_v58  ;;  %vm1466_vm8 = vcmask 1041409  }
  0x3f   : > { %737 = vmatpush.bf16.msrb.mxu2 %v1795_v6  ;;  %v225_v49 = vshrl.u32 %v224_v47, 16  ;;  %v228_v50 = vshll.u32 %v224_v47, 16  ;;  %v2188_v0 = vld [vmem:[#allocation3 + $0x194] sm:$0xf]  ;;  %v1764_v1 = vld [vmem:[#allocation3 + $0x198] sm:$0xf0]  ;;  %v1763_v8 = vor.u32 %v2189_v62, %v1762_v61 }
  0x40   : > { %750 = vmatpush.bf16.msrb.mxu3 %v1799_v10  ;;  %v1690_v4 = vld [vmem:[#allocation3 + $0x100] sm:$0xf]  ;;  %v2171_v5 = vld [vmem:[#allocation3 + $0x104] sm:$0xf0]  ;;  %v2170_v6 = vld [vmem:[#allocation3 + $0x104] sm:$0xf]  ;;  %v1767_v14 = vor.u32 %v2188_v0, %v1764_v1 }
  0x41   : > { %604 = vmatpush.bf16.msrb.mxu0 %v1723_v16  ;;  %v227_v59 = vrot.slane %v225_v49, 7  ;;  %v1692_v9 = vld [vmem:[#allocation3 + $0x108] sm:$0xf0]  ;;  %v1754_v10 = vld [vmem:[#allocation3 + $0x180] sm:$0xf]  ;;  %v1691_v19 = vor.u32 %v2171_v5, %v1690_v4 }
  0x42   : > { %617 = vmatpush.bf16.msrb.mxu1 %v1727_v20  ;;  %v2187_v11 = vld [vmem:[#allocation3 + $0x184] sm:$0xf0]  ;;  %v2186_v15 = vld [vmem:[#allocation3 + $0x184] sm:$0xf]  ;;  %v1756_v16 = vld [vmem:[#allocation3 + $0x188] sm:$0xf0]  ;;  %v1695_v22 = vor.u32 %v2170_v6, %v1692_v9 }
  0x43   : > { %738 = vmatpush.bf16.msrb.mxu2 %v1787_v21  ;;  %v230_v2 = vor.u32 %v228_v50, %v227_v59  ;;  %v1938_v17 = vld [vmem:[#allocation3 + $0x2f0] sm:$0xf]  ;;  %v2233_v18 = vld [vmem:[#allocation3 + $0x2f4] sm:$0xf0]  ;;  %v2232_v20 = vld [vmem:[#allocation3 + $0x2f4] sm:$0xf]  ;;  %v1755_v23 = vor.u32 %v2187_v11, %v1754_v10  ;;  %v1759_v24 = vor.u32 %v2186_v15, %v1756_v16 }
  0x44   : > { %751 = vmatpush.bf16.msrb.mxu3 %v1791_v25  ;;  %v1940_v21 = vld [vmem:[#allocation3 + $0x2f8] sm:$0xf0]  ;;  %v1939_v25 = vor.u32 %v2233_v18, %v1938_v17  ;;  %v1930_v28 = vld [vmem:[#allocation3 + $0x2e0] sm:$0xf]  ;;  %v2231_v29 = vld [vmem:[#allocation3 + $0x2e4] sm:$0xf0] }
  0x45   : > { %605 = vmatpush.bf16.msrb.mxu0 %v1715_v35  ;;  %v236_v12 = vsel %vm2476_vm5, %v230_v2, %v235_v53  ;;  %v238_v13 = vld [vmem:[#allocation2] sm:$0xf]  ;;  %v1943_v27 = vor.u32 %v2232_v20, %v1940_v21  ;;  %v2230_v30 = vld [vmem:[#allocation3 + $0x2e4] sm:$0xf]  ;;  %v1932_v31 = vld [vmem:[#allocation3 + $0x2e8] sm:$0xf0]  ;;  %v1931_v36 = vor.u32 %v2231_v29, %v1930_v28 }
  0x46   : > { %618 = vmatpush.bf16.msrb.mxu1 %v1719_v37  ;;  %237 = vst [vmem:[#allocation2 + $0x4] sm:$0x3] %v236_v12  ;;  %480 = vmatmul.bf16.vlgmr.msra.gmra.mxu2 %v238_v13  ;;  %v2482_v26 = vld [vmem:[#allocation2] sm:$0xc]  ;;  %v275_v32 = vunpack.c.l.b16 %v238_v13  ;;  %v1935_v39 = vor.u32 %v2230_v30, %v1932_v31  ;;  %v1922_v40 = vld [vmem:[#allocation3 + $0x2d0] sm:$0xf] }
  0x47   : > { %739 = vmatpush.bf16.msrb.mxu2 %v1779_v38  ;;  %493 = vmatmul.bf16.vlgmr.msra.gmra.mxu3 %v238_v13  ;;  %v650_v33 = vunpack.c.l.b16 %v2482_v26  ;;  %v2229_v41 = vld [vmem:[#allocation3 + $0x2d4] sm:$0xf0]  ;;  %v2228_v44 = vld [vmem:[#allocation3 + $0x2d4] sm:$0xf]  ;;  %v1924_v45 = vld [vmem:[#allocation3 + $0x2d8] sm:$0xf0] }
  0x48   : > { %752 = vmatpush.bf16.msrb.mxu3 %v1783_v43  ;;  %v1874_v46 = vld [vmem:[#allocation3 + $0x270] sm:$0xf]  ;;  %v2217_v47 = vld [vmem:[#allocation3 + $0x274] sm:$0xf0]  ;;  %v2216_v48 = vld [vmem:[#allocation3 + $0x274] sm:$0xf]  ;;  %v1923_v49 = vor.u32 %v2229_v41, %v1922_v40 }
  0x49   : > { %606 = vmatpush.bf16.msrb.mxu0 %v1707_v51  ;;  %v1876_v52 = vld [vmem:[#allocation3 + $0x278] sm:$0xf0]  ;;  %v2227_v56 = vld [vmem:[#allocation3 + $0x2c4] sm:$0xf0]  ;;  %v2226_v58 = vld [vmem:[#allocation3 + $0x2c4] sm:$0xf] }
  0x4a   : > { %619 = vmatpush.bf16.msrb.mxu1 %v1711_v54  ;;  %v1927_v54 = vor.u32 %v2228_v44, %v1924_v45  ;;  %v1916_v59 = vld [vmem:[#allocation3 + $0x2c8] sm:$0xf0]  ;;  %v1879_v61 = vor.u32 %v2216_v48, %v1876_v52  ;;  %v1866_v62 = vld [vmem:[#allocation3 + $0x260] sm:$0xf]  ;;  %v2215_v0 = vld [vmem:[#allocation3 + $0x264] sm:$0xf0] }
  0x4b   : > { %740 = vmatpush.bf16.msrb.mxu2 %v1771_v55  ;;  %v1914_v55 = vld [vmem:[#allocation3 + $0x2c0] sm:$0xf]  ;;  %v2214_v1 = vld [vmem:[#allocation3 + $0x264] sm:$0xf]  ;;  %v1868_v2 = vld [vmem:[#allocation3 + $0x268] sm:$0xf0]  ;;  %v1919_v5 = vor.u32 %v2226_v58, %v1916_v59  ;;  %v1867_v10 = vor.u32 %v2215_v0, %v1866_v62 }
  0x4c   : > { %753 = vmatpush.bf16.msrb.mxu3 %v1775_v60  ;;  %v1875_v60 = vor.u32 %v2217_v47, %v1874_v46  ;;  %v498_v4 = vld [vmem:[#allocation2] sm:$0xe]  ;;  %v1906_v6 = vld [vmem:[#allocation3 + $0x2b0] sm:$0xf]  ;;  %v1908_v9 = vld [vmem:[#allocation3 + $0x2b8] sm:$0xf0]  ;;  %v1871_v11 = vor.u32 %v2214_v1, %v1868_v2 }
  0x4d   : > { %607 = vmatpush.bf16.msrb.mxu0 %v1699_v3  ;;  %v2485_v34 = vld [vmem:[#allocation2 + $0x4] sm:$0x1]  ;;  %v1915_v3 = vor.u32 %v2227_v56, %v1914_v55  ;;  %v1858_v12 = vld [vmem:[#allocation3 + $0x250] sm:$0xf]  ;;  %v517_v13 = vunpack.c.l.b16 %v498_v4  ;;  %v2212_v15 = vld [vmem:[#allocation3 + $0x254] sm:$0xf] }
  0x4e   : > { %620 = vmatpush.bf16.msrb.mxu1 %v1703_v7  ;;  %v630_v35 = vld [vmem:[#allocation2 + $0x4] sm:$0x3]  ;;  %v276_v37 = vunpack.c.l.b16 %v2485_v34  ;;  %v1860_v16 = vld [vmem:[#allocation3 + $0x258] sm:$0xf0]  ;;  %v2223_v20 = vld [vmem:[#allocation3 + $0x2a4] sm:$0xf0] }
  0x4f   : > { %741 = vmatpush.bf16.msrb.mxu2 %v1763_v8  ;;  %v651_v38 = vunpack.c.l.b16 %v630_v35  ;;  %v2225_v7 = vld [vmem:[#allocation3 + $0x2b4] sm:$0xf0]  ;;  %v2224_v8 = vld [vmem:[#allocation3 + $0x2b4] sm:$0xf]  ;;  %v2222_v21 = vld [vmem:[#allocation3 + $0x2a4] sm:$0xf] }
  0x50   : > { %754 = vmatpush.bf16.msrb.mxu3 %v1767_v14  ;;  %v277_v42 = vpack.c.b16 %v276_v37, %v275_v32  ;;  %v2213_v14 = vld [vmem:[#allocation3 + $0x254] sm:$0xf0]  ;;  %v1907_v17 = vor.u32 %v2225_v7, %v1906_v6  ;;  %v1911_v18 = vor.u32 %v2224_v8, %v1908_v9  ;;  %v2211_v28 = vld [vmem:[#allocation3 + $0x244] sm:$0xf0]  ;;  %v2210_v29 = vld [vmem:[#allocation3 + $0x244] sm:$0xf] }
  0x51   : > { %608 = vmatpush.bf16.msrb.mxu0 %v1691_v19  ;;  %v652_v43 = vpack.c.b16 %v651_v38, %v650_v33  ;;  %v1898_v19 = vld [vmem:[#allocation3 + $0x2a0] sm:$0xf]  ;;  %v1852_v30 = vld [vmem:[#allocation3 + $0x248] sm:$0xf0]  ;;  %v1890_v35 = vld [vmem:[#allocation3 + $0x290] sm:$0xf] }
  0x52   : > { %621 = vmatpush.bf16.msrb.mxu1 %v1695_v22  ;;  %v279_v50 = vshrl.u32 %v277_v42, 16  ;;  %v281_v51 = vshll.u32 %v277_v42, 16  ;;  %v1900_v22 = vld [vmem:[#allocation3 + $0x2a8] sm:$0xf0]  ;;  %v1899_v31 = vor.u32 %v2223_v20, %v1898_v19  ;;  %v901_v38 = vld [vmem:[#allocation2] sm:$0x8] }
  0x53   : > { %742 = vmatpush.bf16.msrb.mxu2 %v1755_v23  ;;  %v653_v53 = vrot.slane %v652_v43, 2  ;;  %v1859_v23 = vor.u32 %v2213_v14, %v1858_v12  ;;  %v1903_v32 = vor.u32 %v2222_v21, %v1900_v22  ;;  %v1892_v40 = vld [vmem:[#allocation3 + $0x298] sm:$0xf0]  ;;  %v763_v41 = vld [vmem:[#allocation2 + $0x4] sm:$0x7]  ;;  %v1855_v43 = vor.u32 %v2210_v29, %v1852_v30 }
  0x54   : > { %755 = vmatpush.bf16.msrb.mxu3 %v1759_v24  ;;  %v283_v57 = vrot.slane %v281_v51, 1  ;;  %v1863_v24 = vor.u32 %v2212_v15, %v1860_v16  ;;  %v1842_v44 = vld [vmem:[#allocation3 + $0x230] sm:$0xf]  ;;  %v2209_v34 = vld [vmem:[#allocation3 + $0x234] sm:$0xf0]  ;;  %v920_v48 = vunpack.c.l.b16 %v901_v38 }
  0x55   : > { %v2208_v45 = vld [vmem:[#allocation3 + $0x234] sm:$0xf]  ;;  %v1844_v46 = vld [vmem:[#allocation3 + $0x238] sm:$0xf0]  ;;  %v2219_v51 = vld [vmem:[#allocation3 + $0x284] sm:$0xf0] }
  0x56   : > { %v284_v63 = vor.u32 %v283_v57, %v279_v50  ;;  %743 = vmatmul.bf16.vlgmr.msrb.gmra.mxu2 %v653_v53  ;;  %v1882_v50 = vld [vmem:[#allocation3 + $0x280] sm:$0xf]  ;;  %v2218_v52 = vld [vmem:[#allocation3 + $0x284] sm:$0xf]  ;;  %v2066_v55 = vld [vmem:[#allocation3 + $0x3f0] sm:$0xf]  ;;  %v1843_v57 = vor.u32 %v2209_v34, %v1842_v44  ;;  %v1847_v58 = vor.u32 %v2208_v45, %v1844_v46 }
  0x57   : > { %1004 = vmatpush.bf16.msra.mxu2 %v1939_v25  ;;  %756 = vmatmul.bf16.vlgmr.msrb.gmra.mxu3 %v653_v53  ;;  %v1850_v25 = vld [vmem:[#allocation3 + $0x240] sm:$0xf]  ;;  %v782_v53 = vunpack.c.l.b16 %v763_v41  ;;  %v2265_v56 = vld [vmem:[#allocation3 + $0x3f4] sm:$0xf0]  ;;  %v2207_v62 = vld [vmem:[#allocation3 + $0x224] sm:$0xf0]  ;;  %v1883_v1 = vor.u32 %v2219_v51, %v1882_v50 }
  0x58   : > { %1017 = vmatpush.bf16.msra.mxu3 %v1943_v27  ;;  %374 = vmatmul.bf16.vlgmr.msra.gmra.mxu0 %v284_v63  ;;  %v518_v27 = vpack.c.b16 %v276_v37, %v517_v13  ;;  %v1851_v42 = vor.u32 %v2211_v28, %v1850_v25  ;;  %v1834_v59 = vld [vmem:[#allocation3 + $0x220] sm:$0xf]  ;;  %v1836_v0 = vld [vmem:[#allocation3 + $0x228] sm:$0xf0]  ;;  %v2067_v4 = vor.u32 %v2265_v56, %v2066_v55  ;;  %v1826_v6 = vld [vmem:[#allocation3 + $0x210] sm:$0xf] }
  0x59   : > { %387 = vmatmul.bf16.vlgmr.msra.gmra.mxu1 %v284_v63  ;;  %873 = vmatpush.bf16.msra.mxu0 %v1875_v60  ;;  %v2264_v60 = vld [vmem:[#allocation3 + $0x3f4] sm:$0xf]  ;;  %v2206_v63 = vld [vmem:[#allocation3 + $0x224] sm:$0xf]  ;;  %v921_v2 = vpack.c.b16 %v782_v53, %v920_v48  ;;  %v2058_v8 = vld [vmem:[#allocation3 + $0x3e0] sm:$0xf] }
  0x5a   : > { %886 = vmatpush.bf16.msra.mxu1 %v1879_v61  ;;  %v519_v37 = vrot.slane %v518_v27, 1  ;;  %v2068_v61 = vld [vmem:[#allocation3 + $0x3f8] sm:$0xf0]  ;;  %v2263_v9 = vld [vmem:[#allocation3 + $0x3e4] sm:$0xf0] }
  0x5b   : > { %1005 = vmatpush.bf16.msra.mxu2 %v1931_v36  ;;  %v2221_v36 = vld [vmem:[#allocation3 + $0x294] sm:$0xf0]  ;;  %v2071_v7 = vor.u32 %v2264_v60, %v2068_v61  ;;  %v2262_v13 = vld [vmem:[#allocation3 + $0x3e4] sm:$0xf]  ;;  %v2060_v14 = vld [vmem:[#allocation3 + $0x3e8] sm:$0xf0] }
  0x5c   : > { %1018 = vmatpush.bf16.msra.mxu3 %v1935_v39  ;;  %v2220_v39 = vld [vmem:[#allocation3 + $0x294] sm:$0xf]  ;;  %v1891_v47 = vor.u32 %v2221_v36, %v1890_v35  ;;  %v2205_v12 = vld [vmem:[#allocation3 + $0x214] sm:$0xf0]  ;;  %v1828_v16 = vld [vmem:[#allocation3 + $0x218] sm:$0xf0]  ;;  %v2063_v20 = vor.u32 %v2262_v13, %v2060_v14 }
  0x5d   : > { %874 = vmatpush.bf16.msra.mxu0 %v1867_v10  ;;  %v1835_v10 = vor.u32 %v2207_v62, %v1834_v59  ;;  %v2204_v15 = vld [vmem:[#allocation3 + $0x214] sm:$0xf]  ;;  %v1818_v26 = vld [vmem:[#allocation3 + $0x200] sm:$0xf]  ;;  %v2050_v21 = vld [vmem:[#allocation3 + $0x3d0] sm:$0xf] }
  0x5e   : > { %887 = vmatpush.bf16.msra.mxu1 %v1871_v11  ;;  %v1839_v11 = vor.u32 %v2206_v63, %v1836_v0  ;;  %v2261_v22 = vld [vmem:[#allocation3 + $0x3d4] sm:$0xf0]  ;;  %v2203_v25 = vld [vmem:[#allocation3 + $0x204] sm:$0xf0]  ;;  %v2260_v27 = vld [vmem:[#allocation3 + $0x3d4] sm:$0xf] }
  0x5f   : > { %1006 = vmatpush.bf16.msra.mxu2 %v1923_v49  ;;  %v1895_v49 = vor.u32 %v2220_v39, %v1892_v40  ;;  %v2052_v28 = vld [vmem:[#allocation3 + $0x3d8] sm:$0xf0]  ;;  %v2202_v29 = vld [vmem:[#allocation3 + $0x204] sm:$0xf]  ;;  %v1820_v30 = vld [vmem:[#allocation3 + $0x208] sm:$0xf0]  ;;  %v2051_v38 = vor.u32 %v2261_v22, %v2050_v21  ;;  %v1819_v44 = vor.u32 %v2203_v25, %v1818_v26 }
  0x60   : > { %1019 = vmatpush.bf16.msra.mxu3 %v1927_v54  ;;  %v1884_v54 = vld [vmem:[#allocation3 + $0x288] sm:$0xf0]  ;;  %v2248_v35 = vld [vmem:[#allocation3 + $0x374] sm:$0xf]  ;;  %v2004_v36 = vld [vmem:[#allocation3 + $0x378] sm:$0xf0]  ;;  %v2055_v41 = vor.u32 %v2260_v27, %v2052_v28  ;;  %v1823_v34 = vor.u32 %v2202_v29, %v1820_v30 }
  0x61   : > { %875 = vmatpush.bf16.msra.mxu0 %v1859_v23  ;;  %v1827_v23 = vor.u32 %v2205_v12, %v1826_v6  ;;  %v2007_v45 = vor.u32 %v2248_v35, %v2004_v36  ;;  %v1994_v46 = vld [vmem:[#allocation3 + $0x360] sm:$0xf]  ;;  %v2044_v48 = vld [vmem:[#allocation3 + $0x3c8] sm:$0xf0]  ;;  %v2246_v50 = vld [vmem:[#allocation3 + $0x364] sm:$0xf] }
  0x62   : > { %888 = vmatpush.bf16.msra.mxu1 %v1863_v24  ;;  %v1831_v24 = vor.u32 %v2204_v15, %v1828_v16  ;;  %v1996_v51 = vld [vmem:[#allocation3 + $0x368] sm:$0xf0]  ;;  %v2257_v55 = vld [vmem:[#allocation3 + $0x3b4] sm:$0xf0]  ;;  %v1986_v56 = vld [vmem:[#allocation3 + $0x350] sm:$0xf] }
  0x63   : > { %1007 = vmatpush.bf16.msra.mxu2 %v1915_v3  ;;  %v1887_v3 = vor.u32 %v2218_v52, %v1884_v54  ;;  %v2034_v54 = vld [vmem:[#allocation3 + $0x3b0] sm:$0xf]  ;;  %v1999_v60 = vor.u32 %v2246_v50, %v1996_v51  ;;  %v2256_v61 = vld [vmem:[#allocation3 + $0x3b4] sm:$0xf]  ;;  %v2036_v62 = vld [vmem:[#allocation3 + $0x3b8] sm:$0xf0] }
  0x64   : > { %1020 = vmatpush.bf16.msra.mxu3 %v1919_v5  ;;  %v783_v5 = vpack.c.b16 %v782_v53, %v650_v33  ;;  %v2496_v63 = vld [vmem:[#allocation2 + $0x8] sm:$0x1]  ;;  %v2245_v0 = vld [vmem:[#allocation3 + $0x354] sm:$0xf0]  ;;  %v2026_v6 = vld [vmem:[#allocation3 + $0x3a0] sm:$0xf] }
  0x65   : > { %876 = vmatpush.bf16.msra.mxu0 %v1851_v42  ;;  %v2042_v42 = vld [vmem:[#allocation3 + $0x3c0] sm:$0xf]  ;;  %v2254_v12 = vld [vmem:[#allocation3 + $0x3a4] sm:$0xf]  ;;  %v2028_v13 = vld [vmem:[#allocation3 + $0x3a8] sm:$0xf0] }
  0x66   : > { %889 = vmatpush.bf16.msra.mxu1 %v1855_v43  ;;  %v785_v33 = vshrl.u32 %v783_v5, 16  ;;  %v788_v19 = vshll.u32 %v783_v5, 16  ;;  %v2259_v43 = vld [vmem:[#allocation3 + $0x3c4] sm:$0xf0]  ;;  %v1180_v5 = vunpack.c.l.b16 %v2496_v63  ;;  %v2242_v15 = vld [vmem:[#allocation3 + $0x344] sm:$0xf] }
  0x67   : > { %1008 = vmatpush.bf16.msra.mxu2 %v1907_v17  ;;  %v922_v17 = vrot.slane %v921_v2, 3  ;;  %v2043_v52 = vor.u32 %v2259_v43, %v2042_v42  ;;  %v1988_v2 = vld [vmem:[#allocation3 + $0x358] sm:$0xf0]  ;;  %v2243_v14 = vld [vmem:[#allocation3 + $0x344] sm:$0xf0] }
  0x68   : > { %1021 = vmatpush.bf16.msra.mxu3 %v1911_v18  ;;  %609 = vmatmul.bf16.vlgmr.msrb.gmra.mxu0 %v519_v37  ;;  %v2059_v18 = vor.u32 %v2263_v9, %v2058_v8  ;;  %v787_v39 = vrot.slane %v785_v33, 2  ;;  %v790_v40 = vrot.slane %v788_v19, 3  ;;  %v2039_v8 = vor.u32 %v2256_v61, %v2036_v62  ;;  %v1980_v16 = vld [vmem:[#allocation3 + $0x348] sm:$0xf0]  ;;  %v2018_v26 = vld [vmem:[#allocation3 + $0x390] sm:$0xf] }
  0x69   : > { %622 = vmatmul.bf16.vlgmr.msrb.gmra.mxu1 %v519_v37  ;;  %877 = vmatpush.bf16.msra.mxu0 %v1843_v57  ;;  %v1987_v9 = vor.u32 %v2245_v0, %v1986_v56  ;;  %v2253_v33 = vld [vmem:[#allocation3 + $0x394] sm:$0xf0]  ;;  %v1970_v19 = vld [vmem:[#allocation3 + $0x330] sm:$0xf]  ;;  %v1983_v22 = vor.u32 %v2242_v15, %v1980_v16  ;;  %v2020_v25 = vld [vmem:[#allocation3 + $0x398] sm:$0xf0] }
  0x6a   : > { %890 = vmatpush.bf16.msra.mxu1 %v1847_v58  ;;  %v791_v53 = vor.u32 %v790_v40, %v787_v39  ;;  %v1158_v58 = vld [vmem:[#allocation2 + $0x4] sm:$0xf]  ;;  %v2240_v27 = vld [vmem:[#allocation3 + $0x334] sm:$0xf]  ;;  %v1972_v28 = vld [vmem:[#allocation3 + $0x338] sm:$0xf0]  ;;  %v2019_v29 = vor.u32 %v2253_v33, %v2018_v26 }
  0x6b   : > { %1009 = vmatpush.bf16.msra.mxu2 %v1899_v31  ;;  %v2002_v31 = vld [vmem:[#allocation3 + $0x370] sm:$0xf]  ;;  %v1962_v35 = vld [vmem:[#allocation3 + $0x320] sm:$0xf]  ;;  %v1975_v39 = vor.u32 %v2240_v27, %v1972_v28  ;;  %v2239_v40 = vld [vmem:[#allocation3 + $0x324] sm:$0xf0] }
  0x6c   : > { %1022 = vmatpush.bf16.msra.mxu3 %v1903_v32  ;;  %v2249_v32 = vld [vmem:[#allocation3 + $0x374] sm:$0xf0]  ;;  %v2012_v42 = vld [vmem:[#allocation3 + $0x388] sm:$0xf0]  ;;  %v2238_v43 = vld [vmem:[#allocation3 + $0x324] sm:$0xf] }
  0x6d   : > { %878 = vmatpush.bf16.msra.mxu0 %v1835_v10  ;;  %v2003_v37 = vor.u32 %v2249_v32, %v2002_v31  ;;  %v2010_v31 = vld [vmem:[#allocation3 + $0x380] sm:$0xf]  ;;  %v2251_v32 = vld [vmem:[#allocation3 + $0x384] sm:$0xf0]  ;;  %v2237_v50 = vld [vmem:[#allocation3 + $0x314] sm:$0xf0] }
  0x6e   : > { %891 = vmatpush.bf16.msra.mxu1 %v1839_v11  ;;  %v1978_v11 = vld [vmem:[#allocation3 + $0x340] sm:$0xf]  ;;  %v2236_v51 = vld [vmem:[#allocation3 + $0x314] sm:$0xf]  ;;  %v2281_v61 = vld [vmem:[#allocation3 + $0x474] sm:$0xf0] }
  0x6f   : > { %1010 = vmatpush.bf16.msra.mxu2 %v1891_v47  ;;  %v2258_v47 = vld [vmem:[#allocation3 + $0x3c4] sm:$0xf]  ;;  %v1979_v21 = vor.u32 %v2243_v14, %v1978_v11  ;;  %v1946_v56 = vld [vmem:[#allocation3 + $0x300] sm:$0xf]  ;;  %v2280_v62 = vld [vmem:[#allocation3 + $0x474] sm:$0xf] }
  0x70   : > { %1023 = vmatpush.bf16.msra.mxu3 %v1895_v49  ;;  %v2247_v49 = vld [vmem:[#allocation3 + $0x364] sm:$0xf0]  ;;  %v2047_v57 = vor.u32 %v2258_v47, %v2044_v48  ;;  %v1963_v47 = vor.u32 %v2239_v40, %v1962_v35  ;;  %v2132_v0 = vld [vmem:[#allocation3 + $0x478] sm:$0xf0]  ;;  %v2277_v14 = vld [vmem:[#allocation3 + $0x454] sm:$0xf0] }
  0x71   : > { %879 = vmatpush.bf16.msra.mxu0 %v1827_v23  ;;  %v1995_v59 = vor.u32 %v2247_v49, %v1994_v46  ;;  %v2241_v23 = vld [vmem:[#allocation3 + $0x334] sm:$0xf0]  ;;  %v1954_v49 = vld [vmem:[#allocation3 + $0x310] sm:$0xf]  ;;  %v2276_v15 = vld [vmem:[#allocation3 + $0x454] sm:$0xf] }
  0x72   : > { %892 = vmatpush.bf16.msra.mxu1 %v1831_v24  ;;  %v2252_v24 = vld [vmem:[#allocation3 + $0x394] sm:$0xf]  ;;  %v2116_v16 = vld [vmem:[#allocation3 + $0x458] sm:$0xf0]  ;;  %v2106_v26 = vld [vmem:[#allocation3 + $0x440] sm:$0xf] }
  0x73   : > { %1011 = vmatpush.bf16.msra.mxu2 %v1883_v1  ;;  %v2244_v1 = vld [vmem:[#allocation3 + $0x354] sm:$0xf]  ;;  %v2023_v36 = vor.u32 %v2252_v24, %v2020_v25  ;;  %v2275_v33 = vld [vmem:[#allocation3 + $0x444] sm:$0xf0]  ;;  %v2273_v24 = vld [vmem:[#allocation3 + $0x434] sm:$0xf0] }
  0x74   : > { %1024 = vmatpush.bf16.msra.mxu3 %v1887_v3  ;;  %v2035_v3 = vor.u32 %v2257_v55, %v2034_v54  ;;  %v1991_v10 = vor.u32 %v2244_v1, %v1988_v2  ;;  %v1955_v54 = vor.u32 %v2237_v50, %v1954_v49  ;;  %v2272_v25 = vld [vmem:[#allocation3 + $0x434] sm:$0xf]  ;;  %v2100_v27 = vld [vmem:[#allocation3 + $0x438] sm:$0xf0]  ;;  %v2092_v35 = vld [vmem:[#allocation3 + $0x428] sm:$0xf0] }
  0x75   : > { %880 = vmatpush.bf16.msra.mxu0 %v1819_v44  ;;  %v1964_v44 = vld [vmem:[#allocation3 + $0x328] sm:$0xf0]  ;;  %v1298_v40 = vld [vmem:[#allocation2 + $0x4] sm:$0xe]  ;;  %vm1464_vm7 = vsmask.f32 256 }
  0x76   : > { %1012 = vmatmul.bf16.vlgmr.msra.gmra.mxu2 %v922_v17  ;;  %893 = vmatpush.bf16.msra.mxu1 %v1823_v34  ;;  %v2011_v34 = vor.u32 %v2251_v32, %v2010_v31  ;;  %v1967_v48 = vor.u32 %v2238_v43, %v1964_v44  ;;  %v2271_v31 = vld [vmem:[#allocation3 + $0x424] sm:$0xf0]  ;;  %v2270_v32 = vld [vmem:[#allocation3 + $0x424] sm:$0xf]  ;;  %v2084_v43 = vld [vmem:[#allocation3 + $0x418] sm:$0xf0]  ;;  %v1317_v44 = vunpack.c.l.b16 %v1298_v40 }
  0x77   : > { %1270 = vmatpush.bf16.msrb.mxu2 %v2067_v4  ;;  %1025 = vmatmul.bf16.vlgmr.msra.gmra.mxu3 %v922_v17  ;;  %v1179_v4 = vunpack.c.l.b16 %v1158_v58  ;;  %v2234_v58 = vld [vmem:[#allocation3 + $0x304] sm:$0xf]  ;;  %vm1467_vm9 = vsmask.f32 1280  ;;  %vm1465_vm10 = vmand %vm1458_vm6, %vm1464_vm7 }
  0x78   : > { %1283 = vmatpush.bf16.msrb.mxu3 %v2071_v7  ;;  %881 = vmatmul.bf16.vlgmr.msra.gmra.mxu0 %v791_v53  ;;  %v2255_v7 = vld [vmem:[#allocation3 + $0x3a4] sm:$0xf0]  ;;  %v1318_v49 = vpack.c.b16 %v1180_v5, %v1317_v44  ;;  %vm1468_vm11 = vmand %vm1466_vm8, %vm1467_vm9 }
  0x79   : > { %1130 = vmatpush.bf16.msrb.mxu0 %v2003_v37  ;;  %894 = vmatmul.bf16.vlgmr.msra.gmra.mxu1 %v791_v53  ;;  %v2027_v17 = vor.u32 %v2255_v7, %v2026_v6  ;;  %v2122_v6 = vld [vmem:[#allocation3 + $0x460] sm:$0xf]  ;;  %v2279_v7 = vld [vmem:[#allocation3 + $0x464] sm:$0xf0]  ;;  %vm1469_vm12 = vmor %vm1468_vm11, %vm1465_vm10 }
  0x7a   : > { %1143 = vmatpush.bf16.msrb.mxu1 %v2007_v45  ;;  %v2123_v11 = vor.u32 %v2279_v7, %v2122_v6 }
  0x7b   : > { %1271 = vmatpush.bf16.msrb.mxu2 %v2059_v18  ;;  %v1181_v18 = vpack.c.b16 %v1180_v5, %v1179_v4  ;;  %v2135_v4 = vor.u32 %v2280_v62, %v2132_v0 }
  0x7c   : > { %1284 = vmatpush.bf16.msrb.mxu3 %v2063_v20  ;;  %v2031_v20 = vor.u32 %v2254_v12, %v2028_v13  ;;  %v2114_v13 = vld [vmem:[#allocation3 + $0x450] sm:$0xf] }
  0x7d   : > { %1131 = vmatpush.bf16.msrb.mxu0 %v1995_v59  ;;  %v1185_v30 = vshll.u32 %v1181_v18, 16  ;;  %v1183_v37 = vshrl.u32 %v1181_v18, 16  ;;  %v1948_v59 = vld [vmem:[#allocation3 + $0x308] sm:$0xf0]  ;;  %v2119_v18 = vor.u32 %v2276_v15, %v2116_v16 }
  0x7e   : > { %1144 = vmatpush.bf16.msrb.mxu1 %v1999_v60  ;;  %v2130_v60 = vld [vmem:[#allocation3 + $0x470] sm:$0xf]  ;;  %v1951_v2 = vor.u32 %v2234_v58, %v1948_v59 }
  0x7f   : > { %1272 = vmatpush.bf16.msrb.mxu2 %v2051_v38  ;;  %v1971_v38 = vor.u32 %v2241_v23, %v1970_v19  ;;  %v1187_v45 = vrot.slane %v1185_v30, 1  ;;  %v2274_v19 = vld [vmem:[#allocation3 + $0x444] sm:$0xf]  ;;  %v2098_v23 = vld [vmem:[#allocation3 + $0x430] sm:$0xf] }
  0x80   : > { %1285 = vmatpush.bf16.msrb.mxu3 %v2055_v41  ;;  %v2250_v41 = vld [vmem:[#allocation3 + $0x384] sm:$0xf]  ;;  %v2099_v28 = vor.u32 %v2273_v24, %v2098_v23  ;;  %v2090_v30 = vld [vmem:[#allocation3 + $0x420] sm:$0xf] }
  0x81   : > { %1132 = vmatpush.bf16.msrb.mxu0 %v1987_v9  ;;  %v2015_v46 = vor.u32 %v2250_v41, %v2012_v42  ;;  %v1188_v53 = vor.u32 %v1187_v45, %v1183_v37  ;;  %v2124_v9 = vld [vmem:[#allocation3 + $0x468] sm:$0xf0]  ;;  %v2269_v41 = vld [vmem:[#allocation3 + $0x414] sm:$0xf0]  ;;  %v2268_v42 = vld [vmem:[#allocation3 + $0x414] sm:$0xf] }
  0x82   : > { %1145 = vmatpush.bf16.msrb.mxu1 %v1991_v10  ;;  %v1032_v10 = vld [vmem:[#allocation2 + $0x4] sm:$0xf]  ;;  %v2087_v37 = vor.u32 %v2268_v42, %v2084_v43  ;;  %v2074_v45 = vld [vmem:[#allocation3 + $0x400] sm:$0xf] }
  0x83   : > { %1273 = vmatpush.bf16.msrb.mxu2 %v2043_v52  ;;  %v1956_v52 = vld [vmem:[#allocation3 + $0x318] sm:$0xf0] }
  0x84   : > { %1286 = vmatpush.bf16.msrb.mxu3 %v2047_v57  ;;  %v1959_v55 = vor.u32 %v2236_v51, %v1956_v52  ;;  %v2235_v57 = vld [vmem:[#allocation3 + $0x304] sm:$0xf0]  ;;  %v1319_v52 = vrot.slane %v1318_v49, 1 }
  0x85   : > { %1133 = vmatpush.bf16.msrb.mxu0 %v1979_v21  ;;  %v1947_v1 = vor.u32 %v2235_v57, %v1946_v56  ;;  %v2107_v21 = vor.u32 %v2275_v33, %v2106_v26 }
  0x86   : > { %1146 = vmatpush.bf16.msrb.mxu1 %v1983_v22 }
  0x87   : > { %1274 = vmatpush.bf16.msrb.mxu2 %v2035_v3  ;;  %v2131_v3 = vor.u32 %v2281_v61, %v2130_v60 }
  0x88   : > { %1287 = vmatpush.bf16.msrb.mxu3 %v2039_v8  ;;  %v2278_v8 = vld [vmem:[#allocation3 + $0x464] sm:$0xf] }
  0x89   : > { %1134 = vmatpush.bf16.msrb.mxu0 %v1971_v38  ;;  %v2127_v12 = vor.u32 %v2278_v8, %v2124_v9  ;;  %v2095_v38 = vor.u32 %v2270_v32, %v2092_v35 }
  0x8a   : > { %1147 = vmatpush.bf16.msrb.mxu1 %v1975_v39  ;;  %v2082_v39 = vld [vmem:[#allocation3 + $0x410] sm:$0xf] }
  0x8b   : > { %1275 = vmatpush.bf16.msrb.mxu2 %v2027_v17  ;;  %v2115_v17 = vor.u32 %v2277_v14, %v2114_v13 }
  0x8c   : > { %1288 = vmatpush.bf16.msrb.mxu3 %v2031_v20  ;;  %v2108_v20 = vld [vmem:[#allocation3 + $0x448] sm:$0xf0] }
  0x8d   : > { %1135 = vmatpush.bf16.msrb.mxu0 %v1963_v47  ;;  %v2111_v22 = vor.u32 %v2274_v19, %v2108_v20  ;;  %v2266_v47 = vld [vmem:[#allocation3 + $0x404] sm:$0xf] }
  0x8e   : > { %1148 = vmatpush.bf16.msrb.mxu1 %v1967_v48  ;;  %v2076_v48 = vld [vmem:[#allocation3 + $0x408] sm:$0xf0] }
  0x8f   : > { %1276 = vmatpush.bf16.msrb.mxu2 %v2019_v29  ;;  %v2103_v29 = vor.u32 %v2272_v25, %v2100_v27  ;;  %v2079_v51 = vor.u32 %v2266_v47, %v2076_v48 }
  0x90   : > { %1289 = vmatpush.bf16.msrb.mxu3 %v2023_v36  ;;  %v2091_v36 = vor.u32 %v2271_v31, %v2090_v30  ;;  %v1429_v30 = vld [vmem:[#allocation5] sm:$0x3] }
  0x91   : > { %1136 = vmatpush.bf16.msrb.mxu0 %v1955_v54 }
  0x92   : > { %1149 = vmatpush.bf16.msrb.mxu1 %v1959_v55 }
  0x93   : > { %1277 = vmatpush.bf16.msrb.mxu2 %v2011_v34  ;;  %v2083_v34 = vor.u32 %v2269_v41, %v2082_v39  ;;  %v1432_v39 = vperm.slane %v1429_v30, 1 }
  0x94   : > { %1290 = vmatpush.bf16.msrb.mxu3 %v2015_v46  ;;  %v2267_v46 = vld [vmem:[#allocation3 + $0x404] sm:$0xf0] }
  0x95   : > { %1137 = vmatpush.bf16.msrb.mxu0 %v1947_v1  ;;  %v2075_v50 = vor.u32 %v2267_v46, %v2074_v45 }
  0x96   : > { %1278 = vmatmul.bf16.vlgmr.msrb.gmra.mxu2 %v1188_v53  ;;  %1150 = vmatpush.bf16.msrb.mxu1 %v1951_v2 }
  0x97   : > { %1291 = vmatmul.bf16.vlgmr.msrb.gmra.mxu3 %v1188_v53 }
  0x98   : > { %1138 = vmatmul.bf16.vlgmr.msrb.gmra.mxu0 %v1032_v10 }
  0x99   : > { %1401 = vmatpush.bf16.msra.mxu0 %v2131_v3  ;;  %1151 = vmatmul.bf16.vlgmr.msrb.gmra.mxu1 %v1032_v10 }
  0x9a   : > { %1414 = vmatpush.bf16.msra.mxu1 %v2135_v4 }
  0x9d   : > { %1402 = vmatpush.bf16.msra.mxu0 %v2123_v11 }
  0x9e   : > { %1415 = vmatpush.bf16.msra.mxu1 %v2127_v12 }
  0xa1   : > { %1403 = vmatpush.bf16.msra.mxu0 %v2115_v17 }
  0xa2   : > { %1416 = vmatpush.bf16.msra.mxu1 %v2119_v18 }
  0xa5   : > { %1404 = vmatpush.bf16.msra.mxu0 %v2107_v21 }
  0xa6   : > { %1417 = vmatpush.bf16.msra.mxu1 %v2111_v22 }
  0xa9   : > { %1405 = vmatpush.bf16.msra.mxu0 %v2099_v28 }
  0xaa   : > { %1418 = vmatpush.bf16.msra.mxu1 %v2103_v29 }
  0xad   : > { %1406 = vmatpush.bf16.msra.mxu0 %v2091_v36 }
  0xae   : > { %1419 = vmatpush.bf16.msra.mxu1 %v2095_v38  ;;  %v1431_v38 = vperm.slane %v1429_v30, 0 }
  0xb1   : > { %1407 = vmatpush.bf16.msra.mxu0 %v2083_v34 }
  0xb2   : > { %1420 = vmatpush.bf16.msra.mxu1 %v2087_v37 }
  0xb5   : > { %1408 = vmatpush.bf16.msra.mxu0 %v2075_v50 }
  0xb6   : > { %1421 = vmatpush.bf16.msra.mxu1 %v2079_v51 }
  0xb8   : > { %1409 = vmatmul.bf16.vlgmr.msra.gmra.mxu0 %v1319_v52 }
  0xb9   : > { %1422 = vmatmul.bf16.vlgmr.msra.gmra.mxu1 %v1319_v52 }
  0xc9   : > { %v481_v53 = vpop.f32.mrf.mxu2 }
  0xca   : > { %v494_v54 = vpop.f32.mrf.mxu3 }
  0xd1   : > { %v483_v55 = vpop.f32.mrf.mxu2 }
  0xd2   : > { %v496_v56 = vpop.f32.mrf.mxu3 }
  0xd5   : > { %v375_v57 = vpop.f32.mrf.mxu0 }
  0xd6   : > { %v388_v58 = vpop.f32.mrf.mxu1  ;;  %v482_v59 = vadd.f32 %v481_v53, %v375_v57 }
  0xd7   : > { %v495_v60 = vadd.f32 %v494_v54, %v388_v58  ;;  %v1470_v58 = vld [vmem:[%s197_s6] sm:$0x3] }
  0xd9   : > { %v744_v61 = vpop.f32.mrf.mxu2 }
  0xda   : > { %v757_v63 = vpop.f32.mrf.mxu3 }
  0xdd   : > { %v377_v5 = vpop.f32.mrf.mxu0 }
  0xde   : > { %v390_v62 = vpop.f32.mrf.mxu1 }
  0xe1   : > { %v746_v0 = vpop.f32.mrf.mxu2 }
  0xe2   : > { %v759_v1 = vpop.f32.mrf.mxu3 }
  0xe5   : > { %v610_v2 = vpop.f32.mrf.mxu0 }
  0xe6   : > { %v623_v3 = vpop.f32.mrf.mxu1  ;;  %v627_v4 = vadd.f32 %v610_v2, %v482_v59 }
  0xe7   : > { %v628_v6 = vadd.f32 %v623_v3, %v495_v60 }
  0xe8   : > { %v761_v7 = vadd.f32 %v744_v61, %v627_v4 }
  0xe9   : > { %v762_v8 = vadd.f32 %v757_v63, %v628_v6 }
  0xed   : > { %v612_v9 = vpop.f32.mrf.mxu0 }
  0xee   : > { %v625_v10 = vpop.f32.mrf.mxu1 }
  0xf5   : > { %v882_v13 = vpop.f32.mrf.mxu0 }
  0xf6   : > { %v895_v14 = vpop.f32.mrf.mxu1  ;;  %v899_v25 = vadd.f32 %v882_v13, %v761_v7 }
  0xf7   : > { %v900_v27 = vadd.f32 %v895_v14, %v762_v8 }
  0xf9   : > { %v1013_v11 = vpop.f32.mrf.mxu2 }
  0xfa   : > { %v1026_v12 = vpop.f32.mrf.mxu3  ;;  %v1030_v28 = vadd.f32 %v1013_v11, %v899_v25 }
  0xfb   : > { %v1031_v29 = vadd.f32 %v1026_v12, %v900_v27 }
  0xfd   : > { %v884_v17 = vpop.f32.mrf.mxu0 }
  0xfe   : > { %v897_v18 = vpop.f32.mrf.mxu1 }
 0x101   : > { %v1015_v15 = vpop.f32.mrf.mxu2 }
 0x102   : > { %v1028_v16 = vpop.f32.mrf.mxu3 }
 0x115   : > { %v1139_v19 = vpop.f32.mrf.mxu0 }
 0x116   : > { %v1152_v20 = vpop.f32.mrf.mxu1  ;;  %v1156_v31 = vadd.f32 %v1139_v19, %v1030_v28 }
 0x117   : > { %v1157_v32 = vadd.f32 %v1152_v20, %v1031_v29 }
 0x119   : > { %v1279_v26 = vpop.f32.mrf.mxu2 }
 0x11a   : > { %v1292_v33 = vpop.f32.mrf.mxu3  ;;  %v1296_v35 = vadd.f32 %v1279_v26, %v1156_v31 }
 0x11b   : > { %v1297_v36 = vadd.f32 %v1292_v33, %v1157_v32 }
 0x11d   : > { %v1141_v23 = vpop.f32.mrf.mxu0 }
 0x11e   : > { %v1154_v24 = vpop.f32.mrf.mxu1 }
 0x121   : > { %v1281_v21 = vpop.f32.mrf.mxu2 }
 0x122   : > { %v1294_v22 = vpop.f32.mrf.mxu3 }
 0x135   : > { %v1410_v40 = vpop.f32.mrf.mxu0 }
 0x136   : > { %v1423_v41 = vpop.f32.mrf.mxu1  ;;  %v1427_v42 = vadd.f32 %v1410_v40, %v1296_v35 }
 0x137   : > { %v1428_v43 = vadd.f32 %v1423_v41, %v1297_v36 }
 0x138   : > { %v1435_v44 = vadd.f32 %v1431_v38, %v1427_v42 }
 0x139   : > { %v1436_v34 = vadd.f32 %v1432_v39, %v1428_v43 }
 0x13a   : > { %v1437_v37 = vmax.f32 %v1435_v44, 0.0 }
 0x13b   : > { %v1438_v45 = vmax.f32 %v1436_v34, 0.0 }
 0x13c   : > { %v1441_v46 = vrot.slane %v1437_v37, 4 }
 0x13d   : > { %v1442_v47 = vrot.slane %v1438_v45, 4  ;;  %v1412_v48 = vpop.f32.mrf.mxu0 }
 0x13e   : > { %v1425_v49 = vpop.f32.mrf.mxu1  ;;  %v1445_v50 = vmax.f32 %v1437_v37, %v1441_v46 }
 0x13f   : > { %v1446_v51 = vmax.f32 %v1438_v45, %v1442_v47 }
 0x140   : > { %v1449_v52 = vrot.slane %v1445_v50, 1 }
 0x141   : > { %v1450_v53 = vrot.slane %v1446_v51, 1 }
 0x142   : > { %v1453_v54 = vmax.f32 %v1445_v50, %v1449_v52 }
 0x143   : > { %v1454_v55 = vmax.f32 %v1446_v51, %v1450_v53 }
 0x145   : > { %v1455_v56 = vpack.c.bf16 %v1454_v55, %v1453_v54 }
 0x147   : > { %v1457_v57 = vrot.slane %v1455_v56, 3 }
 0x149   : > { %v1461_v59 = vsel %vm1458_vm6, %v1455_v56, %v1457_v57 }
 0x14a   : > { %v1471_v60 = vsel %vm1469_vm12, %v1461_v59, %v1470_v58 }
 0x14b   : > { %1472 = vst [vmem:[%s197_s6] sm:$0x3] %v1471_v60 }
 0x14c PF: > { %s15_s12 = sadd.s32 1, %s2388_s12  }
 0x14d   : > { %p12_p7 = scmp.ge.s32.totalorder %s15_s12, 4  }
 0x14f   :  { %14 = sbr.rel (!%p12_p7) target bundleno = 2 (0x2), region = 80 }
 0x154   :  { %1492 = vsyncpa [#allocation4], 1 }
 0x155   :  { %1494 = vsyncpa [#allocation4 + $0x1], 1 }
 0x156   :  { %1495 = vsyncpa [#allocation6], 1 }

// kernel: vgg_forward.5
= control target key start
LH: loop header
LB: loop body
LE: loop exit
PB: predicated region body
PF: predicated region fallthrough
CT: control target
= control target key end

     0   :  { %8 = vsyncpa [#allocation4], 0  ;;  %s2418_s0 = inlined_call_operand.vmem [shape: bf16[2,8,8,3], index: 0, kind: input, shape index: {}]   ;;  %s2419_s1 = inlined_call_operand.hbm [shape: bf16[9,3,64], index: 1, kind: input, shape index: {}]   ;;  %s2420_s2 = inlined_call_operand.hbm [shape: f32[1,64], index: 2, kind: input, shape index: {}]   ;;  %s2421_s3 = inlined_call_operand.vmem [shape: bf16[2,4,4,64], index: 3, kind: output, shape index: {}]  }
   0x1   :  { %9 = vsyncpa [#allocation6], 0  ;;  %s1911_s12 = smov 0  }
   0x2 LB: > { %s125_s15 = sshll.u32 %s2419_s1, 4  ;;  %s1920_s16 = sadd.s32 4294967295, %s1883_s12   ;;  %s1883_s12 = sphi %s1911_s12, %s15_s12   ;;  %s126_s15 = int_to_ptr.hbm [resolvable:$true] %s125_s15 }
   0x3   : > { %p1610_p0 = scmp.ge.s32.totalorder %s1883_s12, 1  ;;  %p114_p1 = scmp.lt.s32.totalorder %s1883_s12, 3 }
   0x4   : > { %p1790_p2 = scmp.eq.s32.totalorder %s1920_s16, 0  ;;  %s1885_s18 = smov [#allocation3]  }
   0x5   : > { %p1925_p3 = pnand %p1610_p0, %p114_p1  ;;  %s127_s19 = sshll.u32 %s1885_s18, 4  ;;  %s128_s19 = int_to_ptr.vmem [resolvable:$true] %s127_s19 }
   0x6   : > { %s140_s22 = sshll.u32 %s2420_s2, 4  ;;  %s1886_s23 = smov [#allocation5]   ;;  %s141_s22 = int_to_ptr.hbm [resolvable:$true] %s140_s22 }
   0x7   : > { %p1783_p4 = pneg %p1925_p3  ;;  %s142_s24 = sshll.u32 %s1886_s23, 4  ;;  %s143_s24 = int_to_ptr.vmem [resolvable:$true] %s142_s24 }
   0x8   : > { %s1887_s25 = smov 32   ;;  %s1888_s26 = smov 2  }
   0x9   : > { %p1784_p5 = pnand %p1790_p2, %p1783_p4  ;;  %163 = sbr.rel (%p1925_p3) target bundleno = 421 (0x1a5), region = 32 }
   0xb   : > { %1786 = dma.hbm_to_vmem [thread:$0]  (!%p1784_p5), %s126_s15, 288, %s128_s19, [#allocation4], %s1887_s25, %s1887_s25, %s1888_s26  }
   0xc   : > { %1789 = dma.hbm_to_vmem [thread:$0]  (!%p1784_p5), %s141_s22, 16, %s143_s24, [#allocation6]  }
   0xe   : > { %1874 = dma.done.wait (%p1790_p2), [#allocation4], 288  }
   0xf   : > { %1876 = vsyncadd (%p1790_p2), [#allocation4], 4294967008 }
  0x10   : > { %1878 = dma.done.wait (%p1790_p2), [#allocation6], 16  }
  0x11   : > { %1880 = vsyncadd (%p1790_p2), [#allocation6], 4294967280  ;;  %vm495_vm0 = vcmask 1040384   ;;  %vm496_vm1 = vcmask 1041408   ;;  %p193_p6 = scmp.lt.s32.totalorder %s1920_s16, 1  ;;  %v1889_v0 = vmov 65535  }
  0x12   : > { %v497_v1 = vsel %vm495_vm0, 4294967295, %v1889_v0  ;;  %vm204_vm2 = vcmask 19456   ;;  %v1890_v2 = vmov 0   ;;  %vm218_vm3 = vcmask 18432   ;;  %v405_v4 = vld [vmem:[#allocation3 + $0x2] sm:$0x3] }
  0x13   : > { %s2448_s16 = smov (!%p193_p6, %s1920_s16), 1  ;;  %207 = vst.msk [vmem:[#allocation2 + $0x8] sm:$0xf] %vm204_vm2, %v1890_v2  ;;  %v1953_v3 = vsel %vm496_vm1, %v497_v1, 0  ;;  %vm238_vm4 = vcmask 17408   ;;  %vm257_vm8 = vcmask 19458  }
  0x14   : > { %208 = vst.msk [vmem:[#allocation2 + $0xc] sm:$0xf] %vm204_vm2, %v1890_v2  ;;  %s1751_s27 = sshll.u32 %s2448_s16, 5  ;;  %vm239_vm5 = vsmask.f32 1280  ;;  %vm282_vm9 = vcmask 19459   ;;  %v500_v7 = vand.u32 %v1953_v3, %v405_v4 }
  0x15   : > { %209 = vst.msk [vmem:[#allocation2 + $0x10] sm:$0xf] %vm204_vm2, %v1890_v2  ;;  %s1963_s30 = scalar_lea.vmem %s2418_s0, %s1751_s27  ;;  %vm258_vm6 = vsmask.f32 7946  ;;  %vm264_vm7 = vsmask.f32 2304  ;;  %vm1988_vm15 = vmand %vm238_vm4, %vm239_vm5 }
  0x16   : > { %210 = vst.msk [vmem:[#allocation2 + $0x14] sm:$0xf] %vm204_vm2, %v1890_v2  ;;  %vm283_vm10 = vsmask.f32 7950  ;;  %v220_v5 = vld [vmem:[%s1963_s30] sm:$0xf]  ;;  %1772 = vmatpush.bf16.msra.mxu1 %v500_v7  ;;  %1773 = vmatpush.bf16.msra.mxu2 %v500_v7  ;;  %vm1981_vm14 = vmand %vm257_vm8, %vm258_vm6 }
  0x17   : > { %v1621_v6 = vld [vmem:[%s1963_s30 + $0x4] sm:$0xf]  ;;  %v222_v8 = vshrl.u32 %v220_v5, 16  ;;  %v225_v9 = vshll.u32 %v220_v5, 16  ;;  %v1622_v11 = vld [vmem:[%s1963_s30 + $0x8] sm:$0xf]  ;;  %vm1973_vm13 = vmand %vm282_vm9, %vm283_vm10  ;;  %1774 = vmatpush.bf16.msra.mxu3 %v500_v7  ;;  %509 = vmatpush.bf16.msra.mxu0 %v500_v7 }
  0x18   : > { %v247_v10 = vshrl.u32 %v1621_v6, 16  ;;  %v250_v12 = vshll.u32 %v1621_v6, 16  ;;  %v272_v13 = vshll.u32 %v1622_v11, 16  ;;  %vm289_vm11 = vsmask.f32 3328  ;;  %vm2000_vm0 = vmand %vm218_vm3, %vm264_vm7  ;;  %s1752_s4 = sshll.u32 %s2448_s16, 3 }
  0x19   : > { %vm306_vm12 = vsmask.f32 7938  ;;  %v224_v14 = vrot.slane %v222_v8, 6  ;;  %v227_v15 = vrot.slane %v225_v9, 7  ;;  %v275_v17 = vshrl.u32 %v1622_v11, 16  ;;  %vm2008_vm4 = vmand %vm204_vm2, %vm289_vm11  ;;  %s2300_s7 = scalar_lea.vmem %s2421_s3, %s1752_s4 }
  0x1a   : > { %v249_v16 = vrot.slane %v247_v10, 5  ;;  %v241_v19 = vld [vmem:[#allocation2 + $0x8] sm:$0x3]  ;;  %v252_v20 = vrot.slane %v250_v12, 6  ;;  %v260_v21 = vld [vmem:[#allocation2 + $0x8] sm:$0xc]  ;;  %vm2020_vm3 = vmand %vm204_vm2, %vm306_vm12 }
  0x1b   : > { %v274_v22 = vrot.slane %v272_v13, 5  ;;  %v285_v23 = vld [vmem:[#allocation2 + $0xc] sm:$0x8]  ;;  %v1977_v24 = vor.u32 %v227_v15, %v224_v14  ;;  %v266_v26 = vld [vmem:[#allocation2 + $0xc] sm:$0x7]  ;;  %v277_v27 = vrot.slane %v275_v17, 4 }
  0x1c   : > { %v1623_v28 = vld [vmem:[%s1963_s30 + $0xc] sm:$0xf]  ;;  %v253_v30 = vor.u32 %v252_v20, %v249_v16  ;;  %205 = vst.msk [vmem:[#allocation2] sm:$0xf] %vm204_vm2, %v1890_v2  ;;  %v1624_v34 = vld [vmem:[%s1963_s30 + $0x10] sm:$0xf] }
  0x1d   : > { %v286_v31 = vsel %vm1973_vm13, %v274_v22, %v285_v23  ;;  %v297_v32 = vshrl.u32 %v1623_v28, 16  ;;  %v300_v33 = vshll.u32 %v1623_v28, 16  ;;  %v229_v35 = vrot.slane %v1977_v24, 4  ;;  %v291_v38 = vld [vmem:[#allocation2 + $0x10] sm:$0xf] }
  0x1e   : > { %v278_v37 = vor.u32 %v277_v27, %v274_v22  ;;  %287 = vst [vmem:[#allocation2 + $0xc] sm:$0x8] %v286_v31  ;;  %v254_v39 = vrot.slane %v253_v30, 4  ;;  %v261_v40 = vsel %vm1981_vm14, %v253_v30, %v260_v21  ;;  %v308_v43 = vld [vmem:[#allocation2 + $0x14] sm:$0xf]  ;;  %v320_v47 = vshrl.u32 %v1624_v34, 16 }
  0x1f   : > { %v2012_v42 = vrot.slane %v297_v32, 7  ;;  %206 = vst.msk [vmem:[#allocation2 + $0x4] sm:$0xf] %vm204_vm2, %v1890_v2  ;;  %v242_v44 = vsel %vm1988_vm15, %v229_v35, %v241_v19  ;;  %vm233_vm6 = vsmask.f32 7942  ;;  %v323_v50 = vshll.u32 %v1624_v34, 16 }
  0x20   : > { %262 = vst [vmem:[#allocation2 + $0x8] sm:$0xc] %v261_v40  ;;  %v279_v45 = vrot.slane %v278_v37, 4  ;;  %v267_v48 = vsel %vm2000_vm0, %v254_v39, %v266_v26  ;;  %v1625_v51 = vld [vmem:[%s1963_s30 + $0x14] sm:$0xf]  ;;  %v322_v53 = vrot.slane %v320_v47, 6 }
  0x21   : > { %243 = vst [vmem:[#allocation2 + $0x8] sm:$0x3] %v242_v44  ;;  %v302_v49 = vor.u32 %v300_v33, %v2012_v42  ;;  %v339_v54 = vshrl.u32 %v1625_v51, 16  ;;  %v342_v55 = vshll.u32 %v1625_v51, 16  ;;  %vm232_vm7 = vcmask 19457  }
  0x22   : > { %268 = vst [vmem:[#allocation2 + $0xc] sm:$0x7] %v267_v48  ;;  %v292_v52 = vsel %vm2008_vm4, %v279_v45, %v291_v38  ;;  %v325_v57 = vrot.slane %v323_v50, 7  ;;  %v585_v58 = vld [vmem:[#allocation3 + $0x4] sm:$0x3]  ;;  %vm311_vm8 = vcmask 16384   ;;  %vm2046_vm10 = vmand %vm232_vm7, %vm233_vm6 }
  0x23   : > { %293 = vst [vmem:[#allocation2 + $0x10] sm:$0xf] %v292_v52  ;;  %v309_v56 = vsel %vm2020_vm3, %v302_v49, %v308_v43  ;;  %v341_v59 = vrot.slane %v339_v54, 5  ;;  %v344_v60 = vrot.slane %v342_v55, 6  ;;  %v617_v61 = vand.u32 %v585_v58, %v1953_v3  ;;  %v1626_v62 = vld [vmem:[%s1963_s30 + $0x18] sm:$0xf] }
  0x24   : > { %310 = vst [vmem:[#allocation2 + $0x14] sm:$0xf] %v309_v56  ;;  %v358_v63 = vshll.u32 %v1626_v62, 16  ;;  %v361_v0 = vshrl.u32 %v1626_v62, 16  ;;  %v1627_v1 = vld [vmem:[%s1963_s30 + $0x1c] sm:$0xf]  ;;  %v326_v4 = vor.u32 %v325_v57, %v322_v53 }
  0x25   : > { %211 = vst.msk [vmem:[#allocation2 + $0x18] sm:$0xf] %vm204_vm2, %v1890_v2  ;;  %626 = vmatpush.bf16.msrb.mxu2 %v617_v61  ;;  %v377_v5 = vshrl.u32 %v1627_v1, 16  ;;  %v402_v6 = vld [vmem:[#allocation3] sm:$0x3]  ;;  %v345_v11 = vor.u32 %v344_v60, %v341_v59  ;;  %v303_v14 = vrot.slane %v2012_v42, 4 }
  0x26   : > { %212 = vst.msk [vmem:[#allocation2 + $0x1c] sm:$0xf] %vm204_vm2, %v1890_v2  ;;  %vm312_vm9 = vsmask.f32 256  ;;  %v360_v7 = vrot.slane %v358_v63, 5  ;;  %v363_v8 = vrot.slane %v361_v0, 4  ;;  %v547_v9 = vand.u32 %v1953_v3, %v402_v6 }
  0x27   : > { %213 = vst.msk [vmem:[#allocation2 + $0x20] sm:$0xf] %vm204_vm2, %v1890_v2  ;;  %v235_v12 = vld [vmem:[#allocation2 + $0x4] sm:$0xe]  ;;  %vm2062_vm11 = vmand %vm311_vm8, %vm312_vm9  ;;  %v327_v19 = vrot.slane %v326_v4, 4  ;;  %v346_v20 = vrot.slane %v345_v11, 4 }
  0x28   : > { %214 = vst.msk [vmem:[#allocation2 + $0x24] sm:$0xf] %vm204_vm2, %v1890_v2  ;;  %v364_v15 = vor.u32 %v363_v8, %v360_v7  ;;  %556 = vmatpush.bf16.msrb.mxu1 %v547_v9  ;;  %v236_v16 = vsel %vm2046_vm10, %v1977_v24, %v235_v12  ;;  %v2066_v21 = vrot.slane %v377_v5, 7  ;;  %v380_v22 = vshll.u32 %v1627_v1, 16  ;;  %v675_v50 = vld [vmem:[#allocation3 + $0x6] sm:$0x3] }
  0x29   : > { %v2050_v13 = vld [vmem:[#allocation2 + $0x8] sm:$0xff]  ;;  %215 = vst.msk [vmem:[#allocation2 + $0x28] sm:$0xf] %vm204_vm2, %v1890_v2  ;;  %vm434_vm7 = vsmask.f32 7424  ;;  %v731_v51 = vand.u32 %v675_v50, %v1953_v3 }
  0x2a   : > { %216 = vst.msk [vmem:[#allocation2 + $0x2c] sm:$0xf] %vm204_vm2, %v1890_v2  ;;  %v443_v26 = vshll.u32 %v2050_v13, 16  ;;  %v447_v24 = vshrl.u32 %v2050_v13, 16  ;;  %v365_v27 = vrot.slane %v364_v15, 4  ;;  %v382_v40 = vor.u32 %v380_v22, %v2066_v21  ;;  %v2095_v52 = vld [vmem:[#allocation2 + $0x8] sm:$0xff]  }
  0x2b   : > { %v2068_v23 = vld [vmem:[#allocation2 + $0x10] sm:$0xff]  ;;  %217 = vst.msk [vmem:[#allocation2 + $0x30] sm:$0xf] %vm204_vm2, %v1890_v2  ;;  %vm479_vm2 = vcmask 23552   ;;  %740 = vmatpush.bf16.msrb.mxu3 %v731_v51  ;;  %v688_v56 = vunpack.c.l.b16 %v2095_v52  ;;  %v779_v46 = vld [vmem:[#allocation3 + $0x8] sm:$0x3] }
  0x2c   : > { %v314_v28 = vld [vmem:[#allocation2 + $0x18] sm:$0x1]  ;;  %v330_v30 = vld [vmem:[#allocation2 + $0x18] sm:$0xe]  ;;  %237 = vst [vmem:[#allocation2 + $0x4] sm:$0xe] %v236_v16  ;;  %v853_v59 = vand.u32 %v779_v46, %v1953_v3 }
  0x2d   : > { %v445_v31 = vrot.slane %v443_v26, 1  ;;  %v451_v32 = vshll.u32 %v2068_v23, 16  ;;  %v315_v33 = vsel %vm2062_vm11, %v303_v14, %v314_v28  ;;  %v331_v34 = vsel %vm2046_vm10, %v326_v4, %v330_v30  ;;  %v333_v35 = vld [vmem:[#allocation2 + $0x1c] sm:$0x3]  ;;  %v349_v37 = vld [vmem:[#allocation2 + $0x1c] sm:$0xc] }
  0x2e   : > { %316 = vst [vmem:[#allocation2 + $0x18] sm:$0x1] %v315_v33  ;;  %v334_v2 = vsel %vm1988_vm15, %v327_v19, %v333_v35  ;;  %v350_v38 = vsel %vm1981_vm14, %v345_v11, %v349_v37  ;;  %v352_v39 = vld [vmem:[#allocation2 + $0x20] sm:$0x7]  ;;  %v368_v45 = vld [vmem:[#allocation2 + $0x20] sm:$0x8]  ;;  %862 = vmatpush.bf16.msrb.mxu0 %v853_v59 }
  0x2f   : > { %v449_v42 = vor.u32 %v447_v24, %v445_v31  ;;  %v453_v43 = vrot.slane %v451_v32, 1  ;;  %332 = vst [vmem:[#allocation2 + $0x18] sm:$0xe] %v331_v34  ;;  %v353_v44 = vsel %vm2000_vm0, %v346_v20, %v352_v39  ;;  %v369_v47 = vsel %vm1973_vm13, %v360_v7, %v368_v45  ;;  %v371_v29 = vld [vmem:[#allocation2 + $0x24] sm:$0xf]  ;;  %v2108_v4 = vld [vmem:[#allocation2 + $0xc] sm:$0xff] }
  0x30   : > { %335 = vst [vmem:[#allocation2 + $0x1c] sm:$0x3] %v334_v2  ;;  %v386_v48 = vld [vmem:[#allocation2 + $0x28] sm:$0xf]  ;;  %v372_v49 = vsel %vm2008_vm4, %v365_v27, %v371_v29  ;;  %v455_v57 = vshrl.u32 %v2068_v23, 16  ;;  %v793_v10 = vshrl.u32 %v2108_v4, 16 }
  0x31   : > { %v454_v25 = vsel %vm434_vm7, %v449_v42, %v453_v43  ;;  %351 = vst [vmem:[#allocation2 + $0x1c] sm:$0xc] %v350_v38  ;;  %v387_v36 = vsel %vm2020_vm3, %v382_v40, %v386_v48  ;;  %v796_v11 = vshll.u32 %v2108_v4, 16  ;;  %v991_v22 = vld [vmem:[#allocation3 + $0xc] sm:$0x3]  ;;  %vm589_vm14 = vcmask 1046528  }
  0x32   : > { %1645 = vmatmul.msk.bf16.vlgmr.msra.gmra.mxu1 %vm479_vm2, %v454_v25  ;;  %354 = vst [vmem:[#allocation2 + $0x20] sm:$0x7] %v353_v44  ;;  %v457_v63 = vor.u32 %v455_v57, %v453_v43  ;;  %v1047_v27 = vand.u32 %v991_v22, %v1953_v3  ;;  %v795_v28 = vrot.slane %v793_v10, 1  ;;  %v901_v32 = vld [vmem:[#allocation3 + $0xa] sm:$0x3]  ;;  %v593_v57 = vrot.slane %v2068_v23, 1 }
  0x33   : > { %370 = vst [vmem:[#allocation2 + $0x20] sm:$0x8] %v369_v47  ;;  %v1766_v18 = vld [vmem:[#allocation2] sm:$0xff]   ;;  %v798_v30 = vrot.slane %v796_v11, 2  ;;  %v933_v35 = vand.u32 %v901_v32, %v1953_v3  ;;  %vm783_vm13 = vsmask.f32 6400 }
  0x34   : > { %v663_v53 = vld [vmem:[#allocation2 + $0x4] sm:$0xe]  ;;  %373 = vst [vmem:[#allocation2 + $0x24] sm:$0xf] %v372_v49  ;;  %v436_v54 = vshrl.u32 %v1766_v18, 16  ;;  %v438_v55 = vshll.u32 %v1766_v18, 16 }
  0x35   : > { %388 = vst [vmem:[#allocation2 + $0x28] sm:$0xf] %v387_v36  ;;  %v687_v41 = vunpack.c.l.b16 %v663_v53  ;;  %v799_v40 = vor.u32 %v798_v30, %v795_v28  ;;  %942 = vmatpush.bf16.msra.mxu1 %v933_v35  ;;  %v1217_v43 = vld [vmem:[#allocation3 + $0x10] sm:$0x3]  ;;  %v1770_v53 = vld [vmem:[#allocation2] sm:$0xe] }
  0x36   : > { %v440_v58 = vrot.slane %v438_v55, 1  ;;  %v1249_v44 = vand.u32 %v1217_v43, %v1953_v3  ;;  %v2133_v29 = vld [vmem:[#allocation2 + $0x14] sm:$0xff]  ;;  %v591_v59 = vrot.slane %v2050_v13, 1  ;;  %v383_v11 = vrot.slane %v2066_v21, 4 }
  0x37   : > { %v2104_v62 = vpack.c.b16 %v688_v56, %v687_v41  ;;  %v802_v25 = vshrl.u32 %v2133_v29, 16  ;;  %v805_v49 = vshll.u32 %v2133_v29, 16  ;;  %vm905_vm15 = vcmask 1045504  }
  0x38   : > { %v2100_v60 = vld [vmem:[#allocation2 + $0x18] sm:$0xff]  ;;  %v441_v61 = vor.u32 %v440_v58, %v436_v54  ;;  %vm1221_vm0 = vcmask 1044480   ;;  %vm1099_vm4 = vsmask.f32 5376  ;;  %vm1332_vm3 = vcmask 516096  }
  0x39   : > { %v459_v0 = vshll.u32 %v2100_v60, 16  ;;  %v785_v6 = vshrl.u32 %v2104_v62, 16  ;;  %v788_v7 = vshll.u32 %v2104_v62, 16  ;;  %v463_v38 = vshrl.u32 %v2100_v60, 16  ;;  %vm2306_vm8 = vmand %vm1332_vm3, %vm312_vm9 }
  0x3a   : > { %v446_v1 = vsel %vm434_vm7, %v441_v61, %v445_v31  ;;  %v1095_v31 = vld [vmem:[#allocation3 + $0xe] sm:$0x3]  ;;  %v704_v50 = vrot.slane %v2104_v62, 1  ;;  %v804_v36 = vrot.slane %v802_v25, 1  ;;  %v807_v51 = vrot.slane %v805_v49, 2  ;;  %vm2321_vm10 = vmand %vm1332_vm3, %vm306_vm12 }
  0x3b   : > { %v2110_v5 = vld [vmem:[#allocation2 + $0x20] sm:$0xff]  ;;  %1644 = vmatmul.msk.bf16.vlgmr.msra.gmra.mxu0 %vm479_vm2, %v446_v1  ;;  %v461_v8 = vrot.slane %v459_v0, 1  ;;  %v787_v26 = vrot.slane %v785_v6, 1  ;;  %v790_v24 = vrot.slane %v788_v7, 2  ;;  %v1169_v2 = vand.u32 %v1095_v31, %v1953_v3  ;;  %v1215_v49 = vld [vmem:[#allocation2 + $0x8] sm:$0x8] }
  0x3c   : > { %v403_v9 = vld [vmem:[#allocation2 + $0x28] sm:$0x1]  ;;  %v467_v14 = vshll.u32 %v2110_v5, 16  ;;  %v471_v15 = vshrl.u32 %v2110_v5, 16  ;;  %1258 = vmatpush.bf16.msra.mxu0 %v1249_v44  ;;  %v705_v3 = vrot.slane %v2108_v4, 1  ;;  %v808_v41 = vor.u32 %v807_v51, %v804_v36 }
  0x3d   : > { %v427_v12 = vunpack.c.l.b16 %v403_v9  ;;  %v462_v16 = vsel %vm434_vm7, %v457_v63, %v461_v8  ;;  %v791_v39 = vor.u32 %v790_v24, %v787_v26  ;;  %v465_v45 = vor.u32 %v463_v38, %v461_v8  ;;  %v2153_v63 = vld [vmem:[#allocation2 + $0x1c] sm:$0xff]  ;;  %v979_v51 = vld [vmem:[#allocation2 + $0x8] sm:$0xc] }
  0x3e   : > { %1646 = vmatmul.msk.bf16.vlgmr.msra.gmra.mxu2 %vm479_vm2, %v462_v16  ;;  %v469_v20 = vrot.slane %v467_v14, 1  ;;  %v706_v54 = vsel %vm589_vm14, %v704_v50, %v705_v3  ;;  %v595_v58 = vrot.slane %v2100_v60, 1  ;;  %v809_v61 = vsel %vm783_vm13, %v799_v40, %v808_v41  ;;  %v389_v14 = vld [vmem:[#allocation2 + $0x2c] sm:$0x1]  ;;  %v2169_v16 = vld [vmem:[#allocation2 + $0x24] sm:$0xff] }
  0x3f   : > { %v2121_v19 = vpack.c.b16 %v427_v12, %v427_v12  ;;  %1056 = vmatpush.bf16.msra.mxu2 %v1047_v27  ;;  %v800_v47 = vsel %vm783_vm13, %v791_v39, %v799_v40  ;;  %v811_v1 = vshrl.u32 %v2153_v63, 16  ;;  %v814_v6 = vshll.u32 %v2153_v63, 16  ;;  %v899_v39 = vld [vmem:[#allocation2 + $0x4] sm:$0xc] }
  0x40   : > { %v473_v33 = vor.u32 %v471_v15, %v469_v20  ;;  %v470_v48 = vsel %vm434_vm7, %v465_v45, %v469_v20  ;;  %v596_v62 = vsel %vm589_vm14, %v593_v57, %v595_v58  ;;  %v390_v15 = vsel %vm2062_vm11, %v383_v11, %v389_v14 }
  0x41   : > { %v475_v34 = vshll.u32 %v2121_v19, 16  ;;  %v813_v7 = vrot.slane %v811_v1, 1  ;;  %v816_v8 = vrot.slane %v814_v6, 2  ;;  %391 = vst [vmem:[#allocation2 + $0x2c] sm:$0x1] %v390_v15  ;;  %v820_v20 = vshrl.u32 %v2169_v16, 16 }
  0x42   : > { %1649 = vmatmul.msk.bf16.vlgmr.msrb.gmra.mxu1 %vm479_vm2, %v1766_v18  ;;  %v1769_v18 = vld [vmem:[#allocation2] sm:$0xf0]  ;;  %v823_v22 = vshll.u32 %v2169_v16, 16  ;;  %v709_v21 = vrot.slane %v2153_v63, 1  ;;  %v597_v30 = vrot.slane %v2110_v5, 1  ;;  %v599_v31 = vrot.slane %v2121_v19, 1 }
  0x43   : > { %v477_v37 = vrot.slane %v475_v34, 1  ;;  %v1771_v55 = vor.u32 %v1770_v53, %v1769_v18  ;;  %v817_v10 = vor.u32 %v816_v8, %v813_v7  ;;  %v822_v26 = vrot.slane %v820_v20, 1 }
  0x44   : > { %v825_v24 = vrot.slane %v823_v22, 2  ;;  %v600_v34 = vsel %vm589_vm14, %v597_v30, %v599_v31  ;;  %v711_v38 = vrot.slane %v2169_v16, 1  ;;  %v903_v43 = vunpack.c.l.b16 %v899_v39 }
  0x45   : > { %v478_v42 = vsel %vm434_vm7, %v473_v33, %v477_v37  ;;  %v590_v46 = vrot.slane %v1771_v55, 1  ;;  %v818_v12 = vsel %vm783_vm13, %v808_v41, %v817_v10  ;;  %v907_v36 = vrot.slane %v2108_v4, 2  ;;  %v1761_v4 = vld [vmem:[#allocation2 + $0x10] sm:$0xff] }
  0x46   : > { %1648 = vmatmul.msk.bf16.vlgmr.msra.gmra.mxu3 %vm479_vm2, %v478_v42  ;;  %v826_v27 = vor.u32 %v825_v24, %v822_v26  ;;  %v712_v42 = vsel %vm589_vm14, %v709_v21, %v711_v38  ;;  %v1219_v18 = vunpack.c.l.b16 %v1215_v49  ;;  %v1004_v53 = vunpack.c.h.b16 %v2095_v52 }
  0x47   : > { %1178 = vmatpush.bf16.msra.mxu3 %v1169_v2  ;;  %v592_v0 = vsel %vm589_vm14, %v590_v46, %v591_v59  ;;  %v1003_v55 = vunpack.c.l.b16 %v979_v51  ;;  %v909_v8 = vrot.slane %v2133_v29, 2  ;;  %v1021_v22 = vrot.slane %v1761_v4, 2 }
  0x48   : > { %v777_v28 = vld [vmem:[#allocation2 + $0x2c] sm:$0x3]  ;;  %v827_v33 = vsel %vm783_vm13, %v817_v10, %v826_v27  ;;  %v1220_v41 = vpack.c.b16 %v1004_v53, %v1219_v18  ;;  %vm1357_vm9 = vcmask 517121  }
  0x49   : > { %v781_v32 = vunpack.c.l.b16 %v777_v28  ;;  %v673_v44 = vld [vmem:[#allocation2 + $0x2c] sm:$0x1]  ;;  %v910_v11 = vsel %vm905_vm15, %v907_v36, %v909_v8  ;;  %vm2327_vm11 = vmand %vm1357_vm9, %vm239_vm5 }
  0x4a   : > { %v1222_v46 = vrot.slane %v1220_v41, 3  ;;  %vm2344_vm5 = vmand %vm1357_vm9, %vm233_vm6 }
  0x4b   : > { %1680 = vmatmul.msk.bf16.vlgmr.msrb.gmra.mxu0 %vm479_vm2, %v800_v47  ;;  %v2185_v35 = vpack.c.b16 %v781_v32, %v781_v32  ;;  %v697_v47 = vunpack.c.l.b16 %v673_v44  ;;  %v2225_v32 = vld [vmem:[#allocation2 + $0x20] sm:$0xff] }
  0x4d   : > { %v829_v37 = vshrl.u32 %v2185_v35, 16  ;;  %v832_v2 = vshll.u32 %v2185_v35, 16  ;;  %v703_v50 = vpack.c.b16 %v697_v47, %v697_v47 }
  0x4e   : > { %1647 = vmatmul.msk.bf16.gmra.mxu2 %vm479_vm2, %v470_v48  ;;  %v904_v48 = vpack.c.b16 %v688_v56, %v903_v43  ;;  %v913_v43 = vrot.slane %v2169_v16, 2 }
  0x4f   : > { %v831_v40 = vrot.slane %v829_v37, 1  ;;  %v834_v19 = vrot.slane %v832_v2, 2  ;;  %v713_v56 = vrot.slane %v703_v50, 1  ;;  %v1127_v37 = vshrl.u32 %v2225_v32, 16 }
  0x50   : > { %v1130_v2 = vshll.u32 %v2225_v32, 16 }
  0x51   : > { %v835_v45 = vor.u32 %v834_v19, %v831_v40  ;;  %v1129_v19 = vrot.slane %v1127_v37, 2 }
  0x52   : > { %1650 = vmatmul.msk.bf16.gmra.mxu1 %vm479_vm2, %v2050_v13  ;;  %v707_v13 = vrot.slane %v2133_v29, 1 }
  0x53   : > { %v836_v25 = vsel %vm783_vm13, %v826_v27, %v835_v45 }
  0x54   : > { %v708_v9 = vsel %vm589_vm14, %v705_v3, %v707_v13  ;;  %v710_v17 = vsel %vm589_vm14, %v707_v13, %v709_v21  ;;  %v906_v3 = vrot.slane %v904_v48, 2 }
  0x56   : > { %1675 = vmatmul.msk.bf16.vlgmr.msrb.gmra.mxu3 %vm479_vm2, %v706_v54  ;;  %v908_v54 = vsel %vm905_vm15, %v906_v3, %v907_v36  ;;  %v2239_v3 = vld [vmem:[#allocation2 + $0x28] sm:$0xff] }
  0x57   : > { %v1229_v16 = vrot.slane %v2239_v3, 3  ;;  %v1136_v51 = vshrl.u32 %v2239_v3, 16  ;;  %v1139_v18 = vshll.u32 %v2239_v3, 16 }
  0x5b   : > { %1681 = vmatmul.msk.bf16.gmra.mxu0 %vm479_vm2, %v809_v61 }
  0x5e   : > { %1654 = vmatmul.msk.bf16.vlgmr.msrb.gmra.mxu2 %vm479_vm2, %v592_v0 }
  0x62   : > { %1651 = vmatmul.msk.bf16.gmra.mxu1 %vm479_vm2, %v2068_v23  ;;  %v594_v23 = vsel %vm589_vm14, %v591_v59, %v593_v57  ;;  %v714_v57 = vsel %vm589_vm14, %v711_v38, %v713_v56  ;;  %v1109_v59 = vshrl.u32 %v1761_v4, 16 }
  0x64   : > { %v1111_v1 = vrot.slane %v1109_v59, 2 }
  0x66   : > { %1676 = vmatmul.msk.bf16.gmra.mxu3 %vm479_vm2, %v708_v9 }
  0x6b   : > { %1682 = vmatmul.msk.bf16.gmra.mxu0 %vm479_vm2, %v818_v12  ;;  %v1762_v12 = vld [vmem:[#allocation2 + $0x18] sm:$0xff] }
  0x6c   : > { %v1225_v15 = vrot.slane %v1762_v12, 3  ;;  %v1121_v20 = vshll.u32 %v1762_v12, 16  ;;  %v1023_v38 = vrot.slane %v1762_v12, 2 }
  0x6e   : > { %1655 = vmatmul.msk.bf16.gmra.mxu2 %vm479_vm2, %v594_v23  ;;  %v1118_v23 = vshrl.u32 %v1762_v12, 16  ;;  %v1123_v24 = vrot.slane %v1121_v20, 3  ;;  %v1024_v44 = vsel %vm905_vm15, %v1021_v22, %v1023_v38 }
  0x70   : > { %v1120_v26 = vrot.slane %v1118_v23, 2 }
  0x72   : > { %1652 = vmatmul.msk.bf16.gmra.mxu1 %vm479_vm2, %v2100_v60  ;;  %v1014_v60 = vpack.c.b16 %v1004_v53, %v1003_v55  ;;  %v1124_v28 = vor.u32 %v1123_v24, %v1120_v26  ;;  %v1025_v53 = vrot.slane %v2225_v32, 2 }
  0x74   : > { %v1101_v52 = vshrl.u32 %v1014_v60, 16  ;;  %v1104_v61 = vshll.u32 %v1014_v60, 16  ;;  %v1020_v29 = vrot.slane %v1014_v60, 2  ;;  %v1141_v60 = vrot.slane %v1139_v18, 3 }
  0x75   : > { %v1026_v59 = vsel %vm905_vm15, %v1023_v38, %v1025_v53 }
  0x76   : > { %1677 = vmatmul.msk.bf16.gmra.mxu3 %vm479_vm2, %v710_v17  ;;  %v1103_v6 = vrot.slane %v1101_v52, 2  ;;  %v1106_v13 = vrot.slane %v1104_v61, 3  ;;  %v911_v17 = vrot.slane %v2153_v63, 2  ;;  %v1022_v27 = vsel %vm905_vm15, %v1020_v29, %v1021_v22 }
  0x78   : > { %v1107_v9 = vor.u32 %v1106_v13, %v1103_v6  ;;  %v912_v31 = vsel %vm905_vm15, %v909_v8, %v911_v17  ;;  %v914_v48 = vsel %vm905_vm15, %v911_v17, %v913_v43  ;;  %v989_v17 = vld [vmem:[#allocation2 + $0x30] sm:$0x3] }
  0x7b   : > { %1683 = vmatmul.msk.bf16.gmra.mxu0 %vm479_vm2, %v827_v33 }
  0x7e   : > { %1656 = vmatmul.msk.bf16.gmra.mxu2 %vm479_vm2, %v596_v62  ;;  %v1112_v62 = vshll.u32 %v1761_v4, 16 }
  0x80   : > { %v1114_v7 = vrot.slane %v1112_v62, 3 }
  0x82   : > { %1653 = vmatmul.msk.bf16.gmra.mxu1 %vm479_vm2, %v2110_v5  ;;  %v598_v5 = vsel %vm589_vm14, %v595_v58, %v597_v30  ;;  %v1223_v58 = vrot.slane %v1761_v4, 3  ;;  %v1115_v10 = vor.u32 %v1114_v7, %v1111_v1 }
  0x84   : > { %v1224_v0 = vsel %vm1221_vm0, %v1222_v46, %v1223_v58  ;;  %v1116_v14 = vsel %vm1099_vm4, %v1107_v9, %v1115_v10  ;;  %v1226_v21 = vsel %vm1221_vm0, %v1223_v58, %v1225_v15  ;;  %v1125_v33 = vsel %vm1099_vm4, %v1115_v10, %v1124_v28  ;;  %v1093_v58 = vld [vmem:[#allocation2 + $0x30] sm:$0x7] }
  0x85   : > { %v915_v46 = vrot.slane %v2185_v35, 2  ;;  %v1097_v52 = vunpack.c.l.b16 %v1093_v58 }
  0x86   : > { %1678 = vmatmul.msk.bf16.gmra.mxu3 %vm479_vm2, %v712_v42  ;;  %v1132_v42 = vrot.slane %v1130_v2, 3 }
  0x87   : > { %v1098_v35 = vpack.c.b16 %v1097_v52, %v1097_v52 }
  0x88   : > { %v1133_v45 = vor.u32 %v1132_v42, %v1129_v19 }
  0x89   : > { %v1231_v9 = vrot.slane %v1098_v35, 3  ;;  %v1148_v12 = vshll.u32 %v1098_v35, 16 }
  0x8a   : > { %v1134_v36 = vsel %vm1099_vm4, %v1124_v28, %v1133_v45 }
  0x8b   : > { %1684 = vmatmul.msk.bf16.gmra.mxu0 %vm479_vm2, %v836_v25  ;;  %v1232_v20 = vsel %vm1221_vm0, %v1229_v16, %v1231_v9  ;;  %v1150_v26 = vrot.slane %v1148_v12, 3 }
  0x8e   : > { %1657 = vmatmul.msk.bf16.gmra.mxu2 %vm479_vm2, %v598_v5 }
  0x92   : > { %1685 = vmatmul.msk.bf16.vlgmr.msra.gmra.mxu1 %vm479_vm2, %v908_v54 }
  0x96   : > { %1679 = vmatmul.msk.bf16.gmra.mxu3 %vm479_vm2, %v714_v57  ;;  %v1138_v57 = vrot.slane %v1136_v51, 2 }
  0x98   : > { %v1142_v61 = vor.u32 %v1141_v60, %v1138_v57 }
  0x9a   : > { %v1143_v8 = vsel %vm1099_vm4, %v1133_v45, %v1142_v61 }
  0x9b   : > { %1716 = vmatmul.msk.bf16.vlgmr.msra.gmra.mxu0 %vm479_vm2, %v1224_v0  ;;  %v916_v0 = vsel %vm905_vm15, %v913_v43, %v915_v46 }
  0x9e   : > { %1658 = vmatmul.msk.bf16.gmra.mxu2 %vm479_vm2, %v600_v34  ;;  %v1227_v34 = vrot.slane %v2225_v32, 3 }
  0xa0   : > { %v1228_v40 = vsel %vm1221_vm0, %v1225_v15, %v1227_v34  ;;  %v1230_v55 = vsel %vm1221_vm0, %v1227_v34, %v1229_v16 }
  0xa2   : > { %1686 = vmatmul.msk.bf16.gmra.mxu1 %vm479_vm2, %v910_v11  ;;  %v1145_v11 = vshrl.u32 %v1098_v35, 16 }
  0xa6   : > { %1711 = vmatmul.msk.bf16.vlgmr.msra.gmra.mxu3 %vm479_vm2, %v1116_v14  ;;  %v1027_v14 = vrot.slane %v2239_v3, 2 }
  0xa8   : > { %v1028_v24 = vsel %vm905_vm15, %v1025_v53, %v1027_v14 }
  0xab   : > { %1717 = vmatmul.msk.bf16.gmra.mxu0 %vm479_vm2, %v1226_v21  ;;  %v1147_v21 = vrot.slane %v1145_v11, 2 }
  0xae   : > { %1706 = vmatmul.msk.bf16.vlgmr.msra.gmra.mxu2 %vm479_vm2, %v1022_v27  ;;  %v1151_v27 = vor.u32 %v1150_v26, %v1147_v21 }
  0xaf   : > { %v516_v30 = vpop.f32.mrf.mxu1 }
  0xb0   : > { %v1152_v37 = vsel %vm1099_vm4, %v1142_v61, %v1151_v27 }
  0xb2   : > { %1687 = vmatmul.msk.bf16.gmra.mxu1 %vm479_vm2, %v912_v31  ;;  %v1013_v31 = vunpack.c.l.b16 %v989_v17 }
  0xb4   : > { %v1019_v2 = vpack.c.b16 %v1013_v31, %v1013_v31 }
  0xb6   : > { %1712 = vmatmul.msk.bf16.gmra.mxu3 %vm479_vm2, %v1125_v33  ;;  %v1029_v19 = vrot.slane %v1019_v2, 2 }
  0xb7   : > { %v518_v63 = vpop.f32.mrf.mxu1 }
  0xb8   : > { %v511_v39 = vpop.f32.mrf.mxu0 }
  0xbb   : > { %1718 = vmatmul.msk.bf16.gmra.mxu0 %vm479_vm2, %v1228_v40 }
  0xbe   : > { %1707 = vmatmul.msk.bf16.gmra.mxu2 %vm479_vm2, %v1024_v44 }
  0xbf   : > { %v558_v47 = vpop.f32.mrf.mxu1 }
  0xc0   : > { %v559_v25 = vadd.f32 %v558_v47, %v511_v39  ;;  %v513_v49 = vpop.f32.mrf.mxu0 }
  0xc1   : > { %v521_v50 = vpop.f32.mrf.mxu2 }
  0xc2   : > { %1688 = vmatmul.msk.bf16.gmra.mxu1 %vm479_vm2, %v914_v48  ;;  %v1030_v48 = vsel %vm905_vm15, %v1027_v14, %v1029_v19 }
  0xc6   : > { %1713 = vmatmul.msk.bf16.gmra.mxu3 %vm479_vm2, %v1134_v36 }
  0xc7   : > { %v560_v5 = vpop.f32.mrf.mxu1 }
  0xc8   : > { %v561_v56 = vadd.f32 %v560_v5, %v513_v49  ;;  %v864_v54 = vpop.f32.mrf.mxu0 }
  0xc9   : > { %v2248_v41 = vpop.f32.mrf.mxu3  ;;  %v523_v4 = vpop.f32.mrf.mxu2 }
  0xcb   : > { %1719 = vmatmul.msk.bf16.gmra.mxu0 %vm479_vm2, %v1230_v55 }
  0xce   : > { %1708 = vmatmul.msk.bf16.gmra.mxu2 %vm479_vm2, %v1026_v59 }
  0xcf   : > { %v563_v62 = vpop.f32.mrf.mxu1 }
  0xd0   : > { %v564_v1 = vadd.f32 %v563_v62, %v516_v30  ;;  %v866_v6 = vpop.f32.mrf.mxu0 }
  0xd1   : > { %v2255_v13 = vpop.f32.mrf.mxu3  ;;  %v526_v7 = vpop.f32.mrf.mxu2 }
  0xd2   : > { %1689 = vmatmul.msk.bf16.gmra.mxu1 %vm479_vm2, %v916_v0 }
  0xd6   : > { %1714 = vmatmul.msk.bf16.gmra.mxu3 %vm479_vm2, %v1143_v8 }
  0xd7   : > { %v565_v10 = vpop.f32.mrf.mxu1 }
  0xd8   : > { %v566_v15 = vadd.f32 %v565_v10, %v518_v63  ;;  %v869_v23 = vpop.f32.mrf.mxu0 }
  0xd9   : > { %v742_v29 = vpop.f32.mrf.mxu3  ;;  %v528_v22 = vpop.f32.mrf.mxu2 }
  0xdb   : > { %1720 = vmatmul.msk.bf16.gmra.mxu0 %vm479_vm2, %v1232_v20 }
  0xde   : > { %1709 = vmatmul.msk.bf16.gmra.mxu2 %vm479_vm2, %v1028_v24 }
  0xdf   : > { %v568_v28 = vpop.f32.mrf.mxu1 }
  0xe0   : > { %v569_v30 = vadd.f32 %v568_v28, %v521_v50  ;;  %v871_v32 = vpop.f32.mrf.mxu0 }
  0xe1   : > { %v744_v33 = vpop.f32.mrf.mxu3  ;;  %v628_v34 = vpop.f32.mrf.mxu2 }
  0xe2   : > { %v653_v63 = vadd.f32 %v628_v34, %v559_v25 }
  0xe4   : > { %v767_v38 = vadd.f32 %v742_v29, %v653_v63 }
  0xe6   : > { %1715 = vmatmul.msk.bf16.gmra.mxu3 %vm479_vm2, %v1152_v37  ;;  %v2267_v40 = vadd.f32 %v864_v54, %v767_v38 }
  0xe7   : > { %v570_v39 = vpop.f32.mrf.mxu1 }
  0xe8   : > { %v571_v42 = vadd.f32 %v570_v39, %v523_v4  ;;  %v874_v43 = vpop.f32.mrf.mxu0 }
  0xe9   : > { %v747_v44 = vpop.f32.mrf.mxu3  ;;  %v630_v45 = vpop.f32.mrf.mxu2 }
  0xea   : > { %v654_v47 = vadd.f32 %v630_v45, %v561_v56 }
  0xec   : > { %v768_v49 = vadd.f32 %v744_v33, %v654_v47 }
  0xee   : > { %1710 = vmatmul.msk.bf16.gmra.mxu2 %vm479_vm2, %v1030_v48  ;;  %v890_v50 = vadd.f32 %v866_v6, %v768_v49 }
  0xef   : > { %v573_v25 = vpop.f32.mrf.mxu1 }
  0xf0   : > { %v574_v3 = vadd.f32 %v573_v25, %v526_v7  ;;  %v876_v5 = vpop.f32.mrf.mxu0 }
  0xf1   : > { %v749_v36 = vpop.f32.mrf.mxu3  ;;  %v633_v16 = vpop.f32.mrf.mxu2 }
  0xf2   : > { %v655_v51 = vadd.f32 %v633_v16, %v564_v1 }
  0xf4   : > { %v769_v18 = vadd.f32 %v747_v44, %v655_v51 }
  0xf6   : > { %v891_v54 = vadd.f32 %v869_v23, %v769_v18 }
  0xf7   : > { %v575_v53 = vpop.f32.mrf.mxu1 }
  0xf8   : > { %v576_v55 = vadd.f32 %v575_v53, %v528_v22  ;;  %v879_v56 = vpop.f32.mrf.mxu0 }
  0xf9   : > { %v752_v4 = vpop.f32.mrf.mxu3  ;;  %v635_v57 = vpop.f32.mrf.mxu2 }
  0xfa   : > { %v656_v60 = vadd.f32 %v635_v57, %v566_v15 }
  0xfc   : > { %v770_v46 = vadd.f32 %v749_v36, %v656_v60 }
  0xfe   : > { %v2271_v59 = vadd.f32 %v871_v32, %v770_v46  ;;  %v2288_v46 = vld [vmem:[#allocation5] ss:$0 sm:$0xff] }
  0xff   : > { %v578_v58 = vpop.f32.mrf.mxu1 }
 0x100   : > { %v579_v52 = vadd.f32 %v578_v58, %v2248_v41  ;;  %v881_v7 = vpop.f32.mrf.mxu0 }
 0x101   : > { %v754_v61 = vpop.f32.mrf.mxu3  ;;  %v638_v62 = vpop.f32.mrf.mxu2 }
 0x102   : > { %v657_v0 = vadd.f32 %v638_v62, %v569_v30 }
 0x104   : > { %v771_v6 = vadd.f32 %v752_v4, %v657_v0 }
 0x106   : > { %v2274_v35 = vadd.f32 %v874_v43, %v771_v6 }
 0x107   : > { %v580_v1 = vpop.f32.mrf.mxu1 }
 0x108   : > { %v581_v8 = vadd.f32 %v580_v1, %v2255_v13  ;;  %v884_v15 = vpop.f32.mrf.mxu0 }
 0x109   : > { %v757_v9 = vpop.f32.mrf.mxu3  ;;  %v640_v10 = vpop.f32.mrf.mxu2 }
 0x10a   : > { %v658_v11 = vadd.f32 %v640_v10, %v571_v42 }
 0x10c   : > { %v772_v12 = vadd.f32 %v754_v61, %v658_v11 }
 0x10e   : > { %v2277_v14 = vadd.f32 %v876_v5, %v772_v12 }
 0x10f   : > { %v944_v27 = vpop.f32.mrf.mxu1 }
 0x110   : > { %v886_v24 = vpop.f32.mrf.mxu0  ;;  %v969_v5 = vadd.f32 %v944_v27, %v2267_v40 }
 0x111   : > { %v759_v23 = vpop.f32.mrf.mxu3  ;;  %v643_v20 = vpop.f32.mrf.mxu2 }
 0x112   : > { %v659_v41 = vadd.f32 %v643_v20, %v574_v3 }
 0x114   : > { %v773_v29 = vadd.f32 %v757_v9, %v659_v41 }
 0x116   : > { %v2279_v22 = vadd.f32 %v879_v56, %v773_v29 }
 0x117   : > { %v946_v63 = vpop.f32.mrf.mxu1 }
 0x118   : > { %v1260_v33 = vpop.f32.mrf.mxu0  ;;  %v970_v49 = vadd.f32 %v946_v63, %v890_v50 }
 0x119   : > { %v762_v21 = vpop.f32.mrf.mxu3  ;;  %v645_v26 = vpop.f32.mrf.mxu2 }
 0x11a   : > { %v660_v17 = vadd.f32 %v645_v26, %v576_v55 }
 0x11c   : > { %v774_v28 = vadd.f32 %v759_v23, %v660_v17 }
 0x11e   : > { %v2281_v13 = vadd.f32 %v881_v7, %v774_v28 }
 0x11f   : > { %v949_v44 = vpop.f32.mrf.mxu1 }
 0x120   : > { %v1262_v42 = vpop.f32.mrf.mxu0  ;;  %v971_v53 = vadd.f32 %v949_v44, %v891_v54 }
 0x121   : > { %v764_v30 = vpop.f32.mrf.mxu3  ;;  %v648_v31 = vpop.f32.mrf.mxu2 }
 0x122   : > { %v661_v32 = vadd.f32 %v648_v31, %v579_v52 }
 0x124   : > { %v775_v34 = vadd.f32 %v762_v21, %v661_v32 }
 0x126   : > { %v2283_v37 = vadd.f32 %v884_v15, %v775_v34 }
 0x127   : > { %v951_v3 = vpop.f32.mrf.mxu1 }
 0x128   : > { %v1265_v48 = vpop.f32.mrf.mxu0  ;;  %v972_v40 = vadd.f32 %v951_v3, %v2271_v59 }
 0x129   : > { %v1180_v2 = vpop.f32.mrf.mxu3  ;;  %v650_v38 = vpop.f32.mrf.mxu2 }
 0x12a   : > { %v662_v39 = vadd.f32 %v650_v38, %v581_v8 }
 0x12c   : > { %v776_v19 = vadd.f32 %v764_v30, %v662_v39 }
 0x12e   : > { %v2285_v43 = vadd.f32 %v886_v24, %v776_v19 }
 0x12f   : > { %v954_v52 = vpop.f32.mrf.mxu1 }
 0x130   : > { %v1267_v56 = vpop.f32.mrf.mxu0  ;;  %v973_v59 = vadd.f32 %v954_v52, %v2274_v35  ;;  %v1334_v35 = vld [vmem:[%s2300_s7] sm:$0x1] }
 0x131   : > { %v1182_v45 = vpop.f32.mrf.mxu3  ;;  %v1058_v47 = vpop.f32.mrf.mxu2 }
 0x132   : > { %v1083_v18 = vadd.f32 %v1058_v47, %v969_v5 }
 0x134   : > { %v1205_v57 = vadd.f32 %v1180_v2, %v1083_v18 }
 0x136   : > { %v1285_v62 = vadd.f32 %v1260_v33, %v1205_v57 }
 0x137   : > { %v956_v41 = vpop.f32.mrf.mxu1 }
 0x138   : > { %v1299_v7 = vadd.f32 %v2288_v46, %v1285_v62  ;;  %v1270_v11 = vpop.f32.mrf.mxu0 }
 0x139   : > { %v1185_v25 = vpop.f32.mrf.mxu3  ;;  %v1060_v36 = vpop.f32.mrf.mxu2 }
 0x13a   : > { %v1084_v16 = vadd.f32 %v1060_v36, %v970_v49  ;;  %v1309_v20 = vmax.f32 %v1299_v7, 0.0 }
 0x13c   : > { %v1206_v51 = vadd.f32 %v1182_v45, %v1084_v16 }
 0x13e   : > { %v1286_v55 = vadd.f32 %v1262_v42, %v1206_v51 }
 0x13f   : > { %v959_v19 = vpop.f32.mrf.mxu1 }
 0x140   : > { %v1300_v50 = vadd.f32 %v2288_v46, %v1286_v55  ;;  %v2312_v63 = vpop.f32.mrf.mxu0 }
 0x141   : > { %v1187_v4 = vpop.f32.mrf.mxu3  ;;  %v1063_v60 = vpop.f32.mrf.mxu2 }
 0x142   : > { %v1085_v58 = vadd.f32 %v1063_v60, %v971_v53  ;;  %v1310_v6 = vmax.f32 %v1300_v50, 0.0  ;;  %v1359_v53 = vld [vmem:[%s2300_s7] sm:$0x2]  ;;  %v975_v50 = vadd.f32 %v959_v19, %v2279_v22 }
 0x144   : > { %v1207_v61 = vadd.f32 %v1185_v25, %v1085_v58  ;;  %v1322_v12 = vrot.slane %v1310_v6, 2 }
 0x146   : > { %v1287_v0 = vadd.f32 %v1265_v48, %v1207_v61 }
 0x148   : > { %v1301_v54 = vadd.f32 %v2288_v46, %v1287_v0  ;;  %v1275_v58 = vpop.f32.mrf.mxu0 }
 0x149   : > { %v1065_v1 = vpop.f32.mrf.mxu2  ;;  %v1190_v8 = vpop.f32.mrf.mxu3 }
 0x14a   : > { %v1311_v9 = vmax.f32 %v1301_v54, 0.0  ;;  %v1086_v10 = vadd.f32 %v1065_v1, %v972_v40  ;;  %v961_v40 = vpop.f32.mrf.mxu1  ;;  %v974_v1 = vadd.f32 %v956_v41, %v2277_v14  ;;  %v1727_v41 = vld [vmem:[%s2300_s7 + $0x2] sm:$0x2] }
 0x14c   : > { %v1323_v15 = vrot.slane %v1311_v9, 2  ;;  %v1208_v23 = vadd.f32 %v1187_v4, %v1086_v10 }
 0x14e   : > { %v1324_v29 = vsel %vm905_vm15, %v1322_v12, %v1323_v15  ;;  %v1288_v26 = vadd.f32 %v1267_v56, %v1208_v23 }
 0x14f   : > { %v1326_v21 = vmax.f32 %v1309_v20, %v1324_v29 }
 0x150   : > { %v1302_v32 = vadd.f32 %v2288_v46, %v1288_v26 }
 0x151   : > { %v1328_v24 = vrot.slane %v1326_v21, 1  ;;  %v1068_v17 = vpop.f32.mrf.mxu2  ;;  %v2302_v30 = vpop.f32.mrf.mxu3 }
 0x152   : > { %v1087_v27 = vadd.f32 %v1068_v17, %v973_v59  ;;  %v1312_v42 = vmax.f32 %v1302_v32, 0.0 }
 0x153   : > { %v1330_v28 = vmax.f32 %v1326_v21, %v1328_v24  ;;  %v976_v21 = vadd.f32 %v961_v40, %v2281_v13 }
 0x154   : > { %v1209_v33 = vadd.f32 %v1190_v8, %v1087_v27  ;;  %v1374_v25 = vrot.slane %v1312_v42, 2  ;;  %v1277_v27 = vpop.f32.mrf.mxu0 }
 0x155   : > { %v1331_v34 = vpack.c.bf16 %v1330_v28, %v1330_v28 }
 0x156   : > { %v1289_v2 = vadd.f32 %v1270_v11, %v1209_v33 }
 0x157   : > { %v1335_v38 = vsel %vm2306_vm8, %v1331_v34, %v1334_v35  ;;  %v1338_v39 = vrot.slane %v1331_v34, 2  ;;  %1351 = vst.sshfl [vmem:[#allocation1] sm:$0xff pattern:$0x75643120] %v1331_v34 }
 0x158   : > { %1336 = vst [vmem:[%s2300_s7] sm:$0x1] %v1335_v38  ;;  %v1303_v44 = vadd.f32 %v2288_v46, %v1289_v2  ;;  %v1722_v2 = vld [vmem:[%s2300_s7 + $0x2] sm:$0x1] }
 0x159   : > { %v1341_v45 = vsel %vm496_vm1, %v1331_v34, %v1338_v39  ;;  %v1070_v47 = vpop.f32.mrf.mxu2  ;;  %v1195_v16 = vpop.f32.mrf.mxu3 }
 0x15a   : > { %v1342_v48 = vshll.u32 %v1341_v45, 16  ;;  %v1313_v49 = vmax.f32 %v1303_v44, 0.0  ;;  %v1088_v22 = vadd.f32 %v1070_v47, %v974_v1 }
 0x15c   : > { %v1375_v3 = vrot.slane %v1313_v49, 2  ;;  %v1721_v5 = vrot.slane %v1342_v48, 9  ;;  %v1210_v17 = vadd.f32 %v2302_v30, %v1088_v22 }
 0x15e   : > { %v1353_v51 = vld [vmem:[#allocation1 + $0x1] ss:$2 sm:$0xff]  ;;  %v1376_v55 = vsel %vm905_vm15, %v1374_v25, %v1375_v3  ;;  %v1380_v4 = vmax.f32 %v1312_v42, %v1375_v3  ;;  %v1290_v30 = vadd.f32 %v2312_v63, %v1210_v17 }
 0x15f   : > { %v1348_v57 = vld [vmem:[%s2300_s7] sm:$0x1]  ;;  %1362 = vst.sshfl [vmem:[#allocation1] sm:$0xff pattern:$0x75643120] %v1331_v34  ;;  %v1355_v60 = vrot.slane %v1353_v51, 7  ;;  %v1379_v56 = vmax.f32 %v1311_v9, %v1376_v55  ;;  %v964_v34 = vpop.f32.mrf.mxu1  ;;  %v1280_v51 = vpop.f32.mrf.mxu0 }
 0x160   : > { %v1349_v52 = vsel %vm2321_vm10, %v1721_v5, %v1348_v57  ;;  %v1407_v61 = vrot.slane %v1380_v4, 1  ;;  %v977_v44 = vadd.f32 %v964_v34, %v2283_v37  ;;  %v1304_v48 = vadd.f32 %v2288_v46, %v1290_v30 }
 0x161   : > { %1350 = vst [vmem:[%s2300_s7] sm:$0x1] %v1349_v52  ;;  %v1360_v62 = vsel %vm2327_vm11, %v1355_v60, %v1359_v53  ;;  %v1382_v0 = vrot.slane %v1379_v56, 1  ;;  %v1073_v6 = vpop.f32.mrf.mxu2  ;;  %v1197_v29 = vpop.f32.mrf.mxu3 }
 0x162   : > { %1361 = vst [vmem:[%s2300_s7] sm:$0x2] %v1360_v62  ;;  %v1409_v54 = vmax.f32 %v1380_v4, %v1407_v61  ;;  %v1089_v7 = vadd.f32 %v1073_v6, %v975_v50  ;;  %v1314_v37 = vmax.f32 %v1304_v48, 0.0 }
 0x163   : > { %v1384_v8 = vmax.f32 %v1379_v56, %v1382_v0 }
 0x164   : > { %v1410_v9 = vpack.c.bf16 %v1409_v54, %v1409_v54  ;;  %v1211_v10 = vadd.f32 %v1195_v16, %v1089_v7 }
 0x165   : > { %v1385_v11 = vpack.c.bf16 %v1384_v8, %v1384_v8 }
 0x166   : > { %v1364_v12 = vld [vmem:[#allocation1 + $0x1] ss:$2 sm:$0xff]  ;;  %v1412_v15 = vrot.slane %v1410_v9, 2  ;;  %v1291_v59 = vadd.f32 %v1275_v58, %v1211_v10  ;;  %v1731_v10 = vld [vmem:[%s2300_s7 + $0x4] sm:$0x1] }
 0x167   : > { %v1365_v23 = vshll.u32 %v1364_v12, 16  ;;  %1387 = vst.sshfl [vmem:[#allocation1] sm:$0xff pattern:$0x75643120] %v1385_v11  ;;  %v966_v60 = vpop.f32.mrf.mxu1 }
 0x168   : > { %v1415_v14 = vsel %vm496_vm1, %v1410_v9, %v1412_v15  ;;  %v1305_v13 = vadd.f32 %v2288_v46, %v1291_v59  ;;  %v978_v61 = vadd.f32 %v966_v60, %v2285_v43  ;;  %v1282_v43 = vpop.f32.mrf.mxu0 }
 0x169   : > { %v1369_v26 = vld [vmem:[%s2300_s7] sm:$0x2]  ;;  %v1417_v24 = vrot.slane %v1415_v14, 7  ;;  %v1075_v28 = vpop.f32.mrf.mxu2  ;;  %v1200_v49 = vpop.f32.mrf.mxu3  ;;  %v1422_v3 = vshll.u32 %v1415_v14, 16 }
 0x16a   : > { %v1370_v35 = vsel %vm2344_vm5, %v1365_v23, %v1369_v26  ;;  %v1090_v32 = vadd.f32 %v1075_v28, %v976_v21  ;;  %v1315_v45 = vmax.f32 %v1305_v13, 0.0 }
 0x16b   : > { %1371 = vst [vmem:[%s2300_s7] sm:$0x2] %v1370_v35  ;;  %v1420_v33 = vsel %vm2327_vm11, %v1417_v24, %v1727_v41  ;;  %v1736_v35 = vld [vmem:[%s2300_s7 + $0x4] sm:$0x2] }
 0x16c   : > { %1728 = vst [vmem:[%s2300_s7 + $0x2] sm:$0x2] %v1420_v33  ;;  %v1212_v38 = vadd.f32 %v1197_v29, %v1090_v32  ;;  %v1430_v55 = vrot.slane %v1315_v45, 2 }
 0x16e   : > { %v1389_v39 = vld [vmem:[#allocation1 + $0x1] ss:$2 sm:$0xff]  ;;  %v1292_v19 = vadd.f32 %v1277_v27, %v1212_v38 }
 0x16f   : > { %v1393_v42 = vsel %vm2306_vm8, %v1389_v39, %v1722_v2  ;;  %1395 = vst.sshfl [vmem:[#allocation1] sm:$0xff pattern:$0x75643120] %v1385_v11 }
 0x170   : > { %1723 = vst [vmem:[%s2300_s7 + $0x2] sm:$0x1] %v1393_v42  ;;  %v1306_v47 = vadd.f32 %v2288_v46, %v1292_v19 }
 0x171   : > { %v1078_v25 = vpop.f32.mrf.mxu2  ;;  %v1202_v9 = vpop.f32.mrf.mxu3 }
 0x172   : > { %v1316_v16 = vmax.f32 %v1306_v47, 0.0  ;;  %v1091_v63 = vadd.f32 %v1078_v25, %v977_v44 }
 0x173   : > { %v1729_v5 = vld [vmem:[%s2300_s7 + $0x2] sm:$0x2] }
 0x174   : > { %v1426_v53 = vsel %vm2344_vm5, %v1422_v3, %v1729_v5  ;;  %v1431_v4 = vrot.slane %v1316_v16, 2  ;;  %v1213_v57 = vadd.f32 %v1200_v49, %v1091_v63  ;;  %v1745_v3 = vld [vmem:[%s2300_s7 + $0x6] sm:$0x2] }
 0x175   : > { %1730 = vst [vmem:[%s2300_s7 + $0x2] sm:$0x2] %v1426_v53  ;;  %v1740_v53 = vld [vmem:[%s2300_s7 + $0x6] sm:$0x1] }
 0x176   : > { %v1397_v56 = vld [vmem:[#allocation1 + $0x1] ss:$2 sm:$0xff]  ;;  %v1432_v58 = vsel %vm905_vm15, %v1430_v55, %v1431_v4  ;;  %v1293_v62 = vadd.f32 %v1280_v51, %v1213_v57 }
 0x177   : > { %v1398_v52 = vshll.u32 %v1397_v56, 16  ;;  %v1434_v50 = vmax.f32 %v1314_v37, %v1432_v58  ;;  %v1725_v54 = vld [vmem:[%s2300_s7 + $0x2] sm:$0x1] }
 0x178   : > { %v1307_v11 = vadd.f32 %v2288_v46, %v1293_v62 }
 0x179   : > { %v1724_v0 = vrot.slane %v1398_v52, 9  ;;  %v1436_v40 = vrot.slane %v1434_v50, 1  ;;  %v1080_v6 = vpop.f32.mrf.mxu2 }
 0x17a   : > { %v1092_v7 = vadd.f32 %v1080_v6, %v978_v61  ;;  %v1317_v14 = vmax.f32 %v1307_v11, 0.0 }
 0x17b   : > { %v1404_v1 = vsel %vm2321_vm10, %v1724_v0, %v1725_v54  ;;  %v1438_v8 = vmax.f32 %v1434_v50, %v1436_v40 }
 0x17c   : > { %1726 = vst [vmem:[%s2300_s7 + $0x2] sm:$0x1] %v1404_v1  ;;  %v1214_v22 = vadd.f32 %v1202_v9, %v1092_v7  ;;  %v1477_v24 = vrot.slane %v1317_v14, 2 }
 0x17d   : > { %v1439_v12 = vpack.c.bf16 %v1438_v8, %v1438_v8 }
 0x17e   : > { %v1294_v15 = vadd.f32 %v1282_v43, %v1214_v22 }
 0x17f   : > { %v1442_v23 = vsel %vm2306_vm8, %v1439_v12, %v1731_v10  ;;  %v1445_v29 = vrot.slane %v1439_v12, 2  ;;  %1457 = vst.sshfl [vmem:[#allocation1] sm:$0xff pattern:$0x75643120] %v1439_v12 }
 0x180   : > { %1732 = vst [vmem:[%s2300_s7 + $0x4] sm:$0x1] %v1442_v23  ;;  %v1308_v41 = vadd.f32 %v2288_v46, %v1294_v15 }
 0x181   : > { %v1448_v21 = vsel %vm496_vm1, %v1439_v12, %v1445_v29 }
 0x182   : > { %v1449_v59 = vshll.u32 %v1448_v21, 16  ;;  %v1318_v26 = vmax.f32 %v1308_v41, 0.0 }
 0x184   : > { %v1478_v17 = vrot.slane %v1318_v26, 2  ;;  %v1733_v27 = vrot.slane %v1449_v59, 9 }
 0x186   : > { %v1459_v28 = vld [vmem:[#allocation1 + $0x1] ss:$2 sm:$0xff]  ;;  %v1479_v32 = vsel %vm905_vm15, %v1477_v24, %v1478_v17  ;;  %v1483_v33 = vmax.f32 %v1317_v14, %v1478_v17 }
 0x187   : > { %v1734_v34 = vld [vmem:[%s2300_s7 + $0x4] sm:$0x1]  ;;  %v1461_v2 = vrot.slane %v1459_v28, 7  ;;  %1466 = vst.sshfl [vmem:[#allocation1] sm:$0xff pattern:$0x75643120] %v1439_v12  ;;  %v1482_v13 = vmax.f32 %v1316_v16, %v1479_v32 }
 0x188   : > { %v1455_v46 = vsel %vm2321_vm10, %v1733_v27, %v1734_v34  ;;  %v1510_v38 = vrot.slane %v1483_v33, 1 }
 0x189   : > { %1735 = vst [vmem:[%s2300_s7 + $0x4] sm:$0x1] %v1455_v46  ;;  %v1464_v30 = vsel %vm2327_vm11, %v1461_v2, %v1736_v35  ;;  %v1485_v39 = vrot.slane %v1482_v13, 1 }
 0x18a   : > { %1737 = vst [vmem:[%s2300_s7 + $0x4] sm:$0x2] %v1464_v30  ;;  %v1512_v19 = vmax.f32 %v1483_v33, %v1510_v38 }
 0x18b   : > { %v1487_v42 = vmax.f32 %v1482_v13, %v1485_v39 }
 0x18c   : > { %v1513_v44 = vpack.c.bf16 %v1512_v19, %v1512_v19 }
 0x18d   : > { %v1488_v45 = vpack.c.bf16 %v1487_v42, %v1487_v42 }
 0x18e   : > { %v1468_v47 = vld [vmem:[#allocation1 + $0x1] ss:$2 sm:$0xff]  ;;  %v1515_v48 = vrot.slane %v1513_v44, 2 }
 0x18f   : > { %v1469_v49 = vshll.u32 %v1468_v47, 16  ;;  %1490 = vst.sshfl [vmem:[#allocation1] sm:$0xff pattern:$0x75643120] %v1488_v45 }
 0x190   : > { %v1518_v25 = vsel %vm496_vm1, %v1513_v44, %v1515_v48 }
 0x191   : > { %v1738_v16 = vld [vmem:[%s2300_s7 + $0x4] sm:$0x2]  ;;  %v1520_v63 = vrot.slane %v1518_v25, 7  ;;  %v1525_v57 = vshll.u32 %v1518_v25, 16 }
 0x192   : > { %v1473_v5 = vsel %vm2344_vm5, %v1469_v49, %v1738_v16 }
 0x193   : > { %1739 = vst [vmem:[%s2300_s7 + $0x4] sm:$0x2] %v1473_v5  ;;  %v1523_v51 = vsel %vm2327_vm11, %v1520_v63, %v1745_v3 }
 0x194   : > { %1746 = vst [vmem:[%s2300_s7 + $0x6] sm:$0x2] %v1523_v51 }
 0x196   : > { %v1492_v55 = vld [vmem:[#allocation1 + $0x1] ss:$2 sm:$0xff] }
 0x197   : > { %v1496_v4 = vsel %vm2306_vm8, %v1492_v55, %v1740_v53  ;;  %1498 = vst.sshfl [vmem:[#allocation1] sm:$0xff pattern:$0x75643120] %v1488_v45 }
 0x198   : > { %1741 = vst [vmem:[%s2300_s7 + $0x6] sm:$0x1] %v1496_v4 }
 0x19b   : > { %v1747_v37 = vld [vmem:[%s2300_s7 + $0x6] sm:$0x2] }
 0x19c   : > { %v1529_v60 = vsel %vm2344_vm5, %v1525_v57, %v1747_v37 }
 0x19d   : > { %1748 = vst [vmem:[%s2300_s7 + $0x6] sm:$0x2] %v1529_v60 }
 0x19e   : > { %v1500_v56 = vld [vmem:[#allocation1 + $0x1] ss:$2 sm:$0xff] }
 0x19f   : > { %v1501_v58 = vshll.u32 %v1500_v56, 16  ;;  %v1743_v18 = vld [vmem:[%s2300_s7 + $0x6] sm:$0x1] }
 0x1a1   : > { %v1742_v52 = vrot.slane %v1501_v58, 9 }
 0x1a3   : > { %v1507_v50 = vsel %vm2321_vm10, %v1742_v52, %v1743_v18 }
 0x1a4   : > { %1744 = vst [vmem:[%s2300_s7 + $0x6] sm:$0x1] %v1507_v50 }
 0x1a5 PF: > { %s15_s12 = sadd.s32 1, %s1883_s12  }
 0x1a6   : > { %p12_p7 = scmp.ge.s32.totalorder %s15_s12, 4  }
 0x1a8   :  { %14 = sbr.rel (!%p12_p7) target bundleno = 2 (0x2), region = 97 }
 0x1ad   :  { %1552 = vsyncpa [#allocation4], 1 }
 0x1ae   :  { %1554 = vsyncpa [#allocation4 + $0x1], 1 }
 0x1af   :  { %1555 = vsyncpa [#allocation6], 1 }

// kernel: vgg_forward.8
= control target key start
LH: loop header
LB: loop body
LE: loop exit
PB: predicated region body
PF: predicated region fallthrough
CT: control target
= control target key end

     0   :  { %8 = vsyncpa [#allocation4], 0  ;;  %s8227_s0 = inlined_call_operand.vmem [shape: bf16[2,1,1,256], index: 0, kind: input, shape index: {}]   ;;  %s8228_s1 = inlined_call_operand.hbm [shape: bf16[9,256,512], index: 1, kind: input, shape index: {}]   ;;  %s8229_s2 = inlined_call_operand.hbm [shape: f32[1,512], index: 2, kind: input, shape index: {}]   ;;  %s8230_s3 = inlined_call_operand.vmem [shape: bf16[2,1,1,512], index: 3, kind: output, shape index: {}]  }
   0x1   :  { %9 = vsyncpa [#allocation6], 0  ;;  %s7927_s12 = smov 0  }
   0x2 LB: > { %s125_s15 = sshll.u32 %s8228_s1, 4  ;;  %s7936_s16 = sadd.s32 4294967295, %s7900_s12   ;;  %s7900_s12 = sphi %s7927_s12, %s15_s12   ;;  %s126_s15 = int_to_ptr.hbm [resolvable:$true] %s125_s15 }
   0x3   : > { %p4893_p0 = scmp.ge.s32.totalorder %s7900_s12, 1  ;;  %p114_p1 = scmp.lt.s32.totalorder %s7900_s12, 3 }
   0x4   : > { %p7809_p2 = scmp.eq.s32.totalorder %s7936_s16, 0  ;;  %s7902_s18 = smov [#allocation3]  }
   0x5   : > { %p7941_p3 = pnand %p4893_p0, %p114_p1  ;;  %s127_s19 = sshll.u32 %s7902_s18, 4  ;;  %s128_s19 = int_to_ptr.vmem [resolvable:$true] %s127_s19 }
   0x6   : > { %s140_s22 = sshll.u32 %s8229_s2, 4  ;;  %s7903_s23 = smov [#allocation5]   ;;  %s141_s22 = int_to_ptr.hbm [resolvable:$true] %s140_s22 }
   0x7   : > { %p7802_p4 = pneg %p7941_p3  ;;  %s142_s24 = sshll.u32 %s7903_s23, 4  ;;  %s143_s24 = int_to_ptr.vmem [resolvable:$true] %s142_s24 }
   0x8   : > { %s7904_s25 = smov 256   ;;  %s7905_s26 = smov 16  }
   0x9   : > { %p7803_p5 = pnand %p7809_p2, %p7802_p4  ;;  %162 = sbr.rel (%p7941_p3) target bundleno = 746 (0x2ea), region = 32 }
   0xb   : > { %7805 = dma.hbm_to_vmem [thread:$0]  (!%p7803_p5), %s126_s15, 73728, %s128_s19, [#allocation4], %s7904_s25, %s7904_s25, %s7905_s26  }
   0xc   : > { %7808 = dma.hbm_to_vmem [thread:$0]  (!%p7803_p5), %s141_s22, 64, %s143_s24, [#allocation6]  }
   0xe   : > { %7891 = dma.done.wait (%p7809_p2), [#allocation4], 73728  }
   0xf   : > { %7893 = vsyncadd (%p7809_p2), [#allocation4], 4294893568 }
  0x10   : > { %7895 = dma.done.wait (%p7809_p2), [#allocation6], 64  }
  0x11   : > { %7897 = vsyncadd (%p7809_p2), [#allocation6], 4294967232  ;;  %v5016_v0 = vld [vmem:[#allocation3 + $0x2e0] sm:$0xf]  ;;  %v7310_v1 = vld [vmem:[#allocation3 + $0x2ec] sm:$0xf0] }
  0x12   : > { %v5144_v2 = vld [vmem:[#allocation3 + $0x3e0] sm:$0xf]  ;;  %v5017_v3 = vor.u32 %v7310_v1, %v5016_v0  ;;  %v7342_v4 = vld [vmem:[#allocation3 + $0x3ec] sm:$0xf0]  ;;  %v7308_v5 = vld [vmem:[#allocation3 + $0x2e4] sm:$0xf] }
  0x13   : > { %v5018_v6 = vld [vmem:[#allocation3 + $0x2f0] sm:$0xf0]  ;;  %v5145_v7 = vor.u32 %v7342_v4, %v5144_v2  ;;  %v7340_v9 = vld [vmem:[#allocation3 + $0x3e4] sm:$0xf]  ;;  %v5000_v11 = vld [vmem:[#allocation3 + $0x2c0] sm:$0xf] }
  0x14   : > { %v5021_v8 = vor.u32 %v7308_v5, %v5018_v6  ;;  %v5146_v10 = vld [vmem:[#allocation3 + $0x3f0] sm:$0xf0]  ;;  %688 = vmatpush.bf16.msra.mxu0 %v5017_v3  ;;  %v7306_v13 = vld [vmem:[#allocation3 + $0x2cc] sm:$0xf0]  ;;  %v5128_v14 = vld [vmem:[#allocation3 + $0x3c0] sm:$0xf] }
  0x15   : > { %v5149_v12 = vor.u32 %v7340_v9, %v5146_v10  ;;  %v7338_v15 = vld [vmem:[#allocation3 + $0x3cc] sm:$0xf0]  ;;  %701 = vmatpush.bf16.msra.mxu1 %v5145_v7  ;;  %v5001_v16 = vor.u32 %v7306_v13, %v5000_v11  ;;  %v7304_v18 = vld [vmem:[#allocation3 + $0x2c4] sm:$0xf]  ;;  %v5002_v19 = vld [vmem:[#allocation3 + $0x2d0] sm:$0xf0] }
  0x16   : > { %714 = vmatpush.bf16.msra.mxu2 %v5021_v8  ;;  %v5129_v17 = vor.u32 %v7338_v15, %v5128_v14  ;;  %v7336_v20 = vld [vmem:[#allocation3 + $0x3c4] sm:$0xf]  ;;  %v5005_v21 = vor.u32 %v7304_v18, %v5002_v19  ;;  %v5130_v22 = vld [vmem:[#allocation3 + $0x3d0] sm:$0xf0]  ;;  %v4984_v23 = vld [vmem:[#allocation3 + $0x2a0] sm:$0xf] }
  0x17   : > { %727 = vmatpush.bf16.msra.mxu3 %v5149_v12  ;;  %v7302_v24 = vld [vmem:[#allocation3 + $0x2ac] sm:$0xf0]  ;;  %v5133_v25 = vor.u32 %v7336_v20, %v5130_v22  ;;  %v5112_v26 = vld [vmem:[#allocation3 + $0x3a0] sm:$0xf]  ;;  %v7300_v28 = vld [vmem:[#allocation3 + $0x2a4] sm:$0xf] }
  0x18   : > { %v7334_v27 = vld [vmem:[#allocation3 + $0x3ac] sm:$0xf0]  ;;  %689 = vmatpush.bf16.msra.mxu0 %v5001_v16  ;;  %v4985_v29 = vor.u32 %v7302_v24, %v4984_v23  ;;  %v4986_v30 = vld [vmem:[#allocation3 + $0x2b0] sm:$0xf0]  ;;  %v7332_v31 = vld [vmem:[#allocation3 + $0x3a4] sm:$0xf] }
  0x19   : > { %v5114_v32 = vld [vmem:[#allocation3 + $0x3b0] sm:$0xf0]  ;;  %702 = vmatpush.bf16.msra.mxu1 %v5129_v17  ;;  %v5113_v33 = vor.u32 %v7334_v27, %v5112_v26  ;;  %v4989_v34 = vor.u32 %v7300_v28, %v4986_v30  ;;  %v4968_v35 = vld [vmem:[#allocation3 + $0x280] sm:$0xf]  ;;  %v7298_v36 = vld [vmem:[#allocation3 + $0x28c] sm:$0xf0] }
  0x1a   : > { %715 = vmatpush.bf16.msra.mxu2 %v5005_v21  ;;  %v5096_v37 = vld [vmem:[#allocation3 + $0x380] sm:$0xf]  ;;  %v5117_v38 = vor.u32 %v7332_v31, %v5114_v32  ;;  %v7330_v39 = vld [vmem:[#allocation3 + $0x38c] sm:$0xf0]  ;;  %v7296_v40 = vld [vmem:[#allocation3 + $0x284] sm:$0xf]  ;;  %v4969_v44 = vor.u32 %v7298_v36, %v4968_v35 }
  0x1b   : > { %728 = vmatpush.bf16.msra.mxu3 %v5133_v25  ;;  %v4970_v41 = vld [vmem:[#allocation3 + $0x290] sm:$0xf0]  ;;  %v7328_v42 = vld [vmem:[#allocation3 + $0x384] sm:$0xf]  ;;  %v5097_v45 = vor.u32 %v7330_v39, %v5096_v37  ;;  %v4952_v47 = vld [vmem:[#allocation3 + $0x260] sm:$0xf] }
  0x1c   : > { %v5098_v43 = vld [vmem:[#allocation3 + $0x390] sm:$0xf0]  ;;  %690 = vmatpush.bf16.msra.mxu0 %v4985_v29  ;;  %v4973_v46 = vor.u32 %v7296_v40, %v4970_v41  ;;  %v7294_v48 = vld [vmem:[#allocation3 + $0x26c] sm:$0xf0]  ;;  %v5080_v49 = vld [vmem:[#allocation3 + $0x360] sm:$0xf] }
  0x1d   : > { %703 = vmatpush.bf16.msra.mxu1 %v5113_v33  ;;  %v5101_v50 = vor.u32 %v7328_v42, %v5098_v43  ;;  %v7326_v51 = vld [vmem:[#allocation3 + $0x36c] sm:$0xf0]  ;;  %v7292_v52 = vld [vmem:[#allocation3 + $0x264] sm:$0xf]  ;;  %v4954_v53 = vld [vmem:[#allocation3 + $0x270] sm:$0xf0]  ;;  %v4953_v56 = vor.u32 %v7294_v48, %v4952_v47 }
  0x1e   : > { %716 = vmatpush.bf16.msra.mxu2 %v4989_v34  ;;  %v7324_v54 = vld [vmem:[#allocation3 + $0x364] sm:$0xf]  ;;  %v5082_v55 = vld [vmem:[#allocation3 + $0x370] sm:$0xf0]  ;;  %v5081_v57 = vor.u32 %v7326_v51, %v5080_v49  ;;  %v4957_v58 = vor.u32 %v7292_v52, %v4954_v53  ;;  %v4936_v59 = vld [vmem:[#allocation3 + $0x240] sm:$0xf] }
  0x1f   : > { %729 = vmatpush.bf16.msra.mxu3 %v5117_v38  ;;  %v7290_v60 = vld [vmem:[#allocation3 + $0x24c] sm:$0xf0]  ;;  %v5064_v61 = vld [vmem:[#allocation3 + $0x340] sm:$0xf]  ;;  %v5085_v62 = vor.u32 %v7324_v54, %v5082_v55  ;;  %v7288_v0 = vld [vmem:[#allocation3 + $0x244] sm:$0xf] }
  0x20   : > { %691 = vmatpush.bf16.msra.mxu0 %v4969_v44  ;;  %v7322_v63 = vld [vmem:[#allocation3 + $0x34c] sm:$0xf0]  ;;  %v4938_v1 = vld [vmem:[#allocation3 + $0x250] sm:$0xf0]  ;;  %v7320_v2 = vld [vmem:[#allocation3 + $0x344] sm:$0xf]  ;;  %v4937_v4 = vor.u32 %v7290_v60, %v4936_v59 }
  0x21   : > { %704 = vmatpush.bf16.msra.mxu1 %v5097_v45  ;;  %v5066_v3 = vld [vmem:[#allocation3 + $0x350] sm:$0xf0]  ;;  %v5065_v5 = vor.u32 %v7322_v63, %v5064_v61  ;;  %v4941_v6 = vor.u32 %v7288_v0, %v4938_v1  ;;  %v4920_v7 = vld [vmem:[#allocation3 + $0x220] sm:$0xf]  ;;  %v7286_v8 = vld [vmem:[#allocation3 + $0x22c] sm:$0xf0] }
  0x22   : > { %717 = vmatpush.bf16.msra.mxu2 %v4973_v46  ;;  %v5048_v9 = vld [vmem:[#allocation3 + $0x320] sm:$0xf]  ;;  %v5069_v10 = vor.u32 %v7320_v2, %v5066_v3  ;;  %v7318_v11 = vld [vmem:[#allocation3 + $0x32c] sm:$0xf0]  ;;  %v7284_v12 = vld [vmem:[#allocation3 + $0x224] sm:$0xf]  ;;  %v4921_v16 = vor.u32 %v7286_v8, %v4920_v7 }
  0x23   : > { %730 = vmatpush.bf16.msra.mxu3 %v5101_v50  ;;  %v4922_v13 = vld [vmem:[#allocation3 + $0x230] sm:$0xf0]  ;;  %v7316_v14 = vld [vmem:[#allocation3 + $0x324] sm:$0xf]  ;;  %v4904_v17 = vld [vmem:[#allocation3 + $0x200] sm:$0xf]  ;;  %v5049_v19 = vor.u32 %v7318_v11, %v5048_v9 }
  0x24   : > { %692 = vmatpush.bf16.msra.mxu0 %v4953_v56  ;;  %v5050_v15 = vld [vmem:[#allocation3 + $0x330] sm:$0xf0]  ;;  %v7282_v18 = vld [vmem:[#allocation3 + $0x20c] sm:$0xf0]  ;;  %v4925_v20 = vor.u32 %v7284_v12, %v4922_v13  ;;  %v5032_v21 = vld [vmem:[#allocation3 + $0x300] sm:$0xf] }
  0x25   : > { %705 = vmatpush.bf16.msra.mxu1 %v5081_v57  ;;  %v7314_v22 = vld [vmem:[#allocation3 + $0x30c] sm:$0xf0]  ;;  %v7280_v23 = vld [vmem:[#allocation3 + $0x204] sm:$0xf]  ;;  %v5053_v24 = vor.u32 %v7316_v14, %v5050_v15  ;;  %v4906_v25 = vld [vmem:[#allocation3 + $0x210] sm:$0xf0]  ;;  %v4905_v31 = vor.u32 %v7282_v18, %v4904_v17 }
  0x26   : > { %718 = vmatpush.bf16.msra.mxu2 %v4957_v58  ;;  %v7312_v26 = vld [vmem:[#allocation3 + $0x304] sm:$0xf]  ;;  %v5034_v27 = vld [vmem:[#allocation3 + $0x310] sm:$0xf0]  ;;  %v5024_v28 = vld [vmem:[#allocation3 + $0x2e8] sm:$0xf]  ;;  %v5033_v35 = vor.u32 %v7314_v22, %v5032_v21  ;;  %v4909_v36 = vor.u32 %v7280_v23, %v4906_v25 }
  0x27   : > { %731 = vmatpush.bf16.msra.mxu3 %v5085_v62  ;;  %v7311_v29 = vld [vmem:[#allocation3 + $0x2f4] sm:$0xf0]  ;;  %v5152_v30 = vld [vmem:[#allocation3 + $0x3e8] sm:$0xf]  ;;  %v7309_v33 = vld [vmem:[#allocation3 + $0x2ec] sm:$0xf]  ;;  %v5037_v39 = vor.u32 %v7312_v26, %v5034_v27 }
  0x28   : > { %693 = vmatpush.bf16.msra.mxu0 %v4937_v4  ;;  %v7343_v32 = vld [vmem:[#allocation3 + $0x3f4] sm:$0xf0]  ;;  %v5026_v34 = vld [vmem:[#allocation3 + $0x2f8] sm:$0xf0]  ;;  %v7341_v37 = vld [vmem:[#allocation3 + $0x3ec] sm:$0xf]  ;;  %v5025_v40 = vor.u32 %v7311_v29, %v5024_v28 }
  0x29   : > { %706 = vmatpush.bf16.msra.mxu1 %v5065_v5  ;;  %v5154_v38 = vld [vmem:[#allocation3 + $0x3f8] sm:$0xf0]  ;;  %v5153_v41 = vor.u32 %v7343_v32, %v5152_v30  ;;  %v5029_v42 = vor.u32 %v7309_v33, %v5026_v34  ;;  %v5008_v43 = vld [vmem:[#allocation3 + $0x2c8] sm:$0xf]  ;;  %v7307_v44 = vld [vmem:[#allocation3 + $0x2d4] sm:$0xf0] }
  0x2a   : > { %719 = vmatpush.bf16.msra.mxu2 %v4941_v6  ;;  %v5136_v45 = vld [vmem:[#allocation3 + $0x3c8] sm:$0xf]  ;;  %v5157_v46 = vor.u32 %v7341_v37, %v5154_v38  ;;  %v7339_v47 = vld [vmem:[#allocation3 + $0x3d4] sm:$0xf0]  ;;  %v7305_v48 = vld [vmem:[#allocation3 + $0x2cc] sm:$0xf]  ;;  %v5009_v52 = vor.u32 %v7307_v44, %v5008_v43 }
  0x2b   : > { %732 = vmatpush.bf16.msra.mxu3 %v5069_v10  ;;  %v5010_v49 = vld [vmem:[#allocation3 + $0x2d8] sm:$0xf0]  ;;  %v7337_v50 = vld [vmem:[#allocation3 + $0x3cc] sm:$0xf]  ;;  %v5137_v53 = vor.u32 %v7339_v47, %v5136_v45  ;;  %v4992_v55 = vld [vmem:[#allocation3 + $0x2a8] sm:$0xf] }
  0x2c   : > { %694 = vmatpush.bf16.msra.mxu0 %v4921_v16  ;;  %v5138_v51 = vld [vmem:[#allocation3 + $0x3d8] sm:$0xf0]  ;;  %v5013_v54 = vor.u32 %v7305_v48, %v5010_v49  ;;  %v7303_v56 = vld [vmem:[#allocation3 + $0x2b4] sm:$0xf0]  ;;  %v5120_v57 = vld [vmem:[#allocation3 + $0x3a8] sm:$0xf] }
  0x2d   : > { %707 = vmatpush.bf16.msra.mxu1 %v5049_v19  ;;  %v5141_v58 = vor.u32 %v7337_v50, %v5138_v51  ;;  %v7335_v59 = vld [vmem:[#allocation3 + $0x3b4] sm:$0xf0]  ;;  %v7301_v60 = vld [vmem:[#allocation3 + $0x2ac] sm:$0xf]  ;;  %v4994_v61 = vld [vmem:[#allocation3 + $0x2b8] sm:$0xf0]  ;;  %v4993_v0 = vor.u32 %v7303_v56, %v4992_v55 }
  0x2e   : > { %720 = vmatpush.bf16.msra.mxu2 %v4925_v20  ;;  %v7333_v62 = vld [vmem:[#allocation3 + $0x3ac] sm:$0xf]  ;;  %v5122_v63 = vld [vmem:[#allocation3 + $0x3b8] sm:$0xf0]  ;;  %v4976_v1 = vld [vmem:[#allocation3 + $0x288] sm:$0xf]  ;;  %v5121_v3 = vor.u32 %v7335_v59, %v5120_v57  ;;  %v4997_v4 = vor.u32 %v7301_v60, %v4994_v61 }
  0x2f   : > { %733 = vmatpush.bf16.msra.mxu3 %v5053_v24  ;;  %v7299_v2 = vld [vmem:[#allocation3 + $0x294] sm:$0xf0]  ;;  %v5104_v5 = vld [vmem:[#allocation3 + $0x388] sm:$0xf]  ;;  %v7906_v7 = vmov 0   ;;  %v5125_v8 = vor.u32 %v7333_v62, %v5122_v63  ;;  %p190_p6 = scmp.lt.s32.totalorder %s7936_s16, 1 }
  0x30   : > { %695 = vmatpush.bf16.msra.mxu0 %v4905_v31  ;;  %v7331_v6 = vld [vmem:[#allocation3 + $0x394] sm:$0xf0]  ;;  %199 = vst [vmem:[#allocation2] sm:$0xff] %v7906_v7  ;;  %v7297_v9 = vld [vmem:[#allocation3 + $0x28c] sm:$0xf]  ;;  %v4977_v13 = vor.u32 %v7299_v2, %v4976_v1  ;;  %vm207_vm0 = vcmask 1042434  }
  0x31   : > { %708 = vmatpush.bf16.msra.mxu1 %v5033_v35  ;;  %v4978_v10 = vld [vmem:[#allocation3 + $0x298] sm:$0xf0]  ;;  %200 = vst [vmem:[#allocation2 + $0x8] sm:$0x33] %v7906_v7  ;;  %v7329_v11 = vld [vmem:[#allocation3 + $0x38c] sm:$0xf]  ;;  %v5105_v14 = vor.u32 %v7331_v6, %v5104_v5 }
  0x32   : > { %721 = vmatpush.bf16.msra.mxu2 %v4909_v36  ;;  %v5106_v12 = vld [vmem:[#allocation3 + $0x398] sm:$0xf0]  ;;  %v4981_v15 = vor.u32 %v7297_v9, %v4978_v10  ;;  %v4960_v16 = vld [vmem:[#allocation3 + $0x268] sm:$0xf]  ;;  %v7295_v17 = vld [vmem:[#allocation3 + $0x274] sm:$0xf0] }
  0x33   : > { %734 = vmatpush.bf16.msra.mxu3 %v5037_v39  ;;  %v5088_v18 = vld [vmem:[#allocation3 + $0x368] sm:$0xf]  ;;  %v5109_v19 = vor.u32 %v7329_v11, %v5106_v12  ;;  %v7327_v20 = vld [vmem:[#allocation3 + $0x374] sm:$0xf0]  ;;  %v7293_v21 = vld [vmem:[#allocation3 + $0x26c] sm:$0xf]  ;;  %v4961_v26 = vor.u32 %v7295_v17, %v4960_v16 }
  0x34   : > { %740 = vmatpush.bf16.msrb.mxu0 %v5025_v40  ;;  %v4962_v22 = vld [vmem:[#allocation3 + $0x278] sm:$0xf0]  ;;  %v7325_v23 = vld [vmem:[#allocation3 + $0x36c] sm:$0xf]  ;;  %v4944_v25 = vld [vmem:[#allocation3 + $0x248] sm:$0xf]  ;;  %v5089_v30 = vor.u32 %v7327_v20, %v5088_v18 }
  0x35   : > { %753 = vmatpush.bf16.msrb.mxu1 %v5153_v41  ;;  %v5090_v24 = vld [vmem:[#allocation3 + $0x378] sm:$0xf0]  ;;  %v7291_v27 = vld [vmem:[#allocation3 + $0x254] sm:$0xf0]  ;;  %v5072_v28 = vld [vmem:[#allocation3 + $0x348] sm:$0xf]  ;;  %v4965_v31 = vor.u32 %v7293_v21, %v4962_v22 }
  0x36   : > { %766 = vmatpush.bf16.msrb.mxu2 %v5029_v42  ;;  %v7323_v32 = vld [vmem:[#allocation3 + $0x354] sm:$0xf0]  ;;  %v7289_v33 = vld [vmem:[#allocation3 + $0x24c] sm:$0xf]  ;;  %v4946_v34 = vld [vmem:[#allocation3 + $0x258] sm:$0xf0]  ;;  %v5093_v37 = vor.u32 %v7325_v23, %v5090_v24  ;;  %v4945_v42 = vor.u32 %v7291_v27, %v4944_v25 }
  0x37   : > { %779 = vmatpush.bf16.msrb.mxu3 %v5157_v46  ;;  %v217_v29 = vld [vmem:[#allocation2] sm:$0x33]  ;;  %v7321_v38 = vld [vmem:[#allocation3 + $0x34c] sm:$0xf]  ;;  %v5074_v39 = vld [vmem:[#allocation3 + $0x358] sm:$0xf0]  ;;  %v5073_v43 = vor.u32 %v7323_v32, %v5072_v28  ;;  %v4949_v44 = vor.u32 %v7289_v33, %v4946_v34 }
  0x38   : > { %741 = vmatpush.bf16.msrb.mxu0 %v5009_v52  ;;  %v348_v35 = vunpack.c.l.b16 %v217_v29  ;;  %v349_v36 = vunpack.c.h.b16 %v217_v29  ;;  %v4928_v45 = vld [vmem:[#allocation3 + $0x228] sm:$0xf]  ;;  %v7287_v46 = vld [vmem:[#allocation3 + $0x234] sm:$0xf0]  ;;  %v4930_v55 = vld [vmem:[#allocation3 + $0x238] sm:$0xf0] }
  0x39   : > { %754 = vmatpush.bf16.msrb.mxu1 %v5137_v53  ;;  %v5056_v47 = vld [vmem:[#allocation3 + $0x328] sm:$0xf]  ;;  %v7319_v52 = vld [vmem:[#allocation3 + $0x334] sm:$0xf0]  ;;  %v5077_v53 = vor.u32 %v7321_v38, %v5074_v39  ;;  %v5058_v59 = vld [vmem:[#allocation3 + $0x338] sm:$0xf0]  ;;  %v4929_v60 = vor.u32 %v7287_v46, %v4928_v45 }
  0x3a   : > { %767 = vmatpush.bf16.msrb.mxu2 %v5013_v54  ;;  %v7962_v40 = vpack.c.b16 %v348_v35, %v348_v35  ;;  %v7964_v41 = vpack.c.b16 %v349_v36, %v349_v36  ;;  %v7285_v54 = vld [vmem:[#allocation3 + $0x22c] sm:$0xf]  ;;  %v5057_v61 = vor.u32 %v7319_v52, %v5056_v47  ;;  %v4912_v62 = vld [vmem:[#allocation3 + $0x208] sm:$0xf]  ;;  %v7283_v63 = vld [vmem:[#allocation3 + $0x214] sm:$0xf0] }
  0x3b   : > { %780 = vmatpush.bf16.msrb.mxu3 %v5141_v58  ;;  %v7317_v58 = vld [vmem:[#allocation3 + $0x32c] sm:$0xf]  ;;  %v4933_v2 = vor.u32 %v7285_v54, %v4930_v55  ;;  %v4914_v7 = vld [vmem:[#allocation3 + $0x218] sm:$0xf0]  ;;  %v5272_v10 = vld [vmem:[#allocation3 + $0xe0] sm:$0xf] }
  0x3c   : > { %742 = vmatpush.bf16.msrb.mxu0 %v4993_v0  ;;  %v353_v48 = vshrl.u32 %v7962_v40, 16  ;;  %v355_v49 = vshll.u32 %v7962_v40, 16  ;;  %v360_v50 = vshrl.u32 %v7964_v41, 16  ;;  %v362_v51 = vshll.u32 %v7964_v41, 16  ;;  %v7281_v5 = vld [vmem:[#allocation3 + $0x20c] sm:$0xf] }
  0x3d   : > { %755 = vmatpush.bf16.msrb.mxu1 %v5121_v3  ;;  %v5040_v3 = vld [vmem:[#allocation3 + $0x308] sm:$0xf]  ;;  %v5061_v6 = vor.u32 %v7317_v58, %v5058_v59  ;;  %v5042_v9 = vld [vmem:[#allocation3 + $0x318] sm:$0xf0]  ;;  %v7246_v11 = vld [vmem:[#allocation3 + $0xec] sm:$0xf0]  ;;  %v4917_v18 = vor.u32 %v7281_v5, %v4914_v7 }
  0x3e   : > { %768 = vmatpush.bf16.msrb.mxu2 %v4997_v4  ;;  %v357_v56 = vrot.slane %v355_v49, 1  ;;  %v364_v57 = vrot.slane %v362_v51, 1  ;;  %v7315_v4 = vld [vmem:[#allocation3 + $0x314] sm:$0xf0]  ;;  %v5400_v12 = vld [vmem:[#allocation3 + $0x1e0] sm:$0xf]  ;;  %v5273_v22 = vor.u32 %v7246_v11, %v5272_v10 }
  0x3f   : > { %781 = vmatpush.bf16.msrb.mxu3 %v5125_v8  ;;  %v7313_v8 = vld [vmem:[#allocation3 + $0x30c] sm:$0xf]  ;;  %v5274_v16 = vld [vmem:[#allocation3 + $0xf0] sm:$0xf0]  ;;  %v5041_v17 = vor.u32 %v7315_v4, %v5040_v3  ;;  %v5256_v25 = vld [vmem:[#allocation3 + $0xc0] sm:$0xf] }
  0x40   : > { %743 = vmatpush.bf16.msrb.mxu0 %v4977_v13  ;;  %v7970_v0 = vor.u32 %v357_v56, %v353_v48  ;;  %v7972_v1 = vor.u32 %v364_v57, %v360_v50  ;;  %v4913_v13 = vor.u32 %v7283_v63, %v4912_v62  ;;  %v5402_v20 = vld [vmem:[#allocation3 + $0x1f0] sm:$0xf0]  ;;  %v5045_v21 = vor.u32 %v7313_v8, %v5042_v9  ;;  %v5384_v27 = vld [vmem:[#allocation3 + $0x1c0] sm:$0xf]  ;;  %v7274_v29 = vld [vmem:[#allocation3 + $0x1cc] sm:$0xf0] }
  0x41   : > { %756 = vmatpush.bf16.msrb.mxu1 %v5105_v14  ;;  %v7278_v14 = vld [vmem:[#allocation3 + $0x1ec] sm:$0xf0]  ;;  %v7272_v32 = vld [vmem:[#allocation3 + $0x1c4] sm:$0xf]  ;;  %v5386_v33 = vld [vmem:[#allocation3 + $0x1d0] sm:$0xf0]  ;;  %v5385_v35 = vor.u32 %v7274_v29, %v5384_v27 }
  0x42   : > { %769 = vmatpush.bf16.msrb.mxu2 %v4981_v15  ;;  %735 = vmatmul.bf16.vlgmr.msra.gmra.mxu3 %v7972_v1  ;;  %v7244_v15 = vld [vmem:[#allocation3 + $0xe4] sm:$0xf]  ;;  %v5401_v23 = vor.u32 %v7278_v14, %v5400_v12  ;;  %v7238_v38 = vld [vmem:[#allocation3 + $0xac] sm:$0xf0]  ;;  %v5368_v39 = vld [vmem:[#allocation3 + $0x1a0] sm:$0xf] }
  0x43   : > { %782 = vmatpush.bf16.msrb.mxu3 %v5109_v19  ;;  %722 = vmatmul.bf16.vlgmr.msra.gmra.mxu2 %v7970_v0  ;;  %v7276_v19 = vld [vmem:[#allocation3 + $0x1e4] sm:$0xf]  ;;  %v5277_v24 = vor.u32 %v7244_v15, %v5274_v16  ;;  %v5242_v45 = vld [vmem:[#allocation3 + $0xb0] sm:$0xf0]  ;;  %v5224_v51 = vld [vmem:[#allocation3 + $0x80] sm:$0xf] }
  0x44   : > { %744 = vmatpush.bf16.msrb.mxu0 %v4961_v26  ;;  %709 = vmatmul.bf16.vlgmr.msra.gmra.mxu1 %v7972_v1  ;;  %v7242_v26 = vld [vmem:[#allocation3 + $0xcc] sm:$0xf0]  ;;  %v5405_v28 = vor.u32 %v7276_v19, %v5402_v20  ;;  %v7268_v46 = vld [vmem:[#allocation3 + $0x1a4] sm:$0xf]  ;;  %v5370_v47 = vld [vmem:[#allocation3 + $0x1b0] sm:$0xf0] }
  0x45   : > { %757 = vmatpush.bf16.msrb.mxu1 %v5089_v30  ;;  %696 = vmatmul.bf16.vlgmr.msra.gmra.mxu0 %v7970_v0  ;;  %v7240_v30 = vld [vmem:[#allocation3 + $0xc4] sm:$0xf]  ;;  %v5257_v34 = vor.u32 %v7242_v26, %v5256_v25  ;;  %v7234_v52 = vld [vmem:[#allocation3 + $0x8c] sm:$0xf0]  ;;  %v5373_v54 = vor.u32 %v7268_v46, %v5370_v47  ;;  %v5226_v57 = vld [vmem:[#allocation3 + $0x90] sm:$0xf0] }
  0x46   : > { %770 = vmatpush.bf16.msrb.mxu2 %v4965_v31  ;;  %v5258_v31 = vld [vmem:[#allocation3 + $0xd0] sm:$0xf0]  ;;  %v7266_v55 = vld [vmem:[#allocation3 + $0x18c] sm:$0xf0]  ;;  %v7232_v56 = vld [vmem:[#allocation3 + $0x84] sm:$0xf] }
  0x47   : > { %783 = vmatpush.bf16.msrb.mxu3 %v5093_v37  ;;  %v5261_v36 = vor.u32 %v7240_v30, %v5258_v31  ;;  %v5240_v37 = vld [vmem:[#allocation3 + $0xa0] sm:$0xf]  ;;  %v7264_v58 = vld [vmem:[#allocation3 + $0x184] sm:$0xf]  ;;  %v5354_v59 = vld [vmem:[#allocation3 + $0x190] sm:$0xf0]  ;;  %v5229_v62 = vor.u32 %v7232_v56, %v5226_v57 }
  0x48   : > { %745 = vmatpush.bf16.msrb.mxu0 %v4945_v42  ;;  %v5389_v42 = vor.u32 %v7272_v32, %v5386_v33  ;;  %v5241_v48 = vor.u32 %v7238_v38, %v5240_v37  ;;  %v5208_v63 = vld [vmem:[#allocation3 + $0x60] sm:$0xf]  ;;  %v5357_v4 = vor.u32 %v7264_v58, %v5354_v59  ;;  %v7262_v5 = vld [vmem:[#allocation3 + $0x16c] sm:$0xf0]  ;;  %v5210_v7 = vld [vmem:[#allocation3 + $0x70] sm:$0xf0] }
  0x49   : > { %758 = vmatpush.bf16.msrb.mxu1 %v5073_v43  ;;  %v7270_v43 = vld [vmem:[#allocation3 + $0x1ac] sm:$0xf0]  ;;  %v5336_v3 = vld [vmem:[#allocation3 + $0x160] sm:$0xf]  ;;  %v7260_v8 = vld [vmem:[#allocation3 + $0x164] sm:$0xf] }
  0x4a   : > { %771 = vmatpush.bf16.msrb.mxu2 %v4949_v44  ;;  %v7236_v44 = vld [vmem:[#allocation3 + $0xa4] sm:$0xf]  ;;  %v5369_v49 = vor.u32 %v7270_v43, %v5368_v39  ;;  %v5338_v9 = vld [vmem:[#allocation3 + $0x170] sm:$0xf0]  ;;  %v5337_v11 = vor.u32 %v7262_v5, %v5336_v3  ;;  %v7226_v14 = vld [vmem:[#allocation3 + $0x4c] sm:$0xf0] }
  0x4b   : > { %784 = vmatpush.bf16.msrb.mxu3 %v5077_v53  ;;  %v5245_v50 = vor.u32 %v7236_v44, %v5242_v45  ;;  %v5352_v53 = vld [vmem:[#allocation3 + $0x180] sm:$0xf]  ;;  %v5341_v16 = vor.u32 %v7260_v8, %v5338_v9  ;;  %v5194_v19 = vld [vmem:[#allocation3 + $0x50] sm:$0xf0]  ;;  %v7256_v20 = vld [vmem:[#allocation3 + $0x144] sm:$0xf] }
  0x4c   : > { %746 = vmatpush.bf16.msrb.mxu0 %v4929_v60  ;;  %v5225_v60 = vor.u32 %v7234_v52, %v5224_v51  ;;  %v5320_v15 = vld [vmem:[#allocation3 + $0x140] sm:$0xf]  ;;  %v7222_v25 = vld [vmem:[#allocation3 + $0x2c] sm:$0xf0]  ;;  %v5178_v29 = vld [vmem:[#allocation3 + $0x30] sm:$0xf0] }
  0x4d   : > { %759 = vmatpush.bf16.msrb.mxu1 %v5057_v61  ;;  %v5353_v61 = vor.u32 %v7266_v55, %v5352_v53  ;;  %v5304_v26 = vld [vmem:[#allocation3 + $0x120] sm:$0xf]  ;;  %v7252_v30 = vld [vmem:[#allocation3 + $0x124] sm:$0xf]  ;;  %v5306_v31 = vld [vmem:[#allocation3 + $0x130] sm:$0xf0] }
  0x4e   : > { %772 = vmatpush.bf16.msrb.mxu2 %v4933_v2  ;;  %v7230_v2 = vld [vmem:[#allocation3 + $0x6c] sm:$0xf0]  ;;  %v5160_v33 = vld [vmem:[#allocation3] sm:$0xf]  ;;  %v7216_v39 = vld [vmem:[#allocation3 + $0x4] sm:$0xf] }
  0x4f   : > { %785 = vmatpush.bf16.msrb.mxu3 %v5061_v6  ;;  %v7228_v6 = vld [vmem:[#allocation3 + $0x64] sm:$0xf]  ;;  %v5209_v10 = vor.u32 %v7230_v2, %v5208_v63  ;;  %v5288_v37 = vld [vmem:[#allocation3 + $0x100] sm:$0xf]  ;;  %v7250_v38 = vld [vmem:[#allocation3 + $0x10c] sm:$0xf0] }
  0x50   : > { %747 = vmatpush.bf16.msrb.mxu0 %v4913_v13  ;;  %v5213_v12 = vor.u32 %v7228_v6, %v5210_v7  ;;  %v5192_v13 = vld [vmem:[#allocation3 + $0x40] sm:$0xf]  ;;  %v5162_v43 = vld [vmem:[#allocation3 + $0x10] sm:$0xf0]  ;;  %v7248_v44 = vld [vmem:[#allocation3 + $0x104] sm:$0xf]  ;;  %v5289_v53 = vor.u32 %v7250_v38, %v5288_v37 }
  0x51   : > { %760 = vmatpush.bf16.msrb.mxu1 %v5041_v17  ;;  %v7258_v17 = vld [vmem:[#allocation3 + $0x14c] sm:$0xf0]  ;;  %v5290_v45 = vld [vmem:[#allocation3 + $0x110] sm:$0xf0]  ;;  %v5280_v46 = vld [vmem:[#allocation3 + $0xe8] sm:$0xf] }
  0x52   : > { %773 = vmatpush.bf16.msrb.mxu2 %v4917_v18  ;;  %v7224_v18 = vld [vmem:[#allocation3 + $0x44] sm:$0xf]  ;;  %v7247_v47 = vld [vmem:[#allocation3 + $0xf4] sm:$0xf0]  ;;  %v7245_v51 = vld [vmem:[#allocation3 + $0xec] sm:$0xf]  ;;  %v5293_v57 = vor.u32 %v7248_v44, %v5290_v45 }
  0x53   : > { %786 = vmatpush.bf16.msrb.mxu3 %v5045_v21  ;;  %v5322_v21 = vld [vmem:[#allocation3 + $0x150] sm:$0xf0]  ;;  %v5282_v52 = vld [vmem:[#allocation3 + $0xf8] sm:$0xf0]  ;;  %v7277_v55 = vld [vmem:[#allocation3 + $0x1ec] sm:$0xf]  ;;  %v5281_v58 = vor.u32 %v7247_v47, %v5280_v46 }
  0x54   : > { %1114 = vmatpush.bf16.msra.mxu0 %v5273_v22  ;;  %761 = vmatmul.bf16.vlgmr.msrb.gmra.mxu1 %v7972_v1  ;;  %v5321_v22 = vor.u32 %v7258_v17, %v5320_v15  ;;  %v5325_v27 = vor.u32 %v7256_v20, %v5322_v21  ;;  %v5410_v56 = vld [vmem:[#allocation3 + $0x1f8] sm:$0xf0]  ;;  %s8239_s16 = smov (!%p190_p6, %s7936_s16), 1  ;;  %v5392_v63 = vld [vmem:[#allocation3 + $0x1c8] sm:$0xf]  ;;  %vm210_vm2 = vcmask 1046534  }
  0x55   : > { %1127 = vmatpush.bf16.msra.mxu1 %v5401_v23  ;;  %774 = vmatmul.bf16.vlgmr.msrb.gmra.mxu2 %v7970_v0  ;;  %v5197_v23 = vor.u32 %v7224_v18, %v5194_v19  ;;  %v5413_v2 = vor.u32 %v7277_v55, %v5410_v56  ;;  %v7275_v3 = vld [vmem:[#allocation3 + $0x1d4] sm:$0xf0]  ;;  %v5266_v5 = vld [vmem:[#allocation3 + $0xd8] sm:$0xf0]  ;;  %v7273_v6 = vld [vmem:[#allocation3 + $0x1cc] sm:$0xf] }
  0x56   : > { %1140 = vmatpush.bf16.msra.mxu2 %v5277_v24  ;;  %787 = vmatmul.bf16.vlgmr.msrb.gmra.mxu3 %v7972_v1  ;;  %v5193_v1 = vor.u32 %v7226_v14, %v5192_v13  ;;  %v5176_v24 = vld [vmem:[#allocation3 + $0x20] sm:$0xf]  ;;  %v5394_v7 = vld [vmem:[#allocation3 + $0x1d8] sm:$0xf0]  ;;  %v5248_v9 = vld [vmem:[#allocation3 + $0xa8] sm:$0xf] }
  0x57   : > { %1153 = vmatpush.bf16.msra.mxu3 %v5405_v28  ;;  %748 = vmatmul.bf16.vlgmr.msrb.gmra.mxu0 %v7970_v0  ;;  %v7254_v28 = vld [vmem:[#allocation3 + $0x12c] sm:$0xf0]  ;;  %v7220_v0 = vld [vmem:[#allocation3 + $0x24] sm:$0xf]  ;;  %v5177_v32 = vor.u32 %v7222_v25, %v5176_v24  ;;  %v5376_v13 = vld [vmem:[#allocation3 + $0x1a8] sm:$0xf]  ;;  %v5397_v15 = vor.u32 %v7273_v6, %v5394_v7 }
  0x58   : > { %1115 = vmatpush.bf16.msra.mxu0 %v5257_v34  ;;  %v7218_v34 = vld [vmem:[#allocation3 + $0xc] sm:$0xf0]  ;;  %v7271_v14 = vld [vmem:[#allocation3 + $0x1b4] sm:$0xf0]  ;;  %v5250_v17 = vld [vmem:[#allocation3 + $0xb8] sm:$0xf0] }
  0x59   : > { %1128 = vmatpush.bf16.msra.mxu1 %v5385_v35  ;;  %v5305_v35 = vor.u32 %v7254_v28, %v5304_v26  ;;  %s4900_s27 = sshll.u32 %s8239_s16, 1  ;;  %v7269_v18 = vld [vmem:[#allocation3 + $0x1ac] sm:$0xf]  ;;  %v5378_v19 = vld [vmem:[#allocation3 + $0x1b8] sm:$0xf0]  ;;  %v5377_v21 = vor.u32 %v7271_v14, %v5376_v13  ;;  %vm4804_vm8 = vcmask 1041409  }
  0x5a   : > { %1141 = vmatpush.bf16.msra.mxu2 %v5261_v36  ;;  %v5181_v36 = vor.u32 %v7220_v0, %v5178_v29  ;;  %v5360_v24 = vld [vmem:[#allocation3 + $0x188] sm:$0xf]  ;;  %s193_s30 = scalar_lea.vmem %s8227_s0, %s4900_s27  ;;  %v5381_v25 = vor.u32 %v7269_v18, %v5378_v19  ;;  %v7267_v26 = vld [vmem:[#allocation3 + $0x194] sm:$0xf0]  ;;  %v5234_v28 = vld [vmem:[#allocation3 + $0x98] sm:$0xf0] }
  0x5b   : > { %1154 = vmatpush.bf16.msra.mxu3 %v5389_v42  ;;  %v5309_v42 = vor.u32 %v7252_v30, %v5306_v31  ;;  %v7265_v0 = vld [vmem:[#allocation3 + $0x18c] sm:$0xf]  ;;  %v5362_v29 = vld [vmem:[#allocation3 + $0x198] sm:$0xf0]  ;;  %v201_v31 = vld [vmem:[%s193_s30] sm:$0x3] }
  0x5c   : > { %1116 = vmatpush.bf16.msra.mxu0 %v5241_v48  ;;  %v5408_v48 = vld [vmem:[#allocation3 + $0x1e8] sm:$0xf]  ;;  %v5365_v37 = vor.u32 %v7265_v0, %v5362_v29  ;;  %v7263_v38 = vld [vmem:[#allocation3 + $0x174] sm:$0xf0]  ;;  %v5346_v44 = vld [vmem:[#allocation3 + $0x178] sm:$0xf0] }
  0x5d   : > { %1129 = vmatpush.bf16.msra.mxu1 %v5369_v49  ;;  %v5161_v49 = vor.u32 %v7218_v34, %v5160_v33  ;;  %v5216_v34 = vld [vmem:[#allocation3 + $0x68] sm:$0xf]  ;;  %204 = vst [vmem:[#allocation1 + $0x2] ss:$4 sm:$0xff] %v201_v31  ;;  %v7257_v55 = vld [vmem:[#allocation3 + $0x14c] sm:$0xf] }
  0x5e   : > { %1142 = vmatpush.bf16.msra.mxu2 %v5245_v50  ;;  %v7279_v50 = vld [vmem:[#allocation3 + $0x1f4] sm:$0xf0]  ;;  %v5200_v46 = vld [vmem:[#allocation3 + $0x48] sm:$0xf]  ;;  %v5330_v56 = vld [vmem:[#allocation3 + $0x158] sm:$0xf0] }
  0x5f   : > { %1155 = vmatpush.bf16.msra.mxu3 %v5373_v54  ;;  %v5165_v54 = vor.u32 %v7216_v39, %v5162_v43  ;;  %v5409_v59 = vor.u32 %v7279_v50, %v5408_v48  ;;  %v7229_v39 = vld [vmem:[#allocation3 + $0x6c] sm:$0xf]  ;;  %v5328_v50 = vld [vmem:[#allocation3 + $0x148] sm:$0xf]  ;;  %vm208_vm1 = vsmask.f32 2304 }
  0x60   : > { %1117 = vmatpush.bf16.msra.mxu0 %v5225_v60  ;;  %v5285_v60 = vor.u32 %v7245_v51, %v5282_v52  ;;  %v7261_v43 = vld [vmem:[#allocation3 + $0x16c] sm:$0xf]  ;;  %v7259_v51 = vld [vmem:[#allocation3 + $0x154] sm:$0xf0]  ;;  %v5314_v6 = vld [vmem:[#allocation3 + $0x138] sm:$0xf0] }
  0x61   : > { %1130 = vmatpush.bf16.msra.mxu1 %v5353_v61  ;;  %v5264_v61 = vld [vmem:[#allocation3 + $0xc8] sm:$0xf]  ;;  %v5349_v52 = vor.u32 %v7261_v43, %v5346_v44  ;;  %vm7998_vm3 = vmand %vm207_vm0, %vm208_vm1  ;;  %vm211_vm4 = vsmask.f32 6400  ;;  %v7217_v13 = vld [vmem:[#allocation3 + $0xc] sm:$0xf] }
  0x62   : > { %1143 = vmatpush.bf16.msra.mxu2 %v5229_v62  ;;  %v7243_v62 = vld [vmem:[#allocation3 + $0xd4] sm:$0xf0]  ;;  %v5168_v7 = vld [vmem:[#allocation3 + $0x8] sm:$0xf]  ;;  %vm8003_vm5 = vmand %vm210_vm2, %vm211_vm4  ;;  %vm4802_vm7 = vsmask.f32 256 }
  0x63   : > { %1156 = vmatpush.bf16.msra.mxu3 %v5357_v4  ;;  %v7241_v4 = vld [vmem:[#allocation3 + $0xcc] sm:$0xf]  ;;  %v5265_v8 = vor.u32 %v7243_v62, %v5264_v61  ;;  %v5329_v61 = vor.u32 %v7259_v51, %v5328_v50  ;;  %v5298_v19 = vld [vmem:[#allocation3 + $0x118] sm:$0xf0]  ;;  %vm213_vm6 = vmor %vm8003_vm5, %vm7998_vm3  ;;  %vm4805_vm9 = vsmask.f32 1280 }
  0x64   : > { %1118 = vmatpush.bf16.msra.mxu0 %v5209_v10  ;;  %v5393_v10 = vor.u32 %v7275_v3, %v5392_v63  ;;  %v7255_v63 = vld [vmem:[#allocation3 + $0x134] sm:$0xf0]  ;;  %v5333_v3 = vor.u32 %v7257_v55, %v5330_v56  ;;  %v7249_v18 = vld [vmem:[#allocation3 + $0x10c] sm:$0xf]  ;;  %v5658_v31 = vld [vmem:[#allocation3 + $0x5f0] sm:$0xf0] }
  0x65   : > { %1131 = vmatpush.bf16.msra.mxu1 %v5337_v11  ;;  %v5269_v11 = vor.u32 %v7241_v4, %v5266_v5  ;;  %v5186_v4 = vld [vmem:[#allocation3 + $0x38] sm:$0xf0]  ;;  %v7253_v5 = vld [vmem:[#allocation3 + $0x12c] sm:$0xf]  ;;  %v7402_v43 = vld [vmem:[#allocation3 + $0x5cc] sm:$0xf0] }
  0x66   : > { %1144 = vmatpush.bf16.msra.mxu2 %v5213_v12  ;;  %v7239_v12 = vld [vmem:[#allocation3 + $0xb4] sm:$0xf0]  ;;  %v7368_v44 = vld [vmem:[#allocation3 + $0x4c4] sm:$0xf]  ;;  %v5496_v51 = vld [vmem:[#allocation3 + $0x4a0] sm:$0xf] }
  0x67   : > { %1157 = vmatpush.bf16.msra.mxu3 %v5341_v16  ;;  %v7237_v16 = vld [vmem:[#allocation3 + $0xac] sm:$0xf]  ;;  %v5249_v20 = vor.u32 %v7239_v12, %v5248_v9  ;;  %v7251_v12 = vld [vmem:[#allocation3 + $0x114] sm:$0xf0]  ;;  %v7398_v55 = vld [vmem:[#allocation3 + $0x5ac] sm:$0xf0] }
  0x68   : > { %1119 = vmatpush.bf16.msra.mxu0 %v5193_v1  ;;  %v5253_v1 = vor.u32 %v7237_v16, %v5250_v17  ;;  %v5170_v17 = vld [vmem:[#allocation3 + $0x18] sm:$0xf0]  ;;  %v7364_v56 = vld [vmem:[#allocation3 + $0x4a4] sm:$0xf]  ;;  %v5592_v14 = vld [vmem:[#allocation3 + $0x560] sm:$0xf] }
  0x69   : > { %1132 = vmatpush.bf16.msra.mxu1 %v5321_v22  ;;  %v5232_v22 = vld [vmem:[#allocation3 + $0x88] sm:$0xf]  ;;  %v5173_v29 = vor.u32 %v7217_v13, %v5170_v17  ;;  %v7358_v13 = vld [vmem:[#allocation3 + $0x46c] sm:$0xf0]  ;;  %v7356_v17 = vld [vmem:[#allocation3 + $0x464] sm:$0xf] }
  0x6a   : > { %1145 = vmatpush.bf16.msra.mxu2 %v5197_v23  ;;  %v7235_v23 = vld [vmem:[#allocation3 + $0x94] sm:$0xf0]  ;;  %vm4790_vm10 = vcmask 1040384   ;;  %vm4806_vm12 = vmand %vm4804_vm8, %vm4805_vm9  ;;  %vm4809_vm14 = vcmask 1043459   ;;  %vm4810_vm15 = vsmask.f32 3328 }
  0x6b   : > { %1158 = vmatpush.bf16.msra.mxu3 %v5325_v27  ;;  %v7233_v27 = vld [vmem:[#allocation3 + $0x8c] sm:$0xf]  ;;  %v5233_v30 = vor.u32 %v7235_v23, %v5232_v22  ;;  %v5656_v22 = vld [vmem:[#allocation3 + $0x5e0] sm:$0xf]  ;;  %vm8210_vm11 = vmand %vm4790_vm10, %vm4802_vm7  ;;  %s4901_s4 = sshll.u32 %s8239_s16, 2  ;;  %vm4798_vm4 = vcmask 1041408  }
  0x6c   : > { %1120 = vmatpush.bf16.msra.mxu0 %v5177_v32  ;;  %v5361_v32 = vor.u32 %v7267_v26, %v5360_v24  ;;  %v5237_v33 = vor.u32 %v7233_v27, %v5234_v28  ;;  %v205_v23 = vld [vmem:[#allocation1] sm:$0xff]  ;;  %v214_v24 = vld [vmem:[#allocation2] sm:$0x44]  ;;  %v7372_v27 = vld [vmem:[#allocation3 + $0x4e4] sm:$0xf]  ;;  %s197_s7 = scalar_lea.vmem %s8230_s3, %s4901_s4 }
  0x6d   : > { %1133 = vmatpush.bf16.msra.mxu1 %v5305_v35  ;;  %v7231_v35 = vld [vmem:[#allocation3 + $0x74] sm:$0xf0]  ;;  %v7406_v26 = vld [vmem:[#allocation3 + $0x5ec] sm:$0xf0]  ;;  %v5530_v28 = vld [vmem:[#allocation3 + $0x4f0] sm:$0xf0] }
  0x6e   : > { %1146 = vmatpush.bf16.msra.mxu2 %v5181_v36  ;;  %v5344_v36 = vld [vmem:[#allocation3 + $0x168] sm:$0xf]  ;;  %v5217_v45 = vor.u32 %v7231_v35, %v5216_v34  ;;  %v215_v34 = vsel %vm213_vm6, %v205_v23, %v214_v24  ;;  %v5657_v35 = vor.u32 %v7406_v26, %v5656_v22  ;;  %v5448_v23 = vld [vmem:[#allocation3 + $0x440] sm:$0xf]  ;;  %v7354_v24 = vld [vmem:[#allocation3 + $0x44c] sm:$0xf0] }
  0x6f   : > { %1159 = vmatpush.bf16.msra.mxu3 %v5309_v42  ;;  %v5218_v42 = vld [vmem:[#allocation3 + $0x78] sm:$0xf0]  ;;  %v5345_v47 = vor.u32 %v7263_v38, %v5344_v36  ;;  %v5533_v36 = vor.u32 %v7372_v27, %v5530_v28  ;;  %v7370_v38 = vld [vmem:[#allocation3 + $0x4cc] sm:$0xf0]  ;;  %216 = vst [vmem:[#allocation2] sm:$0x44] %v215_v34  ;;  %vm4807_vm13 = vmor %vm4806_vm12, %vm8210_vm11 }
  0x70   : > { %1121 = vmatpush.bf16.msra.mxu0 %v5161_v49  ;;  %v5221_v48 = vor.u32 %v7229_v39, %v5218_v42  ;;  %v7227_v49 = vld [vmem:[#allocation3 + $0x54] sm:$0xf0]  ;;  %v5640_v39 = vld [vmem:[#allocation3 + $0x5c0] sm:$0xf]  ;;  %v7386_v27 = vld [vmem:[#allocation3 + $0x54c] sm:$0xf0] }
  0x71   : > { %1134 = vmatpush.bf16.msra.mxu1 %v5289_v53  ;;  %v7225_v53 = vld [vmem:[#allocation3 + $0x4c] sm:$0xf]  ;;  %v7352_v28 = vld [vmem:[#allocation3 + $0x444] sm:$0xf]  ;;  %vm4808_vm1 = vmor %vm7998_vm3, %vm4807_vm13 }
  0x72   : > { %1147 = vmatpush.bf16.msra.mxu2 %v5165_v54  ;;  %v5202_v54 = vld [vmem:[#allocation3 + $0x58] sm:$0xf0]  ;;  %vm4811_vm2 = vmand %vm4809_vm14, %vm4810_vm15 }
  0x73   : > { %1160 = vmatpush.bf16.msra.mxu3 %v5293_v57  ;;  %1122 = vmatmul.bf16.vlgmr.msra.gmra.mxu0 %v7962_v40  ;;  %v5184_v57 = vld [vmem:[#allocation3 + $0x28] sm:$0xf]  ;;  %v5205_v62 = vor.u32 %v7225_v53, %v5202_v54  ;;  %v5624_v53 = vld [vmem:[#allocation3 + $0x5a0] sm:$0xf]  ;;  %vm4812_vm5 = vmor %vm4811_vm2, %vm4808_vm1 }
  0x74   : > { %1166 = vmatpush.bf16.msrb.mxu0 %v5281_v58  ;;  %1135 = vmatmul.bf16.vlgmr.msra.gmra.mxu1 %v7964_v41  ;;  %v7223_v58 = vld [vmem:[#allocation3 + $0x34] sm:$0xf0] }
  0x75   : > { %1179 = vmatpush.bf16.msrb.mxu1 %v5409_v59  ;;  %1148 = vmatmul.bf16.vlgmr.msra.gmra.mxu2 %v7962_v40  ;;  %v5201_v59 = vor.u32 %v7227_v49, %v5200_v46  ;;  %v7400_v46 = vld [vmem:[#allocation3 + $0x5c4] sm:$0xf]  ;;  %v5641_v49 = vor.u32 %v7402_v43, %v5640_v39  ;;  %v7382_v39 = vld [vmem:[#allocation3 + $0x52c] sm:$0xf0]  ;;  %v5434_v43 = vld [vmem:[#allocation3 + $0x430] sm:$0xf0] }
  0x76   : > { %1192 = vmatpush.bf16.msrb.mxu2 %v5285_v60  ;;  %1161 = vmatmul.bf16.vlgmr.msra.gmra.mxu3 %v7964_v41  ;;  %v5312_v60 = vld [vmem:[#allocation3 + $0x128] sm:$0xf] }
  0x77   : > { %1205 = vmatpush.bf16.msrb.mxu3 %v5413_v2  ;;  %v7221_v2 = vld [vmem:[#allocation3 + $0x2c] sm:$0xf] }
  0x78   : > { %1167 = vmatpush.bf16.msrb.mxu0 %v5265_v8  ;;  %v7219_v8 = vld [vmem:[#allocation3 + $0x14] sm:$0xf0]  ;;  %v5189_v16 = vor.u32 %v7221_v2, %v5186_v4  ;;  %v7362_v2 = vld [vmem:[#allocation3 + $0x48c] sm:$0xf0] }
  0x79   : > { %1180 = vmatpush.bf16.msrb.mxu1 %v5393_v10  ;;  %v5185_v10 = vor.u32 %v7223_v58, %v5184_v57  ;;  %v5498_v57 = vld [vmem:[#allocation3 + $0x4b0] sm:$0xf0]  ;;  %v7396_v58 = vld [vmem:[#allocation3 + $0x5a4] sm:$0xf] }
  0x7a   : > { %1193 = vmatpush.bf16.msrb.mxu2 %v5269_v11  ;;  %v5296_v11 = vld [vmem:[#allocation3 + $0x108] sm:$0xf] }
  0x7b   : > { %1206 = vmatpush.bf16.msrb.mxu3 %v5397_v15  ;;  %v5313_v15 = vor.u32 %v7255_v63, %v5312_v60  ;;  %v5297_v0 = vor.u32 %v7251_v12, %v5296_v11  ;;  %v5480_v63 = vld [vmem:[#allocation3 + $0x480] sm:$0xf] }
  0x7c   : > { %1168 = vmatpush.bf16.msrb.mxu0 %v5249_v20  ;;  %v5317_v20 = vor.u32 %v7253_v5, %v5314_v6  ;;  %v7394_v5 = vld [vmem:[#allocation3 + $0x58c] sm:$0xf0]  ;;  %v7360_v6 = vld [vmem:[#allocation3 + $0x484] sm:$0xf]  ;;  %v5464_v12 = vld [vmem:[#allocation3 + $0x460] sm:$0xf] }
  0x7d   : > { %1181 = vmatpush.bf16.msrb.mxu1 %v5377_v21  ;;  %v5528_v21 = vld [vmem:[#allocation3 + $0x4e0] sm:$0xf] }
  0x7e   : > { %1194 = vmatpush.bf16.msrb.mxu2 %v5253_v1  ;;  %v7374_v1 = vld [vmem:[#allocation3 + $0x4ec] sm:$0xf0] }
  0x7f   : > { %1207 = vmatpush.bf16.msrb.mxu3 %v5381_v25  ;;  %v5169_v25 = vor.u32 %v7219_v8, %v5168_v7  ;;  %v7392_v7 = vld [vmem:[#allocation3 + $0x584] sm:$0xf]  ;;  %v5610_v8 = vld [vmem:[#allocation3 + $0x590] sm:$0xf0] }
  0x80   : > { %1169 = vmatpush.bf16.msrb.mxu0 %v5233_v30  ;;  %v7404_v30 = vld [vmem:[#allocation3 + $0x5e4] sm:$0xf] }
  0x81   : > { %1182 = vmatpush.bf16.msrb.mxu1 %v5361_v32  ;;  %v5301_v32 = vor.u32 %v7249_v18, %v5298_v19  ;;  %v5661_v42 = vor.u32 %v7404_v30, %v5658_v31  ;;  %v5466_v18 = vld [vmem:[#allocation3 + $0x470] sm:$0xf0]  ;;  %v7388_v19 = vld [vmem:[#allocation3 + $0x564] sm:$0xf]  ;;  %v5449_v31 = vor.u32 %v7354_v24, %v5448_v23  ;;  %v5650_v23 = vld [vmem:[#allocation3 + $0x5d8] sm:$0xf0] }
  0x82   : > { %1195 = vmatpush.bf16.msrb.mxu2 %v5237_v33  ;;  %v5529_v33 = vor.u32 %v7374_v1, %v5528_v21  ;;  %v5465_v21 = vor.u32 %v7358_v13, %v5464_v12  ;;  %v5469_v22 = vor.u32 %v7356_v17, %v5466_v18  ;;  %v5578_v30 = vld [vmem:[#allocation3 + $0x550] sm:$0xf0]  ;;  %v5520_v12 = vld [vmem:[#allocation3 + $0x4c8] sm:$0xf]  ;;  %v7403_v17 = vld [vmem:[#allocation3 + $0x5d4] sm:$0xf0] }
  0x83   : > { %1208 = vmatpush.bf16.msrb.mxu3 %v5365_v37  ;;  %v5512_v37 = vld [vmem:[#allocation3 + $0x4c0] sm:$0xf] }
  0x84   : > { %1170 = vmatpush.bf16.msrb.mxu0 %v5217_v45  ;;  %v5514_v45 = vld [vmem:[#allocation3 + $0x4d0] sm:$0xf0] }
  0x85   : > { %1183 = vmatpush.bf16.msrb.mxu1 %v5345_v47  ;;  %v5642_v47 = vld [vmem:[#allocation3 + $0x5d0] sm:$0xf0]  ;;  %v5517_v50 = vor.u32 %v7368_v44, %v5514_v45  ;;  %v7380_v44 = vld [vmem:[#allocation3 + $0x524] sm:$0xf] }
  0x86   : > { %1196 = vmatpush.bf16.msrb.mxu2 %v5221_v48  ;;  %v5513_v48 = vor.u32 %v7370_v38, %v5512_v37  ;;  %v5645_v54 = vor.u32 %v7400_v46, %v5642_v47  ;;  %v1218_v37 = vld [vmem:[#allocation2] sm:$0x66]  ;;  %v5416_v47 = vld [vmem:[#allocation3 + $0x400] sm:$0xf] }
  0x87   : > { %1209 = vmatpush.bf16.msrb.mxu3 %v5349_v52  ;;  %v7366_v52 = vld [vmem:[#allocation3 + $0x4ac] sm:$0xf0]  ;;  %v5562_v45 = vld [vmem:[#allocation3 + $0x530] sm:$0xf0] }
  0x88   : > { %1171 = vmatpush.bf16.msrb.mxu0 %v5201_v59  ;;  %v5626_v59 = vld [vmem:[#allocation3 + $0x5b0] sm:$0xf0]  ;;  %v5497_v60 = vor.u32 %v7366_v52, %v5496_v51  ;;  %v5544_v52 = vld [vmem:[#allocation3 + $0x500] sm:$0xf] }
  0x89   : > { %1184 = vmatpush.bf16.msrb.mxu1 %v5329_v61  ;;  %v5625_v61 = vor.u32 %v7398_v55, %v5624_v53  ;;  %v5629_v4 = vor.u32 %v7396_v58, %v5626_v59  ;;  %v7378_v53 = vld [vmem:[#allocation3 + $0x50c] sm:$0xf0]  ;;  %v1286_v55 = vunpack.c.h.b16 %v1218_v37  ;;  %v7376_v58 = vld [vmem:[#allocation3 + $0x504] sm:$0xf]  ;;  %v5546_v59 = vld [vmem:[#allocation3 + $0x510] sm:$0xf0] }
  0x8a   : > { %1197 = vmatpush.bf16.msrb.mxu2 %v5205_v62  ;;  %v5501_v62 = vor.u32 %v7364_v56, %v5498_v57  ;;  %v5565_v56 = vor.u32 %v7380_v44, %v5562_v45  ;;  %v5418_v57 = vld [vmem:[#allocation3 + $0x410] sm:$0xf0]  ;;  %v7395_v44 = vld [vmem:[#allocation3 + $0x594] sm:$0xf0]  ;;  %v7361_v45 = vld [vmem:[#allocation3 + $0x48c] sm:$0xf] }
  0x8b   : > { %1210 = vmatpush.bf16.msrb.mxu3 %v5333_v3  ;;  %v5608_v3 = vld [vmem:[#allocation3 + $0x580] sm:$0xf] }
  0x8c   : > { %1172 = vmatpush.bf16.msrb.mxu0 %v5185_v10  ;;  %v5481_v10 = vor.u32 %v7362_v2, %v5480_v63  ;;  %v7407_v2 = vld [vmem:[#allocation3 + $0x5f4] sm:$0xf0] }
  0x8d   : > { %1185 = vmatpush.bf16.msrb.mxu1 %v5313_v15  ;;  %v5613_v15 = vor.u32 %v7392_v7, %v5610_v8  ;;  %v7405_v7 = vld [vmem:[#allocation3 + $0x5ec] sm:$0xf]  ;;  %v5666_v8 = vld [vmem:[#allocation3 + $0x5f8] sm:$0xf0] }
  0x8e   : > { %1198 = vmatpush.bf16.msrb.mxu2 %v5189_v16  ;;  %v7390_v16 = vld [vmem:[#allocation3 + $0x56c] sm:$0xf0]  ;;  %v5669_v18 = vor.u32 %v7405_v7, %v5666_v8  ;;  %v7353_v7 = vld [vmem:[#allocation3 + $0x44c] sm:$0xf]  ;;  %v5458_v8 = vld [vmem:[#allocation3 + $0x458] sm:$0xf0] }
  0x8f   : > { %1211 = vmatpush.bf16.msrb.mxu3 %v5317_v20  ;;  %v5594_v20 = vld [vmem:[#allocation3 + $0x570] sm:$0xf0]  ;;  %v5593_v1 = vor.u32 %v7390_v16, %v5592_v14  ;;  %v5648_v16 = vld [vmem:[#allocation3 + $0x5c8] sm:$0xf] }
  0x90   : > { %1173 = vmatpush.bf16.msrb.mxu0 %v5169_v25  ;;  %v5576_v25 = vld [vmem:[#allocation3 + $0x540] sm:$0xf]  ;;  %v5597_v26 = vor.u32 %v7388_v19, %v5594_v20  ;;  %v7369_v20 = vld [vmem:[#allocation3 + $0x4cc] sm:$0xf] }
  0x91   : > { %1186 = vmatpush.bf16.msrb.mxu1 %v5297_v0  ;;  %v5450_v0 = vld [vmem:[#allocation3 + $0x450] sm:$0xf0] }
  0x92   : > { %1199 = vmatpush.bf16.msrb.mxu2 %v5173_v29  ;;  %v7384_v29 = vld [vmem:[#allocation3 + $0x544] sm:$0xf]  ;;  %v5453_v34 = vor.u32 %v7352_v28, %v5450_v0  ;;  %v7367_v28 = vld [vmem:[#allocation3 + $0x4b4] sm:$0xf0]  ;;  %v5632_v0 = vld [vmem:[#allocation3 + $0x5a8] sm:$0xf] }
  0x93   : > { %1212 = vmatpush.bf16.msrb.mxu3 %v5301_v32  ;;  %1174 = vmatmul.bf16.vlgmr.msrb.gmra.mxu0 %v7962_v40  ;;  %v5432_v32 = vld [vmem:[#allocation3 + $0x420] sm:$0xf]  ;;  %v5581_v38 = vor.u32 %v7384_v29, %v5578_v30  ;;  %v7399_v30 = vld [vmem:[#allocation3 + $0x5b4] sm:$0xf0] }
  0x94   : > { %1613 = vmatpush.bf16.msra.mxu0 %v5529_v33  ;;  %1187 = vmatmul.bf16.vlgmr.msrb.gmra.mxu1 %v7964_v41  ;;  %v5577_v33 = vor.u32 %v7386_v27, %v5576_v25  ;;  %v5649_v25 = vor.u32 %v7403_v17, %v5648_v16  ;;  %v5504_v27 = vld [vmem:[#allocation3 + $0x4a8] sm:$0xf]  ;;  %v7351_v16 = vld [vmem:[#allocation3 + $0x434] sm:$0xf0] }
  0x95   : > { %1626 = vmatpush.bf16.msra.mxu1 %v5657_v35  ;;  %1200 = vmatmul.bf16.vlgmr.msrb.gmra.mxu2 %v7962_v40  ;;  %v5482_v40 = vld [vmem:[#allocation3 + $0x490] sm:$0xf0]  ;;  %v7350_v35 = vld [vmem:[#allocation3 + $0x42c] sm:$0xf0]  ;;  %v5568_v17 = vld [vmem:[#allocation3 + $0x528] sm:$0xf] }
  0x96   : > { %1639 = vmatpush.bf16.msra.mxu2 %v5533_v36  ;;  %1213 = vmatmul.bf16.vlgmr.msrb.gmra.mxu3 %v7964_v41  ;;  %v5609_v41 = vor.u32 %v7394_v5, %v5608_v3  ;;  %v5485_v11 = vor.u32 %v7360_v6, %v5482_v40  ;;  %v5560_v36 = vld [vmem:[#allocation3 + $0x520] sm:$0xf]  ;;  %v5433_v46 = vor.u32 %v7350_v35, %v5432_v32  ;;  %v7373_v3 = vld [vmem:[#allocation3 + $0x4ec] sm:$0xf]  ;;  %v5506_v32 = vld [vmem:[#allocation3 + $0x4b8] sm:$0xf0] }
  0x97   : > { %1652 = vmatpush.bf16.msra.mxu3 %v5661_v42  ;;  %v7348_v42 = vld [vmem:[#allocation3 + $0x424] sm:$0xf]  ;;  %v5545_v6 = vor.u32 %v7378_v53, %v5544_v52  ;;  %v5505_v35 = vor.u32 %v7367_v28, %v5504_v27  ;;  %v5472_v52 = vld [vmem:[#allocation3 + $0x468] sm:$0xf]  ;;  %v7359_v53 = vld [vmem:[#allocation3 + $0x474] sm:$0xf0] }
  0x98   : > { %1614 = vmatpush.bf16.msra.mxu0 %v5513_v48  ;;  %v7346_v48 = vld [vmem:[#allocation3 + $0x40c] sm:$0xf0]  ;;  %v5437_v51 = vor.u32 %v7348_v42, %v5434_v43  ;;  %v5616_v42 = vld [vmem:[#allocation3 + $0x588] sm:$0xf]  ;;  %v7347_v27 = vld [vmem:[#allocation3 + $0x414] sm:$0xf0] }
  0x99   : > { %1627 = vmatpush.bf16.msra.mxu1 %v5641_v49  ;;  %v1285_v49 = vunpack.c.l.b16 %v1218_v37  ;;  %v5417_v63 = vor.u32 %v7346_v48, %v5416_v47  ;;  %v7393_v47 = vld [vmem:[#allocation3 + $0x58c] sm:$0xf]  ;;  %v5618_v48 = vld [vmem:[#allocation3 + $0x598] sm:$0xf0] }
  0x9a   : > { %1640 = vmatpush.bf16.msra.mxu2 %v5517_v50  ;;  %v5561_v50 = vor.u32 %v7382_v39, %v5560_v36  ;;  %v5633_v36 = vor.u32 %v7399_v30, %v5632_v0  ;;  %v7363_v39 = vld [vmem:[#allocation3 + $0x494] sm:$0xf0] }
  0x9b   : > { %1653 = vmatpush.bf16.msra.mxu3 %v5645_v54  ;;  %v7344_v54 = vld [vmem:[#allocation3 + $0x404] sm:$0xf]  ;;  %v8020_v5 = vpack.c.b16 %v1285_v49, %v1285_v49  ;;  %v7379_v30 = vld [vmem:[#allocation3 + $0x514] sm:$0xf0] }
  0x9c   : > { %1615 = vmatpush.bf16.msra.mxu0 %v5497_v60  ;;  %v5536_v60 = vld [vmem:[#allocation3 + $0x4e8] sm:$0xf]  ;;  %v5421_v40 = vor.u32 %v7344_v54, %v5418_v57  ;;  %v7357_v57 = vld [vmem:[#allocation3 + $0x46c] sm:$0xf] }
  0x9d   : > { %1628 = vmatpush.bf16.msra.mxu1 %v5625_v61  ;;  %v7375_v61 = vld [vmem:[#allocation3 + $0x4f4] sm:$0xf0]  ;;  %v8025_v19 = vrot.slane %v8020_v5, 1  ;;  %v5600_v54 = vld [vmem:[#allocation3 + $0x568] sm:$0xf] }
  0x9e   : > { %1641 = vmatpush.bf16.msra.mxu2 %v5501_v62  ;;  %v5664_v62 = vld [vmem:[#allocation3 + $0x5e8] sm:$0xf] }
  0x9f   : > { %1654 = vmatpush.bf16.msra.mxu3 %v5629_v4  ;;  %v5538_v4 = vld [vmem:[#allocation3 + $0x4f8] sm:$0xf0]  ;;  %v5665_v13 = vor.u32 %v7407_v2, %v5664_v62  ;;  %v5456_v2 = vld [vmem:[#allocation3 + $0x448] sm:$0xf] }
  0xa0   : > { %1616 = vmatpush.bf16.msra.mxu0 %v5481_v10  ;;  %v8022_v10 = vpack.c.b16 %v1286_v55, %v1286_v55  ;;  %v5541_v14 = vor.u32 %v7373_v3, %v5538_v4  ;;  %v5621_v55 = vor.u32 %v7393_v47, %v5618_v48  ;;  %v7355_v3 = vld [vmem:[#allocation3 + $0x454] sm:$0xf0]  ;;  %v5584_v4 = vld [vmem:[#allocation3 + $0x548] sm:$0xf]  ;;  %v7468_v47 = vld [vmem:[#allocation3 + $0x7e4] sm:$0xf] }
  0xa1   : > { %1629 = vmatpush.bf16.msra.mxu1 %v5609_v41  ;;  %v5549_v41 = vor.u32 %v7376_v58, %v5546_v59  ;;  %v5474_v58 = vld [vmem:[#allocation3 + $0x478] sm:$0xf0]  ;;  %v7389_v59 = vld [vmem:[#allocation3 + $0x56c] sm:$0xf]  ;;  %v5914_v48 = vld [vmem:[#allocation3 + $0x7f0] sm:$0xf0] }
  0xa2   : > { %1642 = vmatpush.bf16.msra.mxu2 %v5485_v11  ;;  %v5537_v11 = vor.u32 %v7375_v61, %v5536_v60  ;;  %v5602_v60 = vld [vmem:[#allocation3 + $0x578] sm:$0xf0]  ;;  %v5473_v61 = vor.u32 %v7359_v53, %v5472_v52  ;;  %v5768_v53 = vld [vmem:[#allocation3 + $0x6c0] sm:$0xf] }
  0xa3   : > { %1655 = vmatpush.bf16.msra.mxu3 %v5613_v15  ;;  %v7371_v15 = vld [vmem:[#allocation3 + $0x4d4] sm:$0xf0] }
  0xa4   : > { %1617 = vmatpush.bf16.msra.mxu0 %v5465_v21  ;;  %v5522_v21 = vld [vmem:[#allocation3 + $0x4d8] sm:$0xf0]  ;;  %v5521_v24 = vor.u32 %v7371_v15, %v5520_v12  ;;  %v5457_v12 = vor.u32 %v7355_v3, %v5456_v2  ;;  %v5440_v15 = vld [vmem:[#allocation3 + $0x428] sm:$0xf] }
  0xa5   : > { %1630 = vmatpush.bf16.msra.mxu1 %v5593_v1  ;;  %v8028_v1 = vrot.slane %v8022_v10, 1 }
  0xa6   : > { %1643 = vmatpush.bf16.msra.mxu2 %v5469_v22  ;;  %v7401_v22 = vld [vmem:[#allocation3 + $0x5cc] sm:$0xf] }
  0xa7   : > { %1656 = vmatpush.bf16.msra.mxu3 %v5597_v26  ;;  %v5525_v26 = vor.u32 %v7369_v20, %v5522_v21  ;;  %v5653_v29 = vor.u32 %v7401_v22, %v5650_v23  ;;  %v7383_v20 = vld [vmem:[#allocation3 + $0x534] sm:$0xf0]  ;;  %v7349_v21 = vld [vmem:[#allocation3 + $0x42c] sm:$0xf]  ;;  %v5442_v22 = vld [vmem:[#allocation3 + $0x438] sm:$0xf0] }
  0xa8   : > { %1618 = vmatpush.bf16.msra.mxu0 %v5449_v31  ;;  %v7365_v31 = vld [vmem:[#allocation3 + $0x4ac] sm:$0xf]  ;;  %v5569_v28 = vor.u32 %v7383_v20, %v5568_v17  ;;  %v5445_v0 = vor.u32 %v7349_v21, %v5442_v22 }
  0xa9   : > { %1631 = vmatpush.bf16.msra.mxu1 %v5577_v33  ;;  %v7397_v33 = vld [vmem:[#allocation3 + $0x5ac] sm:$0xf]  ;;  %v5509_v37 = vor.u32 %v7365_v31, %v5506_v32 }
  0xaa   : > { %1644 = vmatpush.bf16.msra.mxu2 %v5453_v34  ;;  %v5634_v34 = vld [vmem:[#allocation3 + $0x5b8] sm:$0xf0]  ;;  %v7381_v23 = vld [vmem:[#allocation3 + $0x52c] sm:$0xf] }
  0xab   : > { %1657 = vmatpush.bf16.msra.mxu3 %v5581_v38  ;;  %v5488_v38 = vld [vmem:[#allocation3 + $0x488] sm:$0xf]  ;;  %v5637_v43 = vor.u32 %v7397_v33, %v5634_v34  ;;  %v7345_v31 = vld [vmem:[#allocation3 + $0x40c] sm:$0xf]  ;;  %v5426_v33 = vld [vmem:[#allocation3 + $0x418] sm:$0xf0] }
  0xac   : > { %1619 = vmatpush.bf16.msra.mxu0 %v5433_v46  ;;  %v5490_v46 = vld [vmem:[#allocation3 + $0x498] sm:$0xf0]  ;;  %v5489_v49 = vor.u32 %v7363_v39, %v5488_v38  ;;  %v7377_v34 = vld [vmem:[#allocation3 + $0x50c] sm:$0xf]  ;;  %v5912_v38 = vld [vmem:[#allocation3 + $0x7e0] sm:$0xf] }
  0xad   : > { %1632 = vmatpush.bf16.msra.mxu1 %v5561_v50  ;;  %v5617_v50 = vor.u32 %v7395_v44, %v5616_v42  ;;  %v7470_v42 = vld [vmem:[#allocation3 + $0x7ec] sm:$0xf0]  ;;  %v5786_v44 = vld [vmem:[#allocation3 + $0x6f0] sm:$0xf0] }
  0xae   : > { %1645 = vmatpush.bf16.msra.mxu2 %v5437_v51  ;;  %v5493_v51 = vor.u32 %v7361_v45, %v5490_v46  ;;  %v5429_v46 = vor.u32 %v7345_v31, %v5426_v33 }
  0xaf   : > { %1658 = vmatpush.bf16.msra.mxu3 %v5565_v56  ;;  %v7391_v56 = vld [vmem:[#allocation3 + $0x574] sm:$0xf0] }
  0xb0   : > { %1620 = vmatpush.bf16.msra.mxu0 %v5417_v63  ;;  %v5601_v62 = vor.u32 %v7391_v56, %v5600_v54  ;;  %v5477_v63 = vor.u32 %v7357_v57, %v5474_v58  ;;  %v7434_v54 = vld [vmem:[#allocation3 + $0x6cc] sm:$0xf0]  ;;  %v5917_v56 = vor.u32 %v7468_v47, %v5914_v48  ;;  %v7432_v58 = vld [vmem:[#allocation3 + $0x6c4] sm:$0xf] }
  0xb1   : > { %1633 = vmatpush.bf16.msra.mxu1 %v5545_v6  ;;  %v5605_v6 = vor.u32 %v7389_v59, %v5602_v60  ;;  %v7466_v57 = vld [vmem:[#allocation3 + $0x7cc] sm:$0xf0]  ;;  %v5770_v59 = vld [vmem:[#allocation3 + $0x6d0] sm:$0xf0]  ;;  %v7464_v60 = vld [vmem:[#allocation3 + $0x7c4] sm:$0xf] }
  0xb2   : > { %1646 = vmatpush.bf16.msra.mxu2 %v5421_v40  ;;  %v7387_v40 = vld [vmem:[#allocation3 + $0x554] sm:$0xf0]  ;;  %v5773_v3 = vor.u32 %v7432_v58, %v5770_v59  ;;  %v5834_v58 = vld [vmem:[#allocation3 + $0x750] sm:$0xf0] }
  0xb3   : > { %1659 = vmatpush.bf16.msra.mxu3 %v5549_v41  ;;  %1621 = vmatmul.bf16.vlgmr.msra.gmra.mxu0 %v8025_v19  ;;  %v7385_v41 = vld [vmem:[#allocation3 + $0x54c] sm:$0xf] }
  0xb4   : > { %1665 = vmatpush.bf16.msrb.mxu0 %v5537_v11  ;;  %1634 = vmatmul.bf16.vlgmr.msra.gmra.mxu1 %v8028_v1  ;;  %v5586_v11 = vld [vmem:[#allocation3 + $0x558] sm:$0xf0] }
  0xb5   : > { %1678 = vmatpush.bf16.msrb.mxu1 %v5665_v13  ;;  %1647 = vmatmul.bf16.vlgmr.msra.gmra.mxu2 %v8025_v19  ;;  %v5585_v13 = vor.u32 %v7387_v40, %v5584_v4  ;;  %v7430_v40 = vld [vmem:[#allocation3 + $0x6ac] sm:$0xf0] }
  0xb6   : > { %1691 = vmatpush.bf16.msrb.mxu2 %v5541_v14  ;;  %1660 = vmatmul.bf16.vlgmr.msra.gmra.mxu3 %v8028_v1  ;;  %v5461_v14 = vor.u32 %v7353_v7, %v5458_v8  ;;  %v5880_v7 = vld [vmem:[#allocation3 + $0x7a0] sm:$0xf] }
  0xb7   : > { %1704 = vmatpush.bf16.msrb.mxu3 %v5669_v18  ;;  %v5589_v18 = vor.u32 %v7385_v41, %v5586_v11  ;;  %v7462_v11 = vld [vmem:[#allocation3 + $0x7ac] sm:$0xf0] }
  0xb8   : > { %1666 = vmatpush.bf16.msrb.mxu0 %v5521_v24  ;;  %v5570_v24 = vld [vmem:[#allocation3 + $0x538] sm:$0xf0]  ;;  %v5881_v21 = vor.u32 %v7462_v11, %v5880_v7  ;;  %v5690_v7 = vld [vmem:[#allocation3 + $0x630] sm:$0xf0] }
  0xb9   : > { %1679 = vmatpush.bf16.msrb.mxu1 %v5649_v25  ;;  %v5441_v25 = vor.u32 %v7351_v16, %v5440_v15  ;;  %v5573_v32 = vor.u32 %v7381_v23, %v5570_v24  ;;  %v5882_v15 = vld [vmem:[#allocation3 + $0x7b0] sm:$0xf0]  ;;  %v5736_v23 = vld [vmem:[#allocation3 + $0x680] sm:$0xf]  ;;  %v7426_v24 = vld [vmem:[#allocation3 + $0x68c] sm:$0xf0] }
  0xba   : > { %1692 = vmatpush.bf16.msrb.mxu2 %v5525_v26  ;;  %v5424_v26 = vld [vmem:[#allocation3 + $0x408] sm:$0xf] }
  0xbb   : > { %1705 = vmatpush.bf16.msrb.mxu3 %v5653_v29  ;;  %v5552_v29 = vld [vmem:[#allocation3 + $0x508] sm:$0xf]  ;;  %v5425_v39 = vor.u32 %v7347_v27, %v5424_v26  ;;  %v7424_v27 = vld [vmem:[#allocation3 + $0x684] sm:$0xf] }
  0xbc   : > { %1667 = vmatpush.bf16.msrb.mxu0 %v5505_v35  ;;  %v5554_v35 = vld [vmem:[#allocation3 + $0x518] sm:$0xf0]  ;;  %v5553_v45 = vor.u32 %v7379_v30, %v5552_v29  ;;  %v5737_v30 = vor.u32 %v7426_v24, %v5736_v23 }
  0xbd   : > { %1680 = vmatpush.bf16.msrb.mxu1 %v5633_v36  ;;  %v5784_v36 = vld [vmem:[#allocation3 + $0x6e0] sm:$0xf] }
  0xbe   : > { %1693 = vmatpush.bf16.msrb.mxu2 %v5509_v37  ;;  %v7438_v37 = vld [vmem:[#allocation3 + $0x6ec] sm:$0xf0] }
  0xbf   : > { %1706 = vmatpush.bf16.msrb.mxu3 %v5637_v43  ;;  %v7436_v43 = vld [vmem:[#allocation3 + $0x6e4] sm:$0xf] }
  0xc0   : > { %1668 = vmatpush.bf16.msrb.mxu0 %v5489_v49  ;;  %v5557_v49 = vor.u32 %v7377_v34, %v5554_v35  ;;  %v5789_v52 = vor.u32 %v7436_v43, %v5786_v44  ;;  %v5720_v34 = vld [vmem:[#allocation3 + $0x660] sm:$0xf]  ;;  %v7422_v35 = vld [vmem:[#allocation3 + $0x66c] sm:$0xf0]  ;;  %v7452_v43 = vld [vmem:[#allocation3 + $0x764] sm:$0xf] }
  0xc1   : > { %1681 = vmatpush.bf16.msrb.mxu1 %v5617_v50  ;;  %v5785_v50 = vor.u32 %v7438_v37, %v5784_v36  ;;  %v5848_v36 = vld [vmem:[#allocation3 + $0x760] sm:$0xf]  ;;  %v5850_v44 = vld [vmem:[#allocation3 + $0x770] sm:$0xf0]  ;;  %v5721_v47 = vor.u32 %v7422_v35, %v5720_v34 }
  0xc2   : > { %1694 = vmatpush.bf16.msrb.mxu2 %v5493_v51  ;;  %v5913_v51 = vor.u32 %v7470_v42, %v5912_v38  ;;  %v697_v4 = vpop.f32.mrf.mxu0  ;;  %v7454_v38 = vld [vmem:[#allocation3 + $0x76c] sm:$0xf0]  ;;  %v5722_v42 = vld [vmem:[#allocation3 + $0x670] sm:$0xf0] }
  0xc3   : > { %1707 = vmatpush.bf16.msrb.mxu3 %v5621_v55  ;;  %v5896_v55 = vld [vmem:[#allocation3 + $0x7c0] sm:$0xf]  ;;  %v5849_v48 = vor.u32 %v7454_v38, %v5848_v36  ;;  %v7437_v36 = vld [vmem:[#allocation3 + $0x6ec] sm:$0xf] }
  0xc4   : > { %1669 = vmatpush.bf16.msrb.mxu0 %v5473_v61  ;;  %v5898_v61 = vld [vmem:[#allocation3 + $0x7d0] sm:$0xf0]  ;;  %v5897_v2 = vor.u32 %v7466_v57, %v5896_v55  ;;  %v7416_v55 = vld [vmem:[#allocation3 + $0x644] sm:$0xf] }
  0xc5   : > { %1682 = vmatpush.bf16.msrb.mxu1 %v5601_v62  ;;  %v710_v62 = vpop.f32.mrf.mxu1  ;;  %v5901_v8 = vor.u32 %v7464_v60, %v5898_v61  ;;  %v736_v17 = vpop.f32.mrf.mxu3  ;;  %v7448_v57 = vld [vmem:[#allocation3 + $0x744] sm:$0xf]  ;;  %v5688_v60 = vld [vmem:[#allocation3 + $0x620] sm:$0xf] }
  0xc6   : > { %1695 = vmatpush.bf16.msrb.mxu2 %v5477_v63  ;;  %v5769_v63 = vor.u32 %v7434_v54, %v5768_v53  ;;  %v8035_v41 = vadd.f32 %v710_v62, %v697_v4  ;;  %v723_v16 = vpop.f32.mrf.mxu2  ;;  %v5853_v53 = vor.u32 %v7452_v43, %v5850_v44  ;;  %v7450_v54 = vld [vmem:[#allocation3 + $0x74c] sm:$0xf0]  ;;  %v7469_v44 = vld [vmem:[#allocation3 + $0x7ec] sm:$0xf] }
  0xc7   : > { %1708 = vmatpush.bf16.msrb.mxu3 %v5605_v6  ;;  %v5752_v6 = vld [vmem:[#allocation3 + $0x6a0] sm:$0xf]  ;;  %v8040_v20 = vadd.f32 %v736_v17, %v723_v16  ;;  %v7446_v4 = vld [vmem:[#allocation3 + $0x72c] sm:$0xf0] }
  0xc8   : > { %1670 = vmatpush.bf16.msrb.mxu0 %v5457_v12  ;;  %v7428_v12 = vld [vmem:[#allocation3 + $0x6a4] sm:$0xf]  ;;  %v5800_v17 = vld [vmem:[#allocation3 + $0x700] sm:$0xf] }
  0xc9   : > { %1683 = vmatpush.bf16.msrb.mxu1 %v5585_v13  ;;  %v5754_v13 = vld [vmem:[#allocation3 + $0x6b0] sm:$0xf0] }
  0xca   : > { %1696 = vmatpush.bf16.msrb.mxu2 %v5461_v14  ;;  %v7460_v14 = vld [vmem:[#allocation3 + $0x7a4] sm:$0xf]  ;;  %v5757_v22 = vor.u32 %v7428_v12, %v5754_v13  ;;  %v699_v33 = vpop.f32.mrf.mxu0  ;;  %v5818_v12 = vld [vmem:[#allocation3 + $0x730] sm:$0xf0]  ;;  %v5672_v13 = vld [vmem:[#allocation3 + $0x600] sm:$0xf] }
  0xcb   : > { %1709 = vmatpush.bf16.msrb.mxu3 %v5589_v18  ;;  %v5753_v18 = vor.u32 %v7430_v40, %v5752_v6  ;;  %v5885_v26 = vor.u32 %v7460_v14, %v5882_v15  ;;  %v5837_v6 = vor.u32 %v7448_v57, %v5834_v58  ;;  %v7412_v40 = vld [vmem:[#allocation3 + $0x624] sm:$0xf]  ;;  %v7410_v14 = vld [vmem:[#allocation3 + $0x60c] sm:$0xf0]  ;;  %v5920_v33 = vld [vmem:[#allocation3 + $0x7e8] sm:$0xf] }
  0xcc   : > { %1671 = vmatpush.bf16.msrb.mxu0 %v5441_v25  ;;  %v5864_v25 = vld [vmem:[#allocation3 + $0x780] sm:$0xf]  ;;  %v5693_v24 = vor.u32 %v7412_v40, %v5690_v7  ;;  %v5673_v35 = vor.u32 %v7410_v14, %v5672_v13  ;;  %v7467_v58 = vld [vmem:[#allocation3 + $0x7d4] sm:$0xf0]  ;;  %v5760_v7 = vld [vmem:[#allocation3 + $0x6a8] sm:$0xf] }
  0xcd   : > { %1684 = vmatpush.bf16.msrb.mxu1 %v5569_v28  ;;  %v5738_v28 = vld [vmem:[#allocation3 + $0x690] sm:$0xf0]  ;;  %v712_v29 = vpop.f32.mrf.mxu1  ;;  %v7463_v13 = vld [vmem:[#allocation3 + $0x7b4] sm:$0xf0]  ;;  %v7429_v14 = vld [vmem:[#allocation3 + $0x6ac] sm:$0xf] }
  0xce   : > { %1697 = vmatpush.bf16.msrb.mxu2 %v5445_v0  ;;  %v7456_v0 = vld [vmem:[#allocation3 + $0x784] sm:$0xf]  ;;  %v5802_v29 = vld [vmem:[#allocation3 + $0x710] sm:$0xf0] }
  0xcf   : > { %1710 = vmatpush.bf16.msrb.mxu3 %v5573_v32  ;;  %v5741_v32 = vor.u32 %v7424_v27, %v5738_v28  ;;  %v1795_v27 = vshrl.u32 %v8022_v10, 16  ;;  %v1798_v28 = vshll.u32 %v8022_v10, 16 }
  0xd0   : > { %1672 = vmatpush.bf16.msrb.mxu0 %v5425_v39  ;;  %v7420_v39 = vld [vmem:[#allocation3 + $0x664] sm:$0xf] }
  0xd1   : > { %1685 = vmatpush.bf16.msrb.mxu1 %v5553_v45  ;;  %v725_v45 = vpop.f32.mrf.mxu2 }
  0xd2   : > { %1698 = vmatpush.bf16.msrb.mxu2 %v5429_v46  ;;  %v738_v46 = vpop.f32.mrf.mxu3  ;;  %v5922_v45 = vld [vmem:[#allocation3 + $0x7f8] sm:$0xf0] }
  0xd3   : > { %1711 = vmatpush.bf16.msrb.mxu3 %v5557_v49  ;;  %1673 = vmatmul.bf16.vlgmr.msrb.gmra.mxu0 %v8025_v19  ;;  %v5725_v49 = vor.u32 %v7420_v39, %v5722_v42  ;;  %v1797_v46 = vrot.slane %v1795_v27, 1  ;;  %v7459_v27 = vld [vmem:[#allocation3 + $0x794] sm:$0xf0] }
  0xd4   : > { %2124 = vmatpush.bf16.msra.mxu0 %v5785_v50  ;;  %1686 = vmatmul.bf16.vlgmr.msrb.gmra.mxu1 %v8028_v1  ;;  %v5704_v50 = vld [vmem:[#allocation3 + $0x640] sm:$0xf]  ;;  %v749_v11 = vpop.f32.mrf.mxu0 }
  0xd5   : > { %2137 = vmatpush.bf16.msra.mxu1 %v5913_v51  ;;  %1699 = vmatmul.bf16.vlgmr.msrb.gmra.mxu2 %v8025_v19  ;;  %v7458_v19 = vld [vmem:[#allocation3 + $0x78c] sm:$0xf0]  ;;  %v762_v61 = vpop.f32.mrf.mxu1 }
  0xd6   : > { %2150 = vmatpush.bf16.msra.mxu2 %v5789_v52  ;;  %1712 = vmatmul.bf16.vlgmr.msrb.gmra.mxu3 %v8028_v1  ;;  %v5866_v1 = vld [vmem:[#allocation3 + $0x790] sm:$0xf0]  ;;  %v5865_v31 = vor.u32 %v7458_v19, %v5864_v25  ;;  %v7418_v51 = vld [vmem:[#allocation3 + $0x64c] sm:$0xf0]  ;;  %v5832_v52 = vld [vmem:[#allocation3 + $0x740] sm:$0xf]  ;;  %v8042_v16 = vadd.f32 %v762_v61, %v749_v11 }
  0xd7   : > { %2163 = vmatpush.bf16.msra.mxu3 %v5917_v56  ;;  %v5869_v37 = vor.u32 %v7456_v0, %v5866_v1  ;;  %v5706_v56 = vld [vmem:[#allocation3 + $0x650] sm:$0xf0]  ;;  %v5705_v59 = vor.u32 %v7418_v51, %v5704_v50  ;;  %v5833_v62 = vor.u32 %v7450_v54, %v5832_v52  ;;  %v7408_v25 = vld [vmem:[#allocation3 + $0x604] sm:$0xf]  ;;  %v7435_v54 = vld [vmem:[#allocation3 + $0x6d4] sm:$0xf0] }
  0xd8   : > { %2125 = vmatpush.bf16.msra.mxu0 %v5769_v63  ;;  %v5709_v63 = vor.u32 %v7416_v55, %v5706_v56  ;;  %v7440_v1 = vld [vmem:[#allocation3 + $0x704] sm:$0xf]  ;;  %v5904_v55 = vld [vmem:[#allocation3 + $0x7c8] sm:$0xf]  ;;  %v5925_v56 = vor.u32 %v7469_v44, %v5922_v45  ;;  %v5730_v44 = vld [vmem:[#allocation3 + $0x678] sm:$0xf0] }
  0xd9   : > { %2138 = vmatpush.bf16.msra.mxu1 %v5897_v2  ;;  %v7414_v2 = vld [vmem:[#allocation3 + $0x62c] sm:$0xf0]  ;;  %v775_v19 = vpop.f32.mrf.mxu2  ;;  %v5888_v11 = vld [vmem:[#allocation3 + $0x7a8] sm:$0xf]  ;;  %v7453_v45 = vld [vmem:[#allocation3 + $0x76c] sm:$0xf] }
  0xda   : > { %2151 = vmatpush.bf16.msra.mxu2 %v5773_v3  ;;  %v5816_v3 = vld [vmem:[#allocation3 + $0x720] sm:$0xf]  ;;  %v5689_v15 = vor.u32 %v7414_v2, %v5688_v60  ;;  %v5778_v60 = vld [vmem:[#allocation3 + $0x6d8] sm:$0xf0] }
  0xdb   : > { %2164 = vmatpush.bf16.msra.mxu3 %v5901_v8  ;;  %v7444_v8 = vld [vmem:[#allocation3 + $0x724] sm:$0xf]  ;;  %v5817_v23 = vor.u32 %v7446_v4, %v5816_v3 }
  0xdc   : > { %2126 = vmatpush.bf16.msra.mxu0 %v5753_v18  ;;  %v7442_v18 = vld [vmem:[#allocation3 + $0x70c] sm:$0xf0]  ;;  %v5821_v0 = vor.u32 %v7444_v8, %v5818_v12  ;;  %v751_v52 = vpop.f32.mrf.mxu0  ;;  %v7431_v8 = vld [vmem:[#allocation3 + $0x6b4] sm:$0xf0] }
  0xdd   : > { %2139 = vmatpush.bf16.msra.mxu1 %v5881_v21  ;;  %v1787_v21 = vshrl.u32 %v8020_v5, 16  ;;  %v764_v42 = vpop.f32.mrf.mxu1  ;;  %v5801_v10 = vor.u32 %v7442_v18, %v5800_v17  ;;  %v7461_v17 = vld [vmem:[#allocation3 + $0x7ac] sm:$0xf]  ;;  %v5890_v18 = vld [vmem:[#allocation3 + $0x7b8] sm:$0xf0] }
  0xde   : > { %2152 = vmatpush.bf16.msra.mxu2 %v5757_v22  ;;  %v1790_v22 = vshll.u32 %v8020_v5, 16  ;;  %v7471_v5 = vld [vmem:[#allocation3 + $0x7f4] sm:$0xf0] }
  0xdf   : > { %2165 = vmatpush.bf16.msra.mxu3 %v5885_v26  ;;  %v5674_v26 = vld [vmem:[#allocation3 + $0x610] sm:$0xf0]  ;;  %v1789_v38 = vrot.slane %v1787_v21, 1  ;;  %v5921_v50 = vor.u32 %v7471_v5, %v5920_v33  ;;  %v5761_v21 = vor.u32 %v7431_v8, %v5760_v7  ;;  %v5696_v7 = vld [vmem:[#allocation3 + $0x628] sm:$0xf] }
  0xe0   : > { %2127 = vmatpush.bf16.msra.mxu0 %v5737_v30  ;;  %v5792_v30 = vld [vmem:[#allocation3 + $0x6e8] sm:$0xf]  ;;  %v1792_v39 = vrot.slane %v1790_v22, 2  ;;  %v5677_v43 = vor.u32 %v7408_v25, %v5674_v26  ;;  %v5889_v22 = vor.u32 %v7463_v13, %v5888_v11  ;;  %v7427_v25 = vld [vmem:[#allocation3 + $0x694] sm:$0xf0] }
  0xe1   : > { %2140 = vmatpush.bf16.msra.mxu1 %v5865_v31  ;;  %v788_v31 = vpop.f32.mrf.mxu3  ;;  %v777_v2 = vpop.f32.mrf.mxu2  ;;  %v5872_v26 = vld [vmem:[#allocation3 + $0x788] sm:$0xf]  ;;  %v7415_v8 = vld [vmem:[#allocation3 + $0x634] sm:$0xf0] }
  0xe2   : > { %2153 = vmatpush.bf16.msra.mxu2 %v5741_v32  ;;  %v7439_v32 = vld [vmem:[#allocation3 + $0x6f4] sm:$0xf0]  ;;  %v8048_v34 = vadd.f32 %v788_v31, %v775_v19  ;;  %v8050_v57 = vor.u32 %v1792_v39, %v1789_v38  ;;  %v5893_v19 = vor.u32 %v7461_v17, %v5890_v18  ;;  %v5873_v5 = vor.u32 %v7459_v27, %v5872_v26  ;;  %v5856_v38 = vld [vmem:[#allocation3 + $0x768] sm:$0xf]  ;;  %v5826_v17 = vld [vmem:[#allocation3 + $0x738] sm:$0xf0] }
  0xe3   : > { %2166 = vmatpush.bf16.msra.mxu3 %v5869_v37  ;;  %v5794_v37 = vld [vmem:[#allocation3 + $0x6f8] sm:$0xf0]  ;;  %v5824_v11 = vld [vmem:[#allocation3 + $0x728] sm:$0xf]  ;;  %v7447_v13 = vld [vmem:[#allocation3 + $0x734] sm:$0xf0]  ;;  %v5697_v18 = vor.u32 %v7415_v8, %v5696_v7 }
  0xe4   : > { %2128 = vmatpush.bf16.msra.mxu0 %v5721_v47  ;;  %v1800_v47 = vrot.slane %v1798_v28, 2  ;;  %v5797_v51 = vor.u32 %v7437_v36, %v5794_v37  ;;  %v7425_v28 = vld [vmem:[#allocation3 + $0x68c] sm:$0xf]  ;;  %v5728_v36 = vld [vmem:[#allocation3 + $0x668] sm:$0xf] }
  0xe5   : > { %2141 = vmatpush.bf16.msra.mxu1 %v5849_v48  ;;  %v5805_v48 = vor.u32 %v7440_v1, %v5802_v29  ;;  %v7457_v29 = vld [vmem:[#allocation3 + $0x78c] sm:$0xf]  ;;  %v7423_v37 = vld [vmem:[#allocation3 + $0x674] sm:$0xf0]  ;;  %v7524_v7 = vld [vmem:[#allocation3 + $0x9a4] sm:$0xf] }
  0xe6   : > { %2154 = vmatpush.bf16.msra.mxu2 %v5725_v49  ;;  %v5793_v49 = vor.u32 %v7439_v32, %v5792_v30  ;;  %v8052_v61 = vor.u32 %v1800_v47, %v1797_v46  ;;  %v5874_v30 = vld [vmem:[#allocation3 + $0x798] sm:$0xf0]  ;;  %v7443_v26 = vld [vmem:[#allocation3 + $0x714] sm:$0xf0]  ;;  %v6138_v8 = vld [vmem:[#allocation3 + $0x9b0] sm:$0xf0] }
  0xe7   : > { %2167 = vmatpush.bf16.msra.mxu3 %v5853_v53  ;;  %v5776_v53 = vld [vmem:[#allocation3 + $0x6c8] sm:$0xf]  ;;  %v5877_v39 = vor.u32 %v7457_v29, %v5874_v30  ;;  %v5858_v46 = vld [vmem:[#allocation3 + $0x778] sm:$0xf0]  ;;  %v6040_v30 = vld [vmem:[#allocation3 + $0x8e0] sm:$0xf] }
  0xe8   : > { %2129 = vmatpush.bf16.msra.mxu0 %v5705_v59  ;;  %v7433_v59 = vld [vmem:[#allocation3 + $0x6cc] sm:$0xf]  ;;  %v5777_v3 = vor.u32 %v7435_v54, %v5776_v53  ;;  %v5861_v52 = vor.u32 %v7453_v45, %v5858_v46  ;;  %v7451_v54 = vld [vmem:[#allocation3 + $0x754] sm:$0xf0] }
  0xe9   : > { %2142 = vmatpush.bf16.msra.mxu1 %v5833_v62  ;;  %v7465_v62 = vld [vmem:[#allocation3 + $0x7cc] sm:$0xf]  ;;  %v790_v4 = vpop.f32.mrf.mxu3  ;;  %v5781_v40 = vor.u32 %v7433_v59, %v5778_v60 }
  0xea   : > { %2155 = vmatpush.bf16.msra.mxu2 %v5709_v63  ;;  %v5906_v63 = vld [vmem:[#allocation3 + $0x7d8] sm:$0xf0]  ;;  %v7449_v60 = vld [vmem:[#allocation3 + $0x74c] sm:$0xf] }
  0xeb   : > { %2168 = vmatpush.bf16.msra.mxu3 %v5837_v6  ;;  %v5905_v6 = vor.u32 %v7467_v58, %v5904_v55  ;;  %v5909_v12 = vor.u32 %v7465_v62, %v5906_v63  ;;  %v7417_v55 = vld [vmem:[#allocation3 + $0x64c] sm:$0xf]  ;;  %v5842_v62 = vld [vmem:[#allocation3 + $0x758] sm:$0xf0] }
  0xec   : > { %2130 = vmatpush.bf16.msra.mxu0 %v5689_v15  ;;  %v5762_v15 = vld [vmem:[#allocation3 + $0x6b8] sm:$0xf0] }
  0xed   : > { %2143 = vmatpush.bf16.msra.mxu1 %v5817_v23  ;;  %v5765_v23 = vor.u32 %v7429_v14, %v5762_v15  ;;  %v5698_v14 = vld [vmem:[#allocation3 + $0x638] sm:$0xf0]  ;;  %v7445_v15 = vld [vmem:[#allocation3 + $0x72c] sm:$0xf] }
  0xee   : > { %2156 = vmatpush.bf16.msra.mxu2 %v5693_v24  ;;  %v5744_v24 = vld [vmem:[#allocation3 + $0x688] sm:$0xf]  ;;  %v5829_v27 = vor.u32 %v7445_v15, %v5826_v17  ;;  %v6120_v15 = vld [vmem:[#allocation3 + $0x980] sm:$0xf]  ;;  %v6141_v17 = vor.u32 %v7524_v7, %v6138_v8 }
  0xef   : > { %2169 = vmatpush.bf16.msra.mxu3 %v5821_v0  ;;  %v5746_v0 = vld [vmem:[#allocation3 + $0x698] sm:$0xf0]  ;;  %v5745_v32 = vor.u32 %v7427_v25, %v5744_v24  ;;  %v5808_v25 = vld [vmem:[#allocation3 + $0x708] sm:$0xf]  ;;  %v5928_v8 = vld [vmem:[#allocation3 + $0x800] sm:$0xf] }
  0xf0   : > { %2131 = vmatpush.bf16.msra.mxu0 %v5673_v35  ;;  %v1123_v1 = vpop.f32.mrf.mxu0  ;;  %v5749_v35 = vor.u32 %v7425_v28, %v5746_v0  ;;  %v5682_v28 = vld [vmem:[#allocation3 + $0x618] sm:$0xf0]  ;;  %v7441_v0 = vld [vmem:[#allocation3 + $0x70c] sm:$0xf] }
  0xf1   : > { %2144 = vmatpush.bf16.msra.mxu1 %v5801_v10  ;;  %v1124_v31 = vadd.f32 %v1123_v1, %v8035_v41  ;;  %v1136_v33 = vpop.f32.mrf.mxu1  ;;  %v7455_v10 = vld [vmem:[#allocation3 + $0x774] sm:$0xf0]  ;;  %v5729_v41 = vor.u32 %v7423_v37, %v5728_v36  ;;  %v5810_v1 = vld [vmem:[#allocation3 + $0x718] sm:$0xf0]  ;;  %v7500_v36 = vld [vmem:[#allocation3 + $0x8e4] sm:$0xf] }
  0xf2   : > { %2157 = vmatpush.bf16.msra.mxu2 %v5677_v43  ;;  %v7421_v43 = vld [vmem:[#allocation3 + $0x66c] sm:$0xf]  ;;  %v5857_v47 = vor.u32 %v7455_v10, %v5856_v38  ;;  %v6042_v37 = vld [vmem:[#allocation3 + $0x8f0] sm:$0xf0]  ;;  %v5809_v38 = vor.u32 %v7443_v26, %v5808_v25  ;;  %v7532_v10 = vld [vmem:[#allocation3 + $0x9e4] sm:$0xf] }
  0xf3   : > { %2170 = vmatpush.bf16.msra.mxu3 %v5805_v48  ;;  %2132 = vmatmul.bf16.vlgmr.msra.gmra.mxu0 %v8050_v57  ;;  %v8059_v42 = vadd.f32 %v1136_v33, %v1124_v31  ;;  %v5733_v48 = vor.u32 %v7421_v43, %v5730_v44  ;;  %v7502_v31 = vld [vmem:[#allocation3 + $0x8ec] sm:$0xf0]  ;;  %v6170_v43 = vld [vmem:[#allocation3 + $0x9f0] sm:$0xf0]  ;;  %v5813_v44 = vor.u32 %v7441_v0, %v5810_v1  ;;  %v6104_v1 = vld [vmem:[#allocation3 + $0x960] sm:$0xf] }
  0xf4   : > { %2176 = vmatpush.bf16.msrb.mxu0 %v5793_v49  ;;  %2145 = vmatmul.bf16.vlgmr.msra.gmra.mxu1 %v8052_v61  ;;  %v5712_v49 = vld [vmem:[#allocation3 + $0x648] sm:$0xf]  ;;  %v6041_v45 = vor.u32 %v7502_v31, %v6040_v30  ;;  %v7486_v0 = vld [vmem:[#allocation3 + $0x86c] sm:$0xf0] }
  0xf5   : > { %2189 = vmatpush.bf16.msrb.mxu1 %v5921_v50  ;;  %2158 = vmatmul.bf16.vlgmr.msra.gmra.mxu2 %v8050_v57  ;;  %v7419_v50 = vld [vmem:[#allocation3 + $0x654] sm:$0xf0]  ;;  %v7518_v31 = vld [vmem:[#allocation3 + $0x96c] sm:$0xf0] }
  0xf6   : > { %2202 = vmatpush.bf16.msrb.mxu2 %v5797_v51  ;;  %2171 = vmatmul.bf16.vlgmr.msra.gmra.mxu3 %v8052_v61  ;;  %v5840_v51 = vld [vmem:[#allocation3 + $0x748] sm:$0xf]  ;;  %v5713_v2 = vor.u32 %v7419_v50, %v5712_v49  ;;  %v6152_v49 = vld [vmem:[#allocation3 + $0x9c0] sm:$0xf]  ;;  %v6173_v50 = vor.u32 %v7532_v10, %v6170_v43 }
  0xf7   : > { %2215 = vmatpush.bf16.msrb.mxu3 %v5925_v56  ;;  %v5714_v56 = vld [vmem:[#allocation3 + $0x658] sm:$0xf0]  ;;  %v6088_v10 = vld [vmem:[#allocation3 + $0x940] sm:$0xf] }
  0xf8   : > { %2177 = vmatpush.bf16.msrb.mxu0 %v5777_v3  ;;  %v1149_v53 = vpop.f32.mrf.mxu2  ;;  %v1125_v63 = vpop.f32.mrf.mxu0 }
  0xf9   : > { %2190 = vmatpush.bf16.msrb.mxu1 %v5905_v6  ;;  %v1150_v58 = vadd.f32 %v1149_v53, %v8040_v20  ;;  %v1162_v59 = vpop.f32.mrf.mxu3  ;;  %v1138_v3 = vpop.f32.mrf.mxu1  ;;  %v5841_v6 = vor.u32 %v7451_v54, %v5840_v51  ;;  %v7413_v20 = vld [vmem:[#allocation3 + $0x62c] sm:$0xf]  ;;  %v7530_v51 = vld [vmem:[#allocation3 + $0x9cc] sm:$0xf0]  ;;  %v6026_v53 = vld [vmem:[#allocation3 + $0x8d0] sm:$0xf0] }
  0xfa   : > { %2203 = vmatpush.bf16.msrb.mxu2 %v5781_v40  ;;  %v5717_v40 = vor.u32 %v7417_v55, %v5714_v56  ;;  %v5701_v24 = vor.u32 %v7413_v20, %v5698_v14  ;;  %v7528_v54 = vld [vmem:[#allocation3 + $0x9c4] sm:$0xf]  ;;  %v6154_v55 = vld [vmem:[#allocation3 + $0x9d0] sm:$0xf0]  ;;  %v6136_v63 = vld [vmem:[#allocation3 + $0x9a0] sm:$0xf] }
  0xfb   : > { %2216 = vmatpush.bf16.msrb.mxu3 %v5909_v12  ;;  %v8062_v4 = vadd.f32 %v1162_v59, %v1150_v58  ;;  %v5845_v12 = vor.u32 %v7449_v60, %v5842_v62  ;;  %v6153_v58 = vor.u32 %v7530_v51, %v6152_v49  ;;  %v6008_v60 = vld [vmem:[#allocation3 + $0x8a0] sm:$0xf]  ;;  %v7494_v62 = vld [vmem:[#allocation3 + $0x8ac] sm:$0xf0]  ;;  %v7512_v49 = vld [vmem:[#allocation3 + $0x944] sm:$0xf] }
  0xfc   : > { %2178 = vmatpush.bf16.msrb.mxu0 %v5761_v21  ;;  %v5680_v21 = vld [vmem:[#allocation3 + $0x608] sm:$0xf]  ;;  %v7526_v3 = vld [vmem:[#allocation3 + $0x9ac] sm:$0xf0]  ;;  %v5992_v20 = vld [vmem:[#allocation3 + $0x880] sm:$0xf] }
  0xfd   : > { %2191 = vmatpush.bf16.msrb.mxu1 %v5889_v22  ;;  %v7411_v22 = vld [vmem:[#allocation3 + $0x614] sm:$0xf0]  ;;  %v7490_v14 = vld [vmem:[#allocation3 + $0x88c] sm:$0xf0] }
  0xfe   : > { %2204 = vmatpush.bf16.msrb.mxu2 %v5765_v23  ;;  %v5825_v23 = vor.u32 %v7447_v13, %v5824_v11  ;;  %v6009_v11 = vor.u32 %v7494_v62, %v6008_v60  ;;  %v5993_v25 = vor.u32 %v7490_v14, %v5992_v20  ;;  %v6072_v60 = vld [vmem:[#allocation3 + $0x920] sm:$0xf]  ;;  %v2232_v62 = vld [vmem:[#allocation2] sm:$0xcc] }
  0xff   : > { %2217 = vmatpush.bf16.msrb.mxu3 %v5893_v19  ;;  %v7409_v19 = vld [vmem:[#allocation3 + $0x60c] sm:$0xf]  ;;  %v6056_v14 = vld [vmem:[#allocation3 + $0x900] sm:$0xf] }
 0x100   : > { %2179 = vmatpush.bf16.msrb.mxu0 %v5745_v32  ;;  %v1151_v29 = vpop.f32.mrf.mxu2  ;;  %v6168_v32 = vld [vmem:[#allocation3 + $0x9e0] sm:$0xf] }
 0x101   : > { %2192 = vmatpush.bf16.msrb.mxu1 %v5873_v5  ;;  %v1164_v33 = vpop.f32.mrf.mxu3  ;;  %v5681_v5 = vor.u32 %v7411_v22, %v5680_v21  ;;  %v7488_v21 = vld [vmem:[#allocation3 + $0x884] sm:$0xf]  ;;  %v5994_v22 = vld [vmem:[#allocation3 + $0x890] sm:$0xf0] }
 0x102   : > { %2205 = vmatpush.bf16.msrb.mxu2 %v5749_v35  ;;  %v7534_v35 = vld [vmem:[#allocation3 + $0x9ec] sm:$0xf0]  ;;  %v5978_v33 = vld [vmem:[#allocation3 + $0x870] sm:$0xf0] }
 0x103   : > { %2218 = vmatpush.bf16.msrb.mxu3 %v5877_v39  ;;  %v5685_v39 = vor.u32 %v7409_v19, %v5682_v28  ;;  %v6169_v46 = vor.u32 %v7534_v35, %v6168_v32  ;;  %v5976_v28 = vld [vmem:[#allocation3 + $0x860] sm:$0xf]  ;;  %v7484_v32 = vld [vmem:[#allocation3 + $0x864] sm:$0xf]  ;;  %v6106_v35 = vld [vmem:[#allocation3 + $0x970] sm:$0xf0] }
 0x104   : > { %2180 = vmatpush.bf16.msrb.mxu0 %v5729_v41  ;;  %v6045_v41 = vor.u32 %v7500_v36, %v6042_v37  ;;  %v6105_v36 = vor.u32 %v7518_v31, %v6104_v1  ;;  %v5981_v37 = vor.u32 %v7484_v32, %v5978_v33  ;;  %v6050_v1 = vld [vmem:[#allocation3 + $0x8f8] sm:$0xf0]  ;;  %v7533_v33 = vld [vmem:[#allocation3 + $0x9ec] sm:$0xf] }
 0x105   : > { %2193 = vmatpush.bf16.msrb.mxu1 %v5857_v47  ;;  %v6024_v47 = vld [vmem:[#allocation3 + $0x8c0] sm:$0xf] }
 0x106   : > { %2206 = vmatpush.bf16.msrb.mxu2 %v5733_v48  ;;  %v7498_v48 = vld [vmem:[#allocation3 + $0x8cc] sm:$0xf0] }
 0x107   : > { %2219 = vmatpush.bf16.msrb.mxu3 %v5861_v52  ;;  %v7496_v52 = vld [vmem:[#allocation3 + $0x8c4] sm:$0xf]  ;;  %v6025_v56 = vor.u32 %v7498_v48, %v6024_v47 }
 0x108   : > { %2181 = vmatpush.bf16.msrb.mxu0 %v5713_v2  ;;  %v6029_v59 = vor.u32 %v7496_v52, %v6026_v53  ;;  %v6157_v2 = vor.u32 %v7528_v54, %v6154_v55  ;;  %v5944_v53 = vld [vmem:[#allocation3 + $0x820] sm:$0xf] }
 0x109   : > { %2194 = vmatpush.bf16.msrb.mxu1 %v5841_v6  ;;  %v7492_v6 = vld [vmem:[#allocation3 + $0x8a4] sm:$0xf] }
 0x10a   : > { %2207 = vmatpush.bf16.msrb.mxu2 %v5717_v40  ;;  %v6010_v40 = vld [vmem:[#allocation3 + $0x8b0] sm:$0xf0] }
 0x10b   : > { %2220 = vmatpush.bf16.msrb.mxu3 %v5845_v12  ;;  %v6137_v12 = vor.u32 %v7526_v3, %v6136_v63  ;;  %v6013_v13 = vor.u32 %v7492_v6, %v6010_v40  ;;  %v5946_v3 = vld [vmem:[#allocation3 + $0x830] sm:$0xf0]  ;;  %v7508_v6 = vld [vmem:[#allocation3 + $0x924] sm:$0xf] }
 0x10c   : > { %2182 = vmatpush.bf16.msrb.mxu0 %v5697_v18  ;;  %v7522_v18 = vld [vmem:[#allocation3 + $0x98c] sm:$0xf0]  ;;  %v6074_v40 = vld [vmem:[#allocation3 + $0x930] sm:$0xf0] }
 0x10d   : > { %2195 = vmatpush.bf16.msrb.mxu1 %v5825_v23  ;;  %v6121_v19 = vor.u32 %v7522_v18, %v6120_v15  ;;  %v7506_v15 = vld [vmem:[#allocation3 + $0x90c] sm:$0xf0]  ;;  %v2300_v18 = vunpack.c.h.b16 %v2232_v62 }
 0x10e   : > { %2208 = vmatpush.bf16.msrb.mxu2 %v5701_v24  ;;  %v6122_v24 = vld [vmem:[#allocation3 + $0x990] sm:$0xf0]  ;;  %v6057_v31 = vor.u32 %v7506_v15, %v6056_v14  ;;  %v6002_v14 = vld [vmem:[#allocation3 + $0x898] sm:$0xf0] }
 0x10f   : > { %2221 = vmatpush.bf16.msrb.mxu3 %v5829_v27  ;;  %v5997_v27 = vor.u32 %v7488_v21, %v5994_v22  ;;  %v6077_v21 = vor.u32 %v7508_v6, %v6074_v40  ;;  %v5930_v22 = vld [vmem:[#allocation3 + $0x810] sm:$0xf0] }
 0x110   : > { %2183 = vmatpush.bf16.msrb.mxu0 %v5681_v5  ;;  %v1175_v23 = vpop.f32.mrf.mxu0  ;;  %v7516_v5 = vld [vmem:[#allocation3 + $0x964] sm:$0xf] }
 0x111   : > { %2196 = vmatpush.bf16.msrb.mxu1 %v5809_v38  ;;  %v1188_v26 = vpop.f32.mrf.mxu1  ;;  %v5960_v38 = vld [vmem:[#allocation3 + $0x840] sm:$0xf]  ;;  %v6109_v43 = vor.u32 %v7516_v5, %v6106_v35  ;;  %v6178_v5 = vld [vmem:[#allocation3 + $0x9f8] sm:$0xf0]  ;;  %v8076_v35 = vpack.c.b16 %v2300_v18, %v2300_v18 }
 0x112   : > { %2209 = vmatpush.bf16.msrb.mxu2 %v5685_v39  ;;  %v7482_v39 = vld [vmem:[#allocation3 + $0x84c] sm:$0xf0]  ;;  %v6130_v18 = vld [vmem:[#allocation3 + $0x998] sm:$0xf0] }
 0x113   : > { %2222 = vmatpush.bf16.msrb.mxu3 %v5813_v44  ;;  %2184 = vmatmul.bf16.vlgmr.msrb.gmra.mxu0 %v8050_v57  ;;  %v5961_v52 = vor.u32 %v7482_v39, %v5960_v38 }
 0x114   : > { %2627 = vmatpush.bf16.msra.mxu0 %v6041_v45  ;;  %2197 = vmatmul.bf16.vlgmr.msrb.gmra.mxu1 %v8052_v61  ;;  %v7514_v45 = vld [vmem:[#allocation3 + $0x94c] sm:$0xf0] }
 0x115   : > { %2640 = vmatpush.bf16.msra.mxu1 %v6169_v46  ;;  %2210 = vmatmul.bf16.vlgmr.msrb.gmra.mxu2 %v8050_v57  ;;  %v7520_v57 = vld [vmem:[#allocation3 + $0x984] sm:$0xf] }
 0x116   : > { %2653 = vmatpush.bf16.msra.mxu2 %v6045_v41  ;;  %2223 = vmatmul.bf16.vlgmr.msrb.gmra.mxu3 %v8052_v61  ;;  %v1176_v61 = vadd.f32 %v1175_v23, %v8042_v16  ;;  %v6125_v29 = vor.u32 %v7520_v57, %v6122_v24  ;;  %v5977_v16 = vor.u32 %v7486_v0, %v5976_v28  ;;  %v7480_v46 = vld [vmem:[#allocation3 + $0x844] sm:$0xf]  ;;  %v5962_v41 = vld [vmem:[#allocation3 + $0x850] sm:$0xf0]  ;;  %v7535_v28 = vld [vmem:[#allocation3 + $0x9f4] sm:$0xf0] }
 0x117   : > { %2666 = vmatpush.bf16.msra.mxu3 %v6173_v50  ;;  %v6090_v50 = vld [vmem:[#allocation3 + $0x950] sm:$0xf0]  ;;  %v7504_v23 = vld [vmem:[#allocation3 + $0x904] sm:$0xf]  ;;  %v7501_v0 = vld [vmem:[#allocation3 + $0x8ec] sm:$0xf] }
 0x118   : > { %2628 = vmatpush.bf16.msra.mxu0 %v6025_v56  ;;  %v8069_v30 = vadd.f32 %v1188_v26, %v1176_v61  ;;  %v1201_v44 = vpop.f32.mrf.mxu2  ;;  %v1177_v51 = vpop.f32.mrf.mxu0  ;;  %v6089_v56 = vor.u32 %v7514_v45, %v6088_v10  ;;  %v6093_v63 = vor.u32 %v7512_v49, %v6090_v50  ;;  %v6058_v57 = vld [vmem:[#allocation3 + $0x910] sm:$0xf0]  ;;  %v6048_v61 = vld [vmem:[#allocation3 + $0x8e8] sm:$0xf]  ;;  %v6053_v39 = vor.u32 %v7501_v0, %v6050_v1  ;;  %v7499_v10 = vld [vmem:[#allocation3 + $0x8d4] sm:$0xf0] }
 0x119   : > { %2641 = vmatpush.bf16.msra.mxu1 %v6153_v58  ;;  %v1202_v47 = vadd.f32 %v1201_v44, %v8048_v34  ;;  %v1214_v48 = vpop.f32.mrf.mxu3  ;;  %v1190_v54 = vpop.f32.mrf.mxu1  ;;  %v5965_v58 = vor.u32 %v7480_v46, %v5962_v41  ;;  %v7510_v34 = vld [vmem:[#allocation3 + $0x92c] sm:$0xf0]  ;;  %v6176_v26 = vld [vmem:[#allocation3 + $0x9e8] sm:$0xf]  ;;  %v7531_v44 = vld [vmem:[#allocation3 + $0x9d4] sm:$0xf0]  ;;  %v6181_v45 = vor.u32 %v7533_v33, %v6178_v5 }
 0x11a   : > { %2654 = vmatpush.bf16.msra.mxu2 %v6029_v59  ;;  %v7478_v59 = vld [vmem:[#allocation3 + $0x82c] sm:$0xf0]  ;;  %v6177_v38 = vor.u32 %v7535_v28, %v6176_v26  ;;  %v7497_v41 = vld [vmem:[#allocation3 + $0x8cc] sm:$0xf]  ;;  %v6162_v50 = vld [vmem:[#allocation3 + $0x9d8] sm:$0xf0] }
 0x11b   : > { %2667 = vmatpush.bf16.msra.mxu3 %v6157_v2  ;;  %v8072_v55 = vadd.f32 %v1214_v48, %v1202_v47  ;;  %v7476_v2 = vld [vmem:[#allocation3 + $0x824] sm:$0xf]  ;;  %v5945_v7 = vor.u32 %v7478_v59, %v5944_v53  ;;  %v6034_v47 = vld [vmem:[#allocation3 + $0x8d8] sm:$0xf0]  ;;  %v8082_v48 = vrot.slane %v8076_v35, 2 }
 0x11c   : > { %2629 = vmatpush.bf16.msra.mxu0 %v6009_v11  ;;  %v7474_v11 = vld [vmem:[#allocation3 + $0x80c] sm:$0xf0]  ;;  %v5949_v20 = vor.u32 %v7476_v2, %v5946_v3  ;;  %v7529_v49 = vld [vmem:[#allocation3 + $0x9cc] sm:$0xf]  ;;  %v6037_v53 = vor.u32 %v7497_v41, %v6034_v47  ;;  %v6016_v54 = vld [vmem:[#allocation3 + $0x8a8] sm:$0xf] }
 0x11d   : > { %2642 = vmatpush.bf16.msra.mxu1 %v6137_v12  ;;  %v2299_v12 = vunpack.c.l.b16 %v2232_v62  ;;  %v6165_v59 = vor.u32 %v7529_v49, %v6162_v50  ;;  %v7493_v62 = vld [vmem:[#allocation3 + $0x8ac] sm:$0xf]  ;;  %v6146_v2 = vld [vmem:[#allocation3 + $0x9b8] sm:$0xf0]  ;;  %v6112_v26 = vld [vmem:[#allocation3 + $0x968] sm:$0xf] }
 0x11e   : > { %2655 = vmatpush.bf16.msra.mxu2 %v6013_v13  ;;  %v6073_v13 = vor.u32 %v7510_v34, %v6072_v60  ;;  %v7527_v60 = vld [vmem:[#allocation3 + $0x9b4] sm:$0xf0]  ;;  %v7525_v34 = vld [vmem:[#allocation3 + $0x9ac] sm:$0xf]  ;;  %v5986_v0 = vld [vmem:[#allocation3 + $0x878] sm:$0xf0] }
 0x11f   : > { %2668 = vmatpush.bf16.msra.mxu3 %v6141_v17  ;;  %v7472_v17 = vld [vmem:[#allocation3 + $0x804] sm:$0xf]  ;;  %v7485_v28 = vld [vmem:[#allocation3 + $0x86c] sm:$0xf]  ;;  %v6098_v47 = vld [vmem:[#allocation3 + $0x958] sm:$0xf0] }
 0x120   : > { %2630 = vmatpush.bf16.msra.mxu0 %v5993_v25  ;;  %v1203_v24 = vpop.f32.mrf.mxu2  ;;  %v7503_v25 = vld [vmem:[#allocation3 + $0x8f4] sm:$0xf0]  ;;  %v5933_v32 = vor.u32 %v7472_v17, %v5930_v22  ;;  %v7521_v17 = vld [vmem:[#allocation3 + $0x98c] sm:$0xf] }
 0x121   : > { %2643 = vmatpush.bf16.msra.mxu1 %v6121_v19  ;;  %v1216_v19 = vpop.f32.mrf.mxu3 }
 0x122   : > { %2656 = vmatpush.bf16.msra.mxu2 %v5997_v27  ;;  %v5929_v27 = vor.u32 %v7474_v11, %v5928_v8  ;;  %v7491_v8 = vld [vmem:[#allocation3 + $0x894] sm:$0xf0]  ;;  %v6128_v11 = vld [vmem:[#allocation3 + $0x988] sm:$0xf]  ;;  %v6133_v19 = vor.u32 %v7521_v17, %v6130_v18  ;;  %v7505_v17 = vld [vmem:[#allocation3 + $0x90c] sm:$0xf] }
 0x123   : > { %2669 = vmatpush.bf16.msra.mxu3 %v6125_v29  ;;  %v8074_v29 = vpack.c.b16 %v2299_v12, %v2299_v12  ;;  %v6149_v12 = vor.u32 %v7525_v34, %v6146_v2  ;;  %v7477_v34 = vld [vmem:[#allocation3 + $0x82c] sm:$0xf]  ;;  %v5954_v2 = vld [vmem:[#allocation3 + $0x838] sm:$0xf0] }
 0x124   : > { %2631 = vmatpush.bf16.msra.mxu0 %v5977_v16  ;;  %v6061_v16 = vor.u32 %v7504_v23, %v6058_v57  ;;  %v6066_v18 = vld [vmem:[#allocation3 + $0x918] sm:$0xf0] }
 0x125   : > { %2644 = vmatpush.bf16.msra.mxu1 %v6105_v36  ;;  %v6049_v36 = vor.u32 %v7503_v25, %v6048_v61  ;;  %v8079_v46 = vrot.slane %v8074_v29, 2  ;;  %v5984_v61 = vld [vmem:[#allocation3 + $0x868] sm:$0xf]  ;;  %v7487_v25 = vld [vmem:[#allocation3 + $0x874] sm:$0xf0] }
 0x126   : > { %2657 = vmatpush.bf16.msra.mxu2 %v5981_v37  ;;  %v6032_v37 = vld [vmem:[#allocation3 + $0x8c8] sm:$0xf]  ;;  %v5985_v33 = vor.u32 %v7487_v25, %v5984_v61  ;;  %v7598_v25 = vld [vmem:[#allocation3 + $0xbec] sm:$0xf0] }
 0x127   : > { %2670 = vmatpush.bf16.msra.mxu3 %v6109_v43  ;;  %v6160_v43 = vld [vmem:[#allocation3 + $0x9c8] sm:$0xf]  ;;  %v6033_v51 = vor.u32 %v7499_v10, %v6032_v37  ;;  %v7483_v37 = vld [vmem:[#allocation3 + $0x854] sm:$0xf0] }
 0x128   : > { %2632 = vmatpush.bf16.msra.mxu0 %v5961_v52  ;;  %v6161_v52 = vor.u32 %v7531_v44, %v6160_v43  ;;  %v7515_v43 = vld [vmem:[#allocation3 + $0x954] sm:$0xf0]  ;;  %v7481_v44 = vld [vmem:[#allocation3 + $0x84c] sm:$0xf] }
 0x129   : > { %2645 = vmatpush.bf16.msra.mxu1 %v6089_v56  ;;  %v7495_v56 = vld [vmem:[#allocation3 + $0x8b4] sm:$0xf0] }
 0x12a   : > { %2658 = vmatpush.bf16.msra.mxu2 %v5965_v58  ;;  %v6144_v58 = vld [vmem:[#allocation3 + $0x9a8] sm:$0xf]  ;;  %v6017_v3 = vor.u32 %v7495_v56, %v6016_v54 }
 0x12b   : > { %2671 = vmatpush.bf16.msra.mxu3 %v6093_v63  ;;  %v6018_v63 = vld [vmem:[#allocation3 + $0x8b8] sm:$0xf0]  ;;  %v6145_v6 = vor.u32 %v7527_v60, %v6144_v58  ;;  %v5952_v56 = vld [vmem:[#allocation3 + $0x828] sm:$0xf]  ;;  %v7479_v58 = vld [vmem:[#allocation3 + $0x834] sm:$0xf0] }
 0x12c   : > { %2633 = vmatpush.bf16.msra.mxu0 %v5945_v7  ;;  %v6021_v40 = vor.u32 %v7493_v62, %v6018_v63  ;;  %v6000_v7 = vld [vmem:[#allocation3 + $0x888] sm:$0xf]  ;;  %v7511_v63 = vld [vmem:[#allocation3 + $0x934] sm:$0xf0] }
 0x12d   : > { %2646 = vmatpush.bf16.msra.mxu1 %v6073_v13  ;;  %v7523_v13 = vld [vmem:[#allocation3 + $0x994] sm:$0xf0]  ;;  %v6001_v22 = vor.u32 %v7491_v8, %v6000_v7  ;;  %v5936_v7 = vld [vmem:[#allocation3 + $0x808] sm:$0xf] }
 0x12e   : > { %2659 = vmatpush.bf16.msra.mxu2 %v5949_v20  ;;  %v7489_v20 = vld [vmem:[#allocation3 + $0x88c] sm:$0xf]  ;;  %v6129_v57 = vor.u32 %v7523_v13, %v6128_v11  ;;  %v7475_v8 = vld [vmem:[#allocation3 + $0x814] sm:$0xf0]  ;;  %v6064_v13 = vld [vmem:[#allocation3 + $0x908] sm:$0xf] }
 0x12f   : > { %2672 = vmatpush.bf16.msra.mxu3 %v6077_v21  ;;  %v6005_v24 = vor.u32 %v7489_v20, %v6002_v14  ;;  %v7507_v20 = vld [vmem:[#allocation3 + $0x914] sm:$0xf0]  ;;  %v7473_v14 = vld [vmem:[#allocation3 + $0x80c] sm:$0xf]  ;;  %v5937_v61 = vor.u32 %v7475_v8, %v5936_v7  ;;  %v7586_v8 = vld [vmem:[#allocation3 + $0xb8c] sm:$0xf0] }
 0x130   : > { %2634 = vmatpush.bf16.msra.mxu0 %v5929_v27  ;;  %v1622_v15 = vpop.f32.mrf.mxu0  ;;  %v7519_v27 = vld [vmem:[#allocation3 + $0x974] sm:$0xf0] }
 0x131   : > { %2647 = vmatpush.bf16.msra.mxu1 %v6057_v31  ;;  %v1635_v21 = vpop.f32.mrf.mxu1  ;;  %v7517_v31 = vld [vmem:[#allocation3 + $0x96c] sm:$0xf]  ;;  %v6113_v5 = vor.u32 %v7519_v27, %v6112_v26  ;;  %v7564_v26 = vld [vmem:[#allocation3 + $0xae4] sm:$0xf]  ;;  %v6065_v27 = vor.u32 %v7507_v20, %v6064_v13  ;;  %v6378_v20 = vld [vmem:[#allocation3 + $0xb90] sm:$0xf0] }
 0x132   : > { %2660 = vmatpush.bf16.msra.mxu2 %v5933_v32  ;;  %v1636_v23 = vadd.f32 %v1635_v21, %v1622_v15  ;;  %v6114_v32 = vld [vmem:[#allocation3 + $0x978] sm:$0xf0] }
 0x133   : > { %2673 = vmatpush.bf16.msra.mxu3 %v6061_v16  ;;  %2635 = vmatmul.bf16.vlgmr.msra.gmra.mxu0 %v8079_v46  ;;  %v5989_v16 = vor.u32 %v7485_v28, %v5986_v0  ;;  %v5938_v15 = vld [vmem:[#allocation3 + $0x818] sm:$0xf0]  ;;  %v7596_v0 = vld [vmem:[#allocation3 + $0xbe4] sm:$0xf] }
 0x134   : > { %2679 = vmatpush.bf16.msrb.mxu0 %v6049_v36  ;;  %2648 = vmatmul.bf16.vlgmr.msra.gmra.mxu1 %v8082_v48  ;;  %v8089_v1 = vadd.f32 %v1636_v23, %v8059_v42  ;;  %v5968_v36 = vld [vmem:[#allocation3 + $0x848] sm:$0xf]  ;;  %v7513_v42 = vld [vmem:[#allocation3 + $0x94c] sm:$0xf]  ;;  %v7566_v23 = vld [vmem:[#allocation3 + $0xaec] sm:$0xf0]  ;;  %v5941_v28 = vor.u32 %v7473_v14, %v5938_v15 }
 0x135   : > { %2692 = vmatpush.bf16.msrb.mxu1 %v6177_v38  ;;  %2661 = vmatmul.bf16.vlgmr.msra.gmra.mxu2 %v8079_v46  ;;  %v6096_v38 = vld [vmem:[#allocation3 + $0x948] sm:$0xf]  ;;  %v6101_v62 = vor.u32 %v7513_v42, %v6098_v47 }
 0x136   : > { %2705 = vmatpush.bf16.msrb.mxu2 %v6053_v39  ;;  %2674 = vmatmul.bf16.vlgmr.msra.gmra.mxu3 %v8082_v48  ;;  %v6117_v39 = vor.u32 %v7517_v31, %v6114_v32  ;;  %v6426_v31 = vld [vmem:[#allocation3 + $0xbf0] sm:$0xf0]  ;;  %v6069_v32 = vor.u32 %v7505_v17, %v6066_v18  ;;  %v6232_v18 = vld [vmem:[#allocation3 + $0xa60] sm:$0xf] }
 0x137   : > { %2718 = vmatpush.bf16.msrb.mxu3 %v6181_v45  ;;  %v5970_v45 = vld [vmem:[#allocation3 + $0x858] sm:$0xf0] }
 0x138   : > { %2680 = vmatpush.bf16.msrb.mxu0 %v6033_v51  ;;  %v1648_v10 = vpop.f32.mrf.mxu2  ;;  %v1624_v49 = vpop.f32.mrf.mxu0  ;;  %v5969_v51 = vor.u32 %v7483_v37, %v5968_v36  ;;  %v5973_v54 = vor.u32 %v7481_v44, %v5970_v45  ;;  %v6280_v36 = vld [vmem:[#allocation3 + $0xac0] sm:$0xf]  ;;  %v7562_v37 = vld [vmem:[#allocation3 + $0xacc] sm:$0xf0]  ;;  %v6282_v44 = vld [vmem:[#allocation3 + $0xad0] sm:$0xf0] }
 0x139   : > { %2693 = vmatpush.bf16.msrb.mxu1 %v6161_v52  ;;  %v1661_v41 = vpop.f32.mrf.mxu3  ;;  %v1637_v52 = vpop.f32.mrf.mxu1  ;;  %v7592_v45 = vld [vmem:[#allocation3 + $0xbc4] sm:$0xf]  ;;  %v6281_v42 = vor.u32 %v7562_v37, %v6280_v36  ;;  %v7578_v36 = vld [vmem:[#allocation3 + $0xb4c] sm:$0xf0] }
 0x13a   : > { %2706 = vmatpush.bf16.msrb.mxu2 %v6037_v53  ;;  %v1662_v50 = vadd.f32 %v1661_v41, %v1648_v10  ;;  %v6097_v53 = vor.u32 %v7515_v43, %v6096_v38  ;;  %v6408_v38 = vld [vmem:[#allocation3 + $0xbc0] sm:$0xf]  ;;  %v7594_v10 = vld [vmem:[#allocation3 + $0xbcc] sm:$0xf0]  ;;  %v7560_v43 = vld [vmem:[#allocation3 + $0xac4] sm:$0xf] }
 0x13b   : > { %2719 = vmatpush.bf16.msrb.mxu3 %v6165_v59  ;;  %v6080_v59 = vld [vmem:[#allocation3 + $0x928] sm:$0xf]  ;;  %v6410_v41 = vld [vmem:[#allocation3 + $0xbd0] sm:$0xf0]  ;;  %v6409_v47 = vor.u32 %v7594_v10, %v6408_v38  ;;  %v6285_v49 = vor.u32 %v7560_v43, %v6282_v44  ;;  %v6392_v52 = vld [vmem:[#allocation3 + $0xba0] sm:$0xf] }
 0x13c   : > { %2681 = vmatpush.bf16.msrb.mxu0 %v6017_v3  ;;  %v8092_v60 = vadd.f32 %v1662_v50, %v8062_v4  ;;  %v7509_v3 = vld [vmem:[#allocation3 + $0x92c] sm:$0xf]  ;;  %v6081_v11 = vor.u32 %v7511_v63, %v6080_v59  ;;  %v6264_v50 = vld [vmem:[#allocation3 + $0xaa0] sm:$0xf]  ;;  %v7588_v59 = vld [vmem:[#allocation3 + $0xba4] sm:$0xf] }
 0x13d   : > { %2694 = vmatpush.bf16.msrb.mxu1 %v6145_v6  ;;  %v6082_v6 = vld [vmem:[#allocation3 + $0x938] sm:$0xf0]  ;;  %v7544_v37 = vld [vmem:[#allocation3 + $0xa44] sm:$0xf]  ;;  %v6218_v38 = vld [vmem:[#allocation3 + $0xa50] sm:$0xf0] }
 0x13e   : > { %2707 = vmatpush.bf16.msrb.mxu2 %v6021_v40  ;;  %v5953_v40 = vor.u32 %v7479_v58, %v5952_v56  ;;  %v6085_v4 = vor.u32 %v7509_v3, %v6082_v6  ;;  %v7556_v56 = vld [vmem:[#allocation3 + $0xaa4] sm:$0xf]  ;;  %v6266_v58 = vld [vmem:[#allocation3 + $0xab0] sm:$0xf0]  ;;  %v6248_v3 = vld [vmem:[#allocation3 + $0xa80] sm:$0xf] }
 0x13f   : > { %2720 = vmatpush.bf16.msrb.mxu3 %v6149_v12  ;;  %v5957_v12 = vor.u32 %v7477_v34, %v5954_v2  ;;  %v6269_v2 = vor.u32 %v7556_v56, %v6266_v58  ;;  %v7554_v6 = vld [vmem:[#allocation3 + $0xa8c] sm:$0xf0]  ;;  %v6346_v10 = vld [vmem:[#allocation3 + $0xb50] sm:$0xf0]  ;;  %v7540_v56 = vld [vmem:[#allocation3 + $0xa24] sm:$0xf] }
 0x140   : > { %2682 = vmatpush.bf16.msrb.mxu0 %v6001_v22  ;;  %v1650_v21 = vpop.f32.mrf.mxu2  ;;  %v6296_v22 = vld [vmem:[#allocation3 + $0xae0] sm:$0xf]  ;;  %v6202_v58 = vld [vmem:[#allocation3 + $0xa30] sm:$0xf0] }
 0x141   : > { %2695 = vmatpush.bf16.msrb.mxu1 %v6129_v57  ;;  %v6424_v57 = vld [vmem:[#allocation3 + $0xbe0] sm:$0xf]  ;;  %v7550_v21 = vld [vmem:[#allocation3 + $0xa6c] sm:$0xf0] }
 0x142   : > { %2708 = vmatpush.bf16.msrb.mxu2 %v6005_v24  ;;  %v1663_v24 = vpop.f32.mrf.mxu3 }
 0x143   : > { %2721 = vmatpush.bf16.msrb.mxu3 %v6133_v19  ;;  %v6298_v19 = vld [vmem:[#allocation3 + $0xaf0] sm:$0xf0]  ;;  %v7548_v24 = vld [vmem:[#allocation3 + $0xa64] sm:$0xf] }
 0x144   : > { %2683 = vmatpush.bf16.msrb.mxu0 %v5985_v33  ;;  %v6297_v33 = vor.u32 %v7566_v23, %v6296_v22  ;;  %v6360_v22 = vld [vmem:[#allocation3 + $0xb60] sm:$0xf] }
 0x145   : > { %2696 = vmatpush.bf16.msrb.mxu1 %v6113_v5  ;;  %v6425_v5 = vor.u32 %v7598_v25, %v6424_v57  ;;  %v7582_v57 = vld [vmem:[#allocation3 + $0xb6c] sm:$0xf0] }
 0x146   : > { %2709 = vmatpush.bf16.msrb.mxu2 %v5989_v16  ;;  %v6301_v16 = vor.u32 %v7564_v26, %v6298_v19  ;;  %v7580_v26 = vld [vmem:[#allocation3 + $0xb64] sm:$0xf]  ;;  %v6362_v19 = vld [vmem:[#allocation3 + $0xb70] sm:$0xf0] }
 0x147   : > { %2722 = vmatpush.bf16.msrb.mxu3 %v6117_v39  ;;  %v6429_v39 = vor.u32 %v7596_v0, %v6426_v31  ;;  %v6216_v31 = vld [vmem:[#allocation3 + $0xa40] sm:$0xf] }
 0x148   : > { %2684 = vmatpush.bf16.msrb.mxu0 %v5969_v51  ;;  %v7558_v51 = vld [vmem:[#allocation3 + $0xaac] sm:$0xf0] }
 0x149   : > { %2697 = vmatpush.bf16.msrb.mxu1 %v6097_v53  ;;  %v6413_v53 = vor.u32 %v7592_v45, %v6410_v41  ;;  %v6265_v63 = vor.u32 %v7558_v51, %v6264_v50  ;;  %v6200_v41 = vld [vmem:[#allocation3 + $0xa20] sm:$0xf]  ;;  %v7542_v50 = vld [vmem:[#allocation3 + $0xa2c] sm:$0xf0] }
 0x14a   : > { %2710 = vmatpush.bf16.msrb.mxu2 %v5973_v54  ;;  %v7590_v54 = vld [vmem:[#allocation3 + $0xbac] sm:$0xf0]  ;;  %v6328_v51 = vld [vmem:[#allocation3 + $0xb20] sm:$0xf] }
 0x14b   : > { %2723 = vmatpush.bf16.msrb.mxu3 %v6101_v62  ;;  %v6394_v62 = vld [vmem:[#allocation3 + $0xbb0] sm:$0xf0]  ;;  %v6393_v34 = vor.u32 %v7590_v54, %v6392_v52  ;;  %v7574_v52 = vld [vmem:[#allocation3 + $0xb2c] sm:$0xf0] }
 0x14c   : > { %2685 = vmatpush.bf16.msrb.mxu0 %v5953_v40  ;;  %v6376_v40 = vld [vmem:[#allocation3 + $0xb80] sm:$0xf]  ;;  %v6397_v7 = vor.u32 %v7588_v59, %v6394_v62  ;;  %v7572_v59 = vld [vmem:[#allocation3 + $0xb24] sm:$0xf]  ;;  %v6330_v62 = vld [vmem:[#allocation3 + $0xb30] sm:$0xf0] }
 0x14d   : > { %2698 = vmatpush.bf16.msrb.mxu1 %v6081_v11  ;;  %v7552_v11 = vld [vmem:[#allocation3 + $0xa84] sm:$0xf]  ;;  %v6377_v15 = vor.u32 %v7586_v8, %v6376_v40  ;;  %v2801_v40 = vshrl.u32 %v8074_v29, 16  ;;  %v6329_v8 = vor.u32 %v7574_v52, %v6328_v51  ;;  %v7559_v51 = vld [vmem:[#allocation3 + $0xab4] sm:$0xf0] }
 0x14e   : > { %2711 = vmatpush.bf16.msrb.mxu2 %v5957_v12  ;;  %v6250_v12 = vld [vmem:[#allocation3 + $0xa90] sm:$0xf0]  ;;  %v6400_v52 = vld [vmem:[#allocation3 + $0xba8] sm:$0xf] }
 0x14f   : > { %2724 = vmatpush.bf16.msrb.mxu3 %v6085_v4  ;;  %v6253_v17 = vor.u32 %v7552_v11, %v6250_v12  ;;  %v7536_v11 = vld [vmem:[#allocation3 + $0xa04] sm:$0xf]  ;;  %v6186_v12 = vld [vmem:[#allocation3 + $0xa10] sm:$0xf0] }
 0x150   : > { %2686 = vmatpush.bf16.msrb.mxu0 %v5937_v61  ;;  %v1674_v13 = vpop.f32.mrf.mxu0  ;;  %v6234_v61 = vld [vmem:[#allocation3 + $0xa70] sm:$0xf0] }
 0x151   : > { %2699 = vmatpush.bf16.msrb.mxu1 %v6065_v27  ;;  %v1687_v14 = vpop.f32.mrf.mxu1  ;;  %v6233_v27 = vor.u32 %v7550_v21, %v6232_v18  ;;  %v6237_v0 = vor.u32 %v7548_v24, %v6234_v61  ;;  %v6432_v18 = vld [vmem:[#allocation3 + $0xbe8] sm:$0xf]  ;;  %v7599_v21 = vld [vmem:[#allocation3 + $0xbf4] sm:$0xf0]  ;;  %v2803_v24 = vrot.slane %v2801_v40, 2 }
 0x152   : > { %2712 = vmatpush.bf16.msrb.mxu2 %v5941_v28  ;;  %v1688_v4 = vadd.f32 %v1687_v14, %v1674_v13  ;;  %v6361_v28 = vor.u32 %v7582_v57, %v6360_v22  ;;  %v2809_v13 = vshrl.u32 %v8076_v35, 16  ;;  %v7568_v14 = vld [vmem:[#allocation3 + $0xb04] sm:$0xf]  ;;  %v6306_v57 = vld [vmem:[#allocation3 + $0xaf8] sm:$0xf0] }
 0x153   : > { %2725 = vmatpush.bf16.msrb.mxu3 %v6069_v32  ;;  %2687 = vmatmul.bf16.vlgmr.msrb.gmra.mxu0 %v8079_v46  ;;  %v7546_v32 = vld [vmem:[#allocation3 + $0xa4c] sm:$0xf0]  ;;  %v7555_v40 = vld [vmem:[#allocation3 + $0xa94] sm:$0xf0] }
 0x154   : > { %3138 = vmatpush.bf16.msra.mxu0 %v6297_v33  ;;  %2700 = vmatmul.bf16.vlgmr.msrb.gmra.mxu1 %v8082_v48  ;;  %v8099_v25 = vadd.f32 %v1688_v4, %v8069_v30  ;;  %v6344_v33 = vld [vmem:[#allocation3 + $0xb40] sm:$0xf]  ;;  %v7576_v30 = vld [vmem:[#allocation3 + $0xb44] sm:$0xf]  ;;  %v6217_v45 = vor.u32 %v7546_v32, %v6216_v31  ;;  %v6304_v4 = vld [vmem:[#allocation3 + $0xae8] sm:$0xf] }
 0x155   : > { %3151 = vmatpush.bf16.msra.mxu1 %v6425_v5  ;;  %2713 = vmatmul.bf16.vlgmr.msrb.gmra.mxu2 %v8079_v46  ;;  %v7584_v46 = vld [vmem:[#allocation3 + $0xb84] sm:$0xf]  ;;  %v6365_v5 = vor.u32 %v7580_v26, %v6362_v19  ;;  %v6349_v54 = vor.u32 %v7576_v30, %v6346_v10  ;;  %v7597_v19 = vld [vmem:[#allocation3 + $0xbec] sm:$0xf]  ;;  %v7595_v30 = vld [vmem:[#allocation3 + $0xbd4] sm:$0xf0] }
 0x156   : > { %3164 = vmatpush.bf16.msra.mxu2 %v6301_v16  ;;  %2726 = vmatmul.bf16.vlgmr.msrb.gmra.mxu3 %v8082_v48  ;;  %v6249_v48 = vor.u32 %v7554_v6, %v6248_v3  ;;  %v6381_v23 = vor.u32 %v7584_v46, %v6378_v20  ;;  %v6312_v3 = vld [vmem:[#allocation3 + $0xb00] sm:$0xf]  ;;  %v7570_v6 = vld [vmem:[#allocation3 + $0xb0c] sm:$0xf0]  ;;  %v2812_v46 = vshll.u32 %v8076_v35, 16  ;;  %v6333_v20 = vor.u32 %v7572_v59, %v6330_v62 }
 0x157   : > { %3177 = vmatpush.bf16.msra.mxu3 %v6429_v39  ;;  %v6313_v26 = vor.u32 %v7570_v6, %v6312_v3  ;;  %v6189_v35 = vor.u32 %v7536_v11, %v6186_v12  ;;  %v7561_v10 = vld [vmem:[#allocation3 + $0xacc] sm:$0xf]  ;;  %v6274_v59 = vld [vmem:[#allocation3 + $0xab8] sm:$0xf0]  ;;  %v6256_v6 = vld [vmem:[#allocation3 + $0xa88] sm:$0xf] }
 0x158   : > { %3139 = vmatpush.bf16.msra.mxu0 %v6281_v42  ;;  %v1700_v16 = vpop.f32.mrf.mxu2  ;;  %v1676_v43 = vpop.f32.mrf.mxu0  ;;  %v7589_v62 = vld [vmem:[#allocation3 + $0xbac] sm:$0xf]  ;;  %v6258_v12 = vld [vmem:[#allocation3 + $0xa98] sm:$0xf0] }
 0x159   : > { %3152 = vmatpush.bf16.msra.mxu1 %v6409_v47  ;;  %v1713_v39 = vpop.f32.mrf.mxu3  ;;  %v1689_v42 = vpop.f32.mrf.mxu1  ;;  %v6345_v47 = vor.u32 %v7578_v36, %v6344_v33  ;;  %v6433_v33 = vor.u32 %v7599_v21, %v6432_v18  ;;  %v7563_v36 = vld [vmem:[#allocation3 + $0xad4] sm:$0xf0]  ;;  %v6290_v43 = vld [vmem:[#allocation3 + $0xad8] sm:$0xf0]  ;;  %v7553_v11 = vld [vmem:[#allocation3 + $0xa8c] sm:$0xf] }
 0x15a   : > { %3165 = vmatpush.bf16.msra.mxu2 %v6285_v49  ;;  %v1714_v44 = vadd.f32 %v1713_v39, %v1700_v16  ;;  %v6221_v49 = vor.u32 %v7544_v37, %v6218_v38  ;;  %v6288_v16 = vld [vmem:[#allocation3 + $0xac8] sm:$0xf]  ;;  %v7551_v21 = vld [vmem:[#allocation3 + $0xa74] sm:$0xf0] }
 0x15b   : > { %3178 = vmatpush.bf16.msra.mxu3 %v6413_v53  ;;  %v6416_v37 = vld [vmem:[#allocation3 + $0xbc8] sm:$0xf]  ;;  %v6289_v42 = vor.u32 %v7563_v36, %v6288_v16  ;;  %v7579_v16 = vld [vmem:[#allocation3 + $0xb54] sm:$0xf0]  ;;  %v7545_v36 = vld [vmem:[#allocation3 + $0xa4c] sm:$0xf] }
 0x15c   : > { %3140 = vmatpush.bf16.msra.mxu0 %v6265_v63  ;;  %v8102_v53 = vadd.f32 %v1714_v44, %v8072_v55  ;;  %v6184_v63 = vld [vmem:[#allocation3 + $0xa00] sm:$0xf]  ;;  %v6205_v55 = vor.u32 %v7540_v56, %v6202_v58  ;;  %v7591_v56 = vld [vmem:[#allocation3 + $0xbb4] sm:$0xf0]  ;;  %v7557_v58 = vld [vmem:[#allocation3 + $0xaac] sm:$0xf] }
 0x15d   : > { %3153 = vmatpush.bf16.msra.mxu1 %v6393_v34  ;;  %v7538_v34 = vld [vmem:[#allocation3 + $0xa0c] sm:$0xf0]  ;;  %v6277_v3 = vor.u32 %v7557_v58, %v6274_v59  ;;  %v6240_v18 = vld [vmem:[#allocation3 + $0xa68] sm:$0xf]  ;;  %v7541_v58 = vld [vmem:[#allocation3 + $0xa2c] sm:$0xf] }
 0x15e   : > { %3166 = vmatpush.bf16.msra.mxu2 %v6269_v2  ;;  %v6201_v2 = vor.u32 %v7542_v50, %v6200_v41  ;;  %v6185_v22 = vor.u32 %v7538_v34, %v6184_v63  ;;  %v6418_v41 = vld [vmem:[#allocation3 + $0xbd8] sm:$0xf0]  ;;  %v6272_v50 = vld [vmem:[#allocation3 + $0xaa8] sm:$0xf] }
 0x15f   : > { %3179 = vmatpush.bf16.msra.mxu3 %v6397_v7  ;;  %v2804_v7 = vshll.u32 %v8074_v29, 16  ;;  %v6402_v63 = vld [vmem:[#allocation3 + $0xbb8] sm:$0xf0]  ;;  %v6273_v34 = vor.u32 %v7559_v51, %v6272_v50  ;;  %v7543_v50 = vld [vmem:[#allocation3 + $0xa34] sm:$0xf0] }
 0x160   : > { %3141 = vmatpush.bf16.msra.mxu0 %v6249_v48  ;;  %v6314_v48 = vld [vmem:[#allocation3 + $0xb10] sm:$0xf0]  ;;  %v6336_v51 = vld [vmem:[#allocation3 + $0xb28] sm:$0xf]  ;;  %v6210_v59 = vld [vmem:[#allocation3 + $0xa38] sm:$0xf0] }
 0x161   : > { %3154 = vmatpush.bf16.msra.mxu1 %v6377_v15  ;;  %v1702_v15 = vpop.f32.mrf.mxu2  ;;  %v1715_v29 = vpop.f32.mrf.mxu3  ;;  %v2806_v61 = vrot.slane %v2804_v7, 3  ;;  %v6317_v31 = vor.u32 %v7568_v14, %v6314_v48  ;;  %v6384_v7 = vld [vmem:[#allocation3 + $0xb88] sm:$0xf]  ;;  %v6257_v48 = vor.u32 %v7555_v40, %v6256_v6  ;;  %v6213_v40 = vor.u32 %v7541_v58, %v6210_v59  ;;  %v6512_v58 = vld [vmem:[#allocation3 + $0xc80] sm:$0xf] }
 0x162   : > { %3167 = vmatpush.bf16.msra.mxu2 %v6253_v17  ;;  %v7567_v17 = vld [vmem:[#allocation3 + $0xaf4] sm:$0xf0]  ;;  %v6368_v29 = vld [vmem:[#allocation3 + $0xb68] sm:$0xf]  ;;  %v7620_v59 = vld [vmem:[#allocation3 + $0xc8c] sm:$0xf0] }
 0x163   : > { %3180 = vmatpush.bf16.msra.mxu3 %v6381_v23  ;;  %v7565_v23 = vld [vmem:[#allocation3 + $0xaec] sm:$0xf]  ;;  %v6305_v32 = vor.u32 %v7567_v17, %v6304_v4  ;;  %v8108_v39 = vor.u32 %v2806_v61, %v2803_v24  ;;  %v6261_v17 = vor.u32 %v7553_v11, %v6258_v12  ;;  %v6242_v24 = vld [vmem:[#allocation3 + $0xa78] sm:$0xf0] }
 0x164   : > { %3142 = vmatpush.bf16.msra.mxu0 %v6233_v27  ;;  %v6434_v27 = vld [vmem:[#allocation3 + $0xbf8] sm:$0xf0]  ;;  %v7569_v12 = vld [vmem:[#allocation3 + $0xb0c] sm:$0xf] }
 0x165   : > { %3155 = vmatpush.bf16.msra.mxu1 %v6361_v28  ;;  %v2811_v28 = vrot.slane %v2809_v13, 2  ;;  %v6437_v38 = vor.u32 %v7597_v19, %v6434_v27  ;;  %v6241_v19 = vor.u32 %v7551_v21, %v6240_v18  ;;  %v6194_v11 = vld [vmem:[#allocation3 + $0xa18] sm:$0xf0]  ;;  %v7630_v18 = vld [vmem:[#allocation3 + $0xce4] sm:$0xf] }
 0x166   : > { %3168 = vmatpush.bf16.msra.mxu2 %v6237_v0  ;;  %v2814_v0 = vrot.slane %v2812_v46, 3  ;;  %v7585_v46 = vld [vmem:[#allocation3 + $0xb8c] sm:$0xf]  ;;  %v6562_v21 = vld [vmem:[#allocation3 + $0xcf0] sm:$0xf0] }
 0x167   : > { %3181 = vmatpush.bf16.msra.mxu3 %v6365_v5  ;;  %v6309_v5 = vor.u32 %v7565_v23, %v6306_v57  ;;  %v7583_v23 = vld [vmem:[#allocation3 + $0xb74] sm:$0xf0]  ;;  %v7549_v57 = vld [vmem:[#allocation3 + $0xa6c] sm:$0xf] }
 0x168   : > { %3143 = vmatpush.bf16.msra.mxu0 %v6217_v45  ;;  %v8110_v44 = vor.u32 %v2814_v0, %v2811_v28  ;;  %v7593_v45 = vld [vmem:[#allocation3 + $0xbcc] sm:$0xf]  ;;  %v6369_v27 = vor.u32 %v7583_v23, %v6368_v29  ;;  %v6245_v28 = vor.u32 %v7549_v57, %v6242_v24  ;;  %v6224_v0 = vld [vmem:[#allocation3 + $0xa48] sm:$0xf]  ;;  %v7662_v23 = vld [vmem:[#allocation3 + $0xde4] sm:$0xf] }
 0x169   : > { %3156 = vmatpush.bf16.msra.mxu1 %v6345_v47  ;;  %v6417_v47 = vor.u32 %v7595_v30, %v6416_v37  ;;  %v6226_v37 = vld [vmem:[#allocation3 + $0xa58] sm:$0xf0]  ;;  %v6690_v57 = vld [vmem:[#allocation3 + $0xdf0] sm:$0xf0] }
 0x16a   : > { %3169 = vmatpush.bf16.msra.mxu2 %v6221_v49  ;;  %v6293_v49 = vor.u32 %v7561_v10, %v6290_v43  ;;  %v6354_v30 = vld [vmem:[#allocation3 + $0xb58] sm:$0xf0] }
 0x16b   : > { %3182 = vmatpush.bf16.msra.mxu3 %v6349_v54  ;;  %v6421_v54 = vor.u32 %v7593_v45, %v6418_v41 }
 0x16c   : > { %3144 = vmatpush.bf16.msra.mxu0 %v6201_v2  ;;  %v6401_v2 = vor.u32 %v7591_v56, %v6400_v52  ;;  %v7575_v56 = vld [vmem:[#allocation3 + $0xb34] sm:$0xf0] }
 0x16d   : > { %3157 = vmatpush.bf16.msra.mxu1 %v6329_v8  ;;  %v6405_v8 = vor.u32 %v7589_v62, %v6402_v63  ;;  %v7573_v62 = vld [vmem:[#allocation3 + $0xb2c] sm:$0xf]  ;;  %v6338_v63 = vld [vmem:[#allocation3 + $0xb38] sm:$0xf0]  ;;  %v6337_v6 = vor.u32 %v7575_v56, %v6336_v51 }
 0x16e   : > { %3170 = vmatpush.bf16.msra.mxu2 %v6205_v55  ;;  %v7587_v55 = vld [vmem:[#allocation3 + $0xb94] sm:$0xf0] }
 0x16f   : > { %3183 = vmatpush.bf16.msra.mxu3 %v6333_v20  ;;  %v6386_v20 = vld [vmem:[#allocation3 + $0xb98] sm:$0xf0]  ;;  %v6385_v15 = vor.u32 %v7587_v55, %v6384_v7  ;;  %v6320_v7 = vld [vmem:[#allocation3 + $0xb08] sm:$0xf]  ;;  %v7537_v55 = vld [vmem:[#allocation3 + $0xa0c] sm:$0xf] }
 0x170   : > { %3145 = vmatpush.bf16.msra.mxu0 %v6185_v22  ;;  %v2133_v13 = vpop.f32.mrf.mxu0  ;;  %v6389_v22 = vor.u32 %v7585_v46, %v6386_v20  ;;  %v6560_v20 = vld [vmem:[#allocation3 + $0xce0] sm:$0xf] }
 0x171   : > { %3158 = vmatpush.bf16.msra.mxu1 %v6313_v26  ;;  %v2146_v14 = vpop.f32.mrf.mxu1  ;;  %v7581_v26 = vld [vmem:[#allocation3 + $0xb6c] sm:$0xf] }
 0x172   : > { %3171 = vmatpush.bf16.msra.mxu2 %v6189_v35  ;;  %v2147_v4 = vadd.f32 %v2146_v14, %v2133_v13  ;;  %v6370_v35 = vld [vmem:[#allocation3 + $0xb78] sm:$0xf0]  ;;  %v7632_v14 = vld [vmem:[#allocation3 + $0xcec] sm:$0xf0] }
 0x173   : > { %3184 = vmatpush.bf16.msra.mxu3 %v6317_v31  ;;  %3146 = vmatmul.bf16.vlgmr.msra.gmra.mxu0 %v8108_v39  ;;  %v7547_v31 = vld [vmem:[#allocation3 + $0xa54] sm:$0xf0]  ;;  %v6322_v13 = vld [vmem:[#allocation3 + $0xb18] sm:$0xf0] }
 0x174   : > { %3190 = vmatpush.bf16.msrb.mxu0 %v6305_v32  ;;  %3159 = vmatmul.bf16.vlgmr.msra.gmra.mxu1 %v8110_v44  ;;  %v8117_v61 = vadd.f32 %v2147_v4, %v8089_v1  ;;  %v6352_v32 = vld [vmem:[#allocation3 + $0xb48] sm:$0xf]  ;;  %v7577_v1 = vld [vmem:[#allocation3 + $0xb4c] sm:$0xf]  ;;  %v6225_v45 = vor.u32 %v7547_v31, %v6224_v0  ;;  %v6325_v24 = vor.u32 %v7569_v12, %v6322_v13  ;;  %v6672_v0 = vld [vmem:[#allocation3 + $0xdc0] sm:$0xf] }
 0x175   : > { %3203 = vmatpush.bf16.msrb.mxu1 %v6433_v33  ;;  %3172 = vmatmul.bf16.vlgmr.msra.gmra.mxu2 %v8108_v39  ;;  %v6373_v33 = vor.u32 %v7581_v26, %v6370_v35  ;;  %v6561_v26 = vor.u32 %v7632_v14, %v6560_v20  ;;  %v6693_v31 = vor.u32 %v7662_v23, %v6690_v57  ;;  %v7616_v12 = vld [vmem:[#allocation3 + $0xc6c] sm:$0xf0]  ;;  %v6624_v13 = vld [vmem:[#allocation3 + $0xd60] sm:$0xf]  ;;  %v7614_v14 = vld [vmem:[#allocation3 + $0xc64] sm:$0xf] }
 0x176   : > { %3216 = vmatpush.bf16.msrb.mxu2 %v6309_v5  ;;  %3185 = vmatmul.bf16.vlgmr.msra.gmra.mxu3 %v8110_v44  ;;  %v7648_v20 = vld [vmem:[#allocation3 + $0xd6c] sm:$0xf0]  ;;  %v6608_v57 = vld [vmem:[#allocation3 + $0xd40] sm:$0xf] }
 0x177   : > { %3229 = vmatpush.bf16.msrb.mxu3 %v6437_v38  ;;  %v7612_v23 = vld [vmem:[#allocation3 + $0xc4c] sm:$0xf0] }
 0x178   : > { %3191 = vmatpush.bf16.msrb.mxu0 %v6289_v42  ;;  %v2159_v5 = vpop.f32.mrf.mxu2  ;;  %v2135_v10 = vpop.f32.mrf.mxu0  ;;  %v6353_v42 = vor.u32 %v7579_v16, %v6352_v32  ;;  %v7660_v32 = vld [vmem:[#allocation3 + $0xdcc] sm:$0xf0]  ;;  %v7658_v16 = vld [vmem:[#allocation3 + $0xdc4] sm:$0xf] }
 0x179   : > { %3204 = vmatpush.bf16.msrb.mxu1 %v6417_v47  ;;  %v2172_v38 = vpop.f32.mrf.mxu3  ;;  %v2148_v41 = vpop.f32.mrf.mxu1  ;;  %v6229_v47 = vor.u32 %v7545_v36, %v6226_v37  ;;  %v6674_v36 = vld [vmem:[#allocation3 + $0xdd0] sm:$0xf0]  ;;  %v7624_v10 = vld [vmem:[#allocation3 + $0xcac] sm:$0xf0] }
 0x17a   : > { %3217 = vmatpush.bf16.msrb.mxu2 %v6293_v49  ;;  %v2173_v43 = vadd.f32 %v2172_v38, %v2159_v5  ;;  %v6208_v49 = vld [vmem:[#allocation3 + $0xa28] sm:$0xf]  ;;  %v6546_v5 = vld [vmem:[#allocation3 + $0xcd0] sm:$0xf0]  ;;  %v6673_v38 = vor.u32 %v7660_v32, %v6672_v0  ;;  %v7656_v41 = vld [vmem:[#allocation3 + $0xdac] sm:$0xf0] }
 0x17b   : > { %3230 = vmatpush.bf16.msrb.mxu3 %v6421_v54  ;;  %v6357_v54 = vor.u32 %v7577_v1, %v6354_v30  ;;  %v6528_v30 = vld [vmem:[#allocation3 + $0xca0] sm:$0xf]  ;;  %v6610_v0 = vld [vmem:[#allocation3 + $0xd50] sm:$0xf0] }
 0x17c   : > { %3192 = vmatpush.bf16.msrb.mxu0 %v6273_v34  ;;  %v8120_v52 = vadd.f32 %v2173_v43, %v8092_v60  ;;  %v6209_v34 = vor.u32 %v7543_v50, %v6208_v49  ;;  %v6341_v60 = vor.u32 %v7573_v62, %v6338_v63  ;;  %v6656_v43 = vld [vmem:[#allocation3 + $0xda0] sm:$0xf]  ;;  %v7654_v49 = vld [vmem:[#allocation3 + $0xda4] sm:$0xf]  ;;  %v6658_v50 = vld [vmem:[#allocation3 + $0xdb0] sm:$0xf0]  ;;  %v6529_v51 = vor.u32 %v7624_v10, %v6528_v30 }
 0x17d   : > { %3205 = vmatpush.bf16.msrb.mxu1 %v6401_v2  ;;  %v6192_v2 = vld [vmem:[#allocation3 + $0xa08] sm:$0xf]  ;;  %v6640_v62 = vld [vmem:[#allocation3 + $0xd80] sm:$0xf]  ;;  %v6661_v63 = vor.u32 %v7654_v49, %v6658_v50  ;;  %v7640_v30 = vld [vmem:[#allocation3 + $0xd2c] sm:$0xf0] }
 0x17e   : > { %3218 = vmatpush.bf16.msrb.mxu2 %v6277_v3  ;;  %v7539_v3 = vld [vmem:[#allocation3 + $0xa14] sm:$0xf0]  ;;  %v6448_v49 = vld [vmem:[#allocation3 + $0xc00] sm:$0xf]  ;;  %v7604_v50 = vld [vmem:[#allocation3 + $0xc0c] sm:$0xf0] }
 0x17f   : > { %3231 = vmatpush.bf16.msrb.mxu3 %v6405_v8  ;;  %v7571_v8 = vld [vmem:[#allocation3 + $0xb14] sm:$0xf0] }
 0x180   : > { %3193 = vmatpush.bf16.msrb.mxu0 %v6257_v48  ;;  %v2161_v46 = vpop.f32.mrf.mxu2  ;;  %v6688_v48 = vld [vmem:[#allocation3 + $0xde0] sm:$0xf]  ;;  %v6321_v29 = vor.u32 %v7571_v8, %v6320_v7 }
 0x181   : > { %3206 = vmatpush.bf16.msrb.mxu1 %v6385_v15  ;;  %v2174_v4 = vpop.f32.mrf.mxu3  ;;  %v6193_v15 = vor.u32 %v7539_v3, %v6192_v2  ;;  %v7618_v2 = vld [vmem:[#allocation3 + $0xc84] sm:$0xf]  ;;  %v6514_v3 = vld [vmem:[#allocation3 + $0xc90] sm:$0xf0] }
 0x182   : > { %3219 = vmatpush.bf16.msrb.mxu2 %v6261_v17  ;;  %v7664_v17 = vld [vmem:[#allocation3 + $0xdec] sm:$0xf0] }
 0x183   : > { %3232 = vmatpush.bf16.msrb.mxu3 %v6389_v22  ;;  %v6197_v22 = vor.u32 %v7537_v55, %v6194_v11  ;;  %v6689_v35 = vor.u32 %v7664_v17, %v6688_v48  ;;  %v6496_v11 = vld [vmem:[#allocation3 + $0xc60] sm:$0xf]  ;;  %v6498_v48 = vld [vmem:[#allocation3 + $0xc70] sm:$0xf0] }
 0x184   : > { %3194 = vmatpush.bf16.msrb.mxu0 %v6241_v19  ;;  %v6565_v19 = vor.u32 %v7630_v18, %v6562_v21  ;;  %v6626_v17 = vld [vmem:[#allocation3 + $0xd70] sm:$0xf0]  ;;  %v6497_v18 = vor.u32 %v7616_v12, %v6496_v11  ;;  %v6625_v21 = vor.u32 %v7648_v20, %v6624_v13  ;;  %v6449_v11 = vor.u32 %v7604_v50, %v6448_v49  ;;  %v7665_v12 = vld [vmem:[#allocation3 + $0xdf4] sm:$0xf0]  ;;  %v7631_v13 = vld [vmem:[#allocation3 + $0xcec] sm:$0xf] }
 0x185   : > { %3207 = vmatpush.bf16.msrb.mxu1 %v6369_v27  ;;  %v6544_v27 = vld [vmem:[#allocation3 + $0xcc0] sm:$0xf] }
 0x186   : > { %3220 = vmatpush.bf16.msrb.mxu2 %v6245_v28  ;;  %v7628_v28 = vld [vmem:[#allocation3 + $0xccc] sm:$0xf0] }
 0x187   : > { %3233 = vmatpush.bf16.msrb.mxu3 %v6373_v33  ;;  %v7626_v33 = vld [vmem:[#allocation3 + $0xcc4] sm:$0xf]  ;;  %v6545_v37 = vor.u32 %v7628_v28, %v6544_v27  ;;  %v6482_v27 = vld [vmem:[#allocation3 + $0xc50] sm:$0xf0] }
 0x188   : > { %3195 = vmatpush.bf16.msrb.mxu0 %v6225_v45  ;;  %v6549_v1 = vor.u32 %v7626_v33, %v6546_v5  ;;  %v6677_v45 = vor.u32 %v7658_v16, %v6674_v36  ;;  %v6464_v5 = vld [vmem:[#allocation3 + $0xc20] sm:$0xf] }
 0x189   : > { %3208 = vmatpush.bf16.msrb.mxu1 %v6353_v42  ;;  %v7622_v42 = vld [vmem:[#allocation3 + $0xca4] sm:$0xf] }
 0x18a   : > { %3221 = vmatpush.bf16.msrb.mxu2 %v6229_v47  ;;  %v6530_v47 = vld [vmem:[#allocation3 + $0xcb0] sm:$0xf0] }
 0x18b   : > { %3234 = vmatpush.bf16.msrb.mxu3 %v6357_v54  ;;  %v6657_v54 = vor.u32 %v7656_v41, %v6656_v43  ;;  %v6533_v56 = vor.u32 %v7622_v42, %v6530_v47  ;;  %v6466_v41 = vld [vmem:[#allocation3 + $0xc30] sm:$0xf0]  ;;  %v7638_v42 = vld [vmem:[#allocation3 + $0xd24] sm:$0xf] }
 0x18c   : > { %3196 = vmatpush.bf16.msrb.mxu0 %v6209_v34  ;;  %v7652_v34 = vld [vmem:[#allocation3 + $0xd8c] sm:$0xf0]  ;;  %v6594_v47 = vld [vmem:[#allocation3 + $0xd30] sm:$0xf0] }
 0x18d   : > { %3209 = vmatpush.bf16.msrb.mxu1 %v6337_v6  ;;  %v6641_v55 = vor.u32 %v7652_v34, %v6640_v62  ;;  %v7634_v34 = vld [vmem:[#allocation3 + $0xd04] sm:$0xf] }
 0x18e   : > { %3222 = vmatpush.bf16.msrb.mxu2 %v6213_v40  ;;  %v6642_v40 = vld [vmem:[#allocation3 + $0xd90] sm:$0xf0] }
 0x18f   : > { %3235 = vmatpush.bf16.msrb.mxu3 %v6341_v60  ;;  %v6517_v60 = vor.u32 %v7618_v2, %v6514_v3  ;;  %v7601_v2 = vld [vmem:[#allocation2 + $0x4] sm:$0x10]  ;;  %v6597_v3 = vor.u32 %v7638_v42, %v6594_v47  ;;  %v6666_v42 = vld [vmem:[#allocation3 + $0xdb8] sm:$0xf0] }
 0x190   : > { %3197 = vmatpush.bf16.msrb.mxu0 %v6193_v15  ;;  %v2185_v6 = vpop.f32.mrf.mxu0  ;;  %v7646_v15 = vld [vmem:[#allocation3 + $0xd64] sm:$0xf] }
 0x191   : > { %3210 = vmatpush.bf16.msrb.mxu1 %v6321_v29  ;;  %v2198_v7 = vpop.f32.mrf.mxu1  ;;  %v6501_v29 = vor.u32 %v7614_v14, %v6498_v48 }
 0x192   : > { %3223 = vmatpush.bf16.msrb.mxu2 %v6197_v22  ;;  %v2199_v8 = vadd.f32 %v2198_v7, %v2185_v6  ;;  %v6480_v22 = vld [vmem:[#allocation3 + $0xc40] sm:$0xf]  ;;  %v6578_v6 = vld [vmem:[#allocation3 + $0xd10] sm:$0xf0] }
 0x193   : > { %3236 = vmatpush.bf16.msrb.mxu3 %v6325_v24  ;;  %3198 = vmatmul.bf16.vlgmr.msrb.gmra.mxu0 %v8108_v39  ;;  %v6629_v24 = vor.u32 %v7646_v15, %v6626_v17  ;;  %v6481_v33 = vor.u32 %v7612_v23, %v6480_v22  ;;  %v7663_v15 = vld [vmem:[#allocation3 + $0xdec] sm:$0xf]  ;;  %v6698_v17 = vld [vmem:[#allocation3 + $0xdf8] sm:$0xf0]  ;;  %v6552_v22 = vld [vmem:[#allocation3 + $0xcc8] sm:$0xf] }
 0x194   : > { %3645 = vmatpush.bf16.msra.mxu0 %v6561_v26  ;;  %3211 = vmatmul.bf16.vlgmr.msrb.gmra.mxu1 %v8110_v44  ;;  %v8127_v4 = vadd.f32 %v2199_v8, %v8099_v25  ;;  %v7642_v25 = vld [vmem:[#allocation3 + $0xd44] sm:$0xf]  ;;  %v7633_v8 = vld [vmem:[#allocation3 + $0xcf4] sm:$0xf0] }
 0x195   : > { %3658 = vmatpush.bf16.msra.mxu1 %v6689_v35  ;;  %3224 = vmatmul.bf16.vlgmr.msrb.gmra.mxu2 %v8108_v39  ;;  %v7650_v39 = vld [vmem:[#allocation3 + $0xd84] sm:$0xf]  ;;  %v7644_v35 = vld [vmem:[#allocation3 + $0xd4c] sm:$0xf0]  ;;  %v6613_v43 = vor.u32 %v7642_v25, %v6610_v0  ;;  %v6554_v25 = vld [vmem:[#allocation3 + $0xcd8] sm:$0xf0] }
 0x196   : > { %3671 = vmatpush.bf16.msra.mxu2 %v6565_v19  ;;  %3237 = vmatmul.bf16.vlgmr.msrb.gmra.mxu3 %v8110_v44  ;;  %v6513_v44 = vor.u32 %v7620_v59, %v6512_v58  ;;  %v6645_v46 = vor.u32 %v7650_v39, %v6642_v40  ;;  %v7610_v19 = vld [vmem:[#allocation3 + $0xc44] sm:$0xf]  ;;  %v6609_v36 = vor.u32 %v7644_v35, %v6608_v57  ;;  %v6450_v59 = vld [vmem:[#allocation3 + $0xc10] sm:$0xf0]  ;;  %v6442_v40 = vld [vmem:[#allocation2 + $0x8] sm:$0x10] }
 0x197   : > { %3684 = vmatpush.bf16.msra.mxu3 %v6693_v31  ;;  %v7602_v58 = vld [vmem:[#allocation3 + $0xc04] sm:$0xf]  ;;  %v7600_v39 = vld [vmem:[#allocation2 + $0x4] sm:$0x8]  ;;  %v7661_v35 = vld [vmem:[#allocation3 + $0xdd4] sm:$0xf0] }
 0x198   : > { %3646 = vmatpush.bf16.msra.mxu0 %v6545_v37  ;;  %v2211_v26 = vpop.f32.mrf.mxu2  ;;  %v2187_v31 = vpop.f32.mrf.mxu0  ;;  %v6485_v37 = vor.u32 %v7610_v19, %v6482_v27  ;;  %v6453_v48 = vor.u32 %v7602_v58, %v6450_v59  ;;  %v6701_v19 = vor.u32 %v7663_v15, %v6698_v17  ;;  %v7653_v59 = vld [vmem:[#allocation3 + $0xd94] sm:$0xf0] }
 0x199   : > { %3659 = vmatpush.bf16.msra.mxu1 %v6673_v38  ;;  %v2224_v28 = vpop.f32.mrf.mxu3  ;;  %v2200_v16 = vpop.f32.mrf.mxu1  ;;  %v7608_v38 = vld [vmem:[#allocation3 + $0xc2c] sm:$0xf0]  ;;  %v7659_v31 = vld [vmem:[#allocation3 + $0xdcc] sm:$0xf] }
 0x19a   : > { %3672 = vmatpush.bf16.msra.mxu2 %v6549_v1  ;;  %v2225_v32 = vadd.f32 %v2224_v28, %v2211_v26  ;;  %v6592_v1 = vld [vmem:[#allocation3 + $0xd20] sm:$0xf]  ;;  %v6680_v26 = vld [vmem:[#allocation3 + $0xdc8] sm:$0xf]  ;;  %v7627_v28 = vld [vmem:[#allocation3 + $0xccc] sm:$0xf] }
 0x19b   : > { %3685 = vmatpush.bf16.msra.mxu3 %v6677_v45  ;;  %v7606_v45 = vld [vmem:[#allocation3 + $0xc24] sm:$0xf]  ;;  %v6593_v62 = vor.u32 %v7640_v30, %v6592_v1  ;;  %v6557_v16 = vor.u32 %v7627_v28, %v6554_v25  ;;  %v7657_v30 = vld [vmem:[#allocation3 + $0xdb4] sm:$0xf0]  ;;  %v6618_v25 = vld [vmem:[#allocation3 + $0xd58] sm:$0xf0] }
 0x19c   : > { %3647 = vmatpush.bf16.msra.mxu0 %v6529_v51  ;;  %v8130_v10 = vadd.f32 %v2225_v32, %v8102_v53  ;;  %v6465_v51 = vor.u32 %v7608_v38, %v6464_v5  ;;  %v6440_v53 = vld [vmem:[#allocation2] sm:$0x8]  ;;  %v6682_v32 = vld [vmem:[#allocation3 + $0xdd8] sm:$0xf0]  ;;  %v6681_v5 = vor.u32 %v7661_v35, %v6680_v26  ;;  %v6664_v38 = vld [vmem:[#allocation3 + $0xda8] sm:$0xf] }
 0x19d   : > { %3660 = vmatpush.bf16.msra.mxu1 %v6657_v54  ;;  %v6576_v54 = vld [vmem:[#allocation3 + $0xd00] sm:$0xf]  ;;  %v8132_v20 = vor.u32 %v7601_v2, %v6440_v53  ;;  %v6685_v1 = vor.u32 %v7659_v31, %v6682_v32  ;;  %v6665_v49 = vor.u32 %v7657_v30, %v6664_v38  ;;  %v7651_v53 = vld [vmem:[#allocation3 + $0xd8c] sm:$0xf]  ;;  %v6650_v2 = vld [vmem:[#allocation3 + $0xd98] sm:$0xf0] }
 0x19e   : > { %3673 = vmatpush.bf16.msra.mxu2 %v6533_v56  ;;  %v7636_v56 = vld [vmem:[#allocation3 + $0xd0c] sm:$0xf0]  ;;  %v7645_v26 = vld [vmem:[#allocation3 + $0xd54] sm:$0xf0]  ;;  %v7611_v35 = vld [vmem:[#allocation3 + $0xc4c] sm:$0xf] }
 0x19f   : > { %3686 = vmatpush.bf16.msra.mxu3 %v6661_v63  ;;  %v6469_v63 = vor.u32 %v7606_v45, %v6466_v41  ;;  %v6577_v14 = vor.u32 %v7636_v56, %v6576_v54  ;;  %v8137_v27 = vrot.slane %v8132_v20, 3  ;;  %v6538_v45 = vld [vmem:[#allocation3 + $0xcb8] sm:$0xf0]  ;;  %v7655_v41 = vld [vmem:[#allocation3 + $0xdac] sm:$0xf] }
 0x1a0   : > { %3648 = vmatpush.bf16.msra.mxu0 %v6513_v44  ;;  %v2213_v7 = vpop.f32.mrf.mxu2  ;;  %v6568_v44 = vld [vmem:[#allocation3 + $0xce8] sm:$0xf]  ;;  %v7621_v54 = vld [vmem:[#allocation3 + $0xc94] sm:$0xf0]  ;;  %v6669_v58 = vor.u32 %v7655_v41, %v6666_v42  ;;  %v7607_v41 = vld [vmem:[#allocation3 + $0xc2c] sm:$0xf] }
 0x1a1   : > { %3661 = vmatpush.bf16.msra.mxu1 %v6641_v55  ;;  %v6696_v55 = vld [vmem:[#allocation3 + $0xde8] sm:$0xf]  ;;  %v7609_v38 = vld [vmem:[#allocation3 + $0xc34] sm:$0xf0]  ;;  %v6474_v42 = vld [vmem:[#allocation3 + $0xc38] sm:$0xf0] }
 0x1a2   : > { %3674 = vmatpush.bf16.msra.mxu2 %v6517_v60  ;;  %v2226_v60 = vpop.f32.mrf.mxu3  ;;  %v6697_v23 = vor.u32 %v7665_v12, %v6696_v55  ;;  %v6648_v56 = vld [vmem:[#allocation3 + $0xd88] sm:$0xf]  ;;  %v7615_v12 = vld [vmem:[#allocation3 + $0xc6c] sm:$0xf] }
 0x1a3   : > { %3687 = vmatpush.bf16.msra.mxu3 %v6645_v46  ;;  %v6570_v46 = vld [vmem:[#allocation3 + $0xcf8] sm:$0xf0]  ;;  %v6632_v55 = vld [vmem:[#allocation3 + $0xd68] sm:$0xf]  ;;  %v6653_v60 = vor.u32 %v7651_v53, %v6650_v2  ;;  %v7635_v53 = vld [vmem:[#allocation3 + $0xd0c] sm:$0xf] }
 0x1a4   : > { %3649 = vmatpush.bf16.msra.mxu0 %v6497_v18  ;;  %v8134_v18 = vor.u32 %v7600_v39, %v6442_v40  ;;  %v6573_v57 = vor.u32 %v7631_v13, %v6570_v46  ;;  %v6649_v40 = vor.u32 %v7653_v59, %v6648_v56  ;;  %v6506_v13 = vld [vmem:[#allocation3 + $0xc78] sm:$0xf0]  ;;  %v6584_v59 = vld [vmem:[#allocation3 + $0xd08] sm:$0xf] }
 0x1a5   : > { %3662 = vmatpush.bf16.msra.mxu1 %v6625_v21  ;;  %v6581_v21 = vor.u32 %v7634_v34, %v6578_v6  ;;  %v6586_v2 = vld [vmem:[#allocation3 + $0xd18] sm:$0xf0] }
 0x1a6   : > { %3675 = vmatpush.bf16.msra.mxu2 %v6501_v29  ;;  %v6569_v29 = vor.u32 %v7633_v8, %v6568_v44  ;;  %v8140_v0 = vrot.slane %v8134_v18, 3  ;;  %v6504_v44 = vld [vmem:[#allocation3 + $0xc68] sm:$0xf]  ;;  %v7617_v8 = vld [vmem:[#allocation3 + $0xc74] sm:$0xf0] }
 0x1a7   : > { %3688 = vmatpush.bf16.msra.mxu3 %v6629_v24  ;;  %v7629_v24 = vld [vmem:[#allocation3 + $0xcd4] sm:$0xf0]  ;;  %v6505_v15 = vor.u32 %v7617_v8, %v6504_v44  ;;  %v7728_v8 = vld [vmem:[#allocation3 + $0xfec] sm:$0xf0] }
 0x1a8   : > { %3650 = vmatpush.bf16.msra.mxu0 %v6481_v33  ;;  %v6553_v33 = vor.u32 %v7629_v24, %v6552_v22  ;;  %v7613_v22 = vld [vmem:[#allocation3 + $0xc54] sm:$0xf0] }
 0x1a9   : > { %3663 = vmatpush.bf16.msra.mxu1 %v6609_v36  ;;  %v6536_v36 = vld [vmem:[#allocation3 + $0xca8] sm:$0xf] }
 0x1aa   : > { %3676 = vmatpush.bf16.msra.mxu2 %v6485_v37  ;;  %v7625_v37 = vld [vmem:[#allocation3 + $0xcb4] sm:$0xf0] }
 0x1ab   : > { %3689 = vmatpush.bf16.msra.mxu3 %v6613_v43  ;;  %v7623_v43 = vld [vmem:[#allocation3 + $0xcac] sm:$0xf]  ;;  %v6537_v47 = vor.u32 %v7625_v37, %v6536_v36  ;;  %v6472_v37 = vld [vmem:[#allocation3 + $0xc28] sm:$0xf] }
 0x1ac   : > { %3651 = vmatpush.bf16.msra.mxu0 %v6465_v51  ;;  %v6541_v50 = vor.u32 %v7623_v43, %v6538_v45  ;;  %v6520_v51 = vld [vmem:[#allocation3 + $0xc88] sm:$0xf]  ;;  %v7641_v45 = vld [vmem:[#allocation3 + $0xd34] sm:$0xf0] }
 0x1ad   : > { %3664 = vmatpush.bf16.msra.mxu1 %v6593_v62  ;;  %v7619_v62 = vld [vmem:[#allocation3 + $0xc8c] sm:$0xf]  ;;  %v6521_v6 = vor.u32 %v7621_v54, %v6520_v51  ;;  %v6456_v51 = vld [vmem:[#allocation3 + $0xc08] sm:$0xf]  ;;  %v7605_v54 = vld [vmem:[#allocation3 + $0xc14] sm:$0xf0] }
 0x1ae   : > { %3677 = vmatpush.bf16.msra.mxu2 %v6469_v63  ;;  %v6522_v63 = vld [vmem:[#allocation3 + $0xc98] sm:$0xf0]  ;;  %v6457_v44 = vor.u32 %v7605_v54, %v6456_v51  ;;  %v7716_v54 = vld [vmem:[#allocation3 + $0xf8c] sm:$0xf0] }
 0x1af   : > { %3690 = vmatpush.bf16.msra.mxu3 %v6597_v3  ;;  %v6525_v7 = vor.u32 %v7619_v62, %v6522_v63  ;;  %v7637_v62 = vld [vmem:[#allocation3 + $0xd14] sm:$0xf0]  ;;  %v7603_v63 = vld [vmem:[#allocation3 + $0xc0c] sm:$0xf] }
 0x1b0   : > { %3652 = vmatpush.bf16.msra.mxu0 %v6449_v11  ;;  %v2636_v34 = vpop.f32.mrf.mxu0  ;;  %v7649_v11 = vld [vmem:[#allocation3 + $0xd74] sm:$0xf0] }
 0x1b1   : > { %3665 = vmatpush.bf16.msra.mxu1 %v6577_v14  ;;  %v2649_v3 = vpop.f32.mrf.mxu1  ;;  %v7647_v14 = vld [vmem:[#allocation3 + $0xd6c] sm:$0xf]  ;;  %v6633_v17 = vor.u32 %v7649_v11, %v6632_v55  ;;  %v7694_v55 = vld [vmem:[#allocation3 + $0xee4] sm:$0xf]  ;;  %v6585_v11 = vor.u32 %v7637_v62, %v6584_v59  ;;  %v6898_v62 = vld [vmem:[#allocation3 + $0xf90] sm:$0xf0] }
 0x1b2   : > { %3678 = vmatpush.bf16.msra.mxu2 %v6453_v48  ;;  %v2650_v39 = vadd.f32 %v2649_v3, %v2636_v34  ;;  %v6634_v48 = vld [vmem:[#allocation3 + $0xd78] sm:$0xf0] }
 0x1b3   : > { %3691 = vmatpush.bf16.msra.mxu3 %v6581_v21  ;;  %3653 = vmatmul.bf16.vlgmr.msra.gmra.mxu0 %v8137_v27  ;;  %v6509_v21 = vor.u32 %v7615_v12, %v6506_v13  ;;  %v6458_v34 = vld [vmem:[#allocation3 + $0xc18] sm:$0xf0]  ;;  %v7726_v13 = vld [vmem:[#allocation3 + $0xfe4] sm:$0xf] }
 0x1b4   : > { %3697 = vmatpush.bf16.msrb.mxu0 %v6569_v29  ;;  %3666 = vmatmul.bf16.vlgmr.msra.gmra.mxu1 %v8140_v0  ;;  %v8147_v46 = vadd.f32 %v2650_v39, %v8117_v61  ;;  %v6488_v29 = vld [vmem:[#allocation3 + $0xc48] sm:$0xf]  ;;  %v7643_v61 = vld [vmem:[#allocation3 + $0xd4c] sm:$0xf]  ;;  %v7696_v39 = vld [vmem:[#allocation3 + $0xeec] sm:$0xf0]  ;;  %v6461_v12 = vor.u32 %v7603_v63, %v6458_v34 }
 0x1b5   : > { %3710 = vmatpush.bf16.msrb.mxu1 %v6697_v23  ;;  %3679 = vmatmul.bf16.vlgmr.msra.gmra.mxu2 %v8137_v27  ;;  %v6616_v23 = vld [vmem:[#allocation3 + $0xd48] sm:$0xf]  ;;  %v6621_v43 = vor.u32 %v7643_v61, %v6618_v25 }
 0x1b6   : > { %3723 = vmatpush.bf16.msrb.mxu2 %v6573_v57  ;;  %3692 = vmatmul.bf16.vlgmr.msra.gmra.mxu3 %v8140_v0  ;;  %v6637_v57 = vor.u32 %v7647_v14, %v6634_v48  ;;  %v6946_v14 = vld [vmem:[#allocation3 + $0xff0] sm:$0xf0]  ;;  %v6589_v48 = vor.u32 %v7635_v53, %v6586_v2  ;;  %v6752_v2 = vld [vmem:[#allocation3 + $0xe60] sm:$0xf] }
 0x1b7   : > { %3736 = vmatpush.bf16.msrb.mxu3 %v6701_v19  ;;  %v6490_v19 = vld [vmem:[#allocation3 + $0xc58] sm:$0xf0] }
 0x1b8   : > { %3698 = vmatpush.bf16.msrb.mxu0 %v6553_v33  ;;  %v2662_v24 = vpop.f32.mrf.mxu2  ;;  %v2638_v31 = vpop.f32.mrf.mxu0  ;;  %v6489_v33 = vor.u32 %v7613_v22, %v6488_v29  ;;  %v6493_v36 = vor.u32 %v7611_v35, %v6490_v19  ;;  %v6800_v29 = vld [vmem:[#allocation3 + $0xec0] sm:$0xf]  ;;  %v7692_v22 = vld [vmem:[#allocation3 + $0xecc] sm:$0xf0]  ;;  %v6802_v35 = vld [vmem:[#allocation3 + $0xed0] sm:$0xf0] }
 0x1b9   : > { %3711 = vmatpush.bf16.msrb.mxu1 %v6681_v5  ;;  %v2675_v28 = vpop.f32.mrf.mxu3  ;;  %v2651_v5 = vpop.f32.mrf.mxu1  ;;  %v7722_v19 = vld [vmem:[#allocation3 + $0xfc4] sm:$0xf]  ;;  %v6801_v61 = vor.u32 %v7692_v22, %v6800_v29  ;;  %v7708_v29 = vld [vmem:[#allocation3 + $0xf4c] sm:$0xf0] }
 0x1ba   : > { %3724 = vmatpush.bf16.msrb.mxu2 %v6557_v16  ;;  %v2676_v32 = vadd.f32 %v2675_v28, %v2662_v24  ;;  %v6617_v16 = vor.u32 %v7645_v26, %v6616_v23  ;;  %v6928_v23 = vld [vmem:[#allocation3 + $0xfc0] sm:$0xf]  ;;  %v7724_v24 = vld [vmem:[#allocation3 + $0xfcc] sm:$0xf0]  ;;  %v7690_v26 = vld [vmem:[#allocation3 + $0xec4] sm:$0xf] }
 0x1bb   : > { %3737 = vmatpush.bf16.msrb.mxu3 %v6685_v1  ;;  %v6600_v1 = vld [vmem:[#allocation3 + $0xd28] sm:$0xf]  ;;  %v6930_v28 = vld [vmem:[#allocation3 + $0xfd0] sm:$0xf0]  ;;  %v6929_v25 = vor.u32 %v7724_v24, %v6928_v23  ;;  %v6805_v31 = vor.u32 %v7690_v26, %v6802_v35  ;;  %v6912_v5 = vld [vmem:[#allocation3 + $0xfa0] sm:$0xf] }
 0x1bc   : > { %3699 = vmatpush.bf16.msrb.mxu0 %v6537_v47  ;;  %v8150_v30 = vadd.f32 %v2676_v32, %v8120_v52  ;;  %v7639_v47 = vld [vmem:[#allocation3 + $0xd2c] sm:$0xf]  ;;  %v6601_v56 = vor.u32 %v7641_v45, %v6600_v1  ;;  %v6784_v32 = vld [vmem:[#allocation3 + $0xea0] sm:$0xf]  ;;  %v7718_v1 = vld [vmem:[#allocation3 + $0xfa4] sm:$0xf] }
 0x1bd   : > { %3712 = vmatpush.bf16.msrb.mxu1 %v6665_v49  ;;  %v6602_v49 = vld [vmem:[#allocation3 + $0xd38] sm:$0xf0]  ;;  %v7674_v22 = vld [vmem:[#allocation3 + $0xe44] sm:$0xf]  ;;  %v6738_v23 = vld [vmem:[#allocation3 + $0xe50] sm:$0xf0] }
 0x1be   : > { %3725 = vmatpush.bf16.msrb.mxu2 %v6541_v50  ;;  %v6473_v50 = vor.u32 %v7609_v38, %v6472_v37  ;;  %v6605_v52 = vor.u32 %v7639_v47, %v6602_v49  ;;  %v7686_v37 = vld [vmem:[#allocation3 + $0xea4] sm:$0xf]  ;;  %v6786_v38 = vld [vmem:[#allocation3 + $0xeb0] sm:$0xf0]  ;;  %v6768_v47 = vld [vmem:[#allocation3 + $0xe80] sm:$0xf] }
 0x1bf   : > { %3738 = vmatpush.bf16.msrb.mxu3 %v6669_v58  ;;  %v6477_v58 = vor.u32 %v7607_v41, %v6474_v42  ;;  %v6789_v42 = vor.u32 %v7686_v37, %v6786_v38  ;;  %v7684_v49 = vld [vmem:[#allocation3 + $0xe8c] sm:$0xf0]  ;;  %v6866_v24 = vld [vmem:[#allocation3 + $0xf50] sm:$0xf0]  ;;  %v7670_v37 = vld [vmem:[#allocation3 + $0xe24] sm:$0xf] }
 0x1c0   : > { %3700 = vmatpush.bf16.msrb.mxu0 %v6521_v6  ;;  %v2664_v3 = vpop.f32.mrf.mxu2  ;;  %v6816_v6 = vld [vmem:[#allocation3 + $0xee0] sm:$0xf]  ;;  %v6722_v38 = vld [vmem:[#allocation3 + $0xe30] sm:$0xf0] }
 0x1c1   : > { %3713 = vmatpush.bf16.msrb.mxu1 %v6649_v40  ;;  %v6944_v40 = vld [vmem:[#allocation3 + $0xfe0] sm:$0xf]  ;;  %v7680_v3 = vld [vmem:[#allocation3 + $0xe6c] sm:$0xf0] }
 0x1c2   : > { %3726 = vmatpush.bf16.msrb.mxu2 %v6525_v7  ;;  %v2677_v7 = vpop.f32.mrf.mxu3 }
 0x1c3   : > { %3739 = vmatpush.bf16.msrb.mxu3 %v6653_v60  ;;  %v6818_v60 = vld [vmem:[#allocation3 + $0xef0] sm:$0xf0]  ;;  %v7678_v7 = vld [vmem:[#allocation3 + $0xe64] sm:$0xf] }
 0x1c4   : > { %3701 = vmatpush.bf16.msrb.mxu0 %v6505_v15  ;;  %v6817_v15 = vor.u32 %v7696_v39, %v6816_v6  ;;  %v6880_v6 = vld [vmem:[#allocation3 + $0xf60] sm:$0xf] }
 0x1c5   : > { %3714 = vmatpush.bf16.msrb.mxu1 %v6633_v17  ;;  %v6945_v17 = vor.u32 %v7728_v8, %v6944_v40  ;;  %v7712_v40 = vld [vmem:[#allocation3 + $0xf6c] sm:$0xf0] }
 0x1c6   : > { %3727 = vmatpush.bf16.msrb.mxu2 %v6509_v21  ;;  %v6821_v21 = vor.u32 %v7694_v55, %v6818_v60  ;;  %v7710_v55 = vld [vmem:[#allocation3 + $0xf64] sm:$0xf]  ;;  %v6882_v60 = vld [vmem:[#allocation3 + $0xf70] sm:$0xf0] }
 0x1c7   : > { %3740 = vmatpush.bf16.msrb.mxu3 %v6637_v57  ;;  %v6949_v57 = vor.u32 %v7726_v13, %v6946_v14  ;;  %v6736_v14 = vld [vmem:[#allocation3 + $0xe40] sm:$0xf] }
 0x1c8   : > { %3702 = vmatpush.bf16.msrb.mxu0 %v6489_v33  ;;  %v7688_v33 = vld [vmem:[#allocation3 + $0xeac] sm:$0xf0] }
 0x1c9   : > { %3715 = vmatpush.bf16.msrb.mxu1 %v6617_v16  ;;  %v6933_v16 = vor.u32 %v7722_v19, %v6930_v28  ;;  %v6785_v45 = vor.u32 %v7688_v33, %v6784_v32  ;;  %v6720_v28 = vld [vmem:[#allocation3 + $0xe20] sm:$0xf]  ;;  %v7672_v32 = vld [vmem:[#allocation3 + $0xe2c] sm:$0xf0] }
 0x1ca   : > { %3728 = vmatpush.bf16.msrb.mxu2 %v6493_v36  ;;  %v7720_v36 = vld [vmem:[#allocation3 + $0xfac] sm:$0xf0]  ;;  %v6848_v33 = vld [vmem:[#allocation3 + $0xf20] sm:$0xf] }
 0x1cb   : > { %3741 = vmatpush.bf16.msrb.mxu3 %v6621_v43  ;;  %v6914_v43 = vld [vmem:[#allocation3 + $0xfb0] sm:$0xf0]  ;;  %v6913_v41 = vor.u32 %v7720_v36, %v6912_v5  ;;  %v7704_v5 = vld [vmem:[#allocation3 + $0xf2c] sm:$0xf0] }
 0x1cc   : > { %3703 = vmatpush.bf16.msrb.mxu0 %v6473_v50  ;;  %v6896_v50 = vld [vmem:[#allocation3 + $0xf80] sm:$0xf]  ;;  %v6917_v51 = vor.u32 %v7718_v1, %v6914_v43  ;;  %v7702_v1 = vld [vmem:[#allocation3 + $0xf24] sm:$0xf]  ;;  %v6850_v43 = vld [vmem:[#allocation3 + $0xf30] sm:$0xf0] }
 0x1cd   : > { %3716 = vmatpush.bf16.msrb.mxu1 %v6601_v56  ;;  %v7682_v56 = vld [vmem:[#allocation3 + $0xe84] sm:$0xf]  ;;  %v6897_v34 = vor.u32 %v7716_v54, %v6896_v50  ;;  %v3819_v50 = vshrl.u32 %v8132_v20, 16  ;;  %v6849_v54 = vor.u32 %v7704_v5, %v6848_v33  ;;  %v7689_v33 = vld [vmem:[#allocation3 + $0xeb4] sm:$0xf0] }
 0x1ce   : > { %3729 = vmatpush.bf16.msrb.mxu2 %v6477_v58  ;;  %v6770_v58 = vld [vmem:[#allocation3 + $0xe90] sm:$0xf0]  ;;  %v6920_v5 = vld [vmem:[#allocation3 + $0xfa8] sm:$0xf] }
 0x1cf   : > { %3742 = vmatpush.bf16.msrb.mxu3 %v6605_v52  ;;  %v6773_v53 = vor.u32 %v7682_v56, %v6770_v58  ;;  %v7666_v56 = vld [vmem:[#allocation3 + $0xe04] sm:$0xf]  ;;  %v6706_v58 = vld [vmem:[#allocation3 + $0xe10] sm:$0xf0] }
 0x1d0   : > { %3704 = vmatpush.bf16.msrb.mxu0 %v6457_v44  ;;  %v2688_v59 = vpop.f32.mrf.mxu0  ;;  %v6754_v44 = vld [vmem:[#allocation3 + $0xe70] sm:$0xf0] }
 0x1d1   : > { %3717 = vmatpush.bf16.msrb.mxu1 %v6585_v11  ;;  %v2701_v63 = vpop.f32.mrf.mxu1  ;;  %v6753_v11 = vor.u32 %v7680_v3, %v6752_v2  ;;  %v6757_v13 = vor.u32 %v7678_v7, %v6754_v44  ;;  %v6952_v2 = vld [vmem:[#allocation3 + $0xfe8] sm:$0xf]  ;;  %v7729_v3 = vld [vmem:[#allocation3 + $0xff4] sm:$0xf0]  ;;  %v3821_v7 = vrot.slane %v3819_v50, 3 }
 0x1d2   : > { %3730 = vmatpush.bf16.msrb.mxu2 %v6461_v12  ;;  %v2702_v52 = vadd.f32 %v2701_v63, %v2688_v59  ;;  %v6881_v12 = vor.u32 %v7712_v40, %v6880_v6  ;;  %v3827_v59 = vshrl.u32 %v8134_v18, 16  ;;  %v7698_v63 = vld [vmem:[#allocation3 + $0xf04] sm:$0xf]  ;;  %v6826_v40 = vld [vmem:[#allocation3 + $0xef8] sm:$0xf0] }
 0x1d3   : > { %3743 = vmatpush.bf16.msrb.mxu3 %v6589_v48  ;;  %3705 = vmatmul.bf16.vlgmr.msrb.gmra.mxu0 %v8137_v27  ;;  %v7676_v48 = vld [vmem:[#allocation3 + $0xe4c] sm:$0xf0]  ;;  %v7685_v50 = vld [vmem:[#allocation3 + $0xe94] sm:$0xf0] }
 0x1d4   : > { %4156 = vmatpush.bf16.msra.mxu0 %v6817_v15  ;;  %3718 = vmatmul.bf16.vlgmr.msrb.gmra.mxu1 %v8140_v0  ;;  %v8157_v8 = vadd.f32 %v2702_v52, %v8127_v4  ;;  %v6864_v15 = vld [vmem:[#allocation3 + $0xf40] sm:$0xf]  ;;  %v7706_v4 = vld [vmem:[#allocation3 + $0xf44] sm:$0xf]  ;;  %v6737_v19 = vor.u32 %v7676_v48, %v6736_v14  ;;  %v6824_v52 = vld [vmem:[#allocation3 + $0xee8] sm:$0xf] }
 0x1d5   : > { %4169 = vmatpush.bf16.msra.mxu1 %v6945_v17  ;;  %3731 = vmatmul.bf16.vlgmr.msrb.gmra.mxu2 %v8137_v27  ;;  %v7714_v27 = vld [vmem:[#allocation3 + $0xf84] sm:$0xf]  ;;  %v6885_v17 = vor.u32 %v7710_v55, %v6882_v60  ;;  %v6869_v36 = vor.u32 %v7706_v4, %v6866_v24  ;;  %v7727_v60 = vld [vmem:[#allocation3 + $0xfec] sm:$0xf]  ;;  %v7725_v4 = vld [vmem:[#allocation3 + $0xfd4] sm:$0xf0] }
 0x1d6   : > { %4182 = vmatpush.bf16.msra.mxu2 %v6821_v21  ;;  %3744 = vmatmul.bf16.vlgmr.msrb.gmra.mxu3 %v8140_v0  ;;  %v6769_v0 = vor.u32 %v7684_v49, %v6768_v47  ;;  %v6901_v39 = vor.u32 %v7714_v27, %v6898_v62  ;;  %v6832_v47 = vld [vmem:[#allocation3 + $0xf00] sm:$0xf]  ;;  %v7700_v49 = vld [vmem:[#allocation3 + $0xf0c] sm:$0xf0]  ;;  %v3830_v27 = vshll.u32 %v8134_v18, 16  ;;  %v6853_v62 = vor.u32 %v7702_v1, %v6850_v43 }
 0x1d7   : > { %4195 = vmatpush.bf16.msra.mxu3 %v6949_v57  ;;  %v6833_v55 = vor.u32 %v7700_v49, %v6832_v47  ;;  %v6709_v18 = vor.u32 %v7666_v56, %v6706_v58  ;;  %v7691_v24 = vld [vmem:[#allocation3 + $0xecc] sm:$0xf]  ;;  %v6794_v1 = vld [vmem:[#allocation3 + $0xeb8] sm:$0xf0]  ;;  %v6776_v49 = vld [vmem:[#allocation3 + $0xe88] sm:$0xf] }
 0x1d8   : > { %4157 = vmatpush.bf16.msra.mxu0 %v6801_v61  ;;  %v2714_v21 = vpop.f32.mrf.mxu2  ;;  %v2690_v26 = vpop.f32.mrf.mxu0  ;;  %v7719_v43 = vld [vmem:[#allocation3 + $0xfac] sm:$0xf]  ;;  %v6778_v58 = vld [vmem:[#allocation3 + $0xe98] sm:$0xf0] }
 0x1d9   : > { %4170 = vmatpush.bf16.msra.mxu1 %v6929_v25  ;;  %v2727_v57 = vpop.f32.mrf.mxu3  ;;  %v2703_v61 = vpop.f32.mrf.mxu1  ;;  %v6865_v25 = vor.u32 %v7708_v29, %v6864_v15  ;;  %v6953_v15 = vor.u32 %v7729_v3, %v6952_v2  ;;  %v7693_v29 = vld [vmem:[#allocation3 + $0xed4] sm:$0xf0]  ;;  %v6810_v26 = vld [vmem:[#allocation3 + $0xed8] sm:$0xf0]  ;;  %v7683_v56 = vld [vmem:[#allocation3 + $0xe8c] sm:$0xf] }
 0x1da   : > { %4183 = vmatpush.bf16.msra.mxu2 %v6805_v31  ;;  %v2728_v35 = vadd.f32 %v2727_v57, %v2714_v21  ;;  %v6741_v31 = vor.u32 %v7674_v22, %v6738_v23  ;;  %v6808_v21 = vld [vmem:[#allocation3 + $0xec8] sm:$0xf]  ;;  %v7681_v3 = vld [vmem:[#allocation3 + $0xe74] sm:$0xf0] }
 0x1db   : > { %4196 = vmatpush.bf16.msra.mxu3 %v6933_v16  ;;  %v6936_v22 = vld [vmem:[#allocation3 + $0xfc8] sm:$0xf]  ;;  %v6809_v61 = vor.u32 %v7693_v29, %v6808_v21  ;;  %v7709_v21 = vld [vmem:[#allocation3 + $0xf54] sm:$0xf0]  ;;  %v7675_v29 = vld [vmem:[#allocation3 + $0xe4c] sm:$0xf] }
 0x1dc   : > { %4158 = vmatpush.bf16.msra.mxu0 %v6785_v45  ;;  %v8160_v16 = vadd.f32 %v2728_v35, %v8130_v10  ;;  %v6704_v45 = vld [vmem:[#allocation3 + $0xe00] sm:$0xf]  ;;  %v6725_v10 = vor.u32 %v7670_v37, %v6722_v38  ;;  %v7721_v37 = vld [vmem:[#allocation3 + $0xfb4] sm:$0xf0]  ;;  %v7687_v38 = vld [vmem:[#allocation3 + $0xeac] sm:$0xf] }
 0x1dd   : > { %4171 = vmatpush.bf16.msra.mxu1 %v6913_v41  ;;  %v7668_v41 = vld [vmem:[#allocation3 + $0xe0c] sm:$0xf0]  ;;  %v6797_v47 = vor.u32 %v7687_v38, %v6794_v1  ;;  %v6760_v2 = vld [vmem:[#allocation3 + $0xe68] sm:$0xf]  ;;  %v7671_v38 = vld [vmem:[#allocation3 + $0xe2c] sm:$0xf] }
 0x1de   : > { %4184 = vmatpush.bf16.msra.mxu2 %v6789_v42  ;;  %v6721_v42 = vor.u32 %v7672_v32, %v6720_v28  ;;  %v6705_v6 = vor.u32 %v7668_v41, %v6704_v45  ;;  %v6938_v28 = vld [vmem:[#allocation3 + $0xfd8] sm:$0xf0]  ;;  %v6792_v32 = vld [vmem:[#allocation3 + $0xea8] sm:$0xf] }
 0x1df   : > { %4197 = vmatpush.bf16.msra.mxu3 %v6917_v51  ;;  %v3822_v51 = vshll.u32 %v8132_v20, 16  ;;  %v6922_v45 = vld [vmem:[#allocation3 + $0xfb8] sm:$0xf0]  ;;  %v6793_v41 = vor.u32 %v7689_v33, %v6792_v32  ;;  %v7673_v32 = vld [vmem:[#allocation3 + $0xe34] sm:$0xf0] }
 0x1e0   : > { %4159 = vmatpush.bf16.msra.mxu0 %v6769_v0  ;;  %v6834_v0 = vld [vmem:[#allocation3 + $0xf10] sm:$0xf0]  ;;  %v6856_v33 = vld [vmem:[#allocation3 + $0xf28] sm:$0xf]  ;;  %v6730_v1 = vld [vmem:[#allocation3 + $0xe38] sm:$0xf0] }
 0x1e1   : > { %4172 = vmatpush.bf16.msra.mxu1 %v6897_v34  ;;  %v2716_v34 = vpop.f32.mrf.mxu2  ;;  %v2729_v20 = vpop.f32.mrf.mxu3  ;;  %v3824_v44 = vrot.slane %v3822_v51, 4  ;;  %v6837_v14 = vor.u32 %v7698_v63, %v6834_v0  ;;  %v6904_v51 = vld [vmem:[#allocation3 + $0xf88] sm:$0xf]  ;;  %v6777_v0 = vor.u32 %v7685_v50, %v6776_v49  ;;  %v6733_v50 = vor.u32 %v7671_v38, %v6730_v1  ;;  %v7024_v38 = vld [vmem:[#allocation3 + $0x1080] sm:$0xf] }
 0x1e2   : > { %4185 = vmatpush.bf16.msra.mxu2 %v6773_v53  ;;  %v7697_v53 = vld [vmem:[#allocation3 + $0xef4] sm:$0xf0]  ;;  %v6888_v20 = vld [vmem:[#allocation3 + $0xf68] sm:$0xf]  ;;  %v7748_v1 = vld [vmem:[#allocation3 + $0x108c] sm:$0xf0] }
 0x1e3   : > { %4198 = vmatpush.bf16.msra.mxu3 %v6901_v39  ;;  %v7695_v39 = vld [vmem:[#allocation3 + $0xeec] sm:$0xf]  ;;  %v6825_v48 = vor.u32 %v7697_v53, %v6824_v52  ;;  %v8166_v57 = vor.u32 %v3824_v44, %v3821_v7  ;;  %v6781_v53 = vor.u32 %v7683_v56, %v6778_v58  ;;  %v6762_v7 = vld [vmem:[#allocation3 + $0xe78] sm:$0xf0] }
 0x1e4   : > { %4160 = vmatpush.bf16.msra.mxu0 %v6753_v11  ;;  %v6954_v11 = vld [vmem:[#allocation3 + $0xff8] sm:$0xf0]  ;;  %v7699_v58 = vld [vmem:[#allocation3 + $0xf0c] sm:$0xf] }
 0x1e5   : > { %4173 = vmatpush.bf16.msra.mxu1 %v6881_v12  ;;  %v3829_v12 = vrot.slane %v3827_v59, 3  ;;  %v6957_v23 = vor.u32 %v7727_v60, %v6954_v11  ;;  %v6761_v60 = vor.u32 %v7681_v3, %v6760_v2  ;;  %v6714_v56 = vld [vmem:[#allocation3 + $0xe18] sm:$0xf0]  ;;  %v7758_v2 = vld [vmem:[#allocation3 + $0x10e4] sm:$0xf] }
 0x1e6   : > { %4186 = vmatpush.bf16.msra.mxu2 %v6757_v13  ;;  %v3832_v13 = vrot.slane %v3830_v27, 4  ;;  %v7715_v27 = vld [vmem:[#allocation3 + $0xf8c] sm:$0xf]  ;;  %v7074_v3 = vld [vmem:[#allocation3 + $0x10f0] sm:$0xf0] }
 0x1e7   : > { %4199 = vmatpush.bf16.msra.mxu3 %v6885_v17  ;;  %v6829_v17 = vor.u32 %v7695_v39, %v6826_v40  ;;  %v7713_v39 = vld [vmem:[#allocation3 + $0xf74] sm:$0xf0]  ;;  %v7679_v40 = vld [vmem:[#allocation3 + $0xe6c] sm:$0xf] }
 0x1e8   : > { %4161 = vmatpush.bf16.msra.mxu0 %v6737_v19  ;;  %v8168_v35 = vor.u32 %v3832_v13, %v3829_v12  ;;  %v7723_v19 = vld [vmem:[#allocation3 + $0xfcc] sm:$0xf]  ;;  %v6889_v11 = vor.u32 %v7713_v39, %v6888_v20  ;;  %v6765_v12 = vor.u32 %v7679_v40, %v6762_v7  ;;  %v6744_v13 = vld [vmem:[#allocation3 + $0xe48] sm:$0xf]  ;;  %v7790_v39 = vld [vmem:[#allocation3 + $0x11e4] sm:$0xf] }
 0x1e9   : > { %4174 = vmatpush.bf16.msra.mxu1 %v6865_v25  ;;  %v6937_v25 = vor.u32 %v7725_v4, %v6936_v22  ;;  %v6746_v22 = vld [vmem:[#allocation3 + $0xe58] sm:$0xf0]  ;;  %v7202_v40 = vld [vmem:[#allocation3 + $0x11f0] sm:$0xf0] }
 0x1ea   : > { %4187 = vmatpush.bf16.msra.mxu2 %v6741_v31  ;;  %v6813_v31 = vor.u32 %v7691_v24, %v6810_v26  ;;  %v6874_v4 = vld [vmem:[#allocation3 + $0xf58] sm:$0xf0] }
 0x1eb   : > { %4200 = vmatpush.bf16.msra.mxu3 %v6869_v36  ;;  %v6941_v36 = vor.u32 %v7723_v19, %v6938_v28 }
 0x1ec   : > { %4162 = vmatpush.bf16.msra.mxu0 %v6721_v42  ;;  %v6921_v42 = vor.u32 %v7721_v37, %v6920_v5  ;;  %v7705_v37 = vld [vmem:[#allocation3 + $0xf34] sm:$0xf0] }
 0x1ed   : > { %4175 = vmatpush.bf16.msra.mxu1 %v6849_v54  ;;  %v6925_v54 = vor.u32 %v7719_v43, %v6922_v45  ;;  %v7703_v43 = vld [vmem:[#allocation3 + $0xf2c] sm:$0xf]  ;;  %v6858_v45 = vld [vmem:[#allocation3 + $0xf38] sm:$0xf0]  ;;  %v6857_v49 = vor.u32 %v7705_v37, %v6856_v33 }
 0x1ee   : > { %4188 = vmatpush.bf16.msra.mxu2 %v6725_v10  ;;  %v7717_v10 = vld [vmem:[#allocation3 + $0xf94] sm:$0xf0] }
 0x1ef   : > { %4201 = vmatpush.bf16.msra.mxu3 %v6853_v62  ;;  %v6906_v62 = vld [vmem:[#allocation3 + $0xf98] sm:$0xf0]  ;;  %v6905_v34 = vor.u32 %v7717_v10, %v6904_v51  ;;  %v6840_v51 = vld [vmem:[#allocation3 + $0xf08] sm:$0xf]  ;;  %v7667_v10 = vld [vmem:[#allocation3 + $0xe0c] sm:$0xf] }
 0x1f0   : > { %4163 = vmatpush.bf16.msra.mxu0 %v6705_v6  ;;  %v3147_v59 = vpop.f32.mrf.mxu0  ;;  %v6909_v6 = vor.u32 %v7715_v27, %v6906_v62  ;;  %v7072_v62 = vld [vmem:[#allocation3 + $0x10e0] sm:$0xf] }
 0x1f1   : > { %4176 = vmatpush.bf16.msra.mxu1 %v6833_v55  ;;  %v3160_v63 = vpop.f32.mrf.mxu1  ;;  %v7711_v55 = vld [vmem:[#allocation3 + $0xf6c] sm:$0xf] }
 0x1f2   : > { %4189 = vmatpush.bf16.msra.mxu2 %v6709_v18  ;;  %v3161_v52 = vadd.f32 %v3160_v63, %v3147_v59  ;;  %v6890_v18 = vld [vmem:[#allocation3 + $0xf78] sm:$0xf0]  ;;  %v7760_v63 = vld [vmem:[#allocation3 + $0x10ec] sm:$0xf0] }
 0x1f3   : > { %4202 = vmatpush.bf16.msra.mxu3 %v6837_v14  ;;  %4164 = vmatmul.bf16.vlgmr.msra.gmra.mxu0 %v8166_v57  ;;  %v7677_v14 = vld [vmem:[#allocation3 + $0xe54] sm:$0xf0]  ;;  %v6842_v59 = vld [vmem:[#allocation3 + $0xf18] sm:$0xf0] }
 0x1f4   : > { %4208 = vmatpush.bf16.msrb.mxu0 %v6825_v48  ;;  %4177 = vmatmul.bf16.vlgmr.msra.gmra.mxu1 %v8168_v35  ;;  %v8175_v44 = vadd.f32 %v3161_v52, %v8147_v46  ;;  %v6872_v48 = vld [vmem:[#allocation3 + $0xf48] sm:$0xf]  ;;  %v7707_v46 = vld [vmem:[#allocation3 + $0xf4c] sm:$0xf]  ;;  %v6745_v19 = vor.u32 %v7677_v14, %v6744_v13  ;;  %v6845_v7 = vor.u32 %v7699_v58, %v6842_v59  ;;  %v7184_v13 = vld [vmem:[#allocation3 + $0x11c0] sm:$0xf] }
 0x1f5   : > { %4221 = vmatpush.bf16.msrb.mxu1 %v6953_v15  ;;  %4190 = vmatmul.bf16.vlgmr.msra.gmra.mxu2 %v8166_v57  ;;  %v6893_v15 = vor.u32 %v7711_v55, %v6890_v18  ;;  %v7073_v55 = vor.u32 %v7760_v63, %v7072_v62  ;;  %v7205_v14 = vor.u32 %v7790_v39, %v7202_v40  ;;  %v7744_v58 = vld [vmem:[#allocation3 + $0x106c] sm:$0xf0]  ;;  %v7136_v59 = vld [vmem:[#allocation3 + $0x1160] sm:$0xf]  ;;  %v7742_v63 = vld [vmem:[#allocation3 + $0x1064] sm:$0xf] }
 0x1f6   : > { %4234 = vmatpush.bf16.msrb.mxu2 %v6829_v17  ;;  %4203 = vmatmul.bf16.vlgmr.msra.gmra.mxu3 %v8168_v35  ;;  %v7776_v62 = vld [vmem:[#allocation3 + $0x116c] sm:$0xf0]  ;;  %v7120_v40 = vld [vmem:[#allocation3 + $0x1140] sm:$0xf] }
 0x1f7   : > { %4247 = vmatpush.bf16.msrb.mxu3 %v6957_v23  ;;  %v7740_v39 = vld [vmem:[#allocation3 + $0x104c] sm:$0xf0] }
 0x1f8   : > { %4209 = vmatpush.bf16.msrb.mxu0 %v6809_v61  ;;  %v3173_v17 = vpop.f32.mrf.mxu2  ;;  %v3149_v24 = vpop.f32.mrf.mxu0  ;;  %v6873_v61 = vor.u32 %v7709_v21, %v6872_v48  ;;  %v7788_v48 = vld [vmem:[#allocation3 + $0x11cc] sm:$0xf0]  ;;  %v7786_v21 = vld [vmem:[#allocation3 + $0x11c4] sm:$0xf] }
 0x1f9   : > { %4222 = vmatpush.bf16.msrb.mxu1 %v6937_v25  ;;  %v3186_v23 = vpop.f32.mrf.mxu3  ;;  %v3162_v28 = vpop.f32.mrf.mxu1  ;;  %v6749_v25 = vor.u32 %v7675_v29, %v6746_v22  ;;  %v7186_v29 = vld [vmem:[#allocation3 + $0x11d0] sm:$0xf0]  ;;  %v7752_v24 = vld [vmem:[#allocation3 + $0x10ac] sm:$0xf0] }
 0x1fa   : > { %4235 = vmatpush.bf16.msrb.mxu2 %v6813_v31  ;;  %v3187_v26 = vadd.f32 %v3186_v23, %v3173_v17  ;;  %v6728_v31 = vld [vmem:[#allocation3 + $0xe28] sm:$0xf]  ;;  %v7058_v17 = vld [vmem:[#allocation3 + $0x10d0] sm:$0xf0]  ;;  %v7185_v23 = vor.u32 %v7788_v48, %v7184_v13  ;;  %v7784_v28 = vld [vmem:[#allocation3 + $0x11ac] sm:$0xf0] }
 0x1fb   : > { %4248 = vmatpush.bf16.msrb.mxu3 %v6941_v36  ;;  %v6877_v36 = vor.u32 %v7707_v46, %v6874_v4  ;;  %v7040_v4 = vld [vmem:[#allocation3 + $0x10a0] sm:$0xf]  ;;  %v7122_v13 = vld [vmem:[#allocation3 + $0x1150] sm:$0xf0] }
 0x1fc   : > { %4210 = vmatpush.bf16.msrb.mxu0 %v6793_v41  ;;  %v8178_v5 = vadd.f32 %v3187_v26, %v8150_v30  ;;  %v6729_v41 = vor.u32 %v7673_v32, %v6728_v31  ;;  %v6861_v30 = vor.u32 %v7703_v43, %v6858_v45  ;;  %v7168_v26 = vld [vmem:[#allocation3 + $0x11a0] sm:$0xf]  ;;  %v7782_v31 = vld [vmem:[#allocation3 + $0x11a4] sm:$0xf]  ;;  %v7170_v32 = vld [vmem:[#allocation3 + $0x11b0] sm:$0xf0]  ;;  %v7041_v33 = vor.u32 %v7752_v24, %v7040_v4 }
 0x1fd   : > { %4223 = vmatpush.bf16.msrb.mxu1 %v6921_v42  ;;  %v6712_v42 = vld [vmem:[#allocation3 + $0xe08] sm:$0xf]  ;;  %v7152_v43 = vld [vmem:[#allocation3 + $0x1180] sm:$0xf]  ;;  %v7173_v45 = vor.u32 %v7782_v31, %v7170_v32 }
 0x1fe   : > { %4236 = vmatpush.bf16.msrb.mxu2 %v6797_v47  ;;  %v7669_v47 = vld [vmem:[#allocation3 + $0xe14] sm:$0xf0]  ;;  %v6960_v32 = vld [vmem:[#allocation3 + $0x1000] sm:$0xf] }
 0x1ff   : > { %4249 = vmatpush.bf16.msrb.mxu3 %v6925_v54  ;;  %v7701_v54 = vld [vmem:[#allocation3 + $0xf14] sm:$0xf0] }
 0x200   : > { %4211 = vmatpush.bf16.msrb.mxu0 %v6777_v0  ;;  %v3175_v27 = vpop.f32.mrf.mxu2  ;;  %v7200_v0 = vld [vmem:[#allocation3 + $0x11e0] sm:$0xf]  ;;  %v6841_v20 = vor.u32 %v7701_v54, %v6840_v51 }
 0x201   : > { %4224 = vmatpush.bf16.msrb.mxu1 %v6905_v34  ;;  %v3188_v52 = vpop.f32.mrf.mxu3  ;;  %v6713_v34 = vor.u32 %v7669_v47, %v6712_v42  ;;  %v7746_v42 = vld [vmem:[#allocation3 + $0x1084] sm:$0xf]  ;;  %v7026_v47 = vld [vmem:[#allocation3 + $0x1090] sm:$0xf0] }
 0x202   : > { %4237 = vmatpush.bf16.msrb.mxu2 %v6781_v53  ;;  %v7792_v53 = vld [vmem:[#allocation3 + $0x11ec] sm:$0xf0] }
 0x203   : > { %4250 = vmatpush.bf16.msrb.mxu3 %v6909_v6  ;;  %v6717_v6 = vor.u32 %v7667_v10, %v6714_v56  ;;  %v7201_v18 = vor.u32 %v7792_v53, %v7200_v0  ;;  %v7008_v56 = vld [vmem:[#allocation3 + $0x1060] sm:$0xf]  ;;  %v7010_v0 = vld [vmem:[#allocation3 + $0x1070] sm:$0xf0] }
 0x204   : > { %4212 = vmatpush.bf16.msrb.mxu0 %v6761_v60  ;;  %v7077_v60 = vor.u32 %v7758_v2, %v7074_v3  ;;  %v7138_v53 = vld [vmem:[#allocation3 + $0x1170] sm:$0xf0]  ;;  %v7009_v2 = vor.u32 %v7744_v58, %v7008_v56  ;;  %v7137_v3 = vor.u32 %v7776_v62, %v7136_v59  ;;  %v7082_v56 = vld [vmem:[#allocation3 + $0x10f8] sm:$0xf0]  ;;  %v7791_v62 = vld [vmem:[#allocation3 + $0x11ec] sm:$0xf] }
 0x205   : > { %4225 = vmatpush.bf16.msrb.mxu1 %v6889_v11  ;;  %v7056_v11 = vld [vmem:[#allocation3 + $0x10c0] sm:$0xf] }
 0x206   : > { %4238 = vmatpush.bf16.msrb.mxu2 %v6765_v12  ;;  %v7756_v12 = vld [vmem:[#allocation3 + $0x10cc] sm:$0xf0] }
 0x207   : > { %4251 = vmatpush.bf16.msrb.mxu3 %v6893_v15  ;;  %v7754_v15 = vld [vmem:[#allocation3 + $0x10c4] sm:$0xf]  ;;  %v7057_v22 = vor.u32 %v7756_v12, %v7056_v11  ;;  %v6994_v11 = vld [vmem:[#allocation3 + $0x1050] sm:$0xf0] }
 0x208   : > { %4213 = vmatpush.bf16.msrb.mxu0 %v6745_v19  ;;  %v7061_v46 = vor.u32 %v7754_v15, %v7058_v17  ;;  %v7189_v19 = vor.u32 %v7786_v21, %v7186_v29 }
 0x209   : > { %4226 = vmatpush.bf16.msrb.mxu1 %v6873_v61  ;;  %v7750_v61 = vld [vmem:[#allocation3 + $0x10a4] sm:$0xf] }
 0x20a   : > { %4239 = vmatpush.bf16.msrb.mxu2 %v6749_v25  ;;  %v7042_v25 = vld [vmem:[#allocation3 + $0x10b0] sm:$0xf0] }
 0x20b   : > { %4252 = vmatpush.bf16.msrb.mxu3 %v6877_v36  ;;  %v7169_v36 = vor.u32 %v7784_v28, %v7168_v26  ;;  %v7045_v37 = vor.u32 %v7750_v61, %v7042_v25  ;;  %v7768_v26 = vld [vmem:[#allocation3 + $0x112c] sm:$0xf0]  ;;  %v6978_v28 = vld [vmem:[#allocation3 + $0x1030] sm:$0xf0]  ;;  %v7766_v61 = vld [vmem:[#allocation3 + $0x1124] sm:$0xf] }
 0x20c   : > { %4214 = vmatpush.bf16.msrb.mxu0 %v6729_v41  ;;  %v7780_v41 = vld [vmem:[#allocation3 + $0x118c] sm:$0xf0]  ;;  %v7106_v25 = vld [vmem:[#allocation3 + $0x1130] sm:$0xf0] }
 0x20d   : > { %4227 = vmatpush.bf16.msrb.mxu1 %v6857_v49  ;;  %v7153_v10 = vor.u32 %v7780_v41, %v7152_v43  ;;  %v7730_v43 = vld [vmem:[#allocation3 + $0x1004] sm:$0xf]  ;;  %v6962_v41 = vld [vmem:[#allocation3 + $0x1010] sm:$0xf0] }
 0x20e   : > { %4240 = vmatpush.bf16.msrb.mxu2 %v6733_v50  ;;  %v7154_v50 = vld [vmem:[#allocation3 + $0x1190] sm:$0xf0] }
 0x20f   : > { %4253 = vmatpush.bf16.msrb.mxu3 %v6861_v30  ;;  %v7029_v30 = vor.u32 %v7746_v42, %v7026_v47  ;;  %v7762_v42 = vld [vmem:[#allocation3 + $0x1104] sm:$0xf]  ;;  %v7090_v47 = vld [vmem:[#allocation3 + $0x1110] sm:$0xf0] }
 0x210   : > { %4215 = vmatpush.bf16.msrb.mxu0 %v6713_v34  ;;  %v3199_v49 = vpop.f32.mrf.mxu0  ;;  %v7774_v34 = vld [vmem:[#allocation3 + $0x1164] sm:$0xf] }
 0x211   : > { %4228 = vmatpush.bf16.msrb.mxu1 %v6841_v20  ;;  %v3212_v51 = vpop.f32.mrf.mxu1  ;;  %v7013_v20 = vor.u32 %v7742_v63, %v7010_v0  ;;  %v7210_v63 = vld [vmem:[#allocation3 + $0x11f8] sm:$0xf0] }
 0x212   : > { %4241 = vmatpush.bf16.msrb.mxu2 %v6717_v6  ;;  %v3213_v54 = vadd.f32 %v3212_v51, %v3199_v49  ;;  %v6992_v6 = vld [vmem:[#allocation3 + $0x1040] sm:$0xf]  ;;  %v7208_v51 = vld [vmem:[#allocation3 + $0x11e8] sm:$0xf] }
 0x213   : > { %4254 = vmatpush.bf16.msrb.mxu3 %v6845_v7  ;;  %4216 = vmatmul.bf16.vlgmr.msrb.gmra.mxu0 %v8166_v57  ;;  %v7141_v7 = vor.u32 %v7774_v34, %v7138_v53  ;;  %v6993_v15 = vor.u32 %v7740_v39, %v6992_v6  ;;  %v7093_v34 = vor.u32 %v7762_v42, %v7090_v47  ;;  %v7757_v6 = vld [vmem:[#allocation3 + $0x10d4] sm:$0xf0]  ;;  %v7192_v39 = vld [vmem:[#allocation3 + $0x11c8] sm:$0xf] }
 0x214   : > { %4657 = vmatpush.bf16.msra.mxu0 %v7073_v55  ;;  %4229 = vmatmul.bf16.vlgmr.msrb.gmra.mxu1 %v8168_v35  ;;  %v8185_v52 = vadd.f32 %v3213_v54, %v8157_v8  ;;  %v7770_v8 = vld [vmem:[#allocation3 + $0x1144] sm:$0xf] }
 0x215   : > { %4670 = vmatpush.bf16.msra.mxu1 %v7201_v18  ;;  %4242 = vmatmul.bf16.vlgmr.msrb.gmra.mxu2 %v8166_v57  ;;  %v7778_v57 = vld [vmem:[#allocation3 + $0x1184] sm:$0xf]  ;;  %v7772_v18 = vld [vmem:[#allocation3 + $0x114c] sm:$0xf0]  ;;  %v7125_v24 = vor.u32 %v7770_v8, %v7122_v13  ;;  %v7194_v8 = vld [vmem:[#allocation3 + $0x11d8] sm:$0xf0] }
 0x216   : > { %4683 = vmatpush.bf16.msra.mxu2 %v7077_v60  ;;  %4255 = vmatmul.bf16.vlgmr.msrb.gmra.mxu3 %v8168_v35  ;;  %v7025_v35 = vor.u32 %v7748_v1, %v7024_v38  ;;  %v7157_v27 = vor.u32 %v7778_v57, %v7154_v50  ;;  %v7738_v60 = vld [vmem:[#allocation3 + $0x1044] sm:$0xf]  ;;  %v7121_v21 = vor.u32 %v7772_v18, %v7120_v40  ;;  %v7764_v1 = vld [vmem:[#allocation3 + $0x110c] sm:$0xf0]  ;;  %v7080_v57 = vld [vmem:[#allocation3 + $0x10e8] sm:$0xf] }
 0x217   : > { %4696 = vmatpush.bf16.msra.mxu3 %v7205_v14  ;;  %v6997_v29 = vor.u32 %v7738_v60, %v6994_v11  ;;  %v7761_v50 = vld [vmem:[#allocation3 + $0x10f4] sm:$0xf0]  ;;  %v7213_v40 = vor.u32 %v7791_v62, %v7210_v63  ;;  %v7755_v18 = vld [vmem:[#allocation3 + $0x10cc] sm:$0xf]  ;;  %v7066_v60 = vld [vmem:[#allocation3 + $0x10d8] sm:$0xf0] }
 0x218   : > { %4658 = vmatpush.bf16.msra.mxu0 %v7057_v22  ;;  %v3225_v55 = vpop.f32.mrf.mxu2  ;;  %v3201_v14 = vpop.f32.mrf.mxu0  ;;  %v6976_v22 = vld [vmem:[#allocation3 + $0x1020] sm:$0xf]  ;;  %v7081_v53 = vor.u32 %v7761_v50, %v7080_v57  ;;  %v7016_v57 = vld [vmem:[#allocation3 + $0x1068] sm:$0xf]  ;;  %v7745_v50 = vld [vmem:[#allocation3 + $0x1074] sm:$0xf0] }
 0x219   : > { %4671 = vmatpush.bf16.msra.mxu1 %v7185_v23  ;;  %v3238_v12 = vpop.f32.mrf.mxu3  ;;  %v3214_v17 = vpop.f32.mrf.mxu1  ;;  %v7736_v23 = vld [vmem:[#allocation3 + $0x102c] sm:$0xf0] }
 0x21a   : > { %4684 = vmatpush.bf16.msra.mxu2 %v7061_v46  ;;  %v3239_v48 = vadd.f32 %v3238_v12, %v3225_v55  ;;  %v7104_v46 = vld [vmem:[#allocation3 + $0x1120] sm:$0xf]  ;;  %v6977_v31 = vor.u32 %v7736_v23, %v6976_v22  ;;  %v7789_v55 = vld [vmem:[#allocation3 + $0x11d4] sm:$0xf0]  ;;  %v7787_v12 = vld [vmem:[#allocation3 + $0x11cc] sm:$0xf] }
 0x21b   : > { %4697 = vmatpush.bf16.msra.mxu3 %v7189_v19  ;;  %v7734_v19 = vld [vmem:[#allocation3 + $0x1024] sm:$0xf]  ;;  %v7193_v14 = vor.u32 %v7789_v55, %v7192_v39  ;;  %v7753_v17 = vld [vmem:[#allocation3 + $0x10b4] sm:$0xf0]  ;;  %v7751_v23 = vld [vmem:[#allocation3 + $0x10ac] sm:$0xf] }
 0x21c   : > { %4659 = vmatpush.bf16.msra.mxu0 %v7041_v33  ;;  %v8188_v4 = vadd.f32 %v3239_v48, %v8160_v16  ;;  %v7732_v33 = vld [vmem:[#allocation3 + $0x100c] sm:$0xf0]  ;;  %v6981_v38 = vor.u32 %v7734_v19, %v6978_v28  ;;  %v7109_v16 = vor.u32 %v7766_v61, %v7106_v25  ;;  %v7069_v48 = vor.u32 %v7755_v18, %v7066_v60  ;;  %v7785_v22 = vld [vmem:[#allocation3 + $0x11b4] sm:$0xf0]  ;;  %v7032_v25 = vld [vmem:[#allocation3 + $0x1088] sm:$0xf] }
 0x21d   : > { %4672 = vmatpush.bf16.msra.mxu1 %v7169_v36  ;;  %v7088_v36 = vld [vmem:[#allocation3 + $0x1100] sm:$0xf]  ;;  %v6961_v54 = vor.u32 %v7732_v33, %v6960_v32  ;;  %v7160_v32 = vld [vmem:[#allocation3 + $0x1188] sm:$0xf]  ;;  %v7002_v39 = vld [vmem:[#allocation3 + $0x1058] sm:$0xf0] }
 0x21e   : > { %4685 = vmatpush.bf16.msra.mxu2 %v7045_v37  ;;  %v7105_v37 = vor.u32 %v7768_v26, %v7104_v46  ;;  %v7089_v59 = vor.u32 %v7764_v1, %v7088_v36  ;;  %v7050_v46 = vld [vmem:[#allocation3 + $0x10b8] sm:$0xf0]  ;;  %v7781_v36 = vld [vmem:[#allocation3 + $0x1194] sm:$0xf0] }
 0x21f   : > { %4698 = vmatpush.bf16.msra.mxu3 %v7173_v45  ;;  %v4264_v45 = vld [vmem:[#allocation2 + $0x8] sm:$0x33]  ;;  %v7053_v61 = vor.u32 %v7751_v23, %v7050_v46  ;;  %v7161_v47 = vor.u32 %v7781_v36, %v7160_v32  ;;  %v7735_v23 = vld [vmem:[#allocation3 + $0x102c] sm:$0xf]  ;;  %v7096_v32 = vld [vmem:[#allocation3 + $0x1108] sm:$0xf] }
 0x220   : > { %4660 = vmatpush.bf16.msra.mxu0 %v7025_v35  ;;  %v3227_v49 = vpop.f32.mrf.mxu2  ;;  %v4331_v58 = vunpack.c.l.b16 %v4264_v45  ;;  %v4332_v0 = vunpack.c.h.b16 %v4264_v45  ;;  %v7178_v26 = vld [vmem:[#allocation3 + $0x11b8] sm:$0xf0]  ;;  %v7765_v36 = vld [vmem:[#allocation3 + $0x1114] sm:$0xf0] }
 0x221   : > { %4673 = vmatpush.bf16.msra.mxu1 %v7153_v10  ;;  %v3240_v35 = vpop.f32.mrf.mxu3  ;;  %v7793_v10 = vld [vmem:[#allocation3 + $0x11f4] sm:$0xf0]  ;;  %v7162_v45 = vld [vmem:[#allocation3 + $0x1198] sm:$0xf0] }
 0x222   : > { %4686 = vmatpush.bf16.msra.mxu2 %v7029_v30  ;;  %v7759_v30 = vld [vmem:[#allocation3 + $0x10ec] sm:$0xf]  ;;  %v8192_v11 = vpack.c.b16 %v4332_v0, %v4332_v0  ;;  %v7000_v0 = vld [vmem:[#allocation3 + $0x1048] sm:$0xf]  ;;  %v7130_v55 = vld [vmem:[#allocation3 + $0x1158] sm:$0xf0] }
 0x223   : > { %4699 = vmatpush.bf16.msra.mxu3 %v7157_v27  ;;  %v6965_v27 = vor.u32 %v7730_v43, %v6962_v41  ;;  %v7779_v43 = vld [vmem:[#allocation3 + $0x118c] sm:$0xf]  ;;  %v6986_v46 = vld [vmem:[#allocation3 + $0x1038] sm:$0xf0] }
 0x224   : > { %4661 = vmatpush.bf16.msra.mxu0 %v7009_v2  ;;  %v7209_v2 = vor.u32 %v7793_v10, %v7208_v51  ;;  %v7144_v51 = vld [vmem:[#allocation3 + $0x1168] sm:$0xf]  ;;  %v7165_v35 = vor.u32 %v7779_v43, %v7162_v45  ;;  %v7743_v10 = vld [vmem:[#allocation3 + $0x106c] sm:$0xf]  ;;  %v7098_v43 = vld [vmem:[#allocation3 + $0x1118] sm:$0xf0] }
 0x225   : > { %4674 = vmatpush.bf16.msra.mxu1 %v7137_v3  ;;  %v7085_v3 = vor.u32 %v7759_v30, %v7082_v56  ;;  %v7018_v30 = vld [vmem:[#allocation3 + $0x1078] sm:$0xf0] }
 0x226   : > { %4687 = vmatpush.bf16.msra.mxu2 %v7013_v20  ;;  %v7064_v20 = vld [vmem:[#allocation3 + $0x10c8] sm:$0xf]  ;;  %v7021_v63 = vor.u32 %v7743_v10, %v7018_v30 }
 0x227   : > { %4700 = vmatpush.bf16.msra.mxu3 %v7141_v7  ;;  %v8190_v7 = vpack.c.b16 %v4331_v58, %v4331_v58  ;;  %v7065_v13 = vor.u32 %v7757_v6, %v7064_v20  ;;  %v7775_v58 = vld [vmem:[#allocation3 + $0x116c] sm:$0xf]  ;;  %v7773_v20 = vld [vmem:[#allocation3 + $0x1154] sm:$0xf0] }
 0x228   : > { %4662 = vmatpush.bf16.msra.mxu0 %v6993_v15  ;;  %v7048_v15 = vld [vmem:[#allocation3 + $0x10a8] sm:$0xf]  ;;  %v7739_v6 = vld [vmem:[#allocation3 + $0x104c] sm:$0xf] }
 0x229   : > { %4675 = vmatpush.bf16.msra.mxu1 %v7121_v21  ;;  %v7176_v21 = vld [vmem:[#allocation3 + $0x11a8] sm:$0xf]  ;;  %v7049_v19 = vor.u32 %v7753_v17, %v7048_v15  ;;  %v7737_v15 = vld [vmem:[#allocation3 + $0x1034] sm:$0xf0] }
 0x22a   : > { %4688 = vmatpush.bf16.msra.mxu2 %v6997_v29  ;;  %v7197_v29 = vor.u32 %v7787_v12, %v7194_v8  ;;  %v7177_v28 = vor.u32 %v7785_v22, %v7176_v21  ;;  %v7112_v17 = vld [vmem:[#allocation3 + $0x1128] sm:$0xf]  ;;  %v7769_v22 = vld [vmem:[#allocation3 + $0x1134] sm:$0xf0] }
 0x22b   : > { %4701 = vmatpush.bf16.msra.mxu3 %v7125_v24  ;;  %v7783_v24 = vld [vmem:[#allocation3 + $0x11ac] sm:$0xf] }
 0x22c   : > { %4663 = vmatpush.bf16.msra.mxu0 %v6977_v31  ;;  %v7749_v31 = vld [vmem:[#allocation3 + $0x1094] sm:$0xf0]  ;;  %v7181_v33 = vor.u32 %v7783_v24, %v7178_v26  ;;  %v7767_v24 = vld [vmem:[#allocation3 + $0x112c] sm:$0xf]  ;;  %v7114_v26 = vld [vmem:[#allocation3 + $0x1138] sm:$0xf0] }
 0x22d   : > { %4676 = vmatpush.bf16.msra.mxu1 %v7105_v37  ;;  %v7747_v37 = vld [vmem:[#allocation3 + $0x108c] sm:$0xf]  ;;  %v7033_v41 = vor.u32 %v7749_v31, %v7032_v25  ;;  %v6968_v25 = vld [vmem:[#allocation3 + $0x1008] sm:$0xf]  ;;  %v7733_v31 = vld [vmem:[#allocation3 + $0x1014] sm:$0xf0] }
 0x22e   : > { %4689 = vmatpush.bf16.msra.mxu2 %v6981_v38  ;;  %v7034_v38 = vld [vmem:[#allocation3 + $0x1098] sm:$0xf0] }
 0x22f   : > { %4702 = vmatpush.bf16.msra.mxu3 %v7109_v16  ;;  %v7037_v49 = vor.u32 %v7747_v37, %v7034_v38  ;;  %v7731_v37 = vld [vmem:[#allocation3 + $0x100c] sm:$0xf] }
 0x230   : > { %4664 = vmatpush.bf16.msra.mxu0 %v6961_v54  ;;  %v3654_v1 = vpop.f32.mrf.mxu0  ;;  %v7777_v54 = vld [vmem:[#allocation3 + $0x1174] sm:$0xf0] }
 0x231   : > { %4677 = vmatpush.bf16.msra.mxu1 %v7089_v59  ;;  %v3667_v16 = vpop.f32.mrf.mxu1  ;;  %v7146_v59 = vld [vmem:[#allocation3 + $0x1178] sm:$0xf0]  ;;  %v7145_v62 = vor.u32 %v7777_v54, %v7144_v51 }
 0x232   : > { %4690 = vmatpush.bf16.msra.mxu2 %v6965_v27  ;;  %v3668_v42 = vadd.f32 %v3667_v16, %v3654_v1  ;;  %v7017_v27 = vor.u32 %v7745_v50, %v7016_v57  ;;  %v7763_v1 = vld [vmem:[#allocation3 + $0x110c] sm:$0xf]  ;;  %v6969_v16 = vor.u32 %v7733_v31, %v6968_v25 }
 0x233   : > { %4703 = vmatpush.bf16.msra.mxu3 %v7093_v34  ;;  %4665 = vmatmul.bf16.vlgmr.msra.gmra.mxu0 %v8190_v7  ;;  %v7741_v34 = vld [vmem:[#allocation3 + $0x1054] sm:$0xf0] }
 0x234   : > { %4709 = vmatpush.bf16.msrb.mxu0 %v7081_v53  ;;  %4678 = vmatmul.bf16.vlgmr.msra.gmra.mxu1 %v8192_v11  ;;  %v8199_v56 = vadd.f32 %v3668_v42, %v8175_v44  ;;  %v7128_v53 = vld [vmem:[#allocation3 + $0x1148] sm:$0xf]  ;;  %v7771_v44 = vld [vmem:[#allocation3 + $0x114c] sm:$0xf]  ;;  %v7001_v12 = vor.u32 %v7741_v34, %v7000_v0 }
 0x235   : > { %4722 = vmatpush.bf16.msrb.mxu1 %v7209_v2  ;;  %4691 = vmatmul.bf16.vlgmr.msra.gmra.mxu2 %v8190_v7  ;;  %v7149_v2 = vor.u32 %v7775_v58, %v7146_v59 }
 0x236   : > { %4735 = vmatpush.bf16.msrb.mxu2 %v7085_v3  ;;  %4704 = vmatmul.bf16.vlgmr.msra.gmra.mxu3 %v8192_v11 }
 0x237   : > { %4748 = vmatpush.bf16.msrb.mxu3 %v7213_v40 }
 0x238   : > { %4710 = vmatpush.bf16.msrb.mxu0 %v7065_v13  ;;  %v3680_v3 = vpop.f32.mrf.mxu2  ;;  %v3656_v18 = vpop.f32.mrf.mxu0  ;;  %v7129_v13 = vor.u32 %v7773_v20, %v7128_v53 }
 0x239   : > { %4723 = vmatpush.bf16.msrb.mxu1 %v7193_v14  ;;  %v3693_v40 = vpop.f32.mrf.mxu3  ;;  %v3669_v8 = vpop.f32.mrf.mxu1  ;;  %v7005_v14 = vor.u32 %v7739_v6, %v7002_v39 }
 0x23a   : > { %4736 = vmatpush.bf16.msrb.mxu2 %v7069_v48  ;;  %v3694_v60 = vadd.f32 %v3693_v40, %v3680_v3  ;;  %v6984_v48 = vld [vmem:[#allocation3 + $0x1028] sm:$0xf] }
 0x23b   : > { %4749 = vmatpush.bf16.msrb.mxu3 %v7197_v29  ;;  %v7133_v29 = vor.u32 %v7771_v44, %v7130_v55 }
 0x23c   : > { %4711 = vmatpush.bf16.msrb.mxu0 %v7049_v19  ;;  %v3750_v21 = vadd.f32 %v3694_v60, %v8178_v5  ;;  %v6985_v19 = vor.u32 %v7737_v15, %v6984_v48  ;;  %v6970_v5 = vld [vmem:[#allocation3 + $0x1018] sm:$0xf0] }
 0x23d   : > { %4724 = vmatpush.bf16.msrb.mxu1 %v7177_v28  ;;  %v7113_v28 = vor.u32 %v7769_v22, %v7112_v17  ;;  %v6973_v42 = vor.u32 %v7731_v37, %v6970_v5  ;;  %v4765_v17 = vld [vmem:[#allocation5] sm:$0xf] }
 0x23e   : > { %4737 = vmatpush.bf16.msrb.mxu2 %v7053_v61  ;;  %v6989_v61 = vor.u32 %v7735_v23, %v6986_v46  ;;  %v4767_v22 = vperm.slane %v4765_v17, 0 }
 0x23f   : > { %4750 = vmatpush.bf16.msrb.mxu3 %v7181_v33  ;;  %v7117_v33 = vor.u32 %v7767_v24, %v7114_v26  ;;  %v4768_v26 = vperm.slane %v4765_v17, 1 }
 0x240   : > { %4712 = vmatpush.bf16.msrb.mxu0 %v7033_v41  ;;  %v3682_v38 = vpop.f32.mrf.mxu2  ;;  %v7097_v41 = vor.u32 %v7765_v36, %v7096_v32 }
 0x241   : > { %4725 = vmatpush.bf16.msrb.mxu1 %v7161_v47  ;;  %v3695_v45 = vpop.f32.mrf.mxu3  ;;  %v7101_v47 = vor.u32 %v7763_v1, %v7098_v43 }
 0x242   : > { %4738 = vmatpush.bf16.msrb.mxu2 %v7037_v49 }
 0x243   : > { %4751 = vmatpush.bf16.msrb.mxu3 %v7165_v35 }
 0x244   : > { %4713 = vmatpush.bf16.msrb.mxu0 %v7017_v27 }
 0x245   : > { %4726 = vmatpush.bf16.msrb.mxu1 %v7145_v62 }
 0x246   : > { %4739 = vmatpush.bf16.msrb.mxu2 %v7021_v63 }
 0x247   : > { %4752 = vmatpush.bf16.msrb.mxu3 %v7149_v2 }
 0x248   : > { %4714 = vmatpush.bf16.msrb.mxu0 %v7001_v12 }
 0x249   : > { %4727 = vmatpush.bf16.msrb.mxu1 %v7129_v13 }
 0x24a   : > { %4740 = vmatpush.bf16.msrb.mxu2 %v7005_v14 }
 0x24b   : > { %4753 = vmatpush.bf16.msrb.mxu3 %v7133_v29 }
 0x24c   : > { %4715 = vmatpush.bf16.msrb.mxu0 %v6985_v19 }
 0x24d   : > { %4728 = vmatpush.bf16.msrb.mxu1 %v7113_v28 }
 0x24e   : > { %4741 = vmatpush.bf16.msrb.mxu2 %v6989_v61 }
 0x24f   : > { %4754 = vmatpush.bf16.msrb.mxu3 %v7117_v33 }
 0x250   : > { %4716 = vmatpush.bf16.msrb.mxu0 %v6969_v16  ;;  %v3706_v49 = vpop.f32.mrf.mxu0  ;;  %v4769_v16 = vperm.slane %v4765_v17, 2 }
 0x251   : > { %4729 = vmatpush.bf16.msrb.mxu1 %v7097_v41  ;;  %v3719_v57 = vpop.f32.mrf.mxu1 }
 0x252   : > { %4742 = vmatpush.bf16.msrb.mxu2 %v6973_v42  ;;  %v3720_v50 = vadd.f32 %v3719_v57, %v3706_v49 }
 0x253   : > { %4755 = vmatpush.bf16.msrb.mxu3 %v7101_v47  ;;  %4717 = vmatmul.bf16.vlgmr.msrb.gmra.mxu0 %v8190_v7 }
 0x254   : > { %4730 = vmatmul.bf16.vlgmr.msrb.gmra.mxu1 %v8192_v11  ;;  %v3751_v51 = vadd.f32 %v3720_v50, %v8185_v52 }
 0x255   : > { %4743 = vmatmul.bf16.vlgmr.msrb.gmra.mxu2 %v8190_v7 }
 0x256   : > { %4756 = vmatmul.bf16.vlgmr.msrb.gmra.mxu3 %v8192_v11 }
 0x258   : > { %v3732_v35 = vpop.f32.mrf.mxu2  ;;  %v3708_v10 = vpop.f32.mrf.mxu0 }
 0x259   : > { %v3745_v54 = vpop.f32.mrf.mxu3  ;;  %v3721_v58 = vpop.f32.mrf.mxu1 }
 0x25a   : > { %v3746_v30 = vadd.f32 %v3745_v54, %v3732_v35 }
 0x25c   : > { %v3752_v59 = vadd.f32 %v3746_v30, %v8188_v4 }
 0x260   : > { %v3734_v27 = vpop.f32.mrf.mxu2 }
 0x261   : > { %v3747_v62 = vpop.f32.mrf.mxu3 }
 0x270   : > { %v4165_v63 = vpop.f32.mrf.mxu0 }
 0x271   : > { %v4178_v0 = vpop.f32.mrf.mxu1 }
 0x272   : > { %v4179_v34 = vadd.f32 %v4178_v0, %v4165_v63 }
 0x274   : > { %v4260_v7 = vadd.f32 %v4179_v34, %v8199_v56 }
 0x278   : > { %v4191_v11 = vpop.f32.mrf.mxu2  ;;  %v4167_v2 = vpop.f32.mrf.mxu0 }
 0x279   : > { %v4204_v53 = vpop.f32.mrf.mxu3  ;;  %v4180_v20 = vpop.f32.mrf.mxu1 }
 0x27a   : > { %v4205_v3 = vadd.f32 %v4204_v53, %v4191_v11  ;;  %v4813_v11 = vld [vmem:[%s197_s7] sm:$0xf] }
 0x27c   : > { %v4261_v52 = vadd.f32 %v4205_v3, %v3750_v21 }
 0x280   : > { %v4193_v6 = vpop.f32.mrf.mxu2 }
 0x281   : > { %v4206_v39 = vpop.f32.mrf.mxu3 }
 0x290   : > { %v4217_v40 = vpop.f32.mrf.mxu0 }
 0x291   : > { %v4230_v44 = vpop.f32.mrf.mxu1 }
 0x292   : > { %v4231_v55 = vadd.f32 %v4230_v44, %v4217_v40 }
 0x294   : > { %v4262_v18 = vadd.f32 %v4231_v55, %v3751_v51  ;;  %v4770_v51 = vperm.slane %v4765_v17, 3 }
 0x298   : > { %v4243_v4 = vpop.f32.mrf.mxu2  ;;  %v4219_v12 = vpop.f32.mrf.mxu0 }
 0x299   : > { %v4256_v60 = vpop.f32.mrf.mxu3  ;;  %v4232_v8 = vpop.f32.mrf.mxu1 }
 0x29a   : > { %v4257_v43 = vadd.f32 %v4256_v60, %v4243_v4 }
 0x29c   : > { %v4263_v49 = vadd.f32 %v4257_v43, %v3752_v59 }
 0x2a0   : > { %v4245_v13 = vpop.f32.mrf.mxu2 }
 0x2a1   : > { %v4258_v14 = vpop.f32.mrf.mxu3 }
 0x2b0   : > { %v4666_v48 = vpop.f32.mrf.mxu0 }
 0x2b1   : > { %v4679_v56 = vpop.f32.mrf.mxu1 }
 0x2b2   : > { %v4680_v15 = vadd.f32 %v4679_v56, %v4666_v48 }
 0x2b4   : > { %v4761_v29 = vadd.f32 %v4680_v15, %v4260_v7 }
 0x2b6   : > { %v4775_v28 = vadd.f32 %v4767_v22, %v4761_v29 }
 0x2b8   : > { %v4692_v23 = vpop.f32.mrf.mxu2  ;;  %v4668_v46 = vpop.f32.mrf.mxu0  ;;  %v4779_v31 = vmax.f32 %v4775_v28, 0.0 }
 0x2b9   : > { %v4705_v21 = vpop.f32.mrf.mxu3  ;;  %v4681_v19 = vpop.f32.mrf.mxu1 }
 0x2ba   : > { %v4706_v24 = vadd.f32 %v4705_v21, %v4692_v23 }
 0x2bc   : > { %v4762_v61 = vadd.f32 %v4706_v24, %v4261_v52 }
 0x2be   : > { %v4776_v25 = vadd.f32 %v4768_v26, %v4762_v61 }
 0x2c0   : > { %v4780_v32 = vmax.f32 %v4776_v25, 0.0  ;;  %v4694_v33 = vpop.f32.mrf.mxu2 }
 0x2c1   : > { %v4707_v36 = vpop.f32.mrf.mxu3 }
 0x2c2   : > { %v4783_v37 = vpack.c.bf16 %v4780_v32, %v4779_v31 }
 0x2c4   : > { %v4787_v63 = vrot.slane %v4783_v37, 3 }
 0x2c6   : > { %v4793_v53 = vsel %vm4790_vm10, %v4783_v37, %v4787_v63 }
 0x2d0   : > { %v4718_v5 = vpop.f32.mrf.mxu0 }
 0x2d1   : > { %v4731_v38 = vpop.f32.mrf.mxu1 }
 0x2d2   : > { %v4732_v1 = vadd.f32 %v4731_v38, %v4718_v5 }
 0x2d4   : > { %v4763_v45 = vadd.f32 %v4732_v1, %v4262_v18 }
 0x2d6   : > { %v4777_v54 = vadd.f32 %v4769_v16, %v4763_v45 }
 0x2d8   : > { %v4744_v41 = vpop.f32.mrf.mxu2  ;;  %v4720_v47 = vpop.f32.mrf.mxu0  ;;  %v4781_v58 = vmax.f32 %v4777_v54, 0.0 }
 0x2d9   : > { %v4757_v42 = vpop.f32.mrf.mxu3  ;;  %v4733_v35 = vpop.f32.mrf.mxu1 }
 0x2da   : > { %v4758_v50 = vadd.f32 %v4757_v42, %v4744_v41 }
 0x2dc   : > { %v4764_v10 = vadd.f32 %v4758_v50, %v4263_v49 }
 0x2de   : > { %v4778_v30 = vadd.f32 %v4770_v51, %v4764_v10 }
 0x2e0   : > { %v4782_v59 = vmax.f32 %v4778_v30, 0.0  ;;  %v4746_v27 = vpop.f32.mrf.mxu2 }
 0x2e1   : > { %v4759_v62 = vpop.f32.mrf.mxu3 }
 0x2e2   : > { %v4784_v0 = vpack.c.bf16 %v4782_v59, %v4781_v58 }
 0x2e4   : > { %v4788_v34 = vrot.slane %v4784_v0, 6  ;;  %v4789_v7 = vrot.slane %v4784_v0, 1 }
 0x2e6   : > { %v4797_v2 = vsel %vm207_vm0, %v4788_v34, %v4789_v7 }
 0x2e7   : > { %v4799_v3 = vsel %vm4798_vm4, %v4793_v53, %v4797_v2 }
 0x2e8   : > { %v4814_v9 = vsel %vm4812_vm5, %v4799_v3, %v4813_v11 }
 0x2e9   : > { %4815 = vst [vmem:[%s197_s7] sm:$0xf] %v4814_v9 }
 0x2ea PF: > { %s15_s12 = sadd.s32 1, %s7900_s12  }
 0x2eb   : > { %p12_p7 = scmp.ge.s32.totalorder %s15_s12, 4  }
 0x2ed   :  { %14 = sbr.rel (!%p12_p7) target bundleno = 2 (0x2), region = 80 }
 0x2f2   :  { %4835 = vsyncpa [#allocation4], 1 }
 0x2f3   :  { %4837 = vsyncpa [#allocation4 + $0x1], 1 }
 0x2f4   :  { %4838 = vsyncpa [#allocation6], 1 }

// kernel: vgg_forward.9
= control target key start
LH: loop header
LB: loop body
LE: loop exit
PB: predicated region body
PF: predicated region fallthrough
CT: control target
= control target key end

     0   :  { %12 = vsyncpa [#allocation3], 0  ;;  %s4275_s0 = inlined_call_operand.vmem [shape: bf16[2,512], index: 0, kind: input, shape index: {}]   ;;  %s4276_s1 = inlined_call_operand.hbm [shape: bf16[512,512], index: 1, kind: input, shape index: {}]   ;;  %s4277_s2 = inlined_call_operand.hbm [shape: f32[1,512], index: 2, kind: input, shape index: {}]   ;;  %s4278_s3 = inlined_call_operand.hbm [shape: bf16[512,512], index: 3, kind: input, shape index: {}]   ;;  %s4279_s4 = inlined_call_operand.hbm [shape: f32[1,512], index: 4, kind: input, shape index: {}]   ;;  %s4280_s5 = inlined_call_operand.vmem [shape: bf16[512,10], index: 5, kind: input, shape index: {}]   ;;  %s4281_s6 = inlined_call_operand.hbm [shape: f32[1,10], index: 6, kind: input, shape index: {}]   ;;  %s4282_s7 = inlined_call_operand.hbm [shape: f32[2,10], index: 7, kind: output, shape index: {}]  }
   0x1   :  { %13 = vsyncpa [#allocation6], 0 }
   0x2   :  { %14 = vsyncpa [#allocation9], 0  ;;  %s36_s26 = sshll.u32 %s4277_s2, 4  ;;  %s37_s26 = int_to_ptr.hbm [resolvable:$true] %s36_s26 }
   0x3   :  { %15 = vsyncpa [#allocation4], 0  ;;  %s4032_s27 = smov [#allocation5]   ;;  %s60_s8 = sshll.u32 %s4279_s4, 4  ;;  %s61_s8 = int_to_ptr.hbm [resolvable:$true] %s60_s8 }
   0x4   :  { %s38_s28 = sshll.u32 %s4032_s27, 4  ;;  %s4033_s9 = smov [#allocation8]   ;;  %s39_s28 = int_to_ptr.vmem [resolvable:$true] %s38_s28 }
   0x5   :  { %41 = dma.hbm_to_vmem [thread:$0]  %s37_s26, 64, %s39_s28, [#allocation6]  }
   0x6   :  { %s62_s10 = sshll.u32 %s4033_s9, 4  ;;  %s22_s13 = sshll.u32 %s4276_s1, 4  ;;  %s63_s10 = int_to_ptr.vmem [resolvable:$true] %s62_s10  ;;  %s23_s13 = int_to_ptr.hbm [resolvable:$true] %s22_s13 }
   0x7   :  { %65 = dma.hbm_to_vmem [thread:$0]  %s61_s8, 64, %s63_s10, [#allocation9]  }
   0x8   :  { %s4034_s2 = smov [#allocation2]   ;;  %s46_s17 = sshll.u32 %s4278_s3, 4  ;;  %s47_s17 = int_to_ptr.hbm [resolvable:$true] %s46_s17 }
   0x9   :  { %s24_s14 = sshll.u32 %s4034_s2, 4  ;;  %s4035_s18 = smov 256   ;;  %s25_s14 = int_to_ptr.vmem [resolvable:$true] %s24_s14 }
   0xa   :  { %s4036_s4 = smov 16   ;;  %s4037_s19 = smov [#allocation7]  }
   0xb   :  { %30 = dma.hbm_to_vmem [thread:$0]  %s23_s13, 16384, %s25_s14, [#allocation3], %s4035_s18, %s4035_s18, %s4036_s4  }
   0xc   :  { %s48_s20 = sshll.u32 %s4037_s19, 4  ;;  %s73_s1 = sshll.u32 %s4281_s6, 4  ;;  %s49_s20 = int_to_ptr.vmem [resolvable:$true] %s48_s20  ;;  %s74_s1 = int_to_ptr.hbm [resolvable:$true] %s73_s1 }
   0xd   :  { %54 = dma.hbm_to_vmem [thread:$0]  %s47_s17, 16384, %s49_s20, [#allocation6], %s4035_s18, %s4035_s18, %s4036_s4  }
   0xe   :  { %s4038_s23 = smov [#allocation10]  }
   0xf   :  { %s75_s24 = sshll.u32 %s4038_s23, 4  ;;  %s76_s24 = int_to_ptr.vmem [resolvable:$true] %s75_s24 }
  0x10   :  { %78 = dma.hbm_to_vmem [thread:$0]  %s74_s1, 16, %s76_s24, [#allocation9]  }
  0x11   :  { %4024 = dma.done.wait [#allocation3], 16384  }
  0x12   :  { %4025 = vsyncadd [#allocation3], 4294950912 }
  0x13   :  { %4026 = dma.done.wait [#allocation6], 16448  }
  0x14   :  { %4027 = vsyncadd [#allocation6], 4294950848 }
  0x15   :  { %4028 = dma.done.wait [#allocation9], 80  }
  0x16   :  { %4029 = vsyncadd [#allocation9], 4294967216  ;;  %v2545_v0 = vld [vmem:[#allocation2 + $0xe0] sm:$0xf]  ;;  %v3613_v1 = vld [vmem:[#allocation2 + $0xec] sm:$0xf0] }
  0x17   :  { %v2673_v2 = vld [vmem:[#allocation2 + $0x1e0] sm:$0xf]  ;;  %v2546_v3 = vor.u32 %v3613_v1, %v2545_v0  ;;  %v3645_v4 = vld [vmem:[#allocation2 + $0x1ec] sm:$0xf0]  ;;  %s2419_s10 = sshll.u32 %s4282_s7, 4  ;;  %vm2410_vm0 = vcmask 74752   ;;  %s2420_s10 = int_to_ptr.hbm [resolvable:$true] %s2419_s10 }
  0x18   :  { %v2801_v5 = vld [vmem:[#allocation2 + $0x2e0] sm:$0xf]  ;;  %v3677_v6 = vld [vmem:[#allocation2 + $0x2ec] sm:$0xf0]  ;;  %v2674_v7 = vor.u32 %v3645_v4, %v2673_v2 }
  0x19   :  { %v2802_v8 = vor.u32 %v3677_v6, %v2801_v5  ;;  %v2929_v9 = vld [vmem:[#allocation2 + $0x3e0] sm:$0xf]  ;;  %v3709_v10 = vld [vmem:[#allocation2 + $0x3ec] sm:$0xf0]  ;;  %888 = vmatpush.bf16.msra.mxu0 %v2546_v3 }
  0x1a   :  { %v2529_v11 = vld [vmem:[#allocation2 + $0xc0] sm:$0xf]  ;;  %v2930_v12 = vor.u32 %v3709_v10, %v2929_v9  ;;  %v3609_v13 = vld [vmem:[#allocation2 + $0xcc] sm:$0xf0]  ;;  %901 = vmatpush.bf16.msra.mxu1 %v2674_v7 }
  0x1b   :  { %v2657_v14 = vld [vmem:[#allocation2 + $0x1c0] sm:$0xf]  ;;  %v3641_v15 = vld [vmem:[#allocation2 + $0x1cc] sm:$0xf0]  ;;  %914 = vmatpush.bf16.msra.mxu2 %v2802_v8  ;;  %v2530_v16 = vor.u32 %v3609_v13, %v2529_v11 }
  0x1c   :  { %v2658_v17 = vor.u32 %v3641_v15, %v2657_v14  ;;  %v2785_v18 = vld [vmem:[#allocation2 + $0x2c0] sm:$0xf]  ;;  %v3673_v19 = vld [vmem:[#allocation2 + $0x2cc] sm:$0xf0]  ;;  %927 = vmatpush.bf16.msra.mxu3 %v2930_v12 }
  0x1d   :  { %v2913_v20 = vld [vmem:[#allocation2 + $0x3c0] sm:$0xf]  ;;  %v2786_v21 = vor.u32 %v3673_v19, %v2785_v18  ;;  %v3705_v22 = vld [vmem:[#allocation2 + $0x3cc] sm:$0xf0]  ;;  %889 = vmatpush.bf16.msra.mxu0 %v2530_v16 }
  0x1e   :  { %v2513_v23 = vld [vmem:[#allocation2 + $0xa0] sm:$0xf]  ;;  %v3605_v24 = vld [vmem:[#allocation2 + $0xac] sm:$0xf0]  ;;  %v2914_v25 = vor.u32 %v3705_v22, %v2913_v20  ;;  %902 = vmatpush.bf16.msra.mxu1 %v2658_v17 }
  0x1f   :  { %v2641_v26 = vld [vmem:[#allocation2 + $0x1a0] sm:$0xf]  ;;  %v3637_v27 = vld [vmem:[#allocation2 + $0x1ac] sm:$0xf0]  ;;  %v2514_v29 = vor.u32 %v3605_v24, %v2513_v23  ;;  %915 = vmatpush.bf16.msra.mxu2 %v2786_v21 }
  0x20   :  { %v2769_v28 = vld [vmem:[#allocation2 + $0x2a0] sm:$0xf]  ;;  %v3669_v30 = vld [vmem:[#allocation2 + $0x2ac] sm:$0xf0]  ;;  %v2642_v33 = vor.u32 %v3637_v27, %v2641_v26  ;;  %928 = vmatpush.bf16.msra.mxu3 %v2914_v25  ;;  %v99_v25 = vld [vmem:[%s4275_s0] sm:$0xf] }
  0x21   :  { %v2897_v31 = vld [vmem:[#allocation2 + $0x3a0] sm:$0xf]  ;;  %v3701_v32 = vld [vmem:[#allocation2 + $0x3ac] sm:$0xf0]  ;;  %v2770_v34 = vor.u32 %v3669_v30, %v2769_v28  ;;  %890 = vmatpush.bf16.msra.mxu0 %v2514_v29  ;;  %239 = vst [vmem:[#allocation1] ss:$9 sm:$0xff] %v99_v25 }
  0x22   :  { %v2497_v35 = vld [vmem:[#allocation2 + $0x80] sm:$0xf]  ;;  %v3601_v36 = vld [vmem:[#allocation2 + $0x8c] sm:$0xf0]  ;;  %v2898_v38 = vor.u32 %v3701_v32, %v2897_v31  ;;  %903 = vmatpush.bf16.msra.mxu1 %v2642_v33  ;;  %v3611_v29 = vld [vmem:[#allocation2 + $0xe4] sm:$0xf] }
  0x23   :  { %v2625_v37 = vld [vmem:[#allocation2 + $0x180] sm:$0xf]  ;;  %v3633_v39 = vld [vmem:[#allocation2 + $0x18c] sm:$0xf0]  ;;  %v2498_v44 = vor.u32 %v3601_v36, %v2497_v35  ;;  %916 = vmatpush.bf16.msra.mxu2 %v2770_v34  ;;  %v2547_v30 = vld [vmem:[#allocation2 + $0xf0] sm:$0xf0] }
  0x24   :  { %v2753_v40 = vld [vmem:[#allocation2 + $0x280] sm:$0xf]  ;;  %v3665_v41 = vld [vmem:[#allocation2 + $0x28c] sm:$0xf0]  ;;  %v2626_v45 = vor.u32 %v3633_v39, %v2625_v37  ;;  %929 = vmatpush.bf16.msra.mxu3 %v2898_v38  ;;  %v3643_v31 = vld [vmem:[#allocation2 + $0x1e4] sm:$0xf] }
  0x25   :  { %v2881_v42 = vld [vmem:[#allocation2 + $0x380] sm:$0xf]  ;;  %v3697_v43 = vld [vmem:[#allocation2 + $0x38c] sm:$0xf0]  ;;  %v2754_v46 = vor.u32 %v3665_v41, %v2753_v40  ;;  %891 = vmatpush.bf16.msra.mxu0 %v2498_v44  ;;  %v2675_v33 = vld [vmem:[#allocation2 + $0x1f0] sm:$0xf0]  ;;  %v2550_v41 = vor.u32 %v3611_v29, %v2547_v30 }
  0x26   :  { %v2481_v47 = vld [vmem:[#allocation2 + $0x60] sm:$0xf]  ;;  %v3597_v48 = vld [vmem:[#allocation2 + $0x6c] sm:$0xf0]  ;;  %v2882_v50 = vor.u32 %v3697_v43, %v2881_v42  ;;  %904 = vmatpush.bf16.msra.mxu1 %v2626_v45  ;;  %v3675_v34 = vld [vmem:[#allocation2 + $0x2e4] sm:$0xf]  ;;  %v2678_v42 = vor.u32 %v3643_v31, %v2675_v33 }
  0x27   :  { %v2609_v49 = vld [vmem:[#allocation2 + $0x160] sm:$0xf]  ;;  %v3629_v51 = vld [vmem:[#allocation2 + $0x16c] sm:$0xf0]  ;;  %v2482_v56 = vor.u32 %v3597_v48, %v2481_v47  ;;  %917 = vmatpush.bf16.msra.mxu2 %v2754_v46  ;;  %v2803_v35 = vld [vmem:[#allocation2 + $0x2f0] sm:$0xf0] }
  0x28   :  { %v2737_v52 = vld [vmem:[#allocation2 + $0x260] sm:$0xf]  ;;  %v3661_v53 = vld [vmem:[#allocation2 + $0x26c] sm:$0xf0]  ;;  %v2610_v57 = vor.u32 %v3629_v51, %v2609_v49  ;;  %930 = vmatpush.bf16.msra.mxu3 %v2882_v50  ;;  %v3707_v38 = vld [vmem:[#allocation2 + $0x3e4] sm:$0xf]  ;;  %v2806_v43 = vor.u32 %v3675_v34, %v2803_v35 }
  0x29   :  { %v2865_v54 = vld [vmem:[#allocation2 + $0x360] sm:$0xf]  ;;  %v3693_v55 = vld [vmem:[#allocation2 + $0x36c] sm:$0xf0]  ;;  %v2738_v58 = vor.u32 %v3661_v53, %v2737_v52  ;;  %892 = vmatpush.bf16.msra.mxu0 %v2482_v56  ;;  %v2931_v39 = vld [vmem:[#allocation2 + $0x3f0] sm:$0xf0] }
  0x2a   :  { %v2465_v59 = vld [vmem:[#allocation2 + $0x40] sm:$0xf]  ;;  %v3593_v60 = vld [vmem:[#allocation2 + $0x4c] sm:$0xf0]  ;;  %v2866_v62 = vor.u32 %v3693_v55, %v2865_v54  ;;  %905 = vmatpush.bf16.msra.mxu1 %v2610_v57  ;;  %v3607_v44 = vld [vmem:[#allocation2 + $0xc4] sm:$0xf]  ;;  %v2934_v47 = vor.u32 %v3707_v38, %v2931_v39 }
  0x2b   :  { %v2593_v61 = vld [vmem:[#allocation2 + $0x140] sm:$0xf]  ;;  %v3625_v63 = vld [vmem:[#allocation2 + $0x14c] sm:$0xf0]  ;;  %v2466_v4 = vor.u32 %v3593_v60, %v2465_v59  ;;  %918 = vmatpush.bf16.msra.mxu2 %v2738_v58  ;;  %v2531_v45 = vld [vmem:[#allocation2 + $0xd0] sm:$0xf0] }
  0x2c   :  { %v2721_v0 = vld [vmem:[#allocation2 + $0x240] sm:$0xf]  ;;  %v3657_v1 = vld [vmem:[#allocation2 + $0x24c] sm:$0xf0]  ;;  %v2594_v5 = vor.u32 %v3625_v63, %v2593_v61  ;;  %931 = vmatpush.bf16.msra.mxu3 %v2866_v62  ;;  %v3639_v46 = vld [vmem:[#allocation2 + $0x1c4] sm:$0xf]  ;;  %v2534_v54 = vor.u32 %v3607_v44, %v2531_v45 }
  0x2d   :  { %v2849_v2 = vld [vmem:[#allocation2 + $0x340] sm:$0xf]  ;;  %v3689_v3 = vld [vmem:[#allocation2 + $0x34c] sm:$0xf0]  ;;  %v2722_v6 = vor.u32 %v3657_v1, %v2721_v0  ;;  %893 = vmatpush.bf16.msra.mxu0 %v2466_v4  ;;  %v2659_v48 = vld [vmem:[#allocation2 + $0x1d0] sm:$0xf0] }
  0x2e   :  { %v2449_v7 = vld [vmem:[#allocation2 + $0x20] sm:$0xf]  ;;  %v3589_v8 = vld [vmem:[#allocation2 + $0x2c] sm:$0xf0]  ;;  %v2850_v10 = vor.u32 %v3689_v3, %v2849_v2  ;;  %906 = vmatpush.bf16.msra.mxu1 %v2594_v5  ;;  %v3671_v49 = vld [vmem:[#allocation2 + $0x2c4] sm:$0xf]  ;;  %v2662_v58 = vor.u32 %v3639_v46, %v2659_v48 }
  0x2f   :  { %v2577_v9 = vld [vmem:[#allocation2 + $0x120] sm:$0xf]  ;;  %v3621_v11 = vld [vmem:[#allocation2 + $0x12c] sm:$0xf0]  ;;  %v2450_v17 = vor.u32 %v3589_v8, %v2449_v7  ;;  %919 = vmatpush.bf16.msra.mxu2 %v2722_v6  ;;  %v2787_v50 = vld [vmem:[#allocation2 + $0x2d0] sm:$0xf0] }
  0x30   :  { %v2705_v12 = vld [vmem:[#allocation2 + $0x220] sm:$0xf]  ;;  %v3653_v13 = vld [vmem:[#allocation2 + $0x22c] sm:$0xf0]  ;;  %v2578_v21 = vor.u32 %v3621_v11, %v2577_v9  ;;  %932 = vmatpush.bf16.msra.mxu3 %v2850_v10  ;;  %v3703_v52 = vld [vmem:[#allocation2 + $0x3c4] sm:$0xf]  ;;  %v2790_v59 = vor.u32 %v3671_v49, %v2787_v50 }
  0x31   :  { %v2833_v14 = vld [vmem:[#allocation2 + $0x320] sm:$0xf]  ;;  %v3685_v15 = vld [vmem:[#allocation2 + $0x32c] sm:$0xf0]  ;;  %v2706_v22 = vor.u32 %v3653_v13, %v2705_v12  ;;  %894 = vmatpush.bf16.msra.mxu0 %v2450_v17  ;;  %v2915_v53 = vld [vmem:[#allocation2 + $0x3d0] sm:$0xf0] }
  0x32   :  { %v2433_v16 = vld [vmem:[#allocation2] sm:$0xf]  ;;  %v3585_v18 = vld [vmem:[#allocation2 + $0xc] sm:$0xf0]  ;;  %v2834_v26 = vor.u32 %v3685_v15, %v2833_v14  ;;  %907 = vmatpush.bf16.msra.mxu1 %v2578_v21  ;;  %v4100_v55 = vld [vmem:[#allocation1] sm:$0xff]  ;;  %v2918_v63 = vor.u32 %v3703_v52, %v2915_v53 }
  0x33   :  { %v2561_v19 = vld [vmem:[#allocation2 + $0x100] sm:$0xf]  ;;  %v3617_v20 = vld [vmem:[#allocation2 + $0x10c] sm:$0xf0]  ;;  %v2434_v32 = vor.u32 %v3585_v18, %v2433_v16  ;;  %920 = vmatpush.bf16.msra.mxu2 %v2706_v22  ;;  %v3603_v57 = vld [vmem:[#allocation2 + $0xa4] sm:$0xf] }
  0x34   :  { %v2689_v23 = vld [vmem:[#allocation2 + $0x200] sm:$0xf]  ;;  %v3649_v24 = vld [vmem:[#allocation2 + $0x20c] sm:$0xf0]  ;;  %v2562_v36 = vor.u32 %v3617_v20, %v2561_v19  ;;  %933 = vmatpush.bf16.msra.mxu3 %v2834_v26  ;;  %v2515_v61 = vld [vmem:[#allocation2 + $0xb0] sm:$0xf0] }
  0x35   :  { %v2817_v27 = vld [vmem:[#allocation2 + $0x300] sm:$0xf]  ;;  %v3681_v28 = vld [vmem:[#allocation2 + $0x30c] sm:$0xf0]  ;;  %v2690_v37 = vor.u32 %v3649_v24, %v2689_v23  ;;  %895 = vmatpush.bf16.msra.mxu0 %v2434_v32  ;;  %v3635_v62 = vld [vmem:[#allocation2 + $0x1a4] sm:$0xf]  ;;  %v2518_v5 = vor.u32 %v3603_v57, %v2515_v61 }
  0x36   :  { %v2818_v40 = vor.u32 %v3681_v28, %v2817_v27  ;;  %908 = vmatpush.bf16.msra.mxu1 %v2562_v36  ;;  %v4098_v51 = vld [vmem:[#allocation1 + $0x12] sm:$0xff]  ;;  %v4102_v56 = vld [vmem:[#allocation1 + $0x1b] sm:$0xff]  ;;  %v4104_v60 = vld [vmem:[#allocation1 + $0x9] sm:$0xff] }
  0x37   :  { %921 = vmatpush.bf16.msra.mxu2 %v2690_v37  ;;  %v2643_v0 = vld [vmem:[#allocation2 + $0x1b0] sm:$0xf0]  ;;  %v3667_v1 = vld [vmem:[#allocation2 + $0x2a4] sm:$0xf] }
  0x38   :  { %934 = vmatpush.bf16.msra.mxu3 %v2818_v40  ;;  %v2771_v2 = vld [vmem:[#allocation2 + $0x2b0] sm:$0xf0]  ;;  %896 = vmatmul.bf16.vlgmr.msra.gmra.mxu0 %v4100_v55  ;;  %v3699_v3 = vld [vmem:[#allocation2 + $0x3a4] sm:$0xf]  ;;  %v2646_v6 = vor.u32 %v3635_v62, %v2643_v0 }
  0x39   :  { %940 = vmatpush.bf16.msrb.mxu0 %v2550_v41  ;;  %v2899_v4 = vld [vmem:[#allocation2 + $0x3b0] sm:$0xf0]  ;;  %909 = vmatmul.bf16.vlgmr.msra.gmra.mxu1 %v4104_v60  ;;  %v2774_v7 = vor.u32 %v3667_v1, %v2771_v2  ;;  %v3599_v8 = vld [vmem:[#allocation2 + $0x84] sm:$0xf] }
  0x3a   :  { %953 = vmatpush.bf16.msrb.mxu1 %v2678_v42  ;;  %922 = vmatmul.bf16.vlgmr.msra.gmra.mxu2 %v4098_v51  ;;  %v2499_v9 = vld [vmem:[#allocation2 + $0x90] sm:$0xf0]  ;;  %v3631_v10 = vld [vmem:[#allocation2 + $0x184] sm:$0xf]  ;;  %v2902_v11 = vor.u32 %v3699_v3, %v2899_v4 }
  0x3b   :  { %966 = vmatpush.bf16.msrb.mxu2 %v2806_v43  ;;  %935 = vmatmul.bf16.vlgmr.msra.gmra.mxu3 %v4102_v56  ;;  %v2627_v12 = vld [vmem:[#allocation2 + $0x190] sm:$0xf0]  ;;  %v3663_v13 = vld [vmem:[#allocation2 + $0x284] sm:$0xf]  ;;  %v2502_v17 = vor.u32 %v3599_v8, %v2499_v9  ;;  %v3646_v9 = vld [vmem:[#allocation2 + $0x1f4] sm:$0xf0] }
  0x3c   :  { %979 = vmatpush.bf16.msrb.mxu3 %v2934_v47  ;;  %v2755_v14 = vld [vmem:[#allocation2 + $0x290] sm:$0xf0]  ;;  %v3695_v15 = vld [vmem:[#allocation2 + $0x384] sm:$0xf]  ;;  %v2630_v18 = vor.u32 %v3631_v10, %v2627_v12  ;;  %v2809_v10 = vld [vmem:[#allocation2 + $0x2e8] sm:$0xf] }
  0x3d   :  { %941 = vmatpush.bf16.msrb.mxu0 %v2534_v54  ;;  %v2883_v16 = vld [vmem:[#allocation2 + $0x390] sm:$0xf0]  ;;  %v2758_v19 = vor.u32 %v3663_v13, %v2755_v14  ;;  %v3595_v20 = vld [vmem:[#allocation2 + $0x64] sm:$0xf]  ;;  %v2937_v14 = vld [vmem:[#allocation2 + $0x3e8] sm:$0xf] }
  0x3e   :  { %954 = vmatpush.bf16.msrb.mxu1 %v2662_v58  ;;  %v2483_v21 = vld [vmem:[#allocation2 + $0x70] sm:$0xf0]  ;;  %v3627_v22 = vld [vmem:[#allocation2 + $0x164] sm:$0xf]  ;;  %v2886_v23 = vor.u32 %v3695_v15, %v2883_v16  ;;  %v3710_v15 = vld [vmem:[#allocation2 + $0x3f4] sm:$0xf0] }
  0x3f   :  { %967 = vmatpush.bf16.msrb.mxu2 %v2790_v59  ;;  %v2611_v24 = vld [vmem:[#allocation2 + $0x170] sm:$0xf0]  ;;  %v3659_v25 = vld [vmem:[#allocation2 + $0x264] sm:$0xf]  ;;  %v2486_v29 = vor.u32 %v3595_v20, %v2483_v21  ;;  %v2537_v20 = vld [vmem:[#allocation2 + $0xc8] sm:$0xf] }
  0x40   :  { %980 = vmatpush.bf16.msrb.mxu3 %v2918_v63  ;;  %v2739_v26 = vld [vmem:[#allocation2 + $0x270] sm:$0xf0]  ;;  %v3691_v27 = vld [vmem:[#allocation2 + $0x364] sm:$0xf]  ;;  %v2614_v30 = vor.u32 %v3627_v22, %v2611_v24  ;;  %v3610_v21 = vld [vmem:[#allocation2 + $0xd4] sm:$0xf0] }
  0x41   :  { %942 = vmatpush.bf16.msrb.mxu0 %v2518_v5  ;;  %v2867_v28 = vld [vmem:[#allocation2 + $0x370] sm:$0xf0]  ;;  %v2742_v31 = vor.u32 %v3659_v25, %v2739_v26  ;;  %v3591_v32 = vld [vmem:[#allocation2 + $0x44] sm:$0xf]  ;;  %v2553_v5 = vld [vmem:[#allocation2 + $0xe8] sm:$0xf] }
  0x42   :  { %955 = vmatpush.bf16.msrb.mxu1 %v2646_v6  ;;  %v2467_v33 = vld [vmem:[#allocation2 + $0x50] sm:$0xf0]  ;;  %v3623_v34 = vld [vmem:[#allocation2 + $0x144] sm:$0xf]  ;;  %v2870_v35 = vor.u32 %v3691_v27, %v2867_v28  ;;  %v3614_v6 = vld [vmem:[#allocation2 + $0xf4] sm:$0xf0] }
  0x43   :  { %968 = vmatpush.bf16.msrb.mxu2 %v2774_v7  ;;  %v2595_v36 = vld [vmem:[#allocation2 + $0x150] sm:$0xf0]  ;;  %v3655_v37 = vld [vmem:[#allocation2 + $0x244] sm:$0xf]  ;;  %v2470_v41 = vor.u32 %v3591_v32, %v2467_v33  ;;  %v2681_v7 = vld [vmem:[#allocation2 + $0x1e8] sm:$0xf] }
  0x44   :  { %981 = vmatpush.bf16.msrb.mxu3 %v2902_v11  ;;  %v2723_v38 = vld [vmem:[#allocation2 + $0x250] sm:$0xf0]  ;;  %v3687_v39 = vld [vmem:[#allocation2 + $0x344] sm:$0xf]  ;;  %v2598_v42 = vor.u32 %v3623_v34, %v2595_v36  ;;  %v3678_v11 = vld [vmem:[#allocation2 + $0x2f4] sm:$0xf0] }
  0x45   :  { %943 = vmatpush.bf16.msrb.mxu0 %v2502_v17  ;;  %v2851_v40 = vld [vmem:[#allocation2 + $0x350] sm:$0xf0]  ;;  %v2726_v43 = vor.u32 %v3655_v37, %v2723_v38  ;;  %v3587_v44 = vld [vmem:[#allocation2 + $0x24] sm:$0xf]  ;;  %v2554_v17 = vor.u32 %v3614_v6, %v2553_v5  ;;  %v2665_v22 = vld [vmem:[#allocation2 + $0x1c8] sm:$0xf] }
  0x46   :  { %956 = vmatpush.bf16.msrb.mxu1 %v2630_v18  ;;  %v2451_v45 = vld [vmem:[#allocation2 + $0x30] sm:$0xf0]  ;;  %v3619_v46 = vld [vmem:[#allocation2 + $0x124] sm:$0xf]  ;;  %v2854_v47 = vor.u32 %v3687_v39, %v2851_v40  ;;  %v2682_v18 = vor.u32 %v3646_v9, %v2681_v7  ;;  %v3642_v24 = vld [vmem:[#allocation2 + $0x1d4] sm:$0xf0] }
  0x47   :  { %969 = vmatpush.bf16.msrb.mxu2 %v2758_v19  ;;  %v2579_v48 = vld [vmem:[#allocation2 + $0x130] sm:$0xf0]  ;;  %v3651_v49 = vld [vmem:[#allocation2 + $0x224] sm:$0xf]  ;;  %v2454_v54 = vor.u32 %v3587_v44, %v2451_v45  ;;  %v2810_v19 = vor.u32 %v3678_v11, %v2809_v10  ;;  %v2793_v25 = vld [vmem:[#allocation2 + $0x2c8] sm:$0xf] }
  0x48   :  { %982 = vmatpush.bf16.msrb.mxu3 %v2886_v23  ;;  %v2707_v50 = vld [vmem:[#allocation2 + $0x230] sm:$0xf0]  ;;  %v3683_v52 = vld [vmem:[#allocation2 + $0x324] sm:$0xf]  ;;  %v2582_v59 = vor.u32 %v3619_v46, %v2579_v48  ;;  %v2938_v23 = vor.u32 %v3710_v15, %v2937_v14  ;;  %v3674_v26 = vld [vmem:[#allocation2 + $0x2d4] sm:$0xf0] }
  0x49   :  { %944 = vmatpush.bf16.msrb.mxu0 %v2486_v29  ;;  %v2835_v53 = vld [vmem:[#allocation2 + $0x330] sm:$0xf0]  ;;  %v3583_v57 = vld [vmem:[#allocation2 + $0x4] sm:$0xf]  ;;  %v2710_v61 = vor.u32 %v3651_v49, %v2707_v50  ;;  %v2921_v27 = vld [vmem:[#allocation2 + $0x3c8] sm:$0xf]  ;;  %v2538_v29 = vor.u32 %v3610_v21, %v2537_v20 }
  0x4a   :  { %957 = vmatpush.bf16.msrb.mxu1 %v2614_v30  ;;  %v2435_v58 = vld [vmem:[#allocation2 + $0x10] sm:$0xf0]  ;;  %v3615_v62 = vld [vmem:[#allocation2 + $0x104] sm:$0xf]  ;;  %v2838_v1 = vor.u32 %v3683_v52, %v2835_v53  ;;  %v3706_v28 = vld [vmem:[#allocation2 + $0x3d4] sm:$0xf0]  ;;  %v2666_v30 = vor.u32 %v3642_v24, %v2665_v22 }
  0x4b   :  { %970 = vmatpush.bf16.msrb.mxu2 %v2742_v31  ;;  %v2563_v63 = vld [vmem:[#allocation2 + $0x110] sm:$0xf0]  ;;  %v3647_v0 = vld [vmem:[#allocation2 + $0x204] sm:$0xf]  ;;  %v2438_v8 = vor.u32 %v3583_v57, %v2435_v58  ;;  %v2794_v31 = vor.u32 %v3674_v26, %v2793_v25  ;;  %v2521_v32 = vld [vmem:[#allocation2 + $0xa8] sm:$0xf] }
  0x4c   :  { %983 = vmatpush.bf16.msrb.mxu3 %v2870_v35  ;;  %v2691_v2 = vld [vmem:[#allocation2 + $0x210] sm:$0xf0]  ;;  %v3679_v3 = vld [vmem:[#allocation2 + $0x304] sm:$0xf]  ;;  %v2566_v12 = vor.u32 %v3615_v62, %v2563_v63  ;;  %v3606_v33 = vld [vmem:[#allocation2 + $0xb4] sm:$0xf0]  ;;  %v2922_v35 = vor.u32 %v3706_v28, %v2921_v27 }
  0x4d   :  { %945 = vmatpush.bf16.msrb.mxu0 %v2470_v41  ;;  %v2819_v4 = vld [vmem:[#allocation2 + $0x310] sm:$0xf0]  ;;  %v2694_v13 = vor.u32 %v3647_v0, %v2691_v2  ;;  %v2649_v34 = vld [vmem:[#allocation2 + $0x1a8] sm:$0xf]  ;;  %v3638_v36 = vld [vmem:[#allocation2 + $0x1b4] sm:$0xf0]  ;;  %v2522_v41 = vor.u32 %v3606_v33, %v2521_v32 }
  0x4e   :  { %958 = vmatpush.bf16.msrb.mxu1 %v2598_v42  ;;  %v2822_v16 = vor.u32 %v3679_v3, %v2819_v4  ;;  %v2777_v37 = vld [vmem:[#allocation2 + $0x2a8] sm:$0xf]  ;;  %v3670_v38 = vld [vmem:[#allocation2 + $0x2b4] sm:$0xf0]  ;;  %v2650_v42 = vor.u32 %v3638_v36, %v2649_v34 }
  0x4f   :  { %971 = vmatpush.bf16.msrb.mxu2 %v2726_v43  ;;  %v2905_v39 = vld [vmem:[#allocation2 + $0x3a8] sm:$0xf]  ;;  %v3702_v40 = vld [vmem:[#allocation2 + $0x3b4] sm:$0xf0]  ;;  %v2778_v43 = vor.u32 %v3670_v38, %v2777_v37 }
  0x50   :  { %984 = vmatpush.bf16.msrb.mxu3 %v2854_v47  ;;  %v2505_v44 = vld [vmem:[#allocation2 + $0x88] sm:$0xf]  ;;  %v3602_v45 = vld [vmem:[#allocation2 + $0x94] sm:$0xf0]  ;;  %v2906_v47 = vor.u32 %v3702_v40, %v2905_v39 }
  0x51   :  { %946 = vmatpush.bf16.msrb.mxu0 %v2454_v54  ;;  %v2633_v46 = vld [vmem:[#allocation2 + $0x188] sm:$0xf]  ;;  %v3634_v48 = vld [vmem:[#allocation2 + $0x194] sm:$0xf0]  ;;  %v2506_v54 = vor.u32 %v3602_v45, %v2505_v44  ;;  %v2683_v45 = vld [vmem:[#allocation2 + $0x1f8] sm:$0xf0] }
  0x52   :  { %959 = vmatpush.bf16.msrb.mxu1 %v2582_v59  ;;  %v2761_v49 = vld [vmem:[#allocation2 + $0x288] sm:$0xf]  ;;  %v3666_v50 = vld [vmem:[#allocation2 + $0x294] sm:$0xf0]  ;;  %v2634_v57 = vor.u32 %v3634_v48, %v2633_v46  ;;  %v3676_v46 = vld [vmem:[#allocation2 + $0x2ec] sm:$0xf] }
  0x53   :  { %972 = vmatpush.bf16.msrb.mxu2 %v2710_v61  ;;  %v2889_v52 = vld [vmem:[#allocation2 + $0x388] sm:$0xf]  ;;  %v3698_v53 = vld [vmem:[#allocation2 + $0x394] sm:$0xf0]  ;;  %v2762_v58 = vor.u32 %v3666_v50, %v2761_v49  ;;  %v3708_v50 = vld [vmem:[#allocation2 + $0x3ec] sm:$0xf] }
  0x54   :  { %985 = vmatpush.bf16.msrb.mxu3 %v2838_v1  ;;  %v2489_v59 = vld [vmem:[#allocation2 + $0x68] sm:$0xf]  ;;  %v3598_v61 = vld [vmem:[#allocation2 + $0x74] sm:$0xf0]  ;;  %v2890_v63 = vor.u32 %v3698_v53, %v2889_v52  ;;  %v2939_v52 = vld [vmem:[#allocation2 + $0x3f8] sm:$0xf0] }
  0x55   :  { %947 = vmatpush.bf16.msrb.mxu0 %v2438_v8  ;;  %v2617_v62 = vld [vmem:[#allocation2 + $0x168] sm:$0xf]  ;;  %v3630_v0 = vld [vmem:[#allocation2 + $0x174] sm:$0xf0]  ;;  %v2490_v5 = vor.u32 %v3598_v61, %v2489_v59  ;;  %v3608_v59 = vld [vmem:[#allocation2 + $0xcc] sm:$0xf] }
  0x56   :  { %960 = vmatpush.bf16.msrb.mxu1 %v2566_v12  ;;  %v2745_v1 = vld [vmem:[#allocation2 + $0x268] sm:$0xf]  ;;  %v3662_v2 = vld [vmem:[#allocation2 + $0x274] sm:$0xf0]  ;;  %v2618_v6 = vor.u32 %v3630_v0, %v2617_v62  ;;  %v2539_v61 = vld [vmem:[#allocation2 + $0xd8] sm:$0xf0] }
  0x57   :  { %973 = vmatpush.bf16.msrb.mxu2 %v2694_v13  ;;  %v2873_v3 = vld [vmem:[#allocation2 + $0x368] sm:$0xf]  ;;  %v3694_v4 = vld [vmem:[#allocation2 + $0x374] sm:$0xf0]  ;;  %v2746_v7 = vor.u32 %v3662_v2, %v2745_v1  ;;  %v3640_v62 = vld [vmem:[#allocation2 + $0x1cc] sm:$0xf] }
  0x58   :  { %986 = vmatpush.bf16.msrb.mxu3 %v2822_v16  ;;  %948 = vmatmul.bf16.vlgmr.msrb.gmra.mxu0 %v4100_v55  ;;  %v2473_v8 = vld [vmem:[#allocation2 + $0x48] sm:$0xf]  ;;  %v3594_v9 = vld [vmem:[#allocation2 + $0x54] sm:$0xf0]  ;;  %v2874_v11 = vor.u32 %v3694_v4, %v2873_v3  ;;  %v2667_v0 = vld [vmem:[#allocation2 + $0x1d8] sm:$0xf0] }
  0x59   :  { %992 = vmatpush.bf16.msra.mxu0 %v2554_v17  ;;  %961 = vmatmul.bf16.vlgmr.msrb.gmra.mxu1 %v4104_v60  ;;  %v2601_v10 = vld [vmem:[#allocation2 + $0x148] sm:$0xf]  ;;  %v3626_v12 = vld [vmem:[#allocation2 + $0x154] sm:$0xf0]  ;;  %v2474_v17 = vor.u32 %v3594_v9, %v2473_v8  ;;  %v3672_v1 = vld [vmem:[#allocation2 + $0x2cc] sm:$0xf] }
  0x5a   :  { %1005 = vmatpush.bf16.msra.mxu1 %v2682_v18  ;;  %974 = vmatmul.bf16.vlgmr.msrb.gmra.mxu2 %v4098_v51  ;;  %v2729_v13 = vld [vmem:[#allocation2 + $0x248] sm:$0xf]  ;;  %v3658_v14 = vld [vmem:[#allocation2 + $0x254] sm:$0xf0]  ;;  %v2602_v18 = vor.u32 %v3626_v12, %v2601_v10  ;;  %v2795_v2 = vld [vmem:[#allocation2 + $0x2d8] sm:$0xf0] }
  0x5b   :  { %1018 = vmatpush.bf16.msra.mxu2 %v2810_v19  ;;  %987 = vmatmul.bf16.vlgmr.msrb.gmra.mxu3 %v4102_v56  ;;  %v2857_v15 = vld [vmem:[#allocation2 + $0x348] sm:$0xf]  ;;  %v3690_v16 = vld [vmem:[#allocation2 + $0x354] sm:$0xf0]  ;;  %v2730_v19 = vor.u32 %v3658_v14, %v2729_v13  ;;  %v3704_v3 = vld [vmem:[#allocation2 + $0x3cc] sm:$0xf] }
  0x5c   :  { %1031 = vmatpush.bf16.msra.mxu3 %v2938_v23  ;;  %v2457_v20 = vld [vmem:[#allocation2 + $0x28] sm:$0xf]  ;;  %v3590_v21 = vld [vmem:[#allocation2 + $0x34] sm:$0xf0]  ;;  %v2858_v23 = vor.u32 %v3690_v16, %v2857_v15  ;;  %v2923_v4 = vld [vmem:[#allocation2 + $0x3d8] sm:$0xf0] }
  0x5d   :  { %993 = vmatpush.bf16.msra.mxu0 %v2538_v29  ;;  %v2585_v22 = vld [vmem:[#allocation2 + $0x128] sm:$0xf]  ;;  %v3622_v24 = vld [vmem:[#allocation2 + $0x134] sm:$0xf0]  ;;  %v2458_v29 = vor.u32 %v3590_v21, %v2457_v20  ;;  %v3604_v8 = vld [vmem:[#allocation2 + $0xac] sm:$0xf] }
  0x5e   :  { %1006 = vmatpush.bf16.msra.mxu1 %v2666_v30  ;;  %v2713_v25 = vld [vmem:[#allocation2 + $0x228] sm:$0xf]  ;;  %v3654_v26 = vld [vmem:[#allocation2 + $0x234] sm:$0xf0]  ;;  %v2586_v32 = vor.u32 %v3622_v24, %v2585_v22  ;;  %v2523_v9 = vld [vmem:[#allocation2 + $0xb8] sm:$0xf0] }
  0x5f   :  { %1019 = vmatpush.bf16.msra.mxu2 %v2794_v31  ;;  %v2841_v27 = vld [vmem:[#allocation2 + $0x328] sm:$0xf]  ;;  %v3686_v28 = vld [vmem:[#allocation2 + $0x334] sm:$0xf0]  ;;  %v2714_v33 = vor.u32 %v3654_v26, %v2713_v25  ;;  %v3636_v10 = vld [vmem:[#allocation2 + $0x1ac] sm:$0xf] }
  0x60   :  { %1032 = vmatpush.bf16.msra.mxu3 %v2922_v35  ;;  %v2441_v30 = vld [vmem:[#allocation2 + $0x8] sm:$0xf]  ;;  %v3586_v31 = vld [vmem:[#allocation2 + $0x14] sm:$0xf0]  ;;  %v2842_v37 = vor.u32 %v3686_v28, %v2841_v27  ;;  %v2651_v12 = vld [vmem:[#allocation2 + $0x1b8] sm:$0xf0] }
  0x61   :  { %994 = vmatpush.bf16.msra.mxu0 %v2522_v41  ;;  %v2569_v34 = vld [vmem:[#allocation2 + $0x108] sm:$0xf]  ;;  %v3618_v35 = vld [vmem:[#allocation2 + $0x114] sm:$0xf0]  ;;  %v3612_v41 = vld [vmem:[#allocation2 + $0xec] sm:$0xf]  ;;  %v2442_v44 = vor.u32 %v3586_v31, %v2441_v30 }
  0x62   :  { %1007 = vmatpush.bf16.msra.mxu1 %v2650_v42  ;;  %v2697_v36 = vld [vmem:[#allocation2 + $0x208] sm:$0xf]  ;;  %v3650_v38 = vld [vmem:[#allocation2 + $0x214] sm:$0xf0]  ;;  %v2555_v42 = vld [vmem:[#allocation2 + $0xf8] sm:$0xf0]  ;;  %v2570_v48 = vor.u32 %v3618_v35, %v2569_v34 }
  0x63   :  { %1020 = vmatpush.bf16.msra.mxu2 %v2778_v43  ;;  %v2825_v39 = vld [vmem:[#allocation2 + $0x308] sm:$0xf]  ;;  %v3682_v40 = vld [vmem:[#allocation2 + $0x314] sm:$0xf0]  ;;  %v3644_v43 = vld [vmem:[#allocation2 + $0x1ec] sm:$0xf]  ;;  %v2698_v49 = vor.u32 %v3650_v38, %v2697_v36 }
  0x64   :  { %1033 = vmatpush.bf16.msra.mxu3 %v2906_v47  ;;  %v2811_v47 = vld [vmem:[#allocation2 + $0x2f8] sm:$0xf0]  ;;  %v2826_v53 = vor.u32 %v3682_v40, %v2825_v39  ;;  %v3668_v13 = vld [vmem:[#allocation2 + $0x2ac] sm:$0xf] }
  0x65   :  { %995 = vmatpush.bf16.msra.mxu0 %v2506_v54  ;;  %v2558_v54 = vor.u32 %v3612_v41, %v2555_v42  ;;  %v2779_v14 = vld [vmem:[#allocation2 + $0x2b8] sm:$0xf0]  ;;  %v3700_v15 = vld [vmem:[#allocation2 + $0x3ac] sm:$0xf] }
  0x66   :  { %1008 = vmatpush.bf16.msra.mxu1 %v2634_v57  ;;  %v2686_v57 = vor.u32 %v3644_v43, %v2683_v45  ;;  %v2907_v16 = vld [vmem:[#allocation2 + $0x3b8] sm:$0xf0]  ;;  %v3600_v20 = vld [vmem:[#allocation2 + $0x8c] sm:$0xf] }
  0x67   :  { %1021 = vmatpush.bf16.msra.mxu2 %v2762_v58  ;;  %v2814_v58 = vor.u32 %v3676_v46, %v2811_v47  ;;  %v2507_v21 = vld [vmem:[#allocation2 + $0x98] sm:$0xf0]  ;;  %v3632_v22 = vld [vmem:[#allocation2 + $0x18c] sm:$0xf] }
  0x68   :  { %1034 = vmatpush.bf16.msra.mxu3 %v2890_v63  ;;  %v2942_v63 = vor.u32 %v3708_v50, %v2939_v52  ;;  %v2635_v24 = vld [vmem:[#allocation2 + $0x198] sm:$0xf0]  ;;  %v3664_v25 = vld [vmem:[#allocation2 + $0x28c] sm:$0xf] }
  0x69   :  { %996 = vmatpush.bf16.msra.mxu0 %v2490_v5  ;;  %v2542_v5 = vor.u32 %v3608_v59, %v2539_v61  ;;  %v2763_v26 = vld [vmem:[#allocation2 + $0x298] sm:$0xf0]  ;;  %v3696_v27 = vld [vmem:[#allocation2 + $0x38c] sm:$0xf]  ;;  %v2638_v30 = vor.u32 %v3632_v22, %v2635_v24 }
  0x6a   :  { %1009 = vmatpush.bf16.msra.mxu1 %v2618_v6  ;;  %v2670_v6 = vor.u32 %v3640_v62, %v2667_v0  ;;  %v2891_v28 = vld [vmem:[#allocation2 + $0x398] sm:$0xf0]  ;;  %v2766_v31 = vor.u32 %v3664_v25, %v2763_v26  ;;  %v3628_v34 = vld [vmem:[#allocation2 + $0x16c] sm:$0xf]  ;;  %v3041_v26 = vld [vmem:[#allocation7 + $0xc0] sm:$0xf] }
  0x6b   :  { %1022 = vmatpush.bf16.msra.mxu2 %v2746_v7  ;;  %v2798_v7 = vor.u32 %v3672_v1, %v2795_v2  ;;  %v2894_v35 = vor.u32 %v3696_v27, %v2891_v28  ;;  %v2619_v36 = vld [vmem:[#allocation2 + $0x178] sm:$0xf0]  ;;  %v3692_v39 = vld [vmem:[#allocation2 + $0x36c] sm:$0xf]  ;;  %v3737_v27 = vld [vmem:[#allocation7 + $0xcc] sm:$0xf0] }
  0x6c   :  { %1035 = vmatpush.bf16.msra.mxu3 %v2874_v11  ;;  %v2926_v11 = vor.u32 %v3704_v3, %v2923_v4  ;;  %v2747_v38 = vld [vmem:[#allocation2 + $0x278] sm:$0xf0]  ;;  %v2622_v42 = vor.u32 %v3628_v34, %v2619_v36  ;;  %v3624_v46 = vld [vmem:[#allocation2 + $0x14c] sm:$0xf]  ;;  %v3765_v36 = vld [vmem:[#allocation7 + $0x1ac] sm:$0xf0] }
  0x6d   :  { %997 = vmatpush.bf16.msra.mxu0 %v2474_v17  ;;  %v2526_v17 = vor.u32 %v3604_v8, %v2523_v9  ;;  %v2875_v40 = vld [vmem:[#allocation2 + $0x378] sm:$0xf0]  ;;  %v3688_v52 = vld [vmem:[#allocation2 + $0x34c] sm:$0xf] }
  0x6e   :  { %1010 = vmatpush.bf16.msra.mxu1 %v2602_v18  ;;  %v2654_v18 = vor.u32 %v3636_v10, %v2651_v12  ;;  %v2475_v45 = vld [vmem:[#allocation2 + $0x58] sm:$0xf0]  ;;  %v2878_v47 = vor.u32 %v3692_v39, %v2875_v40  ;;  %v3588_v59 = vld [vmem:[#allocation2 + $0x2c] sm:$0xf]  ;;  %v3729_v39 = vld [vmem:[#allocation7 + $0x8c] sm:$0xf0] }
  0x6f   :  { %1023 = vmatpush.bf16.msra.mxu2 %v2730_v19  ;;  %v2782_v19 = vor.u32 %v3668_v13, %v2779_v14  ;;  %v2731_v50 = vld [vmem:[#allocation2 + $0x258] sm:$0xf0]  ;;  %v3620_v62 = vld [vmem:[#allocation2 + $0x12c] sm:$0xf] }
  0x70   :  { %1036 = vmatpush.bf16.msra.mxu3 %v2858_v23  ;;  %v2910_v23 = vor.u32 %v3700_v15, %v2907_v16  ;;  %v2459_v61 = vld [vmem:[#allocation2 + $0x38] sm:$0xf0]  ;;  %v3652_v1 = vld [vmem:[#allocation2 + $0x22c] sm:$0xf] }
  0x71   :  { %998 = vmatpush.bf16.msra.mxu0 %v2458_v29  ;;  %v2510_v29 = vor.u32 %v3600_v20, %v2507_v21  ;;  %v2587_v0 = vld [vmem:[#allocation2 + $0x138] sm:$0xf0]  ;;  %v3684_v3 = vld [vmem:[#allocation2 + $0x32c] sm:$0xf]  ;;  %v3185_v20 = vld [vmem:[#allocation7 + $0x1e0] sm:$0xf] }
  0x72   :  { %1011 = vmatpush.bf16.msra.mxu1 %v2586_v32  ;;  %v3596_v32 = vld [vmem:[#allocation2 + $0x6c] sm:$0xf]  ;;  %v2715_v2 = vld [vmem:[#allocation2 + $0x238] sm:$0xf0]  ;;  %v3773_v21 = vld [vmem:[#allocation7 + $0x1ec] sm:$0xf0] }
  0x73   :  { %1024 = vmatpush.bf16.msra.mxu2 %v2714_v33  ;;  %v2491_v33 = vld [vmem:[#allocation2 + $0x78] sm:$0xf0]  ;;  %v2718_v8 = vor.u32 %v3652_v1, %v2715_v2  ;;  %v3616_v10 = vld [vmem:[#allocation2 + $0x10c] sm:$0xf]  ;;  %v3186_v28 = vor.u32 %v3773_v21, %v3185_v20  ;;  %v3313_v2 = vld [vmem:[#allocation7 + $0x2e0] sm:$0xf] }
  0x74   :  { %1037 = vmatpush.bf16.msra.mxu3 %v2842_v37  ;;  %v3660_v37 = vld [vmem:[#allocation2 + $0x26c] sm:$0xf]  ;;  %v2494_v41 = vor.u32 %v3596_v32, %v2491_v33  ;;  %v2843_v4 = vld [vmem:[#allocation2 + $0x338] sm:$0xf0]  ;;  %v3025_v32 = vld [vmem:[#allocation7 + $0xa0] sm:$0xf] }
  0x75   :  { %999 = vmatpush.bf16.msra.mxu0 %v2442_v44  ;;  %v2750_v43 = vor.u32 %v3660_v37, %v2747_v38  ;;  %v3592_v44 = vld [vmem:[#allocation2 + $0x4c] sm:$0xf]  ;;  %v2443_v9 = vld [vmem:[#allocation2 + $0x18] sm:$0xf0]  ;;  %v2846_v12 = vor.u32 %v3684_v3, %v2843_v4  ;;  %v3733_v33 = vld [vmem:[#allocation7 + $0xac] sm:$0xf0] }
  0x76   :  { %1012 = vmatpush.bf16.msra.mxu1 %v2570_v48  ;;  %v2603_v48 = vld [vmem:[#allocation2 + $0x158] sm:$0xf0]  ;;  %v3648_v13 = vld [vmem:[#allocation2 + $0x20c] sm:$0xf]  ;;  %v3026_v37 = vor.u32 %v3733_v33, %v3025_v32  ;;  %v3009_v38 = vld [vmem:[#allocation7 + $0x80] sm:$0xf] }
  0x77   :  { %1025 = vmatpush.bf16.msra.mxu2 %v2698_v49  ;;  %v3656_v49 = vld [vmem:[#allocation2 + $0x24c] sm:$0xf]  ;;  %v2699_v14 = vld [vmem:[#allocation2 + $0x218] sm:$0xf0]  ;;  %v3805_v3 = vld [vmem:[#allocation7 + $0x2ec] sm:$0xf0] }
  0x78   :  { %1038 = vmatpush.bf16.msra.mxu3 %v2826_v53  ;;  %1000 = vmatmul.bf16.vlgmr.msra.gmra.mxu0 %v4100_v55  ;;  %v2859_v53 = vld [vmem:[#allocation2 + $0x358] sm:$0xf0]  ;;  %v3680_v15 = vld [vmem:[#allocation2 + $0x30c] sm:$0xf]  ;;  %v3059_v4 = vld [vmem:[#allocation7 + $0xf0] sm:$0xf0] }
  0x79   :  { %1044 = vmatpush.bf16.msrb.mxu0 %v2558_v54  ;;  %1013 = vmatmul.bf16.vlgmr.msra.gmra.mxu1 %v4104_v60  ;;  %v2478_v54 = vor.u32 %v3592_v44, %v2475_v45  ;;  %v2827_v16 = vld [vmem:[#allocation2 + $0x318] sm:$0xf0]  ;;  %v3725_v44 = vld [vmem:[#allocation7 + $0x6c] sm:$0xf0]  ;;  %v3121_v45 = vld [vmem:[#allocation7 + $0x160] sm:$0xf] }
  0x7a   :  { %1057 = vmatpush.bf16.msrb.mxu1 %v2686_v57  ;;  %1026 = vmatmul.bf16.vlgmr.msra.gmra.mxu2 %v4098_v51  ;;  %v2606_v57 = vor.u32 %v3624_v46, %v2603_v48  ;;  %v2830_v24 = vor.u32 %v3680_v15, %v2827_v16  ;;  %v3735_v15 = vld [vmem:[#allocation7 + $0xc4] sm:$0xf]  ;;  %v3043_v16 = vld [vmem:[#allocation7 + $0xd0] sm:$0xf0]  ;;  %v3265_v32 = vld [vmem:[#allocation7 + $0x280] sm:$0xf] }
  0x7b   :  { %1070 = vmatpush.bf16.msrb.mxu2 %v2814_v58  ;;  %1039 = vmatmul.bf16.vlgmr.msra.gmra.mxu3 %v4102_v56  ;;  %v2734_v58 = vor.u32 %v3656_v49, %v2731_v50  ;;  %v3105_v49 = vld [vmem:[#allocation7 + $0x140] sm:$0xf]  ;;  %v3753_v50 = vld [vmem:[#allocation7 + $0x14c] sm:$0xf0]  ;;  %v3171_v20 = vld [vmem:[#allocation7 + $0x1d0] sm:$0xf0]  ;;  %v3046_v21 = vor.u32 %v3735_v15, %v3043_v16 }
  0x7c   :  { %1083 = vmatpush.bf16.msrb.mxu3 %v2942_v63  ;;  %v2862_v63 = vor.u32 %v3688_v52, %v2859_v53  ;;  %v2961_v53 = vld [vmem:[#allocation7 + $0x20] sm:$0xf]  ;;  %v3793_v33 = vld [vmem:[#allocation7 + $0x28c] sm:$0xf0]  ;;  %v3711_v15 = vld [vmem:[#allocation7 + $0x4] sm:$0xf] }
  0x7d   :  { %1045 = vmatpush.bf16.msrb.mxu0 %v2542_v5  ;;  %v2462_v5 = vor.u32 %v3588_v59, %v2459_v61  ;;  %v3749_v59 = vld [vmem:[#allocation7 + $0x12c] sm:$0xf0]  ;;  %v2947_v16 = vld [vmem:[#allocation7 + $0x10] sm:$0xf0] }
  0x7e   :  { %1058 = vmatpush.bf16.msrb.mxu1 %v2670_v6  ;;  %v3584_v6 = vld [vmem:[#allocation2 + $0xc] sm:$0xf] }
  0x7f   :  { %1071 = vmatpush.bf16.msrb.mxu2 %v2798_v7  ;;  %v2590_v7 = vor.u32 %v3620_v62, %v2587_v0  ;;  %v2945_v62 = vld [vmem:[#allocation7] sm:$0xf]  ;;  %v3739_v0 = vld [vmem:[#allocation7 + $0xe4] sm:$0xf] }
  0x80   :  { %1084 = vmatpush.bf16.msrb.mxu3 %v2926_v11  ;;  %v2571_v11 = vld [vmem:[#allocation2 + $0x118] sm:$0xf0] }
  0x81   :  { %1046 = vmatpush.bf16.msrb.mxu0 %v2526_v17  ;;  %v3057_v17 = vld [vmem:[#allocation7 + $0xe0] sm:$0xf]  ;;  %v2574_v22 = vor.u32 %v3616_v10, %v2571_v11  ;;  %v3062_v11 = vor.u32 %v3739_v0, %v3059_v4  ;;  %v3781_v4 = vld [vmem:[#allocation7 + $0x22c] sm:$0xf0] }
  0x82   :  { %1059 = vmatpush.bf16.msrb.mxu1 %v2654_v18  ;;  %v3741_v18 = vld [vmem:[#allocation7 + $0xec] sm:$0xf0] }
  0x83   :  { %1072 = vmatpush.bf16.msrb.mxu2 %v2782_v19  ;;  %v2446_v19 = vor.u32 %v3584_v6, %v2443_v9  ;;  %v3058_v25 = vor.u32 %v3741_v18, %v3057_v17  ;;  %v3745_v6 = vld [vmem:[#allocation7 + $0x10c] sm:$0xf0]  ;;  %v3187_v9 = vld [vmem:[#allocation7 + $0x1f0] sm:$0xf0] }
  0x84   :  { %1085 = vmatpush.bf16.msrb.mxu3 %v2910_v23  ;;  %v2702_v23 = vor.u32 %v3648_v13, %v2699_v14  ;;  %v3297_v13 = vld [vmem:[#allocation7 + $0x2c0] sm:$0xf]  ;;  %v3801_v14 = vld [vmem:[#allocation7 + $0x2cc] sm:$0xf0] }
  0x85   :  { %1047 = vmatpush.bf16.msrb.mxu0 %v2510_v29  ;;  %v3169_v29 = vld [vmem:[#allocation7 + $0x1c0] sm:$0xf]  ;;  %v3298_v18 = vor.u32 %v3801_v14, %v3297_v13  ;;  %v3091_v13 = vld [vmem:[#allocation7 + $0x130] sm:$0xf0] }
  0x86   :  { %1060 = vmatpush.bf16.msrb.mxu1 %v2638_v30  ;;  %v3769_v30 = vld [vmem:[#allocation7 + $0x1cc] sm:$0xf0] }
  0x87   :  { %1073 = vmatpush.bf16.msrb.mxu2 %v2766_v31  ;;  %v3042_v31 = vor.u32 %v3737_v27, %v3041_v26  ;;  %v3170_v34 = vor.u32 %v3769_v30, %v3169_v29  ;;  %v3155_v29 = vld [vmem:[#allocation7 + $0x1b0] sm:$0xf0]  ;;  %v4122_v30 = vld [vmem:[#allocation5] sm:$0xf] }
  0x88   :  { %1086 = vmatpush.bf16.msrb.mxu3 %v2894_v35  ;;  %v3153_v35 = vld [vmem:[#allocation7 + $0x1a0] sm:$0xf] }
  0x89   :  { %1048 = vmatpush.bf16.msrb.mxu0 %v2494_v41  ;;  %v3154_v40 = vor.u32 %v3765_v36, %v3153_v35  ;;  %v3137_v41 = vld [vmem:[#allocation7 + $0x180] sm:$0xf]  ;;  %v3011_v35 = vld [vmem:[#allocation7 + $0x90] sm:$0xf0] }
  0x8a   :  { %1061 = vmatpush.bf16.msrb.mxu1 %v2622_v42  ;;  %v3010_v42 = vor.u32 %v3729_v39, %v3009_v38  ;;  %v230_v38 = vperm.slane %v4122_v30, 0  ;;  %v3759_v39 = vld [vmem:[#allocation7 + $0x184] sm:$0xf] }
  0x8b   :  { %1074 = vmatpush.bf16.msrb.mxu2 %v2750_v43  ;;  %v2993_v43 = vld [vmem:[#allocation7 + $0x60] sm:$0xf] }
  0x8c   :  { %1087 = vmatpush.bf16.msrb.mxu3 %v2878_v47  ;;  %v2994_v46 = vor.u32 %v3725_v44, %v2993_v43  ;;  %v2977_v47 = vld [vmem:[#allocation7 + $0x40] sm:$0xf]  ;;  %v3723_v44 = vld [vmem:[#allocation7 + $0x64] sm:$0xf] }
  0x8d   :  { %1049 = vmatpush.bf16.msrb.mxu0 %v2478_v54  ;;  %v3717_v54 = vld [vmem:[#allocation7 + $0x2c] sm:$0xf0] }
  0x8e   :  { %1062 = vmatpush.bf16.msrb.mxu1 %v2606_v57  ;;  %v3106_v57 = vor.u32 %v3753_v50, %v3105_v49  ;;  %v2962_v61 = vor.u32 %v3717_v54, %v2961_v53  ;;  %v3785_v53 = vld [vmem:[#allocation7 + $0x24c] sm:$0xf0]  ;;  %v3719_v54 = vld [vmem:[#allocation7 + $0x44] sm:$0xf] }
  0x8f   :  { %1075 = vmatpush.bf16.msrb.mxu2 %v2734_v58  ;;  %v3089_v58 = vld [vmem:[#allocation7 + $0x120] sm:$0xf] }
  0x90   :  { %1088 = vmatpush.bf16.msrb.mxu3 %v2862_v63  ;;  %v3713_v63 = vld [vmem:[#allocation7 + $0xc] sm:$0xf0]  ;;  %v3090_v1 = vor.u32 %v3749_v59, %v3089_v58 }
  0x91   :  { %1050 = vmatpush.bf16.msrb.mxu0 %v2462_v5  ;;  %v3073_v5 = vld [vmem:[#allocation7 + $0x100] sm:$0xf]  ;;  %v2946_v10 = vor.u32 %v3713_v63, %v2945_v62  ;;  %v3751_v62 = vld [vmem:[#allocation7 + $0x144] sm:$0xf]  ;;  %v3107_v63 = vld [vmem:[#allocation7 + $0x150] sm:$0xf0] }
  0x92   :  { %1063 = vmatpush.bf16.msrb.mxu1 %v2590_v7  ;;  %v3314_v7 = vor.u32 %v3805_v3, %v3313_v2  ;;  %v3217_v3 = vld [vmem:[#allocation7 + $0x220] sm:$0xf] }
  0x93   :  { %1076 = vmatpush.bf16.msrb.mxu2 %v2718_v8  ;;  %v3771_v8 = vld [vmem:[#allocation7 + $0x1e4] sm:$0xf] }
  0x94   :  { %1089 = vmatpush.bf16.msrb.mxu3 %v2846_v12  ;;  %v3074_v12 = vor.u32 %v3745_v6, %v3073_v5  ;;  %v3190_v17 = vor.u32 %v3771_v8, %v3187_v9  ;;  %v3715_v6 = vld [vmem:[#allocation7 + $0x24] sm:$0xf]  ;;  %v3110_v9 = vor.u32 %v3751_v62, %v3107_v63  ;;  %v3267_v63 = vld [vmem:[#allocation7 + $0x290] sm:$0xf0] }
  0x95   :  { %1051 = vmatpush.bf16.msrb.mxu0 %v2446_v19  ;;  %v3767_v19 = vld [vmem:[#allocation7 + $0x1c4] sm:$0xf] }
  0x96   :  { %1064 = vmatpush.bf16.msrb.mxu1 %v2574_v22  ;;  %v3281_v22 = vld [vmem:[#allocation7 + $0x2a0] sm:$0xf]  ;;  %v3174_v26 = vor.u32 %v3767_v19, %v3171_v20  ;;  %v3742_v19 = vld [vmem:[#allocation7 + $0xf4] sm:$0xf0] }
  0x97   :  { %1077 = vmatpush.bf16.msrb.mxu2 %v2702_v23  ;;  %v3797_v23 = vld [vmem:[#allocation7 + $0x2ac] sm:$0xf0]  ;;  %v3201_v20 = vld [vmem:[#allocation7 + $0x200] sm:$0xf] }
  0x98   :  { %1090 = vmatpush.bf16.msrb.mxu3 %v2830_v24  ;;  %1052 = vmatmul.bf16.vlgmr.msrb.gmra.mxu0 %v4100_v55  ;;  %v3761_v55 = vld [vmem:[#allocation7 + $0x18c] sm:$0xf0]  ;;  %v3731_v24 = vld [vmem:[#allocation7 + $0xa4] sm:$0xf]  ;;  %v3282_v27 = vor.u32 %v3797_v23, %v3281_v22 }
  0x99   :  { %1882 = vmatpush.bf16.msra.mxu0 %v3058_v25  ;;  %1065 = vmatmul.bf16.vlgmr.msrb.gmra.mxu1 %v4104_v60  ;;  %v3138_v60 = vor.u32 %v3761_v55, %v3137_v41  ;;  %v3027_v25 = vld [vmem:[#allocation7 + $0xb0] sm:$0xf0]  ;;  %v3249_v55 = vld [vmem:[#allocation7 + $0x260] sm:$0xf] }
  0x9a   :  { %1895 = vmatpush.bf16.msra.mxu1 %v3186_v28  ;;  %1078 = vmatmul.bf16.vlgmr.msrb.gmra.mxu2 %v4098_v51  ;;  %v3757_v51 = vld [vmem:[#allocation7 + $0x16c] sm:$0xf0]  ;;  %v3763_v28 = vld [vmem:[#allocation7 + $0x1a4] sm:$0xf] }
  0x9b   :  { %1091 = vmatmul.bf16.vlgmr.msrb.gmra.mxu3 %v4102_v56  ;;  %v3721_v56 = vld [vmem:[#allocation7 + $0x4c] sm:$0xf0]  ;;  %v3122_v48 = vor.u32 %v3757_v51, %v3121_v45  ;;  %1908 = vmatpush.bf16.msra.mxu2 %v3314_v7  ;;  %v3158_v36 = vor.u32 %v3763_v28, %v3155_v29  ;;  %v2963_v7 = vld [vmem:[#allocation7 + $0x30] sm:$0xf0] }
  0x9c   :  { %v2978_v52 = vor.u32 %v3721_v56, %v2977_v47  ;;  %v3755_v56 = vld [vmem:[#allocation7 + $0x164] sm:$0xf]  ;;  %v3075_v29 = vld [vmem:[#allocation7 + $0x110] sm:$0xf0] }
  0x9d   :  { %1883 = vmatpush.bf16.msra.mxu0 %v3042_v31  ;;  %v3030_v31 = vor.u32 %v3731_v24, %v3027_v25  ;;  %v3743_v25 = vld [vmem:[#allocation7 + $0x104] sm:$0xf] }
  0x9e   :  { %1896 = vmatpush.bf16.msra.mxu1 %v3170_v34  ;;  %v3727_v34 = vld [vmem:[#allocation7 + $0x84] sm:$0xf] }
  0x9f   :  { %1909 = vmatpush.bf16.msra.mxu2 %v3298_v18  ;;  %v3014_v41 = vor.u32 %v3727_v34, %v3011_v35  ;;  %v3065_v18 = vld [vmem:[#allocation7 + $0xe8] sm:$0xf] }
  0xa1   :  { %1884 = vmatpush.bf16.msra.mxu0 %v3026_v37  ;;  %v3266_v37 = vor.u32 %v3793_v33, %v3265_v32  ;;  %v3803_v32 = vld [vmem:[#allocation7 + $0x2e4] sm:$0xf]  ;;  %v3315_v33 = vld [vmem:[#allocation7 + $0x2f0] sm:$0xf0] }
  0xa2   :  { %1897 = vmatpush.bf16.msra.mxu1 %v3154_v40  ;;  %v3139_v40 = vld [vmem:[#allocation7 + $0x190] sm:$0xf0]  ;;  %v3318_v35 = vor.u32 %v3803_v32, %v3315_v33  ;;  %v3779_v32 = vld [vmem:[#allocation7 + $0x224] sm:$0xf]  ;;  %v2969_v33 = vld [vmem:[#allocation7 + $0x28] sm:$0xf] }
  0xa3   :  { %1910 = vmatpush.bf16.msra.mxu2 %v3282_v27  ;;  %v3142_v45 = vor.u32 %v3759_v39, %v3139_v40  ;;  %v3837_v27 = vld [vmem:[#allocation7 + $0x3ec] sm:$0xf0]  ;;  %v3425_v39 = vld [vmem:[#allocation7 + $0x3c0] sm:$0xf] }
  0xa4   :  { %v3833_v40 = vld [vmem:[#allocation7 + $0x3cc] sm:$0xf0] }
  0xa5   :  { %1885 = vmatpush.bf16.msra.mxu0 %v3010_v42  ;;  %v3789_v42 = vld [vmem:[#allocation7 + $0x26c] sm:$0xf0] }
  0xa6   :  { %1898 = vmatpush.bf16.msra.mxu1 %v3138_v60  ;;  %v2995_v60 = vld [vmem:[#allocation7 + $0x70] sm:$0xf0]  ;;  %v3250_v51 = vor.u32 %v3789_v42, %v3249_v55  ;;  %v3049_v55 = vld [vmem:[#allocation7 + $0xc8] sm:$0xf]  ;;  %v3738_v42 = vld [vmem:[#allocation7 + $0xd4] sm:$0xf0] }
  0xa7   :  { %1911 = vmatpush.bf16.msra.mxu2 %v3266_v37  ;;  %v2998_v49 = vor.u32 %v3723_v44, %v2995_v60  ;;  %v3066_v37 = vor.u32 %v3742_v19, %v3065_v18  ;;  %v3299_v44 = vld [vmem:[#allocation7 + $0x2d0] sm:$0xf0]  ;;  %v2985_v19 = vld [vmem:[#allocation7 + $0x48] sm:$0xf] }
  0xa9   :  { %1886 = vmatpush.bf16.msra.mxu0 %v2994_v46 }
  0xaa   :  { %1899 = vmatpush.bf16.msra.mxu1 %v3122_v48  ;;  %v3123_v48 = vld [vmem:[#allocation7 + $0x170] sm:$0xf0] }
  0xab   :  { %1912 = vmatpush.bf16.msra.mxu2 %v3250_v51  ;;  %v3126_v58 = vor.u32 %v3755_v56, %v3123_v48  ;;  %v3409_v51 = vld [vmem:[#allocation7 + $0x3a0] sm:$0xf]  ;;  %v3033_v56 = vld [vmem:[#allocation7 + $0xa8] sm:$0xf]  ;;  %v3734_v48 = vld [vmem:[#allocation7 + $0xb4] sm:$0xf0] }
  0xad   :  { %1887 = vmatpush.bf16.msra.mxu0 %v2978_v52  ;;  %v3233_v52 = vld [vmem:[#allocation7 + $0x240] sm:$0xf] }
  0xae   :  { %1900 = vmatpush.bf16.msra.mxu1 %v3106_v57  ;;  %v2979_v57 = vld [vmem:[#allocation7 + $0x50] sm:$0xf0]  ;;  %v3234_v59 = vor.u32 %v3785_v53, %v3233_v52  ;;  %v3034_v53 = vor.u32 %v3734_v48, %v3033_v56  ;;  %v3177_v48 = vld [vmem:[#allocation7 + $0x1c8] sm:$0xf] }
  0xaf   :  { %v2982_v2 = vor.u32 %v3719_v54, %v2979_v57  ;;  %v3393_v54 = vld [vmem:[#allocation7 + $0x380] sm:$0xf]  ;;  %v3825_v57 = vld [vmem:[#allocation7 + $0x38c] sm:$0xf0] }
  0xb0   :  { %1913 = vmatpush.bf16.msra.mxu2 %v3234_v59  ;;  %v3017_v59 = vld [vmem:[#allocation7 + $0x88] sm:$0xf]  ;;  %v3394_v62 = vor.u32 %v3825_v57, %v3393_v54  ;;  %v3770_v54 = vld [vmem:[#allocation7 + $0x1d4] sm:$0xf0] }
  0xb1   :  { %1888 = vmatpush.bf16.msra.mxu0 %v2962_v61 }
  0xb2   :  { %1901 = vmatpush.bf16.msra.mxu1 %v3090_v1 }
  0xb5   :  { %1889 = vmatpush.bf16.msra.mxu0 %v2946_v10  ;;  %v897_v43 = vpop.f32.mrf.mxu0  ;;  %v3218_v10 = vor.u32 %v3781_v4, %v3217_v3  ;;  %v3377_v3 = vld [vmem:[#allocation7 + $0x360] sm:$0xf]  ;;  %v3821_v4 = vld [vmem:[#allocation7 + $0x36c] sm:$0xf0] }
  0xb6   :  { %1902 = vmatpush.bf16.msra.mxu1 %v3074_v12  ;;  %v898_v46 = vadd.f32 %v897_v43, %v230_v38  ;;  %v910_v47 = vpop.f32.mrf.mxu1  ;;  %v3747_v12 = vld [vmem:[#allocation7 + $0x124] sm:$0xf]  ;;  %v3078_v38 = vor.u32 %v3743_v25, %v3075_v29  ;;  %v3426_v43 = vor.u32 %v3833_v40, %v3425_v39  ;;  %v3345_v29 = vld [vmem:[#allocation7 + $0x320] sm:$0xf]  ;;  %v3774_v39 = vld [vmem:[#allocation7 + $0x1f4] sm:$0xf0] }
  0xb7   :  { %1914 = vmatpush.bf16.msra.mxu2 %v3218_v10  ;;  %v3094_v23 = vor.u32 %v3747_v12, %v3091_v13 }
  0xb8   :  { %v911_v50 = vadd.f32 %v910_v47, %v898_v46  ;;  %v3829_v46 = vld [vmem:[#allocation7 + $0x3ac] sm:$0xf0]  ;;  %v3795_v47 = vld [vmem:[#allocation7 + $0x2a4] sm:$0xf] }
  0xb9   :  { %1934 = vmatpush.bf16.msrb.mxu0 %v3062_v11 }
  0xba   :  { %1947 = vmatpush.bf16.msrb.mxu1 %v3190_v17  ;;  %v2966_v17 = vor.u32 %v3715_v6, %v2963_v7  ;;  %v3001_v6 = vld [vmem:[#allocation7 + $0x68] sm:$0xf]  ;;  %v3726_v7 = vld [vmem:[#allocation7 + $0x74] sm:$0xf0] }
  0xbd   :  { %1935 = vmatpush.bf16.msrb.mxu0 %v3046_v21  ;;  %v923_v61 = vpop.f32.mrf.mxu2  ;;  %v899_v8 = vpop.f32.mrf.mxu0  ;;  %v3777_v21 = vld [vmem:[#allocation7 + $0x20c] sm:$0xf0] }
  0xbe   :  { %1948 = vmatpush.bf16.msrb.mxu1 %v3174_v26  ;;  %v924_v0 = vadd.f32 %v923_v61, %v911_v50  ;;  %v936_v1 = vpop.f32.mrf.mxu3  ;;  %v912_v11 = vpop.f32.mrf.mxu1  ;;  %v3202_v24 = vor.u32 %v3777_v21, %v3201_v20  ;;  %v3441_v26 = vld [vmem:[#allocation7 + $0x3e0] sm:$0xf]  ;;  %v3283_v50 = vld [vmem:[#allocation7 + $0x2b0] sm:$0xf0]  ;;  %v3730_v61 = vld [vmem:[#allocation7 + $0x94] sm:$0xf0]  ;;  %v3378_v8 = vor.u32 %v3821_v4, %v3377_v3 }
  0xbf   :  { %v3286_v52 = vor.u32 %v3795_v47, %v3283_v50  ;;  %v3722_v20 = vld [vmem:[#allocation7 + $0x54] sm:$0xf0]  ;;  %v3809_v47 = vld [vmem:[#allocation7 + $0x30c] sm:$0xf0]  ;;  %v3775_v50 = vld [vmem:[#allocation7 + $0x204] sm:$0xf] }
  0xc0   :  { %v937_v5 = vadd.f32 %v936_v1, %v924_v0  ;;  %1915 = vmatpush.bf16.msra.mxu2 %v3202_v24  ;;  %v231_v1 = vperm.slane %v4122_v30, 1  ;;  %v3736_v3 = vld [vmem:[#allocation7 + $0xcc] sm:$0xf]  ;;  %v3831_v4 = vld [vmem:[#allocation7 + $0x3c4] sm:$0xf] }
  0xc1   :  { %1936 = vmatpush.bf16.msrb.mxu0 %v3030_v31  ;;  %v3442_v31 = vor.u32 %v3837_v27, %v3441_v26 }
  0xc2   :  { %1949 = vmatpush.bf16.msrb.mxu1 %v3158_v36  ;;  %v1096_v14 = vmax.f32 %v937_v5, 0.0  ;;  %v2950_v36 = vor.u32 %v3711_v15, %v2947_v16  ;;  %v3787_v5 = vld [vmem:[#allocation7 + $0x264] sm:$0xf]  ;;  %v3361_v15 = vld [vmem:[#allocation7 + $0x340] sm:$0xf] }
  0xc3   :  { %1921 = vmatpush.bf16.msra.mxu3 %v3442_v31  ;;  %v3817_v16 = vld [vmem:[#allocation7 + $0x34c] sm:$0xf0] }
  0xc4   :  { %v4125_v22 = vpack.c.bf16 %v1096_v14, %v1096_v14  ;;  %1960 = vmatpush.bf16.msrb.mxu2 %v3318_v35  ;;  %v3002_v14 = vor.u32 %v3726_v7, %v3001_v6  ;;  %v3362_v21 = vor.u32 %v3817_v16, %v3361_v15  ;;  %v3813_v31 = vld [vmem:[#allocation7 + $0x32c] sm:$0xf0]  ;;  %v3051_v6 = vld [vmem:[#allocation7 + $0xd8] sm:$0xf0]  ;;  %v3161_v7 = vld [vmem:[#allocation7 + $0x1a8] sm:$0xf] }
  0xc5   :  { %1937 = vmatpush.bf16.msrb.mxu0 %v3014_v41  ;;  %v925_v28 = vpop.f32.mrf.mxu2  ;;  %v3799_v41 = vld [vmem:[#allocation7 + $0x2c4] sm:$0xf]  ;;  %v3346_v35 = vor.u32 %v3813_v31, %v3345_v29  ;;  %v3035_v15 = vld [vmem:[#allocation7 + $0xb8] sm:$0xf0]  ;;  %v3145_v16 = vld [vmem:[#allocation7 + $0x188] sm:$0xf] }
  0xc6   :  { %1950 = vmatpush.bf16.msrb.mxu1 %v3142_v45  ;;  %1890 = vmatmul.bf16.vlgmr.msra.gmra.mxu0 %v4125_v22  ;;  %v938_v34 = vpop.f32.mrf.mxu3  ;;  %v3302_v60 = vor.u32 %v3799_v41, %v3299_v44  ;;  %v3050_v45 = vor.u32 %v3738_v42, %v3049_v55  ;;  %v2986_v28 = vor.u32 %v3722_v20, %v2985_v19  ;;  %v2953_v55 = vld [vmem:[#allocation7 + $0x8] sm:$0xf]  ;;  %v3714_v42 = vld [vmem:[#allocation7 + $0x14] sm:$0xf0]  ;;  %v3823_v19 = vld [vmem:[#allocation7 + $0x384] sm:$0xf] }
  0xc7   :  { %1922 = vmatpush.bf16.msra.mxu3 %v3426_v43  ;;  %v3718_v34 = vld [vmem:[#allocation7 + $0x34] sm:$0xf0]  ;;  %v3395_v20 = vld [vmem:[#allocation7 + $0x390] sm:$0xf0]  ;;  %v232_v29 = vperm.slane %v4122_v30, 2 }
  0xc8   :  { %1961 = vmatpush.bf16.msrb.mxu2 %v3302_v60  ;;  %v2970_v60 = vor.u32 %v3718_v34, %v2969_v33  ;;  %v3724_v33 = vld [vmem:[#allocation7 + $0x6c] sm:$0xf]  ;;  %v3819_v34 = vld [vmem:[#allocation7 + $0x364] sm:$0xf] }
  0xc9   :  { %1938 = vmatpush.bf16.msrb.mxu0 %v2998_v49  ;;  %v3410_v49 = vor.u32 %v3829_v46, %v3409_v51  ;;  %v3067_v51 = vld [vmem:[#allocation7 + $0xf8] sm:$0xf0]  ;;  %v3329_v46 = vld [vmem:[#allocation7 + $0x300] sm:$0xf] }
  0xca   :  { %1951 = vmatpush.bf16.msrb.mxu1 %v3126_v58  ;;  %v3791_v58 = vld [vmem:[#allocation7 + $0x284] sm:$0xf] }
  0xcb   :  { %1923 = vmatpush.bf16.msra.mxu3 %v3410_v49  ;;  %v3270_v0 = vor.u32 %v3791_v58, %v3267_v63  ;;  %v3330_v49 = vor.u32 %v3809_v47, %v3329_v46  ;;  %v3835_v58 = vld [vmem:[#allocation7 + $0x3e4] sm:$0xf]  ;;  %v2954_v63 = vor.u32 %v3714_v42, %v2953_v55  ;;  %v3097_v46 = vld [vmem:[#allocation7 + $0x128] sm:$0xf]  ;;  %v3750_v47 = vld [vmem:[#allocation7 + $0x134] sm:$0xf0] }
  0xcc   :  { %1962 = vmatpush.bf16.msrb.mxu2 %v3286_v52  ;;  %v3203_v52 = vld [vmem:[#allocation7 + $0x210] sm:$0xf0] }
  0xcd   :  { %1939 = vmatpush.bf16.msrb.mxu0 %v2982_v2  ;;  %v3018_v2 = vor.u32 %v3730_v61, %v3017_v59  ;;  %v3206_v57 = vor.u32 %v3775_v50, %v3203_v52  ;;  %v3443_v59 = vld [vmem:[#allocation7 + $0x3f0] sm:$0xf0]  ;;  %v3098_v52 = vor.u32 %v3750_v47, %v3097_v46  ;;  %v3752_v47 = vld [vmem:[#allocation7 + $0x14c] sm:$0xf] }
  0xce   :  { %1952 = vmatpush.bf16.msrb.mxu1 %v3110_v9  ;;  %v3251_v9 = vld [vmem:[#allocation7 + $0x270] sm:$0xf0] }
  0xcf   :  { %1924 = vmatpush.bf16.msra.mxu3 %v3394_v62  ;;  %v3254_v11 = vor.u32 %v3787_v5, %v3251_v9  ;;  %v3446_v62 = vor.u32 %v3835_v58, %v3443_v59  ;;  %v3427_v5 = vld [vmem:[#allocation7 + $0x3d0] sm:$0xf0] }
  0xd0   :  { %1963 = vmatpush.bf16.msrb.mxu2 %v3270_v0  ;;  %v3430_v9 = vor.u32 %v3831_v4, %v3427_v5  ;;  %v3347_v58 = vld [vmem:[#allocation7 + $0x330] sm:$0xf0] }
  0xd1   :  { %1940 = vmatpush.bf16.msrb.mxu0 %v2966_v17  ;;  %v3783_v17 = vld [vmem:[#allocation7 + $0x244] sm:$0xf] }
  0xd2   :  { %1953 = vmatpush.bf16.msrb.mxu1 %v3094_v23  ;;  %v3235_v23 = vld [vmem:[#allocation7 + $0x250] sm:$0xf0] }
  0xd3   :  { %1925 = vmatpush.bf16.msra.mxu3 %v3378_v8  ;;  %v3238_v24 = vor.u32 %v3783_v17, %v3235_v23  ;;  %v3766_v8 = vld [vmem:[#allocation7 + $0x1b4] sm:$0xf0] }
  0xd4   :  { %1964 = vmatpush.bf16.msrb.mxu2 %v3254_v11  ;;  %v3411_v11 = vld [vmem:[#allocation7 + $0x3b0] sm:$0xf0]  ;;  %v3762_v17 = vld [vmem:[#allocation7 + $0x194] sm:$0xf0] }
  0xd5   :  { %1941 = vmatpush.bf16.msrb.mxu0 %v2950_v36  ;;  %v949_v10 = vpop.f32.mrf.mxu0  ;;  %v3219_v36 = vld [vmem:[#allocation7 + $0x230] sm:$0xf0]  ;;  %v3146_v23 = vor.u32 %v3762_v17, %v3145_v16  ;;  %v2955_v16 = vld [vmem:[#allocation7 + $0x18] sm:$0xf0] }
  0xd6   :  { %1954 = vmatpush.bf16.msrb.mxu1 %v3078_v38  ;;  %v950_v12 = vadd.f32 %v949_v10, %v231_v1  ;;  %v962_v13 = vpop.f32.mrf.mxu1  ;;  %v3193_v38 = vld [vmem:[#allocation7 + $0x1e8] sm:$0xf]  ;;  %v3222_v41 = vor.u32 %v3779_v32, %v3219_v36  ;;  %v3827_v10 = vld [vmem:[#allocation7 + $0x3a4] sm:$0xf]  ;;  %v3003_v36 = vld [vmem:[#allocation7 + $0x78] sm:$0xf0] }
  0xd7   :  { %1926 = vmatpush.bf16.msra.mxu3 %v3362_v21  ;;  %v3194_v56 = vor.u32 %v3774_v39, %v3193_v38  ;;  %v3754_v38 = vld [vmem:[#allocation7 + $0x154] sm:$0xf0]  ;;  %v3006_v42 = vor.u32 %v3724_v33, %v3003_v36  ;;  %v3289_v33 = vld [vmem:[#allocation7 + $0x2a8] sm:$0xf] }
  0xd8   :  { %1942 = vmatmul.bf16.vlgmr.msrb.gmra.mxu0 %v4125_v22  ;;  %v963_v18 = vadd.f32 %v962_v13, %v950_v12  ;;  %1965 = vmatpush.bf16.msrb.mxu2 %v3238_v24  ;;  %v3054_v12 = vor.u32 %v3736_v3, %v3051_v6  ;;  %v3162_v13 = vor.u32 %v3766_v8, %v3161_v7  ;;  %v3728_v24 = vld [vmem:[#allocation7 + $0x8c] sm:$0xf]  ;;  %v3195_v3 = vld [vmem:[#allocation7 + $0x1f8] sm:$0xf0]  ;;  %v3321_v6 = vld [vmem:[#allocation7 + $0x2e8] sm:$0xf] }
  0xd9   :  { %1986 = vmatpush.bf16.msra.mxu0 %v3066_v37  ;;  %v3806_v7 = vld [vmem:[#allocation7 + $0x2f4] sm:$0xf0] }
  0xda   :  { %v3322_v17 = vor.u32 %v3806_v7, %v3321_v6  ;;  %v3209_v7 = vld [vmem:[#allocation7 + $0x208] sm:$0xf] }
  0xdb   :  { %1927 = vmatpush.bf16.msra.mxu3 %v3346_v35  ;;  %v3379_v35 = vld [vmem:[#allocation7 + $0x370] sm:$0xf0] }
  0xdc   :  { %1966 = vmatpush.bf16.msrb.mxu2 %v3222_v41  ;;  %v3382_v39 = vor.u32 %v3819_v34, %v3379_v35  ;;  %v3798_v34 = vld [vmem:[#allocation7 + $0x2b4] sm:$0xf0] }
  0xdd   :  { %1987 = vmatpush.bf16.msra.mxu0 %v3050_v45  ;;  %v975_v25 = vpop.f32.mrf.mxu2  ;;  %v951_v40 = vpop.f32.mrf.mxu0  ;;  %v3740_v45 = vld [vmem:[#allocation7 + $0xec] sm:$0xf]  ;;  %v3290_v36 = vor.u32 %v3798_v34, %v3289_v33  ;;  %v3291_v33 = vld [vmem:[#allocation7 + $0x2b8] sm:$0xf0]  ;;  %v3417_v34 = vld [vmem:[#allocation7 + $0x3a8] sm:$0xf] }
  0xde   :  { %v976_v26 = vadd.f32 %v975_v25, %v963_v18  ;;  %v988_v27 = vpop.f32.mrf.mxu3  ;;  %v964_v43 = vpop.f32.mrf.mxu1  ;;  %v3070_v1 = vor.u32 %v3740_v45, %v3067_v51  ;;  %v3414_v18 = vor.u32 %v3827_v10, %v3411_v11  ;;  %v3019_v25 = vld [vmem:[#allocation7 + $0x98] sm:$0xf0]  ;;  %v3363_v45 = vld [vmem:[#allocation7 + $0x350] sm:$0xf0]  ;;  %v3807_v11 = vld [vmem:[#allocation7 + $0x304] sm:$0xf] }
  0xdf   :  { %1928 = vmatpush.bf16.msra.mxu3 %v3330_v49  ;;  %v3022_v31 = vor.u32 %v3728_v24, %v3019_v25  ;;  %v2987_v51 = vld [vmem:[#allocation7 + $0x58] sm:$0xf0]  ;;  %v3802_v24 = vld [vmem:[#allocation7 + $0x2d4] sm:$0xf0] }
  0xe0   :  { %v989_v37 = vadd.f32 %v988_v27, %v976_v26  ;;  %1967 = vmatpush.bf16.msrb.mxu2 %v3206_v57  ;;  %v3129_v26 = vld [vmem:[#allocation7 + $0x168] sm:$0xf]  ;;  %v3758_v27 = vld [vmem:[#allocation7 + $0x174] sm:$0xf0]  ;;  %v3811_v57 = vld [vmem:[#allocation7 + $0x324] sm:$0xf] }
  0xe1   :  { %1988 = vmatpush.bf16.msra.mxu0 %v3034_v53  ;;  %v3130_v32 = vor.u32 %v3758_v27, %v3129_v26 }
  0xe2   :  { %v1097_v44 = vmax.f32 %v989_v37, 0.0  ;;  %v3113_v37 = vld [vmem:[#allocation7 + $0x148] sm:$0xf] }
  0xe3   :  { %1973 = vmatpush.bf16.msrb.mxu3 %v3446_v62  ;;  %v3114_v43 = vor.u32 %v3754_v38, %v3113_v37  ;;  %v2971_v62 = vld [vmem:[#allocation7 + $0x38] sm:$0xf0]  ;;  %v3760_v37 = vld [vmem:[#allocation7 + $0x18c] sm:$0xf] }
  0xe4   :  { %v4130_v53 = vpack.c.bf16 %v1097_v44, %v1097_v44  ;;  %v3720_v44 = vld [vmem:[#allocation7 + $0x4c] sm:$0xf]  ;;  %v3147_v38 = vld [vmem:[#allocation7 + $0x198] sm:$0xf0] }
  0xe5   :  { %1989 = vmatpush.bf16.msra.mxu0 %v3018_v2  ;;  %v977_v61 = vpop.f32.mrf.mxu2  ;;  %v3178_v2 = vor.u32 %v3770_v54, %v3177_v48  ;;  %v2990_v50 = vor.u32 %v3720_v44, %v2987_v51  ;;  %v3716_v54 = vld [vmem:[#allocation7 + $0x2c] sm:$0xf]  ;;  %v3257_v44 = vld [vmem:[#allocation7 + $0x268] sm:$0xf] }
  0xe6   :  { %1903 = vmatmul.bf16.vlgmr.msra.gmra.mxu1 %v4130_v53  ;;  %v990_v0 = vpop.f32.mrf.mxu3  ;;  %v2974_v8 = vor.u32 %v3716_v54, %v2971_v62  ;;  %v3782_v62 = vld [vmem:[#allocation7 + $0x234] sm:$0xf0] }
  0xe7   :  { %1999 = vmatpush.bf16.msra.mxu1 %v3194_v56  ;;  %1974 = vmatpush.bf16.msrb.mxu3 %v3430_v9  ;;  %v3746_v0 = vld [vmem:[#allocation7 + $0x114] sm:$0xf0] }
  0xe9   :  { %1990 = vmatpush.bf16.msra.mxu0 %v3002_v14  ;;  %v3732_v14 = vld [vmem:[#allocation7 + $0xac] sm:$0xf] }
  0xea   :  { %v3038_v21 = vor.u32 %v3732_v14, %v3035_v15  ;;  %v3712_v15 = vld [vmem:[#allocation7 + $0xc] sm:$0xf] }
  0xeb   :  { %2000 = vmatpush.bf16.msra.mxu1 %v3178_v2  ;;  %1975 = vmatpush.bf16.msrb.mxu3 %v3414_v18  ;;  %v3772_v2 = vld [vmem:[#allocation7 + $0x1ec] sm:$0xf]  ;;  %v2958_v25 = vor.u32 %v3712_v15, %v2955_v16  ;;  %v3838_v15 = vld [vmem:[#allocation7 + $0x3f4] sm:$0xf0] }
  0xec   :  { %v3198_v14 = vor.u32 %v3772_v2, %v3195_v3  ;;  %v3768_v18 = vld [vmem:[#allocation7 + $0x1cc] sm:$0xf]  ;;  %v3083_v3 = vld [vmem:[#allocation7 + $0x118] sm:$0xf0] }
  0xed   :  { %1991 = vmatpush.bf16.msra.mxu0 %v2986_v28  ;;  %v3398_v28 = vor.u32 %v3823_v19, %v3395_v20  ;;  %v3179_v19 = vld [vmem:[#allocation7 + $0x1d8] sm:$0xf0]  ;;  %v3744_v2 = vld [vmem:[#allocation7 + $0x10c] sm:$0xf] }
  0xee   :  { %v3182_v27 = vor.u32 %v3768_v18, %v3179_v19 }
  0xef   :  { %2001 = vmatpush.bf16.msra.mxu1 %v3162_v13  ;;  %1976 = vmatpush.bf16.msrb.mxu3 %v3398_v28 }
  0xf1   :  { %1992 = vmatpush.bf16.msra.mxu0 %v2970_v60  ;;  %v3815_v60 = vld [vmem:[#allocation7 + $0x344] sm:$0xf] }
  0xf2   :  { %v3366_v56 = vor.u32 %v3815_v60, %v3363_v45  ;;  %v3790_v60 = vld [vmem:[#allocation7 + $0x274] sm:$0xf0]  ;;  %v233_v45 = vperm.slane %v4122_v30, 3 }
  0xf3   :  { %2002 = vmatpush.bf16.msra.mxu1 %v3146_v23  ;;  %1977 = vmatpush.bf16.msrb.mxu3 %v3382_v39  ;;  %v3305_v23 = vld [vmem:[#allocation7 + $0x2c8] sm:$0xf]  ;;  %v3258_v46 = vor.u32 %v3790_v60, %v3257_v44  ;;  %v3822_v60 = vld [vmem:[#allocation7 + $0x374] sm:$0xf0] }
  0xf4   :  { %v3273_v39 = vld [vmem:[#allocation7 + $0x288] sm:$0xf] }
  0xf5   :  { %1993 = vmatpush.bf16.msra.mxu0 %v2954_v63  ;;  %v1001_v40 = vpop.f32.mrf.mxu0  ;;  %v3081_v63 = vld [vmem:[#allocation7 + $0x108] sm:$0xf] }
  0xf6   :  { %1955 = vmatmul.bf16.vlgmr.msrb.gmra.mxu1 %v4130_v53  ;;  %v1002_v41 = vadd.f32 %v1001_v40, %v232_v29  ;;  %v1014_v55 = vpop.f32.mrf.mxu1  ;;  %v3082_v9 = vor.u32 %v3746_v0, %v3081_v63  ;;  %v3306_v29 = vor.u32 %v3802_v24, %v3305_v23  ;;  %v3794_v40 = vld [vmem:[#allocation7 + $0x294] sm:$0xf0]  ;;  %v3307_v23 = vld [vmem:[#allocation7 + $0x2d8] sm:$0xf0]  ;;  %v3385_v44 = vld [vmem:[#allocation7 + $0x368] sm:$0xf] }
  0xf7   :  { %2003 = vmatpush.bf16.msra.mxu1 %v3130_v32  ;;  %1978 = vmatpush.bf16.msrb.mxu3 %v3366_v56  ;;  %v3163_v32 = vld [vmem:[#allocation7 + $0x1b8] sm:$0xf0] }
  0xf8   :  { %1994 = vmatmul.bf16.vlgmr.msra.gmra.mxu0 %v4125_v22  ;;  %v1015_v48 = vadd.f32 %v1014_v55, %v1002_v41  ;;  %v3150_v41 = vor.u32 %v3760_v37, %v3147_v38  ;;  %v3274_v55 = vor.u32 %v3794_v40, %v3273_v39  ;;  %v3115_v56 = vld [vmem:[#allocation7 + $0x158] sm:$0xf0]  ;;  %v3792_v38 = vld [vmem:[#allocation7 + $0x28c] sm:$0xf]  ;;  %v3401_v40 = vld [vmem:[#allocation7 + $0x388] sm:$0xf] }
  0xf9   :  { %2038 = vmatpush.bf16.msrb.mxu0 %v3070_v1  ;;  %v3350_v1 = vor.u32 %v3811_v57, %v3347_v58  ;;  %v3118_v54 = vor.u32 %v3752_v47, %v3115_v56  ;;  %v3748_v58 = vld [vmem:[#allocation7 + $0x12c] sm:$0xf]  ;;  %v3275_v39 = vld [vmem:[#allocation7 + $0x298] sm:$0xf0]  ;;  %v3369_v56 = vld [vmem:[#allocation7 + $0x348] sm:$0xf] }
  0xfa   :  { %v3243_v47 = vld [vmem:[#allocation7 + $0x258] sm:$0xf0] }
  0xfb   :  { %2004 = vmatpush.bf16.msra.mxu1 %v3114_v43  ;;  %1979 = vmatpush.bf16.msrb.mxu3 %v3350_v1  ;;  %v3131_v43 = vld [vmem:[#allocation7 + $0x178] sm:$0xf0] }
  0xfd   :  { %2039 = vmatpush.bf16.msrb.mxu0 %v3054_v12  ;;  %v1027_v49 = vpop.f32.mrf.mxu2  ;;  %v1003_v5 = vpop.f32.mrf.mxu0  ;;  %v3331_v12 = vld [vmem:[#allocation7 + $0x310] sm:$0xf0] }
  0xfe   :  { %v1028_v59 = vadd.f32 %v1027_v49, %v1015_v48  ;;  %v1040_v61 = vpop.f32.mrf.mxu3  ;;  %v1016_v10 = vpop.f32.mrf.mxu1  ;;  %v3334_v20 = vor.u32 %v3807_v11, %v3331_v12  ;;  %v3786_v49 = vld [vmem:[#allocation7 + $0x254] sm:$0xf0]  ;;  %v3323_v11 = vld [vmem:[#allocation7 + $0x2f8] sm:$0xf0] }
  0xff   :  { %2005 = vmatpush.bf16.msra.mxu1 %v3098_v52  ;;  %v3804_v10 = vld [vmem:[#allocation7 + $0x2ec] sm:$0xf] }
 0x100   :  { %v1041_v4 = vadd.f32 %v1040_v61, %v1028_v59  ;;  %1980 = vmatpush.bf16.msrb.mxu3 %v3334_v20  ;;  %v3099_v59 = vld [vmem:[#allocation7 + $0x138] sm:$0xf0]  ;;  %v3225_v61 = vld [vmem:[#allocation7 + $0x228] sm:$0xf]  ;;  %v3326_v18 = vor.u32 %v3804_v10, %v3323_v11  ;;  %v3800_v20 = vld [vmem:[#allocation7 + $0x2cc] sm:$0xf] }
 0x101   :  { %2040 = vmatpush.bf16.msrb.mxu0 %v3038_v21  ;;  %v3102_v63 = vor.u32 %v3748_v58, %v3099_v59  ;;  %v3226_v1 = vor.u32 %v3782_v62, %v3225_v61  ;;  %v3211_v61 = vld [vmem:[#allocation7 + $0x218] sm:$0xf0]  ;;  %v3337_v62 = vld [vmem:[#allocation7 + $0x308] sm:$0xf] }
 0x102   :  { %v1098_v13 = vmax.f32 %v1041_v4, 0.0 }
 0x103   :  { %2006 = vmatpush.bf16.msra.mxu1 %v3082_v9 }
 0x104   :  { %v4136_v21 = vpack.c.bf16 %v1098_v13, %v1098_v13  ;;  %v3086_v13 = vor.u32 %v3744_v2, %v3083_v3 }
 0x105   :  { %2041 = vmatpush.bf16.msrb.mxu0 %v3022_v31  ;;  %v1029_v26 = vpop.f32.mrf.mxu2  ;;  %v3764_v31 = vld [vmem:[#allocation7 + $0x1ac] sm:$0xf] }
 0x106   :  { %1916 = vmatmul.bf16.vlgmr.msra.gmra.mxu2 %v4136_v21  ;;  %v1042_v28 = vpop.f32.mrf.mxu3  ;;  %2007 = vmatmul.bf16.vlgmr.msra.gmra.mxu1 %v4130_v53  ;;  %v3166_v35 = vor.u32 %v3764_v31, %v3163_v32  ;;  %v3834_v26 = vld [vmem:[#allocation7 + $0x3d4] sm:$0xf0]  ;;  %v3796_v32 = vld [vmem:[#allocation7 + $0x2ac] sm:$0xf] }
 0x107   :  { %2051 = vmatpush.bf16.msrb.mxu1 %v3198_v14  ;;  %2012 = vmatpush.bf16.msra.mxu2 %v3322_v17  ;;  %v3449_v14 = vld [vmem:[#allocation7 + $0x3e8] sm:$0xf] }
 0x108   :  { %v3450_v19 = vor.u32 %v3838_v15, %v3449_v14  ;;  %v3820_v15 = vld [vmem:[#allocation7 + $0x36c] sm:$0xf] }
 0x109   :  { %2042 = vmatpush.bf16.msrb.mxu0 %v3006_v42  ;;  %v3756_v42 = vld [vmem:[#allocation7 + $0x16c] sm:$0xf] }
 0x10a   :  { %v3134_v51 = vor.u32 %v3756_v42, %v3131_v43  ;;  %v3259_v43 = vld [vmem:[#allocation7 + $0x278] sm:$0xf0] }
 0x10b   :  { %2052 = vmatpush.bf16.msrb.mxu1 %v3182_v27  ;;  %2013 = vmatpush.bf16.msra.mxu2 %v3306_v29  ;;  %v3310_v29 = vor.u32 %v3800_v20, %v3307_v23  ;;  %v3371_v20 = vld [vmem:[#allocation7 + $0x358] sm:$0xf0]  ;;  %v3812_v23 = vld [vmem:[#allocation7 + $0x32c] sm:$0xf] }
 0x10d   :  { %2043 = vmatpush.bf16.msrb.mxu0 %v2990_v50 }
 0x10f   :  { %2053 = vmatpush.bf16.msrb.mxu1 %v3166_v35  ;;  %2014 = vmatpush.bf16.msra.mxu2 %v3290_v36  ;;  %v3830_v35 = vld [vmem:[#allocation7 + $0x3b4] sm:$0xf0]  ;;  %v3294_v36 = vor.u32 %v3796_v32, %v3291_v33 }
 0x110   :  { %v3418_v37 = vor.u32 %v3830_v35, %v3417_v34 }
 0x111   :  { %2044 = vmatpush.bf16.msrb.mxu0 %v2974_v8  ;;  %v3778_v8 = vld [vmem:[#allocation7 + $0x214] sm:$0xf0] }
 0x112   :  { %v3210_v16 = vor.u32 %v3778_v8, %v3209_v7  ;;  %v3828_v8 = vld [vmem:[#allocation7 + $0x3ac] sm:$0xf] }
 0x113   :  { %2054 = vmatpush.bf16.msrb.mxu1 %v3150_v41  ;;  %2015 = vmatpush.bf16.msra.mxu2 %v3274_v55  ;;  %v3826_v41 = vld [vmem:[#allocation7 + $0x394] sm:$0xf0]  ;;  %v3278_v55 = vor.u32 %v3792_v38, %v3275_v39  ;;  %v3844_v38 = vld [vmem:[%s4280_s5 + $0x28] sm:$0xff] }
 0x114   :  { %v3402_v42 = vor.u32 %v3826_v41, %v3401_v40  ;;  %v3843_v40 = vld [vmem:[%s4280_s5 + $0x20] sm:$0xff]  ;;  %v3854_v41 = vld [vmem:[%s4280_s5 + $0x78] sm:$0xff] }
 0x115   :  { %2045 = vmatpush.bf16.msrb.mxu0 %v2958_v25  ;;  %v1053_v48 = vpop.f32.mrf.mxu0  ;;  %v3433_v25 = vld [vmem:[#allocation7 + $0x3c8] sm:$0xf] }
 0x116   :  { %v1054_v50 = vadd.f32 %v1053_v48, %v233_v45  ;;  %v1066_v52 = vpop.f32.mrf.mxu1  ;;  %1968 = vmatmul.bf16.vlgmr.msrb.gmra.mxu2 %v4136_v21  ;;  %v3434_v31 = vor.u32 %v3834_v26, %v3433_v25  ;;  %v3818_v48 = vld [vmem:[#allocation7 + $0x354] sm:$0xf0]  ;;  %v3355_v25 = vld [vmem:[#allocation7 + $0x338] sm:$0xf0] }
 0x117   :  { %2055 = vmatpush.bf16.msrb.mxu1 %v3134_v51  ;;  %2016 = vmatpush.bf16.msra.mxu2 %v3258_v46  ;;  %v3386_v51 = vor.u32 %v3822_v60, %v3385_v44  ;;  %v3784_v46 = vld [vmem:[#allocation7 + $0x24c] sm:$0xf]  ;;  %v3358_v26 = vor.u32 %v3812_v23, %v3355_v25  ;;  %v3840_v60 = vld [vmem:[%s4280_s5 + $0x8] sm:$0xff] }
 0x118   :  { %2046 = vmatmul.bf16.vlgmr.msrb.gmra.mxu0 %v4125_v22  ;;  %v3241_v22 = vld [vmem:[#allocation7 + $0x248] sm:$0xf]  ;;  %v1067_v30 = vadd.f32 %v1066_v52, %v1054_v50  ;;  %v3780_v50 = vld [vmem:[#allocation7 + $0x22c] sm:$0xf]  ;;  %v3227_v52 = vld [vmem:[#allocation7 + $0x238] sm:$0xf0] }
 0x119   :  { %v3242_v57 = vor.u32 %v3786_v49, %v3241_v22  ;;  %v3246_v22 = vor.u32 %v3784_v46, %v3243_v47  ;;  %v3370_v49 = vor.u32 %v3818_v48, %v3369_v56  ;;  %v3230_v58 = vor.u32 %v3780_v50, %v3227_v52  ;;  %v3839_v47 = vld [vmem:[%s4280_s5] sm:$0xff] }
 0x11a   :  { %v3851_v56 = vld [vmem:[%s4280_s5 + $0x60] sm:$0xff] }
 0x11b   :  { %2056 = vmatpush.bf16.msrb.mxu1 %v3118_v54  ;;  %2017 = vmatpush.bf16.msra.mxu2 %v3242_v57  ;;  %v3353_v54 = vld [vmem:[#allocation7 + $0x328] sm:$0xf]  ;;  %v3814_v57 = vld [vmem:[#allocation7 + $0x334] sm:$0xf0] }
 0x11c   :  { %v3354_v59 = vor.u32 %v3814_v57, %v3353_v54  ;;  %v3849_v54 = vld [vmem:[%s4280_s5 + $0x50] sm:$0xff] }
 0x11d   :  { %v1079_v0 = vpop.f32.mrf.mxu2  ;;  %v1055_v6 = vpop.f32.mrf.mxu0  ;;  %v3861_v57 = vld [vmem:[%s4280_s5 + $0xb0] sm:$0xff] }
 0x11e   :  { %v1080_v4 = vadd.f32 %v1079_v0, %v1067_v30  ;;  %v1092_v5 = vpop.f32.mrf.mxu3  ;;  %v1068_v9 = vpop.f32.mrf.mxu1  ;;  %v3776_v30 = vld [vmem:[#allocation7 + $0x20c] sm:$0xf]  ;;  %v3435_v6 = vld [vmem:[#allocation7 + $0x3d8] sm:$0xf0] }
 0x11f   :  { %2057 = vmatpush.bf16.msrb.mxu1 %v3102_v63  ;;  %2018 = vmatpush.bf16.msra.mxu2 %v3226_v1  ;;  %v3810_v63 = vld [vmem:[#allocation7 + $0x314] sm:$0xf0]  ;;  %v3836_v0 = vld [vmem:[#allocation7 + $0x3ec] sm:$0xf]  ;;  %v3451_v1 = vld [vmem:[#allocation7 + $0x3f8] sm:$0xf0]  ;;  %v3214_v2 = vor.u32 %v3776_v30, %v3211_v61 }
 0x120   :  { %v1093_v12 = vadd.f32 %v1092_v5, %v1080_v4  ;;  %v3338_v3 = vor.u32 %v3810_v63, %v3337_v62  ;;  %v3454_v4 = vor.u32 %v3836_v0, %v3451_v1  ;;  %v3832_v5 = vld [vmem:[#allocation7 + $0x3cc] sm:$0xf]  ;;  %v3419_v9 = vld [vmem:[#allocation7 + $0x3b8] sm:$0xf0]  ;;  %v4218_v30 = vld [vmem:[#allocation8] sm:$0xf] }
 0x121   :  { %v3438_v7 = vor.u32 %v3832_v5, %v3435_v6  ;;  %v3422_v10 = vor.u32 %v3828_v8, %v3419_v9  ;;  %v3847_v62 = vld [vmem:[%s4280_s5 + $0x40] sm:$0xff]  ;;  %v1234_v0 = vperm.slane %v4218_v30, 0  ;;  %v3858_v1 = vld [vmem:[%s4280_s5 + $0x98] sm:$0xff]  ;;  %v3856_v8 = vld [vmem:[%s4280_s5 + $0x88] sm:$0xff] }
 0x122   :  { %v1099_v17 = vmax.f32 %v1093_v12, 0.0  ;;  %v3824_v12 = vld [vmem:[#allocation7 + $0x38c] sm:$0xf]  ;;  %v3859_v63 = vld [vmem:[%s4280_s5 + $0xa0] sm:$0xff] }
 0x123   :  { %2058 = vmatpush.bf16.msrb.mxu1 %v3086_v13  ;;  %2019 = vmatpush.bf16.msra.mxu2 %v3210_v16  ;;  %v3403_v13 = vld [vmem:[#allocation7 + $0x398] sm:$0xf0] }
 0x124   :  { %v4143_v24 = vpack.c.bf16 %v1099_v17, %v1099_v17  ;;  %v3406_v14 = vor.u32 %v3824_v12, %v3403_v13  ;;  %v3387_v16 = vld [vmem:[#allocation7 + $0x378] sm:$0xf0] }
 0x125   :  { %v1081_v27 = vpop.f32.mrf.mxu2  ;;  %v3390_v17 = vor.u32 %v3820_v15, %v3387_v16  ;;  %v3870_v15 = vld [vmem:[%s4280_s5 + $0xf8] sm:$0xff] }
 0x126   :  { %v1094_v28 = vpop.f32.mrf.mxu3  ;;  %1929 = vmatmul.bf16.vlgmr.msra.gmra.mxu3 %v4143_v24  ;;  %2059 = vmatmul.bf16.vlgmr.msrb.gmra.mxu1 %v4130_v53  ;;  %v3788_v53 = vld [vmem:[#allocation7 + $0x26c] sm:$0xf] }
 0x127   :  { %2064 = vmatpush.bf16.msrb.mxu2 %v3326_v18  ;;  %2025 = vmatpush.bf16.msra.mxu3 %v3450_v19  ;;  %v3262_v45 = vor.u32 %v3788_v53, %v3259_v43  ;;  %v3816_v19 = vld [vmem:[#allocation7 + $0x34c] sm:$0xf]  ;;  %v3841_v53 = vld [vmem:[%s4280_s5 + $0x10] sm:$0xff] }
 0x128   :  { %2020 = vmatmul.bf16.vlgmr.msra.gmra.mxu2 %v4136_v21  ;;  %v3808_v28 = vld [vmem:[#allocation7 + $0x30c] sm:$0xf]  ;;  %2371 = vmatpush.bf16.msra.mxu1 %v3854_v41  ;;  %v3853_v43 = vld [vmem:[%s4280_s5 + $0x70] sm:$0xff] }
 0x12b   :  { %2065 = vmatpush.bf16.msrb.mxu2 %v3310_v29  ;;  %2026 = vmatpush.bf16.msra.mxu3 %v3434_v31  ;;  %v3339_v29 = vld [vmem:[#allocation7 + $0x318] sm:$0xf0] }
 0x12c   :  { %v3342_v31 = vor.u32 %v3808_v28, %v3339_v29  ;;  %2372 = vmatpush.bf16.msra.mxu1 %v3853_v43 }
 0x12f   :  { %2066 = vmatpush.bf16.msrb.mxu2 %v3294_v36  ;;  %2027 = vmatpush.bf16.msra.mxu3 %v3418_v37  ;;  %v3846_v36 = vld [vmem:[%s4280_s5 + $0x38] sm:$0xff]  ;;  %v3845_v37 = vld [vmem:[%s4280_s5 + $0x30] sm:$0xff] }
 0x130   :  { %2358 = vmatpush.bf16.msra.mxu0 %v3846_v36  ;;  %v1236_v36 = vperm.slane %v4218_v30, 2 }
 0x133   :  { %2067 = vmatpush.bf16.msrb.mxu2 %v3278_v55  ;;  %2028 = vmatpush.bf16.msra.mxu3 %v3402_v42  ;;  %v3842_v55 = vld [vmem:[%s4280_s5 + $0x18] sm:$0xff] }
 0x134   :  { %2359 = vmatpush.bf16.msra.mxu0 %v3845_v37 }
 0x136   :  { %1981 = vmatmul.bf16.vlgmr.msrb.gmra.mxu3 %v4143_v24 }
 0x137   :  { %2068 = vmatpush.bf16.msrb.mxu2 %v3262_v45  ;;  %2029 = vmatpush.bf16.msra.mxu3 %v3386_v51  ;;  %v3852_v45 = vld [vmem:[%s4280_s5 + $0x68] sm:$0xff] }
 0x138   :  { %2360 = vmatpush.bf16.msra.mxu0 %v3844_v38  ;;  %2373 = vmatpush.bf16.msra.mxu1 %v3852_v45 }
 0x13b   :  { %2069 = vmatpush.bf16.msrb.mxu2 %v3246_v22  ;;  %2030 = vmatpush.bf16.msra.mxu3 %v3370_v49  ;;  %v3850_v22 = vld [vmem:[%s4280_s5 + $0x58] sm:$0xff] }
 0x13c   :  { %2361 = vmatpush.bf16.msra.mxu0 %v3843_v40  ;;  %2374 = vmatpush.bf16.msra.mxu1 %v3851_v56  ;;  %v3862_v49 = vld [vmem:[%s4280_s5 + $0xb8] sm:$0xff] }
 0x13f   :  { %2070 = vmatpush.bf16.msrb.mxu2 %v3230_v58  ;;  %2031 = vmatpush.bf16.msra.mxu3 %v3354_v59  ;;  %v3848_v58 = vld [vmem:[%s4280_s5 + $0x48] sm:$0xff] }
 0x140   :  { %2362 = vmatpush.bf16.msra.mxu0 %v3842_v55  ;;  %2375 = vmatpush.bf16.msra.mxu1 %v3850_v22  ;;  %v3860_v59 = vld [vmem:[%s4280_s5 + $0xa8] sm:$0xff]  ;;  %v3863_v55 = vld [vmem:[%s4280_s5 + $0xc0] sm:$0xff] }
 0x143   :  { %2071 = vmatpush.bf16.msrb.mxu2 %v3214_v2  ;;  %2032 = vmatpush.bf16.msra.mxu3 %v3338_v3  ;;  %v4151_v11 = vpop.f32.mrf.mxu0  ;;  %v3857_v3 = vld [vmem:[%s4280_s5 + $0x90] sm:$0xff] }
 0x144   :  { %2363 = vmatpush.bf16.msra.mxu0 %v3841_v53  ;;  %2376 = vmatpush.bf16.msra.mxu1 %v3849_v54  ;;  %v1892_v2 = vadd.f32 %v4151_v11, %v1234_v0 }
 0x146   :  { %2072 = vmatmul.bf16.vlgmr.msrb.gmra.mxu2 %v4136_v21  ;;  %2033 = vmatmul.bf16.vlgmr.msra.gmra.mxu3 %v4143_v24  ;;  %v3374_v21 = vor.u32 %v3816_v19, %v3371_v20  ;;  %v3868_v20 = vld [vmem:[%s4280_s5 + $0xe8] sm:$0xff] }
 0x147   :  { %2077 = vmatpush.bf16.msrb.mxu3 %v3454_v4  ;;  %2384 = vmatpush.bf16.msra.mxu2 %v3862_v49 }
 0x148   :  { %2364 = vmatpush.bf16.msra.mxu0 %v3840_v60  ;;  %2377 = vmatpush.bf16.msra.mxu1 %v3848_v58 }
 0x14b   :  { %2078 = vmatpush.bf16.msrb.mxu3 %v3438_v7  ;;  %v1893_v18 = vpop.f32.mrf.mxu0  ;;  %2385 = vmatpush.bf16.msra.mxu2 %v3861_v57 }
 0x14c   :  { %2365 = vmatpush.bf16.msra.mxu0 %v3839_v47  ;;  %2378 = vmatpush.bf16.msra.mxu1 %v3847_v62  ;;  %v3869_v18 = vld [vmem:[%s4280_s5 + $0xf0] sm:$0xff] }
 0x14f   :  { %2079 = vmatpush.bf16.msrb.mxu3 %v3422_v10  ;;  %2386 = vmatpush.bf16.msra.mxu2 %v3860_v59 }
 0x153   :  { %2080 = vmatpush.bf16.msrb.mxu3 %v3406_v14  ;;  %2387 = vmatpush.bf16.msra.mxu2 %v3859_v63  ;;  %v3855_v14 = vld [vmem:[%s4280_s5 + $0x80] sm:$0xff]  ;;  %v3879_v63 = vld [vmem:[#allocation10] ss:$0 sm:$0xff] }
 0x155   :  { %v4153_v27 = vpop.f32.mrf.mxu0 }
 0x157   :  { %2081 = vmatpush.bf16.msrb.mxu3 %v3390_v17  ;;  %2388 = vmatpush.bf16.msra.mxu2 %v3858_v1  ;;  %v1235_v17 = vperm.slane %v4218_v30, 1 }
 0x159   :  { %v1944_v23 = vadd.f32 %v4153_v27, %v1235_v17  ;;  %v3865_v27 = vld [vmem:[%s4280_s5 + $0xd0] sm:$0xff] }
 0x15b   :  { %2082 = vmatpush.bf16.msrb.mxu3 %v3374_v21  ;;  %2389 = vmatpush.bf16.msra.mxu2 %v3857_v3 }
 0x15d   :  { %v1945_v32 = vpop.f32.mrf.mxu0 }
 0x15e   :  { %v3866_v32 = vld [vmem:[%s4280_s5 + $0xd8] sm:$0xff] }
 0x15f   :  { %2083 = vmatpush.bf16.msrb.mxu3 %v3358_v26  ;;  %2390 = vmatpush.bf16.msra.mxu2 %v3856_v8  ;;  %v3867_v26 = vld [vmem:[%s4280_s5 + $0xe0] sm:$0xff] }
 0x163   :  { %2084 = vmatpush.bf16.msrb.mxu3 %v3342_v31  ;;  %v1904_v33 = vpop.f32.mrf.mxu1  ;;  %2391 = vmatpush.bf16.msra.mxu2 %v3855_v14 }
 0x164   :  { %v1905_v6 = vadd.f32 %v1904_v33, %v1892_v2 }
 0x166   :  { %2085 = vmatmul.bf16.vlgmr.msrb.gmra.mxu3 %v4143_v24 }
 0x167   :  { %2397 = vmatpush.bf16.msra.mxu3 %v3870_v15 }
 0x16b   :  { %v1906_v35 = vpop.f32.mrf.mxu1  ;;  %2398 = vmatpush.bf16.msra.mxu3 %v3869_v18 }
 0x16f   :  { %2399 = vmatpush.bf16.msra.mxu3 %v3868_v20 }
 0x173   :  { %v4167_v24 = vpop.f32.mrf.mxu1  ;;  %2400 = vmatpush.bf16.msra.mxu3 %v3867_v26 }
 0x174   :  { %v1957_v25 = vadd.f32 %v4167_v24, %v1944_v23 }
 0x175   :  { %v4156_v34 = vpop.f32.mrf.mxu0 }
 0x176   :  { %v1996_v38 = vadd.f32 %v4156_v34, %v1236_v36 }
 0x177   :  { %2401 = vmatpush.bf16.msra.mxu3 %v3866_v32 }
 0x17b   :  { %v1958_v42 = vpop.f32.mrf.mxu1  ;;  %2402 = vmatpush.bf16.msra.mxu3 %v3865_v27 }
 0x17d   :  { %v1997_v39 = vpop.f32.mrf.mxu0 }
 0x17e   :  { %v3864_v39 = vld [vmem:[%s4280_s5 + $0xc8] sm:$0xff]  ;;  %s4039_s5 = smov [#allocation11]  }
 0x17f   :  { %2403 = vmatpush.bf16.msra.mxu3 %v3864_v39  ;;  %s2417_s30 = sshll.u32 %s4039_s5, 4  ;;  %s2418_s30 = int_to_ptr.vmem [resolvable:$true] %s2417_s30 }
 0x183   :  { %v4184_v44 = vpop.f32.mrf.mxu1  ;;  %2404 = vmatpush.bf16.msra.mxu3 %v3863_v55 }
 0x184   :  { %v2009_v24 = vadd.f32 %v4184_v44, %v1996_v38 }
 0x189   :  { %v1917_v46 = vpop.f32.mrf.mxu2 }
 0x18a   :  { %v1918_v7 = vadd.f32 %v1917_v46, %v1905_v6  ;;  %v1237_v46 = vperm.slane %v4218_v30, 3 }
 0x18b   :  { %v2010_v48 = vpop.f32.mrf.mxu1 }
 0x191   :  { %v1919_v52 = vpop.f32.mrf.mxu2 }
 0x195   :  { %v4192_v51 = vpop.f32.mrf.mxu0 }
 0x196   :  { %v2048_v47 = vadd.f32 %v4192_v51, %v1237_v46 }
 0x199   :  { %v1969_v61 = vpop.f32.mrf.mxu2 }
 0x19a   :  { %v1970_v28 = vadd.f32 %v1969_v61, %v1957_v25 }
 0x19d   :  { %v2049_v50 = vpop.f32.mrf.mxu0 }
 0x1a1   :  { %v1971_v4 = vpop.f32.mrf.mxu2 }
 0x1a3   :  { %v2060_v5 = vpop.f32.mrf.mxu1 }
 0x1a4   :  { %v2061_v44 = vadd.f32 %v2060_v5, %v2048_v47 }
 0x1a9   :  { %v1930_v9 = vpop.f32.mrf.mxu3 }
 0x1aa   :  { %v1931_v10 = vadd.f32 %v1930_v9, %v1918_v7 }
 0x1ab   :  { %v2021_v12 = vpop.f32.mrf.mxu2  ;;  %v2062_v11 = vpop.f32.mrf.mxu1 }
 0x1ac   :  { %v2090_v13 = vmax.f32 %v1931_v10, 0.0  ;;  %v2022_v40 = vadd.f32 %v2021_v12, %v2009_v24 }
 0x1ae   :  { %v2094_v16 = vpack.c.bf16 %v2090_v13, %v2090_v13 }
 0x1b0   :  { %2366 = vmatmul.bf16.vlgmr.msra.gmra.mxu0 %v2094_v16 }
 0x1b1   :  { %v1932_v19 = vpop.f32.mrf.mxu3 }
 0x1b3   :  { %v2023_v21 = vpop.f32.mrf.mxu2 }
 0x1b9   :  { %v1982_v29 = vpop.f32.mrf.mxu3 }
 0x1ba   :  { %v1983_v31 = vadd.f32 %v1982_v29, %v1970_v28 }
 0x1bc   :  { %v2091_v33 = vmax.f32 %v1983_v31, 0.0 }
 0x1be   :  { %v2095_v35 = vpack.c.bf16 %v2091_v33, %v2091_v33 }
 0x1c0   :  { %2379 = vmatmul.bf16.vlgmr.msra.gmra.mxu1 %v2095_v35 }
 0x1c1   :  { %v1984_v37 = vpop.f32.mrf.mxu3 }
 0x1c9   :  { %v2073_v41 = vpop.f32.mrf.mxu2  ;;  %v2034_v42 = vpop.f32.mrf.mxu3 }
 0x1ca   :  { %v2035_v53 = vadd.f32 %v2034_v42, %v2022_v40  ;;  %v2074_v56 = vadd.f32 %v2073_v41, %v2061_v44 }
 0x1cc   :  { %v2092_v43 = vmax.f32 %v2035_v53, 0.0 }
 0x1ce   :  { %v2096_v60 = vpack.c.bf16 %v2092_v43, %v2092_v43 }
 0x1d0   :  { %2392 = vmatmul.bf16.vlgmr.msra.gmra.mxu2 %v2096_v60 }
 0x1d1   :  { %v2075_v45 = vpop.f32.mrf.mxu2  ;;  %v2036_v34 = vpop.f32.mrf.mxu3 }
 0x1e9   :  { %v2086_v48 = vpop.f32.mrf.mxu3 }
 0x1ea   :  { %v2087_v22 = vadd.f32 %v2086_v48, %v2074_v56 }
 0x1ec   :  { %v2093_v49 = vmax.f32 %v2087_v22, 0.0 }
 0x1ee   :  { %v2097_v50 = vpack.c.bf16 %v2093_v49, %v2093_v49 }
 0x1f0   :  { %2405 = vmatmul.bf16.vlgmr.msra.gmra.mxu3 %v2097_v50 }
 0x1f1   :  { %v2088_v52 = vpop.f32.mrf.mxu3 }
 0x22d   :  { %v2367_v54 = vpop.f32.mrf.mxu0 }
 0x22e   :  { %v2368_v0 = vadd.f32 %v3879_v63, %v2367_v54 }
 0x235   :  { %v2369_v57 = vpop.f32.mrf.mxu0 }
 0x23d   :  { %v2380_v58 = vpop.f32.mrf.mxu1 }
 0x23e   :  { %v2381_v1 = vadd.f32 %v2380_v58, %v2368_v0 }
 0x245   :  { %v2382_v59 = vpop.f32.mrf.mxu1 }
 0x253   :  { %v2393_v61 = vpop.f32.mrf.mxu2 }
 0x254   :  { %v2394_v51 = vadd.f32 %v2393_v61, %v2381_v1 }
 0x25b   :  { %v2395_v62 = vpop.f32.mrf.mxu2 }
 0x273   :  { %v2406_v30 = vpop.f32.mrf.mxu3 }
 0x274   :  { %v2407_v2 = vadd.f32 %v2406_v30, %v2394_v51 }
 0x276   :  { %2411 = vst.msk [vmem:[#allocation11] sm:$0x3] %vm2410_vm0, %v2407_v2 }
 0x277   :  { %2422 = dma.vmem_to_hbm [thread:$0]  %s2418_s30, 32, %s2420_s10, [#allocation4]  }
 0x27b   :  { %v2408_v3 = vpop.f32.mrf.mxu3 }
 0x27c   :  { %4030 = dma.done.wait [#allocation4], 32  }
 0x27d   :  { %4031 = vsyncadd [#allocation4], 4294967264 }
 0x27e   :  { %2427 = vsyncpa [#allocation3], 1 }
 0x27f   :  { %2428 = vsyncpa [#allocation6], 1 }
 0x280   :  { %2429 = vsyncpa [#allocation9], 1 }
 0x281   :  { %2430 = vsyncpa [#allocation4], 1 }

</bundles_post_ra>
